<compile_context>
chip_gen: v5e
topology: v5e:2x2
jax: 0.10.0
libtpu: 0.0.40
codegen_flags: <defaults>
</compile_context>

<pallas_src>
import math

import jax
import jax.numpy as jnp
from jax import lax
from jax.experimental import pallas as pl
from jax.experimental.pallas import tpu as pltpu

LRELU_SLOPE = 0.2
EPS = 1e-8
DOT_DTYPE = jnp.bfloat16          # MXU operand dtype (accumulation stays fp32)


def _raw_cfgs(in_channels):
    #       (true cin, true cout, k, stride, pad, lane-dense cout)
    return [(in_channels, 64, 3, 2, 3, 128),
            (64, 128, 3, 2, 2, 128),
            (128, 128, 3, 3, 1, 128),
            (128, 256, 3, 3, 1, 256)]


def _layer_geometry(H, W, in_channels):
    layers = []
    h, w = H, W
    prev_cout_pad = in_channels
    for cin, cout, k, s, p, cout_pad in _raw_cfgs(in_channels):
        hp, wp = h + 2 * p, w + 2 * p
        ho, wo = (hp - k) // s + 1, (wp - k) // s + 1
        layers.append(dict(cin_pad=prev_cout_pad, cout_pad=cout_pad,
                           k=k, s=s, p=p, hp=hp, wp=wp, ho=ho, wo=wo))
        h, w, prev_cout_pad = ho, wo, cout_pad
    return layers


def init_params(key, in_channels):
    """EqualizedConv2d params: weight ~ N(0,1) (OIHW), bias = 0, forward-time scale
    sqrt(2/fan_in) folded in.  Returns lane-dense padded kernel params (bf16 weights
    in [kh, kw, cin_pad, cout_pad] layout, fp32 bias [1, cout_pad]) and fp32 HWIO
    copies for the pure-JAX reference."""
    kparams, rparams = [], []
    prev_cout_pad = in_channels
    for cin, cout, k, s, p, cout_pad in _raw_cfgs(in_channels):
        key, wk = jax.random.split(key)
        w = jax.random.normal(wk, (cout, cin, k, k), dtype=jnp.float32)   # OIHW
        scale = math.sqrt(2.0) / math.sqrt(cin * k * k)                   # equalized LR
        w_hwio = jnp.transpose(w, (2, 3, 1, 0)) * scale                   # [k,k,cin,cout]
        cin_pad = prev_cout_pad
        w_pad = jnp.zeros((k, k, cin_pad, cout_pad), jnp.float32)
        w_pad = w_pad.at[:, :, :cin, :cout].set(w_hwio)                   # zero padded rows/cols
        b_pad = jnp.zeros((cout_pad,), jnp.float32)                       # bias = 0
        kparams.append((w_pad.astype(DOT_DTYPE), b_pad.reshape(1, cout_pad)))
        rparams.append((w_pad, b_pad))
        prev_cout_pad = cout_pad
    return kparams, rparams


# ------------------------------ fused Pallas kernel ------------------------------

def _make_kernel(H, W, layers):
    l1, l2, l3, l4 = layers

    def conv_layer(xp_ref, w_ref, b_ref, store_row, lyr):
        wp, ho, wo = lyr["wp"], lyr["ho"], lyr["wo"]
        s, k, cout = lyr["s"], lyr["k"], lyr["cout_pad"]

        # Constant 0/1 column-selection matrices (one per kw tap):
        #   sel_kw[o, j] = 1  iff  j == o * s + kw
        out_ids = lax.broadcasted_iota(jnp.int32, (wo, wp), 0)
        col_ids = lax.broadcasted_iota(jnp.int32, (wo, wp), 1)
        sels = [jnp.where(col_ids == out_ids * s + kw, 1.0, 0.0).astype(DOT_DTYPE)
                for kw in range(k)]
        bias = b_ref[...]                                            # [1, cout] fp32

        def row_body(ho_i, carry):
            acc = jnp.zeros((wo, cout), jnp.float32)
            for kh in range(k):
                row = xp_ref[ho_i * s + kh].astype(DOT_DTYPE)        # [wp, cin]
                for kw in range(k):
                    # strided column gather of this tap, done on the MXU
                    tap = jnp.dot(sels[kw], row,
                                  preferred_element_type=jnp.float32)
                    acc += jnp.dot(tap.astype(DOT_DTYPE), w_ref[kh, kw],
                                   preferred_element_type=jnp.float32)
            acc += bias
            acc = jnp.where(acc > 0, acc, LRELU_SLOPE * acc)         # LeakyReLU(0.2), fp32
            store_row(ho_i, acc)
            return carry

        lax.fori_loop(0, ho, row_body, 0)

    def kernel(x_ref, w1, b1, w2, b2, w3, b3, w4, b4, out_ref,
               xp1, xp2, xp3, xp4, y4_ref):
        # Zero the padded buffers (borders must be zero; interiors are overwritten).
        for ref in (xp1, xp2, xp3, xp4):
            ref[...] = jnp.zeros_like(ref)

        # Initial PixelwiseNorm, fused into the write of conv1's padded input buffer.
        x = x_ref[0]                                                  # [H, W, Cin]
        inv = lax.rsqrt(jnp.mean(x * x, axis=-1, keepdims=True) + EPS)
        p1 = l1["p"]
        xp1[p1:p1 + H, p1:p1 + W, :] = x * inv

        def padded_store(dst_ref, pad, wo):
            def store(ho_i, val):
                dst_ref[pad + ho_i, pl.ds(pad, wo), :] = val
            return store

        conv_layer(xp1, w1, b1, padded_store(xp2, l2["p"], l1["wo"]), l1)
        conv_layer(xp2, w2, b2, padded_store(xp3, l3["p"], l2["wo"]), l2)
        conv_layer(xp3, w3, b3, padded_store(xp4, l4["p"], l3["wo"]), l3)

        def store_last(ho_i, val):
            y4_ref[ho_i] = val
        conv_layer(xp4, w4, b4, store_last, l4)

        # AvgPool2d(2) on the final 2x2 map (plain VPU adds) + PixelwiseNorm.
        y = y4_ref[...]                                               # [2, 2, 256]
        pooled = (y[0, 0:1, :] + y[0, 1:2, :] +
                  y[1, 0:1, :] + y[1, 1:2, :]) * 0.25                 # [1, 256]
        inv = lax.rsqrt(jnp.mean(pooled * pooled, axis=-1, keepdims=True) + EPS)
        out_ref[0] = pooled * inv

    return kernel


def gen_initial_block(x_nchw, kparams):
    B, C, H, W = x_nchw.shape
    layers = _layer_geometry(H, W, C)
    assert layers[-1]["ho"] == 2 and layers[-1]["wo"] == 2, (
        "spatial size must yield a 2x2 map before the final AvgPool2d(2)")

    x_nhwc = jnp.transpose(x_nchw, (0, 2, 3, 1)).astype(jnp.float32)

    in_specs = [pl.BlockSpec((1, H, W, C), lambda b: (b, 0, 0, 0))]
    inputs = [x_nhwc]
    for w, bias in kparams:
        in_specs.append(pl.BlockSpec(w.shape, lambda b: (0, 0, 0, 0)))
        in_specs.append(pl.BlockSpec(bias.shape, lambda b: (0, 0)))
        inputs.extend([w, bias])

    cout = layers[-1]["cout_pad"]
    scratch = [pltpu.VMEM((l["hp"], l["wp"], l["cin_pad"]), jnp.float32)
               for l in layers]
    scratch.append(pltpu.VMEM((layers[-1]["ho"], layers[-1]["wo"], cout), jnp.float32))

    out = pl.pallas_call(
        _make_kernel(H, W, layers),
        out_shape=jax.ShapeDtypeStruct((B, 1, cout), jnp.float32),
        grid_spec=pltpu.PrefetchScalarGridSpec(
            num_scalar_prefetch=0,
            grid=(B,),
            in_specs=in_specs,
            out_specs=pl.BlockSpec((1, 1, cout), lambda b: (b, 0, 0)),
            scratch_shapes=scratch),
        compiler_params=pltpu.CompilerParams(
            dimension_semantics=("parallel",)),
    )(*inputs)
    return out.reshape(B, cout, 1, 1)


# ------------------------------ pure-JAX fp32 reference ------------------------------

def reference_forward(x_nchw, rparams, in_channels):
    """fp32 reference of the PyTorch module (padded channels are exactly zero, so it
    matches the unpadded module)."""
    cfgs = _raw_cfgs(in_channels)
    x = jnp.transpose(x_nchw, (0, 2, 3, 1)).astype(jnp.float32)
    x = x * lax.rsqrt(jnp.mean(x * x, axis=-1, keepdims=True) + EPS)
    for (w_hwio, b), (_, _, _, s, p, _) in zip(rparams, cfgs):
        y = lax.conv_general_dilated(
            x, w_hwio, window_strides=(s, s), padding=[(p, p), (p, p)],
            dimension_numbers=("NHWC", "HWIO", "NHWC"),
            precision=lax.Precision.HIGHEST)
        y = y + b
        x = jnp.where(y > 0, y, LRELU_SLOPE * y)
    B, Hh, Ww, Cc = x.shape
    x = x.reshape(B, Hh // 2, 2, Ww // 2, 2, Cc).mean(axis=(2, 4))
    x = x * lax.rsqrt(jnp.mean(x * x, axis=-1, keepdims=True) + EPS)
    return jnp.transpose(x, (0, 3, 1, 2))


if __name__ == "__main__":
    key = jax.random.PRNGKey(0)
    key, xkey, pkey = jax.random.split(key, 3)

    # Smallest spatial size for which the trailing AvgPool2d(2) is well defined:
    # 32 -> 18 -> 10 -> 4 -> 2 -> (pool) 1.
    B, Cin, H, W = 2, 4, 32, 32
    x = jax.random.normal(xkey, (B, Cin, H, W), dtype=jnp.float32)

    kparams, rparams = init_params(pkey, Cin)

    fwd = jax.jit(gen_initial_block)
    out = jax.block_until_ready(fwd(x, kparams))
    assert out.shape == (B, 256, 1, 1), out.shape

    ref = jax.block_until_ready(reference_forward(x, rparams, Cin))
    err = float(jnp.max(jnp.abs(out - ref)))
    # bf16 MXU operands / fp32 accumulation -> small drift vs the fp32 reference.
    assert err < 1e-1, f"max abs error vs fp32 reference: {err}"

    print("KERNEL_OK")
</pallas_src>

<mosaic_0001>
module attributes {stable_mosaic.version = 11 : i64} {
  func.func @kernel(%arg0: i32, %arg1: memref<1x32x32x4xf32, #tpu.memory_space<vmem>>, %arg2: memref<3x3x4x128xbf16, #tpu.memory_space<vmem>>, %arg3: memref<1x128xf32, #tpu.memory_space<vmem>>, %arg4: memref<3x3x128x128xbf16, #tpu.memory_space<vmem>>, %arg5: memref<1x128xf32, #tpu.memory_space<vmem>>, %arg6: memref<3x3x128x128xbf16, #tpu.memory_space<vmem>>, %arg7: memref<1x128xf32, #tpu.memory_space<vmem>>, %arg8: memref<3x3x128x256xbf16, #tpu.memory_space<vmem>>, %arg9: memref<1x256xf32, #tpu.memory_space<vmem>>, %arg10: memref<1x1x256xf32, #tpu.memory_space<vmem>>, %arg11: memref<38x38x4xf32, #tpu.memory_space<vmem>>, %arg12: memref<22x22x128xf32, #tpu.memory_space<vmem>>, %arg13: memref<12x12x128xf32, #tpu.memory_space<vmem>>, %arg14: memref<6x6x128xf32, #tpu.memory_space<vmem>>, %arg15: memref<2x2x256xf32, #tpu.memory_space<vmem>>) attributes {dimension_semantics = [#tpu.dimension_semantics<parallel>], iteration_bounds = array<i64: 2>, scalar_prefetch = 0 : i64, scratch_operands = 5 : i64, tpu.core_type = #tpu.core_type<tc>, window_params = [{transform_indices = @transform_0, window_bounds = array<i64: 1, 32, 32, 4>}, {pipeline_mode = #tpu.pipeline_mode<synchronous>, transform_indices = @transform_1, window_bounds = array<i64: 3, 3, 4, 128>}, {pipeline_mode = #tpu.pipeline_mode<synchronous>, transform_indices = @transform_2, window_bounds = array<i64: 1, 128>}, {pipeline_mode = #tpu.pipeline_mode<synchronous>, transform_indices = @transform_3, window_bounds = array<i64: 3, 3, 128, 128>}, {pipeline_mode = #tpu.pipeline_mode<synchronous>, transform_indices = @transform_4, window_bounds = array<i64: 1, 128>}, {pipeline_mode = #tpu.pipeline_mode<synchronous>, transform_indices = @transform_5, window_bounds = array<i64: 3, 3, 128, 128>}, {pipeline_mode = #tpu.pipeline_mode<synchronous>, transform_indices = @transform_6, window_bounds = array<i64: 1, 128>}, {pipeline_mode = #tpu.pipeline_mode<synchronous>, transform_indices = @transform_7, window_bounds = array<i64: 3, 3, 128, 256>}, {pipeline_mode = #tpu.pipeline_mode<synchronous>, transform_indices = @transform_8, window_bounds = array<i64: 1, 256>}, {transform_indices = @transform_9, window_bounds = array<i64: 1, 1, 256>}]} {
    %cst = arith.constant 0.000000e+00 : f32
    %0 = vector.broadcast %cst : f32 to vector<38x38x4xf32>
    %c0 = arith.constant 0 : index
    %c0_0 = arith.constant 0 : index
    %c0_1 = arith.constant 0 : index
    %1 = vector.load %arg11[%c0, %c0_0, %c0_1] : memref<38x38x4xf32, #tpu.memory_space<vmem>>, vector<38x38x4xf32>
    tpu.vector_store %arg11[%c0, %c0_0, %c0_1], %0 {strides = array<i32>} : memref<38x38x4xf32, #tpu.memory_space<vmem>>, vector<38x38x4xf32>,
    %cst_2 = arith.constant 0.000000e+00 : f32
    %2 = vector.broadcast %cst_2 : f32 to vector<22x22x128xf32>
    %c0_3 = arith.constant 0 : index
    %c0_4 = arith.constant 0 : index
    %c0_5 = arith.constant 0 : index
    %3 = vector.load %arg12[%c0_3, %c0_4, %c0_5] : memref<22x22x128xf32, #tpu.memory_space<vmem>>, vector<22x22x128xf32>
    tpu.vector_store %arg12[%c0_3, %c0_4, %c0_5], %2 {strides = array<i32>} : memref<22x22x128xf32, #tpu.memory_space<vmem>>, vector<22x22x128xf32>,
    %cst_6 = arith.constant 0.000000e+00 : f32
    %4 = vector.broadcast %cst_6 : f32 to vector<12x12x128xf32>
    %c0_7 = arith.constant 0 : index
    %c0_8 = arith.constant 0 : index
    %c0_9 = arith.constant 0 : index
    %5 = vector.load %arg13[%c0_7, %c0_8, %c0_9] : memref<12x12x128xf32, #tpu.memory_space<vmem>>, vector<12x12x128xf32>
    tpu.vector_store %arg13[%c0_7, %c0_8, %c0_9], %4 {strides = array<i32>} : memref<12x12x128xf32, #tpu.memory_space<vmem>>, vector<12x12x128xf32>,
    %cst_10 = arith.constant 0.000000e+00 : f32
    %6 = vector.broadcast %cst_10 : f32 to vector<6x6x128xf32>
    %c0_11 = arith.constant 0 : index
    %c0_12 = arith.constant 0 : index
    %c0_13 = arith.constant 0 : index
    %7 = vector.load %arg14[%c0_11, %c0_12, %c0_13] : memref<6x6x128xf32, #tpu.memory_space<vmem>>, vector<6x6x128xf32>
    tpu.vector_store %arg14[%c0_11, %c0_12, %c0_13], %6 {strides = array<i32>} : memref<6x6x128xf32, #tpu.memory_space<vmem>>, vector<6x6x128xf32>,
    %c0_14 = arith.constant 0 : index
    %c0_15 = arith.constant 0 : index
    %c0_16 = arith.constant 0 : index
    %c0_17 = arith.constant 0 : index
    %8 = vector.load %arg1[%c0_14, %c0_15, %c0_16, %c0_17] : memref<1x32x32x4xf32, #tpu.memory_space<vmem>>, vector<1x32x32x4xf32>
    %9 = vector.shape_cast %8 : vector<1x32x32x4xf32> to vector<32x32x4xf32>
    %10 = arith.mulf %9, %9 : vector<32x32x4xf32>
    %cst_18 = arith.constant dense<0.000000e+00> : vector<32x32xf32>
    %11 = vector.multi_reduction <add>, %10, %cst_18 [2] : vector<32x32x4xf32> to vector<32x32xf32>
    %12 = vector.shape_cast %11 : vector<32x32xf32> to vector<32x32x1xf32>
    %cst_19 = arith.constant 4.000000e+00 : f32
    %13 = vector.broadcast %cst_19 : f32 to vector<32x32x1xf32>
    %14 = arith.divf %12, %13 : vector<32x32x1xf32>
    %cst_20 = arith.constant 9.99999993E-9 : f32
    %15 = vector.broadcast %cst_20 : f32 to vector<32x32x1xf32>
    %16 = arith.addf %14, %15 : vector<32x32x1xf32>
    %17 = math.rsqrt %16 : vector<32x32x1xf32>
    %18 = vector.broadcast %17 : vector<32x32x1xf32> to vector<32x32x4xf32>
    %19 = arith.mulf %9, %18 : vector<32x32x4xf32>
    %c3 = arith.constant 3 : index
    %c3_21 = arith.constant 3 : index
    %c0_22 = arith.constant 0 : index
    %20 = vector.load %arg11[%c3, %c3_21, %c0_22] : memref<38x38x4xf32, #tpu.memory_space<vmem>>, vector<32x32x4xf32>
    tpu.vector_store %arg11[%c3, %c3_21, %c0_22], %19 {strides = array<i32>} : memref<38x38x4xf32, #tpu.memory_space<vmem>>, vector<32x32x4xf32>,
    %21 = tpu.iota {dimensions = array<i32: 0>} : vector<18x38xi32>
    %22 = tpu.iota {dimensions = array<i32: 1>} : vector<18x38xi32>
    %c2_i32 = arith.constant 2 : i32
    %23 = vector.broadcast %c2_i32 : i32 to vector<18x38xi32>
    %24 = arith.muli %21, %23 : vector<18x38xi32>
    %c0_i32 = arith.constant 0 : i32
    %25 = vector.broadcast %c0_i32 : i32 to vector<18x38xi32>
    %26 = arith.addi %24, %25 : vector<18x38xi32>
    %27 = arith.cmpi eq, %22, %26 : vector<18x38xi32>
    %cst_23 = arith.constant 1.000000e+00 : f32
    %cst_24 = arith.constant 0.000000e+00 : f32
    %28 = vector.broadcast %cst_23 : f32 to vector<18x38xf32>
    %29 = vector.broadcast %cst_24 : f32 to vector<18x38xf32>
    %30 = arith.select %27, %28, %29 : vector<18x38xi1>, vector<18x38xf32>
    %31 = arith.truncf %30 : vector<18x38xf32> to vector<18x38xbf16>
    %c2_i32_25 = arith.constant 2 : i32
    %32 = vector.broadcast %c2_i32_25 : i32 to vector<18x38xi32>
    %33 = arith.muli %21, %32 : vector<18x38xi32>
    %c1_i32 = arith.constant 1 : i32
    %34 = vector.broadcast %c1_i32 : i32 to vector<18x38xi32>
    %35 = arith.addi %33, %34 : vector<18x38xi32>
    %36 = arith.cmpi eq, %22, %35 : vector<18x38xi32>
    %cst_26 = arith.constant 1.000000e+00 : f32
    %cst_27 = arith.constant 0.000000e+00 : f32
    %37 = vector.broadcast %cst_26 : f32 to vector<18x38xf32>
    %38 = vector.broadcast %cst_27 : f32 to vector<18x38xf32>
    %39 = arith.select %36, %37, %38 : vector<18x38xi1>, vector<18x38xf32>
    %40 = arith.truncf %39 : vector<18x38xf32> to vector<18x38xbf16>
    %c2_i32_28 = arith.constant 2 : i32
    %41 = vector.broadcast %c2_i32_28 : i32 to vector<18x38xi32>
    %42 = arith.muli %21, %41 : vector<18x38xi32>
    %c2_i32_29 = arith.constant 2 : i32
    %43 = vector.broadcast %c2_i32_29 : i32 to vector<18x38xi32>
    %44 = arith.addi %42, %43 : vector<18x38xi32>
    %45 = arith.cmpi eq, %22, %44 : vector<18x38xi32>
    %cst_30 = arith.constant 1.000000e+00 : f32
    %cst_31 = arith.constant 0.000000e+00 : f32
    %46 = vector.broadcast %cst_30 : f32 to vector<18x38xf32>
    %47 = vector.broadcast %cst_31 : f32 to vector<18x38xf32>
    %48 = arith.select %45, %46, %47 : vector<18x38xi1>, vector<18x38xf32>
    %49 = arith.truncf %48 : vector<18x38xf32> to vector<18x38xbf16>
    %c0_32 = arith.constant 0 : index
    %c0_33 = arith.constant 0 : index
    %50 = vector.load %arg3[%c0_32, %c0_33] : memref<1x128xf32, #tpu.memory_space<vmem>>, vector<1x128xf32>
    %c0_i32_34 = arith.constant 0 : i32
    %c18_i32 = arith.constant 18 : i32
    %51 = arith.addi %c0_i32_34, %c18_i32 : i32
    %c1_i32_35 = arith.constant 1 : i32
    scf.for %arg16 = %c0_i32_34 to %51 step %c1_i32_35  : i32 {
      %cst_98 = arith.constant 0.000000e+00 : f32
      %172 = vector.broadcast %cst_98 : f32 to vector<18x128xf32>
      %c2_i32_99 = arith.constant 2 : i32
      %173 = arith.muli %arg16, %c2_i32_99 : i32
      %c0_i32_100 = arith.constant 0 : i32
      %174 = arith.addi %173, %c0_i32_100 : i32
      %175 = arith.index_cast %174 : i32 to index
      %c0_101 = arith.constant 0 : index
      %c0_102 = arith.constant 0 : index
      %176 = vector.load %arg11[%175, %c0_101, %c0_102] : memref<38x38x4xf32, #tpu.memory_space<vmem>>, vector<1x38x4xf32>
      %177 = vector.shape_cast %176 : vector<1x38x4xf32> to vector<38x4xf32>
      %178 = arith.truncf %177 : vector<38x4xf32> to vector<38x4xbf16>
      %cst_103 = arith.constant dense<0.000000e+00> : vector<18x4xf32>
      %179 = tpu.matmul %31, %178, %cst_103 {dimension_numbers = #tpu.dot_dimension_numbers<[1], [0], [0], [1], [0, 0, 1, 1], [], []>} : vector<18x38xbf16>, vector<38x4xbf16>, vector<18x4xf32> -> vector<18x4xf32>
      %180 = arith.truncf %179 : vector<18x4xf32> to vector<18x4xbf16>
      %c0_104 = arith.constant 0 : index
      %c0_105 = arith.constant 0 : index
      %c0_106 = arith.constant 0 : index
      %c0_107 = arith.constant 0 : index
      %181 = vector.load %arg2[%c0_104, %c0_105, %c0_106, %c0_107] : memref<3x3x4x128xbf16, #tpu.memory_space<vmem>>, vector<1x1x4x128xbf16>
      %182 = vector.shape_cast %181 : vector<1x1x4x128xbf16> to vector<4x128xbf16>
      %cst_108 = arith.constant dense<0.000000e+00> : vector<18x128xf32>
      %183 = tpu.matmul %180, %182, %cst_108 {dimension_numbers = #tpu.dot_dimension_numbers<[1], [0], [0], [1], [0, 0, 1, 1], [], []>} : vector<18x4xbf16>, vector<4x128xbf16>, vector<18x128xf32> -> vector<18x128xf32>
      %184 = arith.addf %172, %183 : vector<18x128xf32>
      %cst_109 = arith.constant dense<0.000000e+00> : vector<18x4xf32>
      %185 = tpu.matmul %40, %178, %cst_109 {dimension_numbers = #tpu.dot_dimension_numbers<[1], [0], [0], [1], [0, 0, 1, 1], [], []>} : vector<18x38xbf16>, vector<38x4xbf16>, vector<18x4xf32> -> vector<18x4xf32>
      %186 = arith.truncf %185 : vector<18x4xf32> to vector<18x4xbf16>
      %c0_110 = arith.constant 0 : index
      %c1 = arith.constant 1 : index
      %c0_111 = arith.constant 0 : index
      %c0_112 = arith.constant 0 : index
      %187 = vector.load %arg2[%c0_110, %c1, %c0_111, %c0_112] : memref<3x3x4x128xbf16, #tpu.memory_space<vmem>>, vector<1x1x4x128xbf16>
      %188 = vector.shape_cast %187 : vector<1x1x4x128xbf16> to vector<4x128xbf16>
      %cst_113 = arith.constant dense<0.000000e+00> : vector<18x128xf32>
      %189 = tpu.matmul %186, %188, %cst_113 {dimension_numbers = #tpu.dot_dimension_numbers<[1], [0], [0], [1], [0, 0, 1, 1], [], []>} : vector<18x4xbf16>, vector<4x128xbf16>, vector<18x128xf32> -> vector<18x128xf32>
      %190 = arith.addf %184, %189 : vector<18x128xf32>
      %cst_114 = arith.constant dense<0.000000e+00> : vector<18x4xf32>
      %191 = tpu.matmul %49, %178, %cst_114 {dimension_numbers = #tpu.dot_dimension_numbers<[1], [0], [0], [1], [0, 0, 1, 1], [], []>} : vector<18x38xbf16>, vector<38x4xbf16>, vector<18x4xf32> -> vector<18x4xf32>
      %192 = arith.truncf %191 : vector<18x4xf32> to vector<18x4xbf16>
      %c0_115 = arith.constant 0 : index
      %c2 = arith.constant 2 : index
      %c0_116 = arith.constant 0 : index
      %c0_117 = arith.constant 0 : index
      %193 = vector.load %arg2[%c0_115, %c2, %c0_116, %c0_117] : memref<3x3x4x128xbf16, #tpu.memory_space<vmem>>, vector<1x1x4x128xbf16>
      %194 = vector.shape_cast %193 : vector<1x1x4x128xbf16> to vector<4x128xbf16>
      %cst_118 = arith.constant dense<0.000000e+00> : vector<18x128xf32>
      %195 = tpu.matmul %192, %194, %cst_118 {dimension_numbers = #tpu.dot_dimension_numbers<[1], [0], [0], [1], [0, 0, 1, 1], [], []>} : vector<18x4xbf16>, vector<4x128xbf16>, vector<18x128xf32> -> vector<18x128xf32>
      %196 = arith.addf %190, %195 : vector<18x128xf32>
      %c2_i32_119 = arith.constant 2 : i32
      %197 = arith.muli %arg16, %c2_i32_119 : i32
      %c1_i32_120 = arith.constant 1 : i32
      %198 = arith.addi %197, %c1_i32_120 : i32
      %199 = arith.index_cast %198 : i32 to index
      %c0_121 = arith.constant 0 : index
      %c0_122 = arith.constant 0 : index
      %200 = vector.load %arg11[%199, %c0_121, %c0_122] : memref<38x38x4xf32, #tpu.memory_space<vmem>>, vector<1x38x4xf32>
      %201 = vector.shape_cast %200 : vector<1x38x4xf32> to vector<38x4xf32>
      %202 = arith.truncf %201 : vector<38x4xf32> to vector<38x4xbf16>
      %cst_123 = arith.constant dense<0.000000e+00> : vector<18x4xf32>
      %203 = tpu.matmul %31, %202, %cst_123 {dimension_numbers = #tpu.dot_dimension_numbers<[1], [0], [0], [1], [0, 0, 1, 1], [], []>} : vector<18x38xbf16>, vector<38x4xbf16>, vector<18x4xf32> -> vector<18x4xf32>
      %204 = arith.truncf %203 : vector<18x4xf32> to vector<18x4xbf16>
      %c1_124 = arith.constant 1 : index
      %c0_125 = arith.constant 0 : index
      %c0_126 = arith.constant 0 : index
      %c0_127 = arith.constant 0 : index
      %205 = vector.load %arg2[%c1_124, %c0_125, %c0_126, %c0_127] : memref<3x3x4x128xbf16, #tpu.memory_space<vmem>>, vector<1x1x4x128xbf16>
      %206 = vector.shape_cast %205 : vector<1x1x4x128xbf16> to vector<4x128xbf16>
      %cst_128 = arith.constant dense<0.000000e+00> : vector<18x128xf32>
      %207 = tpu.matmul %204, %206, %cst_128 {dimension_numbers = #tpu.dot_dimension_numbers<[1], [0], [0], [1], [0, 0, 1, 1], [], []>} : vector<18x4xbf16>, vector<4x128xbf16>, vector<18x128xf32> -> vector<18x128xf32>
      %208 = arith.addf %196, %207 : vector<18x128xf32>
      %cst_129 = arith.constant dense<0.000000e+00> : vector<18x4xf32>
      %209 = tpu.matmul %40, %202, %cst_129 {dimension_numbers = #tpu.dot_dimension_numbers<[1], [0], [0], [1], [0, 0, 1, 1], [], []>} : vector<18x38xbf16>, vector<38x4xbf16>, vector<18x4xf32> -> vector<18x4xf32>
      %210 = arith.truncf %209 : vector<18x4xf32> to vector<18x4xbf16>
      %c1_130 = arith.constant 1 : index
      %c1_131 = arith.constant 1 : index
      %c0_132 = arith.constant 0 : index
      %c0_133 = arith.constant 0 : index
      %211 = vector.load %arg2[%c1_130, %c1_131, %c0_132, %c0_133] : memref<3x3x4x128xbf16, #tpu.memory_space<vmem>>, vector<1x1x4x128xbf16>
      %212 = vector.shape_cast %211 : vector<1x1x4x128xbf16> to vector<4x128xbf16>
      %cst_134 = arith.constant dense<0.000000e+00> : vector<18x128xf32>
      %213 = tpu.matmul %210, %212, %cst_134 {dimension_numbers = #tpu.dot_dimension_numbers<[1], [0], [0], [1], [0, 0, 1, 1], [], []>} : vector<18x4xbf16>, vector<4x128xbf16>, vector<18x128xf32> -> vector<18x128xf32>
      %214 = arith.addf %208, %213 : vector<18x128xf32>
      %cst_135 = arith.constant dense<0.000000e+00> : vector<18x4xf32>
      %215 = tpu.matmul %49, %202, %cst_135 {dimension_numbers = #tpu.dot_dimension_numbers<[1], [0], [0], [1], [0, 0, 1, 1], [], []>} : vector<18x38xbf16>, vector<38x4xbf16>, vector<18x4xf32> -> vector<18x4xf32>
      %216 = arith.truncf %215 : vector<18x4xf32> to vector<18x4xbf16>
      %c1_136 = arith.constant 1 : index
      %c2_137 = arith.constant 2 : index
      %c0_138 = arith.constant 0 : index
      %c0_139 = arith.constant 0 : index
      %217 = vector.load %arg2[%c1_136, %c2_137, %c0_138, %c0_139] : memref<3x3x4x128xbf16, #tpu.memory_space<vmem>>, vector<1x1x4x128xbf16>
      %218 = vector.shape_cast %217 : vector<1x1x4x128xbf16> to vector<4x128xbf16>
      %cst_140 = arith.constant dense<0.000000e+00> : vector<18x128xf32>
      %219 = tpu.matmul %216, %218, %cst_140 {dimension_numbers = #tpu.dot_dimension_numbers<[1], [0], [0], [1], [0, 0, 1, 1], [], []>} : vector<18x4xbf16>, vector<4x128xbf16>, vector<18x128xf32> -> vector<18x128xf32>
      %220 = arith.addf %214, %219 : vector<18x128xf32>
      %c2_i32_141 = arith.constant 2 : i32
      %221 = arith.muli %arg16, %c2_i32_141 : i32
      %c2_i32_142 = arith.constant 2 : i32
      %222 = arith.addi %221, %c2_i32_142 : i32
      %223 = arith.index_cast %222 : i32 to index
      %c0_143 = arith.constant 0 : index
      %c0_144 = arith.constant 0 : index
      %224 = vector.load %arg11[%223, %c0_143, %c0_144] : memref<38x38x4xf32, #tpu.memory_space<vmem>>, vector<1x38x4xf32>
      %225 = vector.shape_cast %224 : vector<1x38x4xf32> to vector<38x4xf32>
      %226 = arith.truncf %225 : vector<38x4xf32> to vector<38x4xbf16>
      %cst_145 = arith.constant dense<0.000000e+00> : vector<18x4xf32>
      %227 = tpu.matmul %31, %226, %cst_145 {dimension_numbers = #tpu.dot_dimension_numbers<[1], [0], [0], [1], [0, 0, 1, 1], [], []>} : vector<18x38xbf16>, vector<38x4xbf16>, vector<18x4xf32> -> vector<18x4xf32>
      %228 = arith.truncf %227 : vector<18x4xf32> to vector<18x4xbf16>
      %c2_146 = arith.constant 2 : index
      %c0_147 = arith.constant 0 : index
      %c0_148 = arith.constant 0 : index
      %c0_149 = arith.constant 0 : index
      %229 = vector.load %arg2[%c2_146, %c0_147, %c0_148, %c0_149] : memref<3x3x4x128xbf16, #tpu.memory_space<vmem>>, vector<1x1x4x128xbf16>
      %230 = vector.shape_cast %229 : vector<1x1x4x128xbf16> to vector<4x128xbf16>
      %cst_150 = arith.constant dense<0.000000e+00> : vector<18x128xf32>
      %231 = tpu.matmul %228, %230, %cst_150 {dimension_numbers = #tpu.dot_dimension_numbers<[1], [0], [0], [1], [0, 0, 1, 1], [], []>} : vector<18x4xbf16>, vector<4x128xbf16>, vector<18x128xf32> -> vector<18x128xf32>
      %232 = arith.addf %220, %231 : vector<18x128xf32>
      %cst_151 = arith.constant dense<0.000000e+00> : vector<18x4xf32>
      %233 = tpu.matmul %40, %226, %cst_151 {dimension_numbers = #tpu.dot_dimension_numbers<[1], [0], [0], [1], [0, 0, 1, 1], [], []>} : vector<18x38xbf16>, vector<38x4xbf16>, vector<18x4xf32> -> vector<18x4xf32>
      %234 = arith.truncf %233 : vector<18x4xf32> to vector<18x4xbf16>
      %c2_152 = arith.constant 2 : index
      %c1_153 = arith.constant 1 : index
      %c0_154 = arith.constant 0 : index
      %c0_155 = arith.constant 0 : index
      %235 = vector.load %arg2[%c2_152, %c1_153, %c0_154, %c0_155] : memref<3x3x4x128xbf16, #tpu.memory_space<vmem>>, vector<1x1x4x128xbf16>
      %236 = vector.shape_cast %235 : vector<1x1x4x128xbf16> to vector<4x128xbf16>
      %cst_156 = arith.constant dense<0.000000e+00> : vector<18x128xf32>
      %237 = tpu.matmul %234, %236, %cst_156 {dimension_numbers = #tpu.dot_dimension_numbers<[1], [0], [0], [1], [0, 0, 1, 1], [], []>} : vector<18x4xbf16>, vector<4x128xbf16>, vector<18x128xf32> -> vector<18x128xf32>
      %238 = arith.addf %232, %237 : vector<18x128xf32>
      %cst_157 = arith.constant dense<0.000000e+00> : vector<18x4xf32>
      %239 = tpu.matmul %49, %226, %cst_157 {dimension_numbers = #tpu.dot_dimension_numbers<[1], [0], [0], [1], [0, 0, 1, 1], [], []>} : vector<18x38xbf16>, vector<38x4xbf16>, vector<18x4xf32> -> vector<18x4xf32>
      %240 = arith.truncf %239 : vector<18x4xf32> to vector<18x4xbf16>
      %c2_158 = arith.constant 2 : index
      %c2_159 = arith.constant 2 : index
      %c0_160 = arith.constant 0 : index
      %c0_161 = arith.constant 0 : index
      %241 = vector.load %arg2[%c2_158, %c2_159, %c0_160, %c0_161] : memref<3x3x4x128xbf16, #tpu.memory_space<vmem>>, vector<1x1x4x128xbf16>
      %242 = vector.shape_cast %241 : vector<1x1x4x128xbf16> to vector<4x128xbf16>
      %cst_162 = arith.constant dense<0.000000e+00> : vector<18x128xf32>
      %243 = tpu.matmul %240, %242, %cst_162 {dimension_numbers = #tpu.dot_dimension_numbers<[1], [0], [0], [1], [0, 0, 1, 1], [], []>} : vector<18x4xbf16>, vector<4x128xbf16>, vector<18x128xf32> -> vector<18x128xf32>
      %244 = arith.addf %238, %243 : vector<18x128xf32>
      %245 = vector.broadcast %50 : vector<1x128xf32> to vector<18x128xf32>
      %246 = arith.addf %244, %245 : vector<18x128xf32>
      %cst_163 = arith.constant 0.000000e+00 : f32
      %247 = vector.broadcast %cst_163 : f32 to vector<18x128xf32>
      %248 = arith.cmpf ogt, %246, %247 : vector<18x128xf32>
      %cst_164 = arith.constant 2.000000e-01 : f32
      %249 = vector.broadcast %cst_164 : f32 to vector<18x128xf32>
      %250 = arith.mulf %249, %246 : vector<18x128xf32>
      %251 = arith.select %248, %246, %250 : vector<18x128xi1>, vector<18x128xf32>
      %c2_i32_165 = arith.constant 2 : i32
      %252 = arith.addi %c2_i32_165, %arg16 : i32
      %253 = arith.index_cast %252 : i32 to index
      %c2_166 = arith.constant 2 : index
      %c0_167 = arith.constant 0 : index
      %254 = vector.load %arg12[%253, %c2_166, %c0_167] : memref<22x22x128xf32, #tpu.memory_space<vmem>>, vector<1x18x128xf32>
      %255 = vector.shape_cast %254 : vector<1x18x128xf32> to vector<18x128xf32>
      %256 = vector.shape_cast %251 : vector<18x128xf32> to vector<1x18x128xf32>
      tpu.vector_store %arg12[%253, %c2_166, %c0_167], %256 {strides = array<i32>} : memref<22x22x128xf32, #tpu.memory_space<vmem>>, vector<1x18x128xf32>,
    }
    %c18_i32_36 = arith.constant 18 : i32
    %52 = tpu.iota {dimensions = array<i32: 0>} : vector<10x22xi32>
    %53 = tpu.iota {dimensions = array<i32: 1>} : vector<10x22xi32>
    %c2_i32_37 = arith.constant 2 : i32
    %54 = vector.broadcast %c2_i32_37 : i32 to vector<10x22xi32>
    %55 = arith.muli %52, %54 : vector<10x22xi32>
    %c0_i32_38 = arith.constant 0 : i32
    %56 = vector.broadcast %c0_i32_38 : i32 to vector<10x22xi32>
    %57 = arith.addi %55, %56 : vector<10x22xi32>
    %58 = arith.cmpi eq, %53, %57 : vector<10x22xi32>
    %cst_39 = arith.constant 1.000000e+00 : f32
    %cst_40 = arith.constant 0.000000e+00 : f32
    %59 = vector.broadcast %cst_39 : f32 to vector<10x22xf32>
    %60 = vector.broadcast %cst_40 : f32 to vector<10x22xf32>
    %61 = arith.select %58, %59, %60 : vector<10x22xi1>, vector<10x22xf32>
    %62 = arith.truncf %61 : vector<10x22xf32> to vector<10x22xbf16>
    %c2_i32_41 = arith.constant 2 : i32
    %63 = vector.broadcast %c2_i32_41 : i32 to vector<10x22xi32>
    %64 = arith.muli %52, %63 : vector<10x22xi32>
    %c1_i32_42 = arith.constant 1 : i32
    %65 = vector.broadcast %c1_i32_42 : i32 to vector<10x22xi32>
    %66 = arith.addi %64, %65 : vector<10x22xi32>
    %67 = arith.cmpi eq, %53, %66 : vector<10x22xi32>
    %cst_43 = arith.constant 1.000000e+00 : f32
    %cst_44 = arith.constant 0.000000e+00 : f32
    %68 = vector.broadcast %cst_43 : f32 to vector<10x22xf32>
    %69 = vector.broadcast %cst_44 : f32 to vector<10x22xf32>
    %70 = arith.select %67, %68, %69 : vector<10x22xi1>, vector<10x22xf32>
    %71 = arith.truncf %70 : vector<10x22xf32> to vector<10x22xbf16>
    %c2_i32_45 = arith.constant 2 : i32
    %72 = vector.broadcast %c2_i32_45 : i32 to vector<10x22xi32>
    %73 = arith.muli %52, %72 : vector<10x22xi32>
    %c2_i32_46 = arith.constant 2 : i32
    %74 = vector.broadcast %c2_i32_46 : i32 to vector<10x22xi32>
    %75 = arith.addi %73, %74 : vector<10x22xi32>
    %76 = arith.cmpi eq, %53, %75 : vector<10x22xi32>
    %cst_47 = arith.constant 1.000000e+00 : f32
    %cst_48 = arith.constant 0.000000e+00 : f32
    %77 = vector.broadcast %cst_47 : f32 to vector<10x22xf32>
    %78 = vector.broadcast %cst_48 : f32 to vector<10x22xf32>
    %79 = arith.select %76, %77, %78 : vector<10x22xi1>, vector<10x22xf32>
    %80 = arith.truncf %79 : vector<10x22xf32> to vector<10x22xbf16>
    %c0_49 = arith.constant 0 : index
    %c0_50 = arith.constant 0 : index
    %81 = vector.load %arg5[%c0_49, %c0_50] : memref<1x128xf32, #tpu.memory_space<vmem>>, vector<1x128xf32>
    %c0_i32_51 = arith.constant 0 : i32
    %c10_i32 = arith.constant 10 : i32
    %82 = arith.addi %c0_i32_51, %c10_i32 : i32
    %c1_i32_52 = arith.constant 1 : i32
    scf.for %arg16 = %c0_i32_51 to %82 step %c1_i32_52  : i32 {
      %cst_98 = arith.constant 0.000000e+00 : f32
      %172 = vector.broadcast %cst_98 : f32 to vector<10x128xf32>
      %c2_i32_99 = arith.constant 2 : i32
      %173 = arith.muli %arg16, %c2_i32_99 : i32
      %c0_i32_100 = arith.constant 0 : i32
      %174 = arith.addi %173, %c0_i32_100 : i32
      %175 = arith.index_cast %174 : i32 to index
      %c0_101 = arith.constant 0 : index
      %c0_102 = arith.constant 0 : index
      %176 = vector.load %arg12[%175, %c0_101, %c0_102] : memref<22x22x128xf32, #tpu.memory_space<vmem>>, vector<1x22x128xf32>
      %177 = vector.shape_cast %176 : vector<1x22x128xf32> to vector<22x128xf32>
      %178 = arith.truncf %177 : vector<22x128xf32> to vector<22x128xbf16>
      %cst_103 = arith.constant dense<0.000000e+00> : vector<10x128xf32>
      %179 = tpu.matmul %62, %178, %cst_103 {dimension_numbers = #tpu.dot_dimension_numbers<[1], [0], [0], [1], [0, 0, 1, 1], [], []>} : vector<10x22xbf16>, vector<22x128xbf16>, vector<10x128xf32> -> vector<10x128xf32>
      %180 = arith.truncf %179 : vector<10x128xf32> to vector<10x128xbf16>
      %c0_104 = arith.constant 0 : index
      %c0_105 = arith.constant 0 : index
      %c0_106 = arith.constant 0 : index
      %c0_107 = arith.constant 0 : index
      %181 = vector.load %arg4[%c0_104, %c0_105, %c0_106, %c0_107] : memref<3x3x128x128xbf16, #tpu.memory_space<vmem>>, vector<1x1x128x128xbf16>
      %182 = vector.shape_cast %181 : vector<1x1x128x128xbf16> to vector<128x128xbf16>
      %cst_108 = arith.constant dense<0.000000e+00> : vector<10x128xf32>
      %183 = tpu.matmul %180, %182, %cst_108 {dimension_numbers = #tpu.dot_dimension_numbers<[1], [0], [0], [1], [0, 0, 1, 1], [], []>} : vector<10x128xbf16>, vector<128x128xbf16>, vector<10x128xf32> -> vector<10x128xf32>
      %184 = arith.addf %172, %183 : vector<10x128xf32>
      %cst_109 = arith.constant dense<0.000000e+00> : vector<10x128xf32>
      %185 = tpu.matmul %71, %178, %cst_109 {dimension_numbers = #tpu.dot_dimension_numbers<[1], [0], [0], [1], [0, 0, 1, 1], [], []>} : vector<10x22xbf16>, vector<22x128xbf16>, vector<10x128xf32> -> vector<10x128xf32>
      %186 = arith.truncf %185 : vector<10x128xf32> to vector<10x128xbf16>
      %c0_110 = arith.constant 0 : index
      %c1 = arith.constant 1 : index
      %c0_111 = arith.constant 0 : index
      %c0_112 = arith.constant 0 : index
      %187 = vector.load %arg4[%c0_110, %c1, %c0_111, %c0_112] : memref<3x3x128x128xbf16, #tpu.memory_space<vmem>>, vector<1x1x128x128xbf16>
      %188 = vector.shape_cast %187 : vector<1x1x128x128xbf16> to vector<128x128xbf16>
      %cst_113 = arith.constant dense<0.000000e+00> : vector<10x128xf32>
      %189 = tpu.matmul %186, %188, %cst_113 {dimension_numbers = #tpu.dot_dimension_numbers<[1], [0], [0], [1], [0, 0, 1, 1], [], []>} : vector<10x128xbf16>, vector<128x128xbf16>, vector<10x128xf32> -> vector<10x128xf32>
      %190 = arith.addf %184, %189 : vector<10x128xf32>
      %cst_114 = arith.constant dense<0.000000e+00> : vector<10x128xf32>
      %191 = tpu.matmul %80, %178, %cst_114 {dimension_numbers = #tpu.dot_dimension_numbers<[1], [0], [0], [1], [0, 0, 1, 1], [], []>} : vector<10x22xbf16>, vector<22x128xbf16>, vector<10x128xf32> -> vector<10x128xf32>
      %192 = arith.truncf %191 : vector<10x128xf32> to vector<10x128xbf16>
      %c0_115 = arith.constant 0 : index
      %c2 = arith.constant 2 : index
      %c0_116 = arith.constant 0 : index
      %c0_117 = arith.constant 0 : index
      %193 = vector.load %arg4[%c0_115, %c2, %c0_116, %c0_117] : memref<3x3x128x128xbf16, #tpu.memory_space<vmem>>, vector<1x1x128x128xbf16>
      %194 = vector.shape_cast %193 : vector<1x1x128x128xbf16> to vector<128x128xbf16>
      %cst_118 = arith.constant dense<0.000000e+00> : vector<10x128xf32>
      %195 = tpu.matmul %192, %194, %cst_118 {dimension_numbers = #tpu.dot_dimension_numbers<[1], [0], [0], [1], [0, 0, 1, 1], [], []>} : vector<10x128xbf16>, vector<128x128xbf16>, vector<10x128xf32> -> vector<10x128xf32>
      %196 = arith.addf %190, %195 : vector<10x128xf32>
      %c2_i32_119 = arith.constant 2 : i32
      %197 = arith.muli %arg16, %c2_i32_119 : i32
      %c1_i32_120 = arith.constant 1 : i32
      %198 = arith.addi %197, %c1_i32_120 : i32
      %199 = arith.index_cast %198 : i32 to index
      %c0_121 = arith.constant 0 : index
      %c0_122 = arith.constant 0 : index
      %200 = vector.load %arg12[%199, %c0_121, %c0_122] : memref<22x22x128xf32, #tpu.memory_space<vmem>>, vector<1x22x128xf32>
      %201 = vector.shape_cast %200 : vector<1x22x128xf32> to vector<22x128xf32>
      %202 = arith.truncf %201 : vector<22x128xf32> to vector<22x128xbf16>
      %cst_123 = arith.constant dense<0.000000e+00> : vector<10x128xf32>
      %203 = tpu.matmul %62, %202, %cst_123 {dimension_numbers = #tpu.dot_dimension_numbers<[1], [0], [0], [1], [0, 0, 1, 1], [], []>} : vector<10x22xbf16>, vector<22x128xbf16>, vector<10x128xf32> -> vector<10x128xf32>
      %204 = arith.truncf %203 : vector<10x128xf32> to vector<10x128xbf16>
      %c1_124 = arith.constant 1 : index
      %c0_125 = arith.constant 0 : index
      %c0_126 = arith.constant 0 : index
      %c0_127 = arith.constant 0 : index
      %205 = vector.load %arg4[%c1_124, %c0_125, %c0_126, %c0_127] : memref<3x3x128x128xbf16, #tpu.memory_space<vmem>>, vector<1x1x128x128xbf16>
      %206 = vector.shape_cast %205 : vector<1x1x128x128xbf16> to vector<128x128xbf16>
      %cst_128 = arith.constant dense<0.000000e+00> : vector<10x128xf32>
      %207 = tpu.matmul %204, %206, %cst_128 {dimension_numbers = #tpu.dot_dimension_numbers<[1], [0], [0], [1], [0, 0, 1, 1], [], []>} : vector<10x128xbf16>, vector<128x128xbf16>, vector<10x128xf32> -> vector<10x128xf32>
      %208 = arith.addf %196, %207 : vector<10x128xf32>
      %cst_129 = arith.constant dense<0.000000e+00> : vector<10x128xf32>
      %209 = tpu.matmul %71, %202, %cst_129 {dimension_numbers = #tpu.dot_dimension_numbers<[1], [0], [0], [1], [0, 0, 1, 1], [], []>} : vector<10x22xbf16>, vector<22x128xbf16>, vector<10x128xf32> -> vector<10x128xf32>
      %210 = arith.truncf %209 : vector<10x128xf32> to vector<10x128xbf16>
      %c1_130 = arith.constant 1 : index
      %c1_131 = arith.constant 1 : index
      %c0_132 = arith.constant 0 : index
      %c0_133 = arith.constant 0 : index
      %211 = vector.load %arg4[%c1_130, %c1_131, %c0_132, %c0_133] : memref<3x3x128x128xbf16, #tpu.memory_space<vmem>>, vector<1x1x128x128xbf16>
      %212 = vector.shape_cast %211 : vector<1x1x128x128xbf16> to vector<128x128xbf16>
      %cst_134 = arith.constant dense<0.000000e+00> : vector<10x128xf32>
      %213 = tpu.matmul %210, %212, %cst_134 {dimension_numbers = #tpu.dot_dimension_numbers<[1], [0], [0], [1], [0, 0, 1, 1], [], []>} : vector<10x128xbf16>, vector<128x128xbf16>, vector<10x128xf32> -> vector<10x128xf32>
      %214 = arith.addf %208, %213 : vector<10x128xf32>
      %cst_135 = arith.constant dense<0.000000e+00> : vector<10x128xf32>
      %215 = tpu.matmul %80, %202, %cst_135 {dimension_numbers = #tpu.dot_dimension_numbers<[1], [0], [0], [1], [0, 0, 1, 1], [], []>} : vector<10x22xbf16>, vector<22x128xbf16>, vector<10x128xf32> -> vector<10x128xf32>
      %216 = arith.truncf %215 : vector<10x128xf32> to vector<10x128xbf16>
      %c1_136 = arith.constant 1 : index
      %c2_137 = arith.constant 2 : index
      %c0_138 = arith.constant 0 : index
      %c0_139 = arith.constant 0 : index
      %217 = vector.load %arg4[%c1_136, %c2_137, %c0_138, %c0_139] : memref<3x3x128x128xbf16, #tpu.memory_space<vmem>>, vector<1x1x128x128xbf16>
      %218 = vector.shape_cast %217 : vector<1x1x128x128xbf16> to vector<128x128xbf16>
      %cst_140 = arith.constant dense<0.000000e+00> : vector<10x128xf32>
      %219 = tpu.matmul %216, %218, %cst_140 {dimension_numbers = #tpu.dot_dimension_numbers<[1], [0], [0], [1], [0, 0, 1, 1], [], []>} : vector<10x128xbf16>, vector<128x128xbf16>, vector<10x128xf32> -> vector<10x128xf32>
      %220 = arith.addf %214, %219 : vector<10x128xf32>
      %c2_i32_141 = arith.constant 2 : i32
      %221 = arith.muli %arg16, %c2_i32_141 : i32
      %c2_i32_142 = arith.constant 2 : i32
      %222 = arith.addi %221, %c2_i32_142 : i32
      %223 = arith.index_cast %222 : i32 to index
      %c0_143 = arith.constant 0 : index
      %c0_144 = arith.constant 0 : index
      %224 = vector.load %arg12[%223, %c0_143, %c0_144] : memref<22x22x128xf32, #tpu.memory_space<vmem>>, vector<1x22x128xf32>
      %225 = vector.shape_cast %224 : vector<1x22x128xf32> to vector<22x128xf32>
      %226 = arith.truncf %225 : vector<22x128xf32> to vector<22x128xbf16>
      %cst_145 = arith.constant dense<0.000000e+00> : vector<10x128xf32>
      %227 = tpu.matmul %62, %226, %cst_145 {dimension_numbers = #tpu.dot_dimension_numbers<[1], [0], [0], [1], [0, 0, 1, 1], [], []>} : vector<10x22xbf16>, vector<22x128xbf16>, vector<10x128xf32> -> vector<10x128xf32>
      %228 = arith.truncf %227 : vector<10x128xf32> to vector<10x128xbf16>
      %c2_146 = arith.constant 2 : index
      %c0_147 = arith.constant 0 : index
      %c0_148 = arith.constant 0 : index
      %c0_149 = arith.constant 0 : index
      %229 = vector.load %arg4[%c2_146, %c0_147, %c0_148, %c0_149] : memref<3x3x128x128xbf16, #tpu.memory_space<vmem>>, vector<1x1x128x128xbf16>
      %230 = vector.shape_cast %229 : vector<1x1x128x128xbf16> to vector<128x128xbf16>
      %cst_150 = arith.constant dense<0.000000e+00> : vector<10x128xf32>
      %231 = tpu.matmul %228, %230, %cst_150 {dimension_numbers = #tpu.dot_dimension_numbers<[1], [0], [0], [1], [0, 0, 1, 1], [], []>} : vector<10x128xbf16>, vector<128x128xbf16>, vector<10x128xf32> -> vector<10x128xf32>
      %232 = arith.addf %220, %231 : vector<10x128xf32>
      %cst_151 = arith.constant dense<0.000000e+00> : vector<10x128xf32>
      %233 = tpu.matmul %71, %226, %cst_151 {dimension_numbers = #tpu.dot_dimension_numbers<[1], [0], [0], [1], [0, 0, 1, 1], [], []>} : vector<10x22xbf16>, vector<22x128xbf16>, vector<10x128xf32> -> vector<10x128xf32>
      %234 = arith.truncf %233 : vector<10x128xf32> to vector<10x128xbf16>
      %c2_152 = arith.constant 2 : index
      %c1_153 = arith.constant 1 : index
      %c0_154 = arith.constant 0 : index
      %c0_155 = arith.constant 0 : index
      %235 = vector.load %arg4[%c2_152, %c1_153, %c0_154, %c0_155] : memref<3x3x128x128xbf16, #tpu.memory_space<vmem>>, vector<1x1x128x128xbf16>
      %236 = vector.shape_cast %235 : vector<1x1x128x128xbf16> to vector<128x128xbf16>
      %cst_156 = arith.constant dense<0.000000e+00> : vector<10x128xf32>
      %237 = tpu.matmul %234, %236, %cst_156 {dimension_numbers = #tpu.dot_dimension_numbers<[1], [0], [0], [1], [0, 0, 1, 1], [], []>} : vector<10x128xbf16>, vector<128x128xbf16>, vector<10x128xf32> -> vector<10x128xf32>
      %238 = arith.addf %232, %237 : vector<10x128xf32>
      %cst_157 = arith.constant dense<0.000000e+00> : vector<10x128xf32>
      %239 = tpu.matmul %80, %226, %cst_157 {dimension_numbers = #tpu.dot_dimension_numbers<[1], [0], [0], [1], [0, 0, 1, 1], [], []>} : vector<10x22xbf16>, vector<22x128xbf16>, vector<10x128xf32> -> vector<10x128xf32>
      %240 = arith.truncf %239 : vector<10x128xf32> to vector<10x128xbf16>
      %c2_158 = arith.constant 2 : index
      %c2_159 = arith.constant 2 : index
      %c0_160 = arith.constant 0 : index
      %c0_161 = arith.constant 0 : index
      %241 = vector.load %arg4[%c2_158, %c2_159, %c0_160, %c0_161] : memref<3x3x128x128xbf16, #tpu.memory_space<vmem>>, vector<1x1x128x128xbf16>
      %242 = vector.shape_cast %241 : vector<1x1x128x128xbf16> to vector<128x128xbf16>
      %cst_162 = arith.constant dense<0.000000e+00> : vector<10x128xf32>
      %243 = tpu.matmul %240, %242, %cst_162 {dimension_numbers = #tpu.dot_dimension_numbers<[1], [0], [0], [1], [0, 0, 1, 1], [], []>} : vector<10x128xbf16>, vector<128x128xbf16>, vector<10x128xf32> -> vector<10x128xf32>
      %244 = arith.addf %238, %243 : vector<10x128xf32>
      %245 = vector.broadcast %81 : vector<1x128xf32> to vector<10x128xf32>
      %246 = arith.addf %244, %245 : vector<10x128xf32>
      %cst_163 = arith.constant 0.000000e+00 : f32
      %247 = vector.broadcast %cst_163 : f32 to vector<10x128xf32>
      %248 = arith.cmpf ogt, %246, %247 : vector<10x128xf32>
      %cst_164 = arith.constant 2.000000e-01 : f32
      %249 = vector.broadcast %cst_164 : f32 to vector<10x128xf32>
      %250 = arith.mulf %249, %246 : vector<10x128xf32>
      %251 = arith.select %248, %246, %250 : vector<10x128xi1>, vector<10x128xf32>
      %c1_i32_165 = arith.constant 1 : i32
      %252 = arith.addi %c1_i32_165, %arg16 : i32
      %253 = arith.index_cast %252 : i32 to index
      %c1_166 = arith.constant 1 : index
      %c0_167 = arith.constant 0 : index
      %254 = vector.load %arg13[%253, %c1_166, %c0_167] : memref<12x12x128xf32, #tpu.memory_space<vmem>>, vector<1x10x128xf32>
      %255 = vector.shape_cast %254 : vector<1x10x128xf32> to vector<10x128xf32>
      %256 = vector.shape_cast %251 : vector<10x128xf32> to vector<1x10x128xf32>
      tpu.vector_store %arg13[%253, %c1_166, %c0_167], %256 {strides = array<i32>} : memref<12x12x128xf32, #tpu.memory_space<vmem>>, vector<1x10x128xf32>,
    }
    %c10_i32_53 = arith.constant 10 : i32
    %83 = tpu.iota {dimensions = array<i32: 0>} : vector<4x12xi32>
    %84 = tpu.iota {dimensions = array<i32: 1>} : vector<4x12xi32>
    %c3_i32 = arith.constant 3 : i32
    %85 = vector.broadcast %c3_i32 : i32 to vector<4x12xi32>
    %86 = arith.muli %83, %85 : vector<4x12xi32>
    %c0_i32_54 = arith.constant 0 : i32
    %87 = vector.broadcast %c0_i32_54 : i32 to vector<4x12xi32>
    %88 = arith.addi %86, %87 : vector<4x12xi32>
    %89 = arith.cmpi eq, %84, %88 : vector<4x12xi32>
    %cst_55 = arith.constant 1.000000e+00 : f32
    %cst_56 = arith.constant 0.000000e+00 : f32
    %90 = vector.broadcast %cst_55 : f32 to vector<4x12xf32>
    %91 = vector.broadcast %cst_56 : f32 to vector<4x12xf32>
    %92 = arith.select %89, %90, %91 : vector<4x12xi1>, vector<4x12xf32>
    %93 = arith.truncf %92 : vector<4x12xf32> to vector<4x12xbf16>
    %c3_i32_57 = arith.constant 3 : i32
    %94 = vector.broadcast %c3_i32_57 : i32 to vector<4x12xi32>
    %95 = arith.muli %83, %94 : vector<4x12xi32>
    %c1_i32_58 = arith.constant 1 : i32
    %96 = vector.broadcast %c1_i32_58 : i32 to vector<4x12xi32>
    %97 = arith.addi %95, %96 : vector<4x12xi32>
    %98 = arith.cmpi eq, %84, %97 : vector<4x12xi32>
    %cst_59 = arith.constant 1.000000e+00 : f32
    %cst_60 = arith.constant 0.000000e+00 : f32
    %99 = vector.broadcast %cst_59 : f32 to vector<4x12xf32>
    %100 = vector.broadcast %cst_60 : f32 to vector<4x12xf32>
    %101 = arith.select %98, %99, %100 : vector<4x12xi1>, vector<4x12xf32>
    %102 = arith.truncf %101 : vector<4x12xf32> to vector<4x12xbf16>
    %c3_i32_61 = arith.constant 3 : i32
    %103 = vector.broadcast %c3_i32_61 : i32 to vector<4x12xi32>
    %104 = arith.muli %83, %103 : vector<4x12xi32>
    %c2_i32_62 = arith.constant 2 : i32
    %105 = vector.broadcast %c2_i32_62 : i32 to vector<4x12xi32>
    %106 = arith.addi %104, %105 : vector<4x12xi32>
    %107 = arith.cmpi eq, %84, %106 : vector<4x12xi32>
    %cst_63 = arith.constant 1.000000e+00 : f32
    %cst_64 = arith.constant 0.000000e+00 : f32
    %108 = vector.broadcast %cst_63 : f32 to vector<4x12xf32>
    %109 = vector.broadcast %cst_64 : f32 to vector<4x12xf32>
    %110 = arith.select %107, %108, %109 : vector<4x12xi1>, vector<4x12xf32>
    %111 = arith.truncf %110 : vector<4x12xf32> to vector<4x12xbf16>
    %c0_65 = arith.constant 0 : index
    %c0_66 = arith.constant 0 : index
    %112 = vector.load %arg7[%c0_65, %c0_66] : memref<1x128xf32, #tpu.memory_space<vmem>>, vector<1x128xf32>
    %c0_i32_67 = arith.constant 0 : i32
    %c4_i32 = arith.constant 4 : i32
    %113 = arith.addi %c0_i32_67, %c4_i32 : i32
    %c1_i32_68 = arith.constant 1 : i32
    scf.for %arg16 = %c0_i32_67 to %113 step %c1_i32_68  : i32 {
      %cst_98 = arith.constant 0.000000e+00 : f32
      %172 = vector.broadcast %cst_98 : f32 to vector<4x128xf32>
      %c3_i32_99 = arith.constant 3 : i32
      %173 = arith.muli %arg16, %c3_i32_99 : i32
      %c0_i32_100 = arith.constant 0 : i32
      %174 = arith.addi %173, %c0_i32_100 : i32
      %175 = arith.index_cast %174 : i32 to index
      %c0_101 = arith.constant 0 : index
      %c0_102 = arith.constant 0 : index
      %176 = vector.load %arg13[%175, %c0_101, %c0_102] : memref<12x12x128xf32, #tpu.memory_space<vmem>>, vector<1x12x128xf32>
      %177 = vector.shape_cast %176 : vector<1x12x128xf32> to vector<12x128xf32>
      %178 = arith.truncf %177 : vector<12x128xf32> to vector<12x128xbf16>
      %cst_103 = arith.constant dense<0.000000e+00> : vector<4x128xf32>
      %179 = tpu.matmul %93, %178, %cst_103 {dimension_numbers = #tpu.dot_dimension_numbers<[1], [0], [0], [1], [0, 0, 1, 1], [], []>} : vector<4x12xbf16>, vector<12x128xbf16>, vector<4x128xf32> -> vector<4x128xf32>
      %180 = arith.truncf %179 : vector<4x128xf32> to vector<4x128xbf16>
      %c0_104 = arith.constant 0 : index
      %c0_105 = arith.constant 0 : index
      %c0_106 = arith.constant 0 : index
      %c0_107 = arith.constant 0 : index
      %181 = vector.load %arg6[%c0_104, %c0_105, %c0_106, %c0_107] : memref<3x3x128x128xbf16, #tpu.memory_space<vmem>>, vector<1x1x128x128xbf16>
      %182 = vector.shape_cast %181 : vector<1x1x128x128xbf16> to vector<128x128xbf16>
      %cst_108 = arith.constant dense<0.000000e+00> : vector<4x128xf32>
      %183 = tpu.matmul %180, %182, %cst_108 {dimension_numbers = #tpu.dot_dimension_numbers<[1], [0], [0], [1], [0, 0, 1, 1], [], []>} : vector<4x128xbf16>, vector<128x128xbf16>, vector<4x128xf32> -> vector<4x128xf32>
      %184 = arith.addf %172, %183 : vector<4x128xf32>
      %cst_109 = arith.constant dense<0.000000e+00> : vector<4x128xf32>
      %185 = tpu.matmul %102, %178, %cst_109 {dimension_numbers = #tpu.dot_dimension_numbers<[1], [0], [0], [1], [0, 0, 1, 1], [], []>} : vector<4x12xbf16>, vector<12x128xbf16>, vector<4x128xf32> -> vector<4x128xf32>
      %186 = arith.truncf %185 : vector<4x128xf32> to vector<4x128xbf16>
      %c0_110 = arith.constant 0 : index
      %c1 = arith.constant 1 : index
      %c0_111 = arith.constant 0 : index
      %c0_112 = arith.constant 0 : index
      %187 = vector.load %arg6[%c0_110, %c1, %c0_111, %c0_112] : memref<3x3x128x128xbf16, #tpu.memory_space<vmem>>, vector<1x1x128x128xbf16>
      %188 = vector.shape_cast %187 : vector<1x1x128x128xbf16> to vector<128x128xbf16>
      %cst_113 = arith.constant dense<0.000000e+00> : vector<4x128xf32>
      %189 = tpu.matmul %186, %188, %cst_113 {dimension_numbers = #tpu.dot_dimension_numbers<[1], [0], [0], [1], [0, 0, 1, 1], [], []>} : vector<4x128xbf16>, vector<128x128xbf16>, vector<4x128xf32> -> vector<4x128xf32>
      %190 = arith.addf %184, %189 : vector<4x128xf32>
      %cst_114 = arith.constant dense<0.000000e+00> : vector<4x128xf32>
      %191 = tpu.matmul %111, %178, %cst_114 {dimension_numbers = #tpu.dot_dimension_numbers<[1], [0], [0], [1], [0, 0, 1, 1], [], []>} : vector<4x12xbf16>, vector<12x128xbf16>, vector<4x128xf32> -> vector<4x128xf32>
      %192 = arith.truncf %191 : vector<4x128xf32> to vector<4x128xbf16>
      %c0_115 = arith.constant 0 : index
      %c2 = arith.constant 2 : index
      %c0_116 = arith.constant 0 : index
      %c0_117 = arith.constant 0 : index
      %193 = vector.load %arg6[%c0_115, %c2, %c0_116, %c0_117] : memref<3x3x128x128xbf16, #tpu.memory_space<vmem>>, vector<1x1x128x128xbf16>
      %194 = vector.shape_cast %193 : vector<1x1x128x128xbf16> to vector<128x128xbf16>
      %cst_118 = arith.constant dense<0.000000e+00> : vector<4x128xf32>
      %195 = tpu.matmul %192, %194, %cst_118 {dimension_numbers = #tpu.dot_dimension_numbers<[1], [0], [0], [1], [0, 0, 1, 1], [], []>} : vector<4x128xbf16>, vector<128x128xbf16>, vector<4x128xf32> -> vector<4x128xf32>
      %196 = arith.addf %190, %195 : vector<4x128xf32>
      %c3_i32_119 = arith.constant 3 : i32
      %197 = arith.muli %arg16, %c3_i32_119 : i32
      %c1_i32_120 = arith.constant 1 : i32
      %198 = arith.addi %197, %c1_i32_120 : i32
      %199 = arith.index_cast %198 : i32 to index
      %c0_121 = arith.constant 0 : index
      %c0_122 = arith.constant 0 : index
      %200 = vector.load %arg13[%199, %c0_121, %c0_122] : memref<12x12x128xf32, #tpu.memory_space<vmem>>, vector<1x12x128xf32>
      %201 = vector.shape_cast %200 : vector<1x12x128xf32> to vector<12x128xf32>
      %202 = arith.truncf %201 : vector<12x128xf32> to vector<12x128xbf16>
      %cst_123 = arith.constant dense<0.000000e+00> : vector<4x128xf32>
      %203 = tpu.matmul %93, %202, %cst_123 {dimension_numbers = #tpu.dot_dimension_numbers<[1], [0], [0], [1], [0, 0, 1, 1], [], []>} : vector<4x12xbf16>, vector<12x128xbf16>, vector<4x128xf32> -> vector<4x128xf32>
      %204 = arith.truncf %203 : vector<4x128xf32> to vector<4x128xbf16>
      %c1_124 = arith.constant 1 : index
      %c0_125 = arith.constant 0 : index
      %c0_126 = arith.constant 0 : index
      %c0_127 = arith.constant 0 : index
      %205 = vector.load %arg6[%c1_124, %c0_125, %c0_126, %c0_127] : memref<3x3x128x128xbf16, #tpu.memory_space<vmem>>, vector<1x1x128x128xbf16>
      %206 = vector.shape_cast %205 : vector<1x1x128x128xbf16> to vector<128x128xbf16>
      %cst_128 = arith.constant dense<0.000000e+00> : vector<4x128xf32>
      %207 = tpu.matmul %204, %206, %cst_128 {dimension_numbers = #tpu.dot_dimension_numbers<[1], [0], [0], [1], [0, 0, 1, 1], [], []>} : vector<4x128xbf16>, vector<128x128xbf16>, vector<4x128xf32> -> vector<4x128xf32>
      %208 = arith.addf %196, %207 : vector<4x128xf32>
      %cst_129 = arith.constant dense<0.000000e+00> : vector<4x128xf32>
      %209 = tpu.matmul %102, %202, %cst_129 {dimension_numbers = #tpu.dot_dimension_numbers<[1], [0], [0], [1], [0, 0, 1, 1], [], []>} : vector<4x12xbf16>, vector<12x128xbf16>, vector<4x128xf32> -> vector<4x128xf32>
      %210 = arith.truncf %209 : vector<4x128xf32> to vector<4x128xbf16>
      %c1_130 = arith.constant 1 : index
      %c1_131 = arith.constant 1 : index
      %c0_132 = arith.constant 0 : index
      %c0_133 = arith.constant 0 : index
      %211 = vector.load %arg6[%c1_130, %c1_131, %c0_132, %c0_133] : memref<3x3x128x128xbf16, #tpu.memory_space<vmem>>, vector<1x1x128x128xbf16>
      %212 = vector.shape_cast %211 : vector<1x1x128x128xbf16> to vector<128x128xbf16>
      %cst_134 = arith.constant dense<0.000000e+00> : vector<4x128xf32>
      %213 = tpu.matmul %210, %212, %cst_134 {dimension_numbers = #tpu.dot_dimension_numbers<[1], [0], [0], [1], [0, 0, 1, 1], [], []>} : vector<4x128xbf16>, vector<128x128xbf16>, vector<4x128xf32> -> vector<4x128xf32>
      %214 = arith.addf %208, %213 : vector<4x128xf32>
      %cst_135 = arith.constant dense<0.000000e+00> : vector<4x128xf32>
      %215 = tpu.matmul %111, %202, %cst_135 {dimension_numbers = #tpu.dot_dimension_numbers<[1], [0], [0], [1], [0, 0, 1, 1], [], []>} : vector<4x12xbf16>, vector<12x128xbf16>, vector<4x128xf32> -> vector<4x128xf32>
      %216 = arith.truncf %215 : vector<4x128xf32> to vector<4x128xbf16>
      %c1_136 = arith.constant 1 : index
      %c2_137 = arith.constant 2 : index
      %c0_138 = arith.constant 0 : index
      %c0_139 = arith.constant 0 : index
      %217 = vector.load %arg6[%c1_136, %c2_137, %c0_138, %c0_139] : memref<3x3x128x128xbf16, #tpu.memory_space<vmem>>, vector<1x1x128x128xbf16>
      %218 = vector.shape_cast %217 : vector<1x1x128x128xbf16> to vector<128x128xbf16>
      %cst_140 = arith.constant dense<0.000000e+00> : vector<4x128xf32>
      %219 = tpu.matmul %216, %218, %cst_140 {dimension_numbers = #tpu.dot_dimension_numbers<[1], [0], [0], [1], [0, 0, 1, 1], [], []>} : vector<4x128xbf16>, vector<128x128xbf16>, vector<4x128xf32> -> vector<4x128xf32>
      %220 = arith.addf %214, %219 : vector<4x128xf32>
      %c3_i32_141 = arith.constant 3 : i32
      %221 = arith.muli %arg16, %c3_i32_141 : i32
      %c2_i32_142 = arith.constant 2 : i32
      %222 = arith.addi %221, %c2_i32_142 : i32
      %223 = arith.index_cast %222 : i32 to index
      %c0_143 = arith.constant 0 : index
      %c0_144 = arith.constant 0 : index
      %224 = vector.load %arg13[%223, %c0_143, %c0_144] : memref<12x12x128xf32, #tpu.memory_space<vmem>>, vector<1x12x128xf32>
      %225 = vector.shape_cast %224 : vector<1x12x128xf32> to vector<12x128xf32>
      %226 = arith.truncf %225 : vector<12x128xf32> to vector<12x128xbf16>
      %cst_145 = arith.constant dense<0.000000e+00> : vector<4x128xf32>
      %227 = tpu.matmul %93, %226, %cst_145 {dimension_numbers = #tpu.dot_dimension_numbers<[1], [0], [0], [1], [0, 0, 1, 1], [], []>} : vector<4x12xbf16>, vector<12x128xbf16>, vector<4x128xf32> -> vector<4x128xf32>
      %228 = arith.truncf %227 : vector<4x128xf32> to vector<4x128xbf16>
      %c2_146 = arith.constant 2 : index
      %c0_147 = arith.constant 0 : index
      %c0_148 = arith.constant 0 : index
      %c0_149 = arith.constant 0 : index
      %229 = vector.load %arg6[%c2_146, %c0_147, %c0_148, %c0_149] : memref<3x3x128x128xbf16, #tpu.memory_space<vmem>>, vector<1x1x128x128xbf16>
      %230 = vector.shape_cast %229 : vector<1x1x128x128xbf16> to vector<128x128xbf16>
      %cst_150 = arith.constant dense<0.000000e+00> : vector<4x128xf32>
      %231 = tpu.matmul %228, %230, %cst_150 {dimension_numbers = #tpu.dot_dimension_numbers<[1], [0], [0], [1], [0, 0, 1, 1], [], []>} : vector<4x128xbf16>, vector<128x128xbf16>, vector<4x128xf32> -> vector<4x128xf32>
      %232 = arith.addf %220, %231 : vector<4x128xf32>
      %cst_151 = arith.constant dense<0.000000e+00> : vector<4x128xf32>
      %233 = tpu.matmul %102, %226, %cst_151 {dimension_numbers = #tpu.dot_dimension_numbers<[1], [0], [0], [1], [0, 0, 1, 1], [], []>} : vector<4x12xbf16>, vector<12x128xbf16>, vector<4x128xf32> -> vector<4x128xf32>
      %234 = arith.truncf %233 : vector<4x128xf32> to vector<4x128xbf16>
      %c2_152 = arith.constant 2 : index
      %c1_153 = arith.constant 1 : index
      %c0_154 = arith.constant 0 : index
      %c0_155 = arith.constant 0 : index
      %235 = vector.load %arg6[%c2_152, %c1_153, %c0_154, %c0_155] : memref<3x3x128x128xbf16, #tpu.memory_space<vmem>>, vector<1x1x128x128xbf16>
      %236 = vector.shape_cast %235 : vector<1x1x128x128xbf16> to vector<128x128xbf16>
      %cst_156 = arith.constant dense<0.000000e+00> : vector<4x128xf32>
      %237 = tpu.matmul %234, %236, %cst_156 {dimension_numbers = #tpu.dot_dimension_numbers<[1], [0], [0], [1], [0, 0, 1, 1], [], []>} : vector<4x128xbf16>, vector<128x128xbf16>, vector<4x128xf32> -> vector<4x128xf32>
      %238 = arith.addf %232, %237 : vector<4x128xf32>
      %cst_157 = arith.constant dense<0.000000e+00> : vector<4x128xf32>
      %239 = tpu.matmul %111, %226, %cst_157 {dimension_numbers = #tpu.dot_dimension_numbers<[1], [0], [0], [1], [0, 0, 1, 1], [], []>} : vector<4x12xbf16>, vector<12x128xbf16>, vector<4x128xf32> -> vector<4x128xf32>
      %240 = arith.truncf %239 : vector<4x128xf32> to vector<4x128xbf16>
      %c2_158 = arith.constant 2 : index
      %c2_159 = arith.constant 2 : index
      %c0_160 = arith.constant 0 : index
      %c0_161 = arith.constant 0 : index
      %241 = vector.load %arg6[%c2_158, %c2_159, %c0_160, %c0_161] : memref<3x3x128x128xbf16, #tpu.memory_space<vmem>>, vector<1x1x128x128xbf16>
      %242 = vector.shape_cast %241 : vector<1x1x128x128xbf16> to vector<128x128xbf16>
      %cst_162 = arith.constant dense<0.000000e+00> : vector<4x128xf32>
      %243 = tpu.matmul %240, %242, %cst_162 {dimension_numbers = #tpu.dot_dimension_numbers<[1], [0], [0], [1], [0, 0, 1, 1], [], []>} : vector<4x128xbf16>, vector<128x128xbf16>, vector<4x128xf32> -> vector<4x128xf32>
      %244 = arith.addf %238, %243 : vector<4x128xf32>
      %245 = vector.broadcast %112 : vector<1x128xf32> to vector<4x128xf32>
      %246 = arith.addf %244, %245 : vector<4x128xf32>
      %cst_163 = arith.constant 0.000000e+00 : f32
      %247 = vector.broadcast %cst_163 : f32 to vector<4x128xf32>
      %248 = arith.cmpf ogt, %246, %247 : vector<4x128xf32>
      %cst_164 = arith.constant 2.000000e-01 : f32
      %249 = vector.broadcast %cst_164 : f32 to vector<4x128xf32>
      %250 = arith.mulf %249, %246 : vector<4x128xf32>
      %251 = arith.select %248, %246, %250 : vector<4x128xi1>, vector<4x128xf32>
      %c1_i32_165 = arith.constant 1 : i32
      %252 = arith.addi %c1_i32_165, %arg16 : i32
      %253 = arith.index_cast %252 : i32 to index
      %c1_166 = arith.constant 1 : index
      %c0_167 = arith.constant 0 : index
      %254 = vector.load %arg14[%253, %c1_166, %c0_167] : memref<6x6x128xf32, #tpu.memory_space<vmem>>, vector<1x4x128xf32>
      %255 = vector.shape_cast %254 : vector<1x4x128xf32> to vector<4x128xf32>
      %256 = vector.shape_cast %251 : vector<4x128xf32> to vector<1x4x128xf32>
      tpu.vector_store %arg14[%253, %c1_166, %c0_167], %256 {strides = array<i32>} : memref<6x6x128xf32, #tpu.memory_space<vmem>>, vector<1x4x128xf32>,
    }
    %c4_i32_69 = arith.constant 4 : i32
    %114 = tpu.iota {dimensions = array<i32: 0>} : vector<2x6xi32>
    %115 = tpu.iota {dimensions = array<i32: 1>} : vector<2x6xi32>
    %c3_i32_70 = arith.constant 3 : i32
    %116 = vector.broadcast %c3_i32_70 : i32 to vector<2x6xi32>
    %117 = arith.muli %114, %116 : vector<2x6xi32>
    %c0_i32_71 = arith.constant 0 : i32
    %118 = vector.broadcast %c0_i32_71 : i32 to vector<2x6xi32>
    %119 = arith.addi %117, %118 : vector<2x6xi32>
    %120 = arith.cmpi eq, %115, %119 : vector<2x6xi32>
    %cst_72 = arith.constant 1.000000e+00 : f32
    %cst_73 = arith.constant 0.000000e+00 : f32
    %121 = vector.broadcast %cst_72 : f32 to vector<2x6xf32>
    %122 = vector.broadcast %cst_73 : f32 to vector<2x6xf32>
    %123 = arith.select %120, %121, %122 : vector<2x6xi1>, vector<2x6xf32>
    %124 = arith.truncf %123 : vector<2x6xf32> to vector<2x6xbf16>
    %c3_i32_74 = arith.constant 3 : i32
    %125 = vector.broadcast %c3_i32_74 : i32 to vector<2x6xi32>
    %126 = arith.muli %114, %125 : vector<2x6xi32>
    %c1_i32_75 = arith.constant 1 : i32
    %127 = vector.broadcast %c1_i32_75 : i32 to vector<2x6xi32>
    %128 = arith.addi %126, %127 : vector<2x6xi32>
    %129 = arith.cmpi eq, %115, %128 : vector<2x6xi32>
    %cst_76 = arith.constant 1.000000e+00 : f32
    %cst_77 = arith.constant 0.000000e+00 : f32
    %130 = vector.broadcast %cst_76 : f32 to vector<2x6xf32>
    %131 = vector.broadcast %cst_77 : f32 to vector<2x6xf32>
    %132 = arith.select %129, %130, %131 : vector<2x6xi1>, vector<2x6xf32>
    %133 = arith.truncf %132 : vector<2x6xf32> to vector<2x6xbf16>
    %c3_i32_78 = arith.constant 3 : i32
    %134 = vector.broadcast %c3_i32_78 : i32 to vector<2x6xi32>
    %135 = arith.muli %114, %134 : vector<2x6xi32>
    %c2_i32_79 = arith.constant 2 : i32
    %136 = vector.broadcast %c2_i32_79 : i32 to vector<2x6xi32>
    %137 = arith.addi %135, %136 : vector<2x6xi32>
    %138 = arith.cmpi eq, %115, %137 : vector<2x6xi32>
    %cst_80 = arith.constant 1.000000e+00 : f32
    %cst_81 = arith.constant 0.000000e+00 : f32
    %139 = vector.broadcast %cst_80 : f32 to vector<2x6xf32>
    %140 = vector.broadcast %cst_81 : f32 to vector<2x6xf32>
    %141 = arith.select %138, %139, %140 : vector<2x6xi1>, vector<2x6xf32>
    %142 = arith.truncf %141 : vector<2x6xf32> to vector<2x6xbf16>
    %c0_82 = arith.constant 0 : index
    %c0_83 = arith.constant 0 : index
    %143 = vector.load %arg9[%c0_82, %c0_83] : memref<1x256xf32, #tpu.memory_space<vmem>>, vector<1x256xf32>
    %c0_i32_84 = arith.constant 0 : i32
    %c2_i32_85 = arith.constant 2 : i32
    %144 = arith.addi %c0_i32_84, %c2_i32_85 : i32
    %c1_i32_86 = arith.constant 1 : i32
    scf.for %arg16 = %c0_i32_84 to %144 step %c1_i32_86  : i32 {
      %cst_98 = arith.constant 0.000000e+00 : f32
      %172 = vector.broadcast %cst_98 : f32 to vector<2x256xf32>
      %c3_i32_99 = arith.constant 3 : i32
      %173 = arith.muli %arg16, %c3_i32_99 : i32
      %c0_i32_100 = arith.constant 0 : i32
      %174 = arith.addi %173, %c0_i32_100 : i32
      %175 = arith.index_cast %174 : i32 to index
      %c0_101 = arith.constant 0 : index
      %c0_102 = arith.constant 0 : index
      %176 = vector.load %arg14[%175, %c0_101, %c0_102] : memref<6x6x128xf32, #tpu.memory_space<vmem>>, vector<1x6x128xf32>
      %177 = vector.shape_cast %176 : vector<1x6x128xf32> to vector<6x128xf32>
      %178 = arith.truncf %177 : vector<6x128xf32> to vector<6x128xbf16>
      %cst_103 = arith.constant dense<0.000000e+00> : vector<2x128xf32>
      %179 = tpu.matmul %124, %178, %cst_103 {dimension_numbers = #tpu.dot_dimension_numbers<[1], [0], [0], [1], [0, 0, 1, 1], [], []>} : vector<2x6xbf16>, vector<6x128xbf16>, vector<2x128xf32> -> vector<2x128xf32>
      %180 = arith.truncf %179 : vector<2x128xf32> to vector<2x128xbf16>
      %c0_104 = arith.constant 0 : index
      %c0_105 = arith.constant 0 : index
      %c0_106 = arith.constant 0 : index
      %c0_107 = arith.constant 0 : index
      %181 = vector.load %arg8[%c0_104, %c0_105, %c0_106, %c0_107] : memref<3x3x128x256xbf16, #tpu.memory_space<vmem>>, vector<1x1x128x256xbf16>
      %182 = vector.shape_cast %181 : vector<1x1x128x256xbf16> to vector<128x256xbf16>
      %cst_108 = arith.constant dense<0.000000e+00> : vector<2x256xf32>
      %183 = tpu.matmul %180, %182, %cst_108 {dimension_numbers = #tpu.dot_dimension_numbers<[1], [0], [0], [1], [0, 0, 1, 1], [], []>} : vector<2x128xbf16>, vector<128x256xbf16>, vector<2x256xf32> -> vector<2x256xf32>
      %184 = arith.addf %172, %183 : vector<2x256xf32>
      %cst_109 = arith.constant dense<0.000000e+00> : vector<2x128xf32>
      %185 = tpu.matmul %133, %178, %cst_109 {dimension_numbers = #tpu.dot_dimension_numbers<[1], [0], [0], [1], [0, 0, 1, 1], [], []>} : vector<2x6xbf16>, vector<6x128xbf16>, vector<2x128xf32> -> vector<2x128xf32>
      %186 = arith.truncf %185 : vector<2x128xf32> to vector<2x128xbf16>
      %c0_110 = arith.constant 0 : index
      %c1 = arith.constant 1 : index
      %c0_111 = arith.constant 0 : index
      %c0_112 = arith.constant 0 : index
      %187 = vector.load %arg8[%c0_110, %c1, %c0_111, %c0_112] : memref<3x3x128x256xbf16, #tpu.memory_space<vmem>>, vector<1x1x128x256xbf16>
      %188 = vector.shape_cast %187 : vector<1x1x128x256xbf16> to vector<128x256xbf16>
      %cst_113 = arith.constant dense<0.000000e+00> : vector<2x256xf32>
      %189 = tpu.matmul %186, %188, %cst_113 {dimension_numbers = #tpu.dot_dimension_numbers<[1], [0], [0], [1], [0, 0, 1, 1], [], []>} : vector<2x128xbf16>, vector<128x256xbf16>, vector<2x256xf32> -> vector<2x256xf32>
      %190 = arith.addf %184, %189 : vector<2x256xf32>
      %cst_114 = arith.constant dense<0.000000e+00> : vector<2x128xf32>
      %191 = tpu.matmul %142, %178, %cst_114 {dimension_numbers = #tpu.dot_dimension_numbers<[1], [0], [0], [1], [0, 0, 1, 1], [], []>} : vector<2x6xbf16>, vector<6x128xbf16>, vector<2x128xf32> -> vector<2x128xf32>
      %192 = arith.truncf %191 : vector<2x128xf32> to vector<2x128xbf16>
      %c0_115 = arith.constant 0 : index
      %c2 = arith.constant 2 : index
      %c0_116 = arith.constant 0 : index
      %c0_117 = arith.constant 0 : index
      %193 = vector.load %arg8[%c0_115, %c2, %c0_116, %c0_117] : memref<3x3x128x256xbf16, #tpu.memory_space<vmem>>, vector<1x1x128x256xbf16>
      %194 = vector.shape_cast %193 : vector<1x1x128x256xbf16> to vector<128x256xbf16>
      %cst_118 = arith.constant dense<0.000000e+00> : vector<2x256xf32>
      %195 = tpu.matmul %192, %194, %cst_118 {dimension_numbers = #tpu.dot_dimension_numbers<[1], [0], [0], [1], [0, 0, 1, 1], [], []>} : vector<2x128xbf16>, vector<128x256xbf16>, vector<2x256xf32> -> vector<2x256xf32>
      %196 = arith.addf %190, %195 : vector<2x256xf32>
      %c3_i32_119 = arith.constant 3 : i32
      %197 = arith.muli %arg16, %c3_i32_119 : i32
      %c1_i32_120 = arith.constant 1 : i32
      %198 = arith.addi %197, %c1_i32_120 : i32
      %199 = arith.index_cast %198 : i32 to index
      %c0_121 = arith.constant 0 : index
      %c0_122 = arith.constant 0 : index
      %200 = vector.load %arg14[%199, %c0_121, %c0_122] : memref<6x6x128xf32, #tpu.memory_space<vmem>>, vector<1x6x128xf32>
      %201 = vector.shape_cast %200 : vector<1x6x128xf32> to vector<6x128xf32>
      %202 = arith.truncf %201 : vector<6x128xf32> to vector<6x128xbf16>
      %cst_123 = arith.constant dense<0.000000e+00> : vector<2x128xf32>
      %203 = tpu.matmul %124, %202, %cst_123 {dimension_numbers = #tpu.dot_dimension_numbers<[1], [0], [0], [1], [0, 0, 1, 1], [], []>} : vector<2x6xbf16>, vector<6x128xbf16>, vector<2x128xf32> -> vector<2x128xf32>
      %204 = arith.truncf %203 : vector<2x128xf32> to vector<2x128xbf16>
      %c1_124 = arith.constant 1 : index
      %c0_125 = arith.constant 0 : index
      %c0_126 = arith.constant 0 : index
      %c0_127 = arith.constant 0 : index
      %205 = vector.load %arg8[%c1_124, %c0_125, %c0_126, %c0_127] : memref<3x3x128x256xbf16, #tpu.memory_space<vmem>>, vector<1x1x128x256xbf16>
      %206 = vector.shape_cast %205 : vector<1x1x128x256xbf16> to vector<128x256xbf16>
      %cst_128 = arith.constant dense<0.000000e+00> : vector<2x256xf32>
      %207 = tpu.matmul %204, %206, %cst_128 {dimension_numbers = #tpu.dot_dimension_numbers<[1], [0], [0], [1], [0, 0, 1, 1], [], []>} : vector<2x128xbf16>, vector<128x256xbf16>, vector<2x256xf32> -> vector<2x256xf32>
      %208 = arith.addf %196, %207 : vector<2x256xf32>
      %cst_129 = arith.constant dense<0.000000e+00> : vector<2x128xf32>
      %209 = tpu.matmul %133, %202, %cst_129 {dimension_numbers = #tpu.dot_dimension_numbers<[1], [0], [0], [1], [0, 0, 1, 1], [], []>} : vector<2x6xbf16>, vector<6x128xbf16>, vector<2x128xf32> -> vector<2x128xf32>
      %210 = arith.truncf %209 : vector<2x128xf32> to vector<2x128xbf16>
      %c1_130 = arith.constant 1 : index
      %c1_131 = arith.constant 1 : index
      %c0_132 = arith.constant 0 : index
      %c0_133 = arith.constant 0 : index
      %211 = vector.load %arg8[%c1_130, %c1_131, %c0_132, %c0_133] : memref<3x3x128x256xbf16, #tpu.memory_space<vmem>>, vector<1x1x128x256xbf16>
      %212 = vector.shape_cast %211 : vector<1x1x128x256xbf16> to vector<128x256xbf16>
      %cst_134 = arith.constant dense<0.000000e+00> : vector<2x256xf32>
      %213 = tpu.matmul %210, %212, %cst_134 {dimension_numbers = #tpu.dot_dimension_numbers<[1], [0], [0], [1], [0, 0, 1, 1], [], []>} : vector<2x128xbf16>, vector<128x256xbf16>, vector<2x256xf32> -> vector<2x256xf32>
      %214 = arith.addf %208, %213 : vector<2x256xf32>
      %cst_135 = arith.constant dense<0.000000e+00> : vector<2x128xf32>
      %215 = tpu.matmul %142, %202, %cst_135 {dimension_numbers = #tpu.dot_dimension_numbers<[1], [0], [0], [1], [0, 0, 1, 1], [], []>} : vector<2x6xbf16>, vector<6x128xbf16>, vector<2x128xf32> -> vector<2x128xf32>
      %216 = arith.truncf %215 : vector<2x128xf32> to vector<2x128xbf16>
      %c1_136 = arith.constant 1 : index
      %c2_137 = arith.constant 2 : index
      %c0_138 = arith.constant 0 : index
      %c0_139 = arith.constant 0 : index
      %217 = vector.load %arg8[%c1_136, %c2_137, %c0_138, %c0_139] : memref<3x3x128x256xbf16, #tpu.memory_space<vmem>>, vector<1x1x128x256xbf16>
      %218 = vector.shape_cast %217 : vector<1x1x128x256xbf16> to vector<128x256xbf16>
      %cst_140 = arith.constant dense<0.000000e+00> : vector<2x256xf32>
      %219 = tpu.matmul %216, %218, %cst_140 {dimension_numbers = #tpu.dot_dimension_numbers<[1], [0], [0], [1], [0, 0, 1, 1], [], []>} : vector<2x128xbf16>, vector<128x256xbf16>, vector<2x256xf32> -> vector<2x256xf32>
      %220 = arith.addf %214, %219 : vector<2x256xf32>
      %c3_i32_141 = arith.constant 3 : i32
      %221 = arith.muli %arg16, %c3_i32_141 : i32
      %c2_i32_142 = arith.constant 2 : i32
      %222 = arith.addi %221, %c2_i32_142 : i32
      %223 = arith.index_cast %222 : i32 to index
      %c0_143 = arith.constant 0 : index
      %c0_144 = arith.constant 0 : index
      %224 = vector.load %arg14[%223, %c0_143, %c0_144] : memref<6x6x128xf32, #tpu.memory_space<vmem>>, vector<1x6x128xf32>
      %225 = vector.shape_cast %224 : vector<1x6x128xf32> to vector<6x128xf32>
      %226 = arith.truncf %225 : vector<6x128xf32> to vector<6x128xbf16>
      %cst_145 = arith.constant dense<0.000000e+00> : vector<2x128xf32>
      %227 = tpu.matmul %124, %226, %cst_145 {dimension_numbers = #tpu.dot_dimension_numbers<[1], [0], [0], [1], [0, 0, 1, 1], [], []>} : vector<2x6xbf16>, vector<6x128xbf16>, vector<2x128xf32> -> vector<2x128xf32>
      %228 = arith.truncf %227 : vector<2x128xf32> to vector<2x128xbf16>
      %c2_146 = arith.constant 2 : index
      %c0_147 = arith.constant 0 : index
      %c0_148 = arith.constant 0 : index
      %c0_149 = arith.constant 0 : index
      %229 = vector.load %arg8[%c2_146, %c0_147, %c0_148, %c0_149] : memref<3x3x128x256xbf16, #tpu.memory_space<vmem>>, vector<1x1x128x256xbf16>
      %230 = vector.shape_cast %229 : vector<1x1x128x256xbf16> to vector<128x256xbf16>
      %cst_150 = arith.constant dense<0.000000e+00> : vector<2x256xf32>
      %231 = tpu.matmul %228, %230, %cst_150 {dimension_numbers = #tpu.dot_dimension_numbers<[1], [0], [0], [1], [0, 0, 1, 1], [], []>} : vector<2x128xbf16>, vector<128x256xbf16>, vector<2x256xf32> -> vector<2x256xf32>
      %232 = arith.addf %220, %231 : vector<2x256xf32>
      %cst_151 = arith.constant dense<0.000000e+00> : vector<2x128xf32>
      %233 = tpu.matmul %133, %226, %cst_151 {dimension_numbers = #tpu.dot_dimension_numbers<[1], [0], [0], [1], [0, 0, 1, 1], [], []>} : vector<2x6xbf16>, vector<6x128xbf16>, vector<2x128xf32> -> vector<2x128xf32>
      %234 = arith.truncf %233 : vector<2x128xf32> to vector<2x128xbf16>
      %c2_152 = arith.constant 2 : index
      %c1_153 = arith.constant 1 : index
      %c0_154 = arith.constant 0 : index
      %c0_155 = arith.constant 0 : index
      %235 = vector.load %arg8[%c2_152, %c1_153, %c0_154, %c0_155] : memref<3x3x128x256xbf16, #tpu.memory_space<vmem>>, vector<1x1x128x256xbf16>
      %236 = vector.shape_cast %235 : vector<1x1x128x256xbf16> to vector<128x256xbf16>
      %cst_156 = arith.constant dense<0.000000e+00> : vector<2x256xf32>
      %237 = tpu.matmul %234, %236, %cst_156 {dimension_numbers = #tpu.dot_dimension_numbers<[1], [0], [0], [1], [0, 0, 1, 1], [], []>} : vector<2x128xbf16>, vector<128x256xbf16>, vector<2x256xf32> -> vector<2x256xf32>
      %238 = arith.addf %232, %237 : vector<2x256xf32>
      %cst_157 = arith.constant dense<0.000000e+00> : vector<2x128xf32>
      %239 = tpu.matmul %142, %226, %cst_157 {dimension_numbers = #tpu.dot_dimension_numbers<[1], [0], [0], [1], [0, 0, 1, 1], [], []>} : vector<2x6xbf16>, vector<6x128xbf16>, vector<2x128xf32> -> vector<2x128xf32>
      %240 = arith.truncf %239 : vector<2x128xf32> to vector<2x128xbf16>
      %c2_158 = arith.constant 2 : index
      %c2_159 = arith.constant 2 : index
      %c0_160 = arith.constant 0 : index
      %c0_161 = arith.constant 0 : index
      %241 = vector.load %arg8[%c2_158, %c2_159, %c0_160, %c0_161] : memref<3x3x128x256xbf16, #tpu.memory_space<vmem>>, vector<1x1x128x256xbf16>
      %242 = vector.shape_cast %241 : vector<1x1x128x256xbf16> to vector<128x256xbf16>
      %cst_162 = arith.constant dense<0.000000e+00> : vector<2x256xf32>
      %243 = tpu.matmul %240, %242, %cst_162 {dimension_numbers = #tpu.dot_dimension_numbers<[1], [0], [0], [1], [0, 0, 1, 1], [], []>} : vector<2x128xbf16>, vector<128x256xbf16>, vector<2x256xf32> -> vector<2x256xf32>
      %244 = arith.addf %238, %243 : vector<2x256xf32>
      %245 = vector.broadcast %143 : vector<1x256xf32> to vector<2x256xf32>
      %246 = arith.addf %244, %245 : vector<2x256xf32>
      %cst_163 = arith.constant 0.000000e+00 : f32
      %247 = vector.broadcast %cst_163 : f32 to vector<2x256xf32>
      %248 = arith.cmpf ogt, %246, %247 : vector<2x256xf32>
      %cst_164 = arith.constant 2.000000e-01 : f32
      %249 = vector.broadcast %cst_164 : f32 to vector<2x256xf32>
      %250 = arith.mulf %249, %246 : vector<2x256xf32>
      %251 = arith.select %248, %246, %250 : vector<2x256xi1>, vector<2x256xf32>
      %252 = arith.index_cast %arg16 : i32 to index
      %c0_165 = arith.constant 0 : index
      %c0_166 = arith.constant 0 : index
      %253 = vector.load %arg15[%252, %c0_165, %c0_166] : memref<2x2x256xf32, #tpu.memory_space<vmem>>, vector<1x2x256xf32>
      %254 = vector.shape_cast %253 : vector<1x2x256xf32> to vector<2x256xf32>
      %255 = vector.shape_cast %251 : vector<2x256xf32> to vector<1x2x256xf32>
      tpu.vector_store %arg15[%252, %c0_165, %c0_166], %255 {strides = array<i32>} : memref<2x2x256xf32, #tpu.memory_space<vmem>>, vector<1x2x256xf32>,
    }
    %c2_i32_87 = arith.constant 2 : i32
    %c0_88 = arith.constant 0 : index
    %c0_89 = arith.constant 0 : index
    %c0_90 = arith.constant 0 : index
    %145 = vector.load %arg15[%c0_88, %c0_89, %c0_90] : memref<2x2x256xf32, #tpu.memory_space<vmem>>, vector<2x2x256xf32>
    %146 = vector.extract_strided_slice %145 {offsets = [0, 0, 0], sizes = [1, 1, 256], strides = [1, 1, 1]} : vector<2x2x256xf32> to vector<1x1x256xf32>
    %147 = vector.shape_cast %146 : vector<1x1x256xf32> to vector<1x256xf32>
    %148 = vector.extract_strided_slice %145 {offsets = [0, 1, 0], sizes = [1, 1, 256], strides = [1, 1, 1]} : vector<2x2x256xf32> to vector<1x1x256xf32>
    %149 = vector.shape_cast %148 : vector<1x1x256xf32> to vector<1x256xf32>
    %150 = arith.addf %147, %149 : vector<1x256xf32>
    %151 = vector.extract_strided_slice %145 {offsets = [1, 0, 0], sizes = [1, 1, 256], strides = [1, 1, 1]} : vector<2x2x256xf32> to vector<1x1x256xf32>
    %152 = vector.shape_cast %151 : vector<1x1x256xf32> to vector<1x256xf32>
    %153 = arith.addf %150, %152 : vector<1x256xf32>
    %154 = vector.extract_strided_slice %145 {offsets = [1, 1, 0], sizes = [1, 1, 256], strides = [1, 1, 1]} : vector<2x2x256xf32> to vector<1x1x256xf32>
    %155 = vector.shape_cast %154 : vector<1x1x256xf32> to vector<1x256xf32>
    %156 = arith.addf %153, %155 : vector<1x256xf32>
    %cst_91 = arith.constant 2.500000e-01 : f32
    %157 = vector.broadcast %cst_91 : f32 to vector<1x256xf32>
    %158 = arith.mulf %156, %157 : vector<1x256xf32>
    %159 = arith.mulf %158, %158 : vector<1x256xf32>
    %cst_92 = arith.constant dense<0.000000e+00> : vector<1xf32>
    %160 = vector.multi_reduction <add>, %159, %cst_92 [1] : vector<1x256xf32> to vector<1xf32>
    %161 = vector.shape_cast %160 : vector<1xf32> to vector<1x1xf32>
    %cst_93 = arith.constant 2.560000e+02 : f32
    %162 = vector.broadcast %cst_93 : f32 to vector<1x1xf32>
    %163 = arith.divf %161, %162 : vector<1x1xf32>
    %cst_94 = arith.constant 9.99999993E-9 : f32
    %164 = vector.broadcast %cst_94 : f32 to vector<1x1xf32>
    %165 = arith.addf %163, %164 : vector<1x1xf32>
    %166 = math.rsqrt %165 : vector<1x1xf32>
    %167 = vector.broadcast %166 : vector<1x1xf32> to vector<1x256xf32>
    %168 = arith.mulf %158, %167 : vector<1x256xf32>
    %c0_95 = arith.constant 0 : index
    %c0_96 = arith.constant 0 : index
    %c0_97 = arith.constant 0 : index
    %169 = vector.load %arg10[%c0_95, %c0_96, %c0_97] : memref<1x1x256xf32, #tpu.memory_space<vmem>>, vector<1x1x256xf32>
    %170 = vector.shape_cast %169 : vector<1x1x256xf32> to vector<1x256xf32>
    %171 = vector.shape_cast %168 : vector<1x256xf32> to vector<1x1x256xf32>
    tpu.vector_store %arg10[%c0_95, %c0_96, %c0_97], %171 {strides = array<i32>} : memref<1x1x256xf32, #tpu.memory_space<vmem>>, vector<1x1x256xf32>,
    return
  }
  func.func @transform_0(%arg0: i32) -> (i32, i32, i32, i32) {
    %c0_i32 = arith.constant 0 : i32
    %c0_i32_0 = arith.constant 0 : i32
    %c0_i32_1 = arith.constant 0 : i32
    %c0_i32_2 = arith.constant 0 : i32
    return %arg0, %c0_i32, %c0_i32_0, %c0_i32_1 : i32, i32, i32, i32
  }
  func.func @transform_1(%arg0: i32) -> (i32, i32, i32, i32) {
    %c0_i32 = arith.constant 0 : i32
    %c0_i32_0 = arith.constant 0 : i32
    %c0_i32_1 = arith.constant 0 : i32
    %c0_i32_2 = arith.constant 0 : i32
    %c0_i32_3 = arith.constant 0 : i32
    return %c0_i32, %c0_i32_0, %c0_i32_1, %c0_i32_2 : i32, i32, i32, i32
  }
  func.func @transform_2(%arg0: i32) -> (i32, i32) {
    %c0_i32 = arith.constant 0 : i32
    %c0_i32_0 = arith.constant 0 : i32
    %c0_i32_1 = arith.constant 0 : i32
    return %c0_i32, %c0_i32_0 : i32, i32
  }
  func.func @transform_3(%arg0: i32) -> (i32, i32, i32, i32) {
    %c0_i32 = arith.constant 0 : i32
    %c0_i32_0 = arith.constant 0 : i32
    %c0_i32_1 = arith.constant 0 : i32
    %c0_i32_2 = arith.constant 0 : i32
    %c0_i32_3 = arith.constant 0 : i32
    return %c0_i32, %c0_i32_0, %c0_i32_1, %c0_i32_2 : i32, i32, i32, i32
  }
  func.func @transform_4(%arg0: i32) -> (i32, i32) {
    %c0_i32 = arith.constant 0 : i32
    %c0_i32_0 = arith.constant 0 : i32
    %c0_i32_1 = arith.constant 0 : i32
    return %c0_i32, %c0_i32_0 : i32, i32
  }
  func.func @transform_5(%arg0: i32) -> (i32, i32, i32, i32) {
    %c0_i32 = arith.constant 0 : i32
    %c0_i32_0 = arith.constant 0 : i32
    %c0_i32_1 = arith.constant 0 : i32
    %c0_i32_2 = arith.constant 0 : i32
    %c0_i32_3 = arith.constant 0 : i32
    return %c0_i32, %c0_i32_0, %c0_i32_1, %c0_i32_2 : i32, i32, i32, i32
  }
  func.func @transform_6(%arg0: i32) -> (i32, i32) {
    %c0_i32 = arith.constant 0 : i32
    %c0_i32_0 = arith.constant 0 : i32
    %c0_i32_1 = arith.constant 0 : i32
    return %c0_i32, %c0_i32_0 : i32, i32
  }
  func.func @transform_7(%arg0: i32) -> (i32, i32, i32, i32) {
    %c0_i32 = arith.constant 0 : i32
    %c0_i32_0 = arith.constant 0 : i32
    %c0_i32_1 = arith.constant 0 : i32
    %c0_i32_2 = arith.constant 0 : i32
    %c0_i32_3 = arith.constant 0 : i32
    return %c0_i32, %c0_i32_0, %c0_i32_1, %c0_i32_2 : i32, i32, i32, i32
  }
  func.func @transform_8(%arg0: i32) -> (i32, i32) {
    %c0_i32 = arith.constant 0 : i32
    %c0_i32_0 = arith.constant 0 : i32
    %c0_i32_1 = arith.constant 0 : i32
    return %c0_i32, %c0_i32_0 : i32, i32
  }
  func.func @transform_9(%arg0: i32) -> (i32, i32, i32) {
    %c0_i32 = arith.constant 0 : i32
    %c0_i32_0 = arith.constant 0 : i32
    %c0_i32_1 = arith.constant 0 : i32
    return %arg0, %c0_i32, %c0_i32_0 : i32, i32, i32
  }
}

</mosaic_0001>

<bundles_post_ra>
// kernel: gen_initial_block.1
= control target key start
LH: loop header
LB: loop body
LE: loop exit
PB: predicated region body
PF: predicated region fallthrough
CT: control target
= control target key end

     0   :  { %s15199_s0 = inlined_call_operand.vmem [shape: f32[2,32,32,4], index: 0, kind: input, shape index: {}]   ;;  %s15200_s1 = inlined_call_operand.hbm [shape: bf16[3,3,4,128], index: 1, kind: input, shape index: {}]   ;;  %s15201_s2 = inlined_call_operand.hbm [shape: f32[1,128], index: 2, kind: input, shape index: {}]   ;;  %s15202_s3 = inlined_call_operand.vmem [shape: bf16[3,3,128,128], index: 3, kind: input, shape index: {}]   ;;  %s15203_s4 = inlined_call_operand.hbm [shape: f32[1,128], index: 4, kind: input, shape index: {}]   ;;  %s15204_s5 = inlined_call_operand.vmem [shape: bf16[3,3,128,128], index: 5, kind: input, shape index: {}]   ;;  %s15205_s6 = inlined_call_operand.hbm [shape: f32[1,128], index: 6, kind: input, shape index: {}]   ;;  %s15206_s7 = inlined_call_operand.vmem [shape: bf16[3,3,128,256], index: 7, kind: input, shape index: {}]   ;;  %s15207_s8 = inlined_call_operand.hbm [shape: f32[1,256], index: 8, kind: input, shape index: {}]   ;;  %s15208_s9 = inlined_call_operand.hbm [shape: f32[2,1,256], index: 9, kind: output, shape index: {}]  }
   0x1   :  { %15210 = sst [smem:[#allocation23_spill]] %s15200_s1 }
   0x2   :  { %15211 = sst [smem:[#allocation24_spill]] %s15201_s2 }
   0x3   :  { %15212 = sst [smem:[#allocation25_spill]] %s15205_s6 }
   0x4   :  { %14 = vsyncpa [#allocation8], 0 }
   0x5   :  { %15 = vsyncpa [#allocation11], 0 }
   0x6   :  { %16 = vsyncpa [#allocation14], 0 }
   0x7   :  { %17 = vsyncpa [#allocation9], 0 }
   0x8   :  { %19 = vsyncpa [#allocation9 + $0x1], 0  ;;  %s9931_s30 = smov 0   ;;  %s9933_s10 = smov 0  }
   0x9   :  { %s9935_s11 = smov 0   ;;  %s9937_s12 = smov 0  }
   0xa LB: > { %15213 = sst [smem:[#allocation21_spill]] %s9848_s11  ;;  %s9952_s13 = sadd.s32 4294967295, %s9852_s12   ;;  %s9852_s12 = sphi %s9937_s12, %s15258_s12   ;;  %s9848_s11 = sphi %s9935_s11, %s15255_s11   ;;  %s9844_s10 = sphi %s9933_s10, %s15257_s10   ;;  %s9840_s30 = sphi %s9931_s30, %s15256_s30  }
   0xb   : > { %s7128_s14 = sadd.s32 4294967294, %s9852_s12   ;;  %s9956_s15 = sadd.s32 1, %s9852_s12  }
   0xc   : > { %s226_s16 = sadd.s32 1, %s9848_s11  ;;  %s223_s17 = ssub.s32 %s9852_s12, %s9956_s15 }
   0xd   : > { %p236_p0 = scmp.ne.s32.totalorder %s9848_s11, %s9844_s10  ;;  %p224_p1 = scmp.eq.s32.totalorder %s223_s17, 0 }
   0xe   : > { %p237_p2 = scmp.eq.s32.totalorder %s9952_s13, 1  ;;  %p242_p3 = scmp.ne.s32.totalorder %s9844_s10, %s9840_s30 }
   0xf   : > { %p243_p4 = scmp.eq.s32.totalorder %s7128_s14, 1  ;;  %p7129_p7 = scmp.ge.s32.totalorder %s9852_s12, 1 }
  0x10   : > { %s9967_s18 = scalar_select %p224_p1, %s9848_s11, %s226_s16  }
  0x11   : > { %p9969_p5 = por %p237_p2, %p236_p0  ;;  %p9973_p6 = por %p243_p4, %p242_p3 }
  0x12   : > { %15214 = sst [smem:[#allocation22_spill]] %s9967_s18  ;;  %p250_p8 = scmp.lt.s32.totalorder %s9852_s12, 3 }
  0x13   : > { %p9134_p9 = scmp.eq.s32.totalorder %s9952_s13, 0  ;;  %s15218_s2 = sld [smem:[#allocation24_spill]] }
  0x14   : > { %p9980_p10 = pnand %p7129_p7, %p250_p8  ;;  %s9870_s25 = smov [#allocation10]  }
  0x15   : > { %s278_s26 = sshll.u32 %s9870_s25, 4  ;;  %s15219_s6 = sld [smem:[#allocation25_spill]]  ;;  %s279_s26 = int_to_ptr.vmem [resolvable:$true] %s278_s26 }
  0x16   : > { %p9114_p11 = pneg %p9980_p10  ;;  %s15221_s1 = sld [smem:[#allocation23_spill]] }
  0x17   : > { %s9871_s23 = smov [#allocation13]   ;;  %s9872_s27 = smov [#allocation7]  }
  0x18   : > { %p9994_p12 = pnand %p9134_p9, %p9114_p11  ;;  %s308_s25 = sshll.u32 %s9871_s23, 4  ;;  %s309_s25 = int_to_ptr.vmem [resolvable:$true] %s308_s25 }
  0x19   : > { %s276_s24 = sshll.u32 %s15218_s2, 4  ;;  %s263_s28 = sshll.u32 %s9872_s27, 4  ;;  %s277_s24 = int_to_ptr.hbm [resolvable:$true] %s276_s24  ;;  %s264_s28 = int_to_ptr.vmem [resolvable:$true] %s263_s28 }
  0x1a   : > { %9120 = dma.hbm_to_vmem [thread:$0]  (!%p9994_p12), %s277_s24, 16, %s279_s26, [#allocation11]  }
  0x1b   : > { %s306_s29 = sshll.u32 %s15219_s6, 4  ;;  %s291_s18 = sshll.u32 %s15203_s4, 4  ;;  %s307_s29 = int_to_ptr.hbm [resolvable:$true] %s306_s29  ;;  %s292_s18 = int_to_ptr.hbm [resolvable:$true] %s291_s18 }
  0x1c   : > { %s261_s22 = sshll.u32 %s15221_s1, 4  ;;  %s9873_s11 = smov 32   ;;  %s262_s22 = int_to_ptr.hbm [resolvable:$true] %s261_s22 }
  0x1d   : > { %9126 = dma.hbm_to_vmem [thread:$0]  (!%p9994_p12), %s307_s29, 16, %s309_s25, [#allocation14]  }
  0x1e   : > { %s9874_s16 = smov 2   ;;  %s9875_s17 = smov [#allocation12]  }
  0x1f   : > { %9117 = dma.hbm_to_vmem [thread:$0]  (!%p9994_p12), %s262_s22, 288, %s264_s28, [#allocation8], %s9873_s11, %s9873_s11, %s9874_s16  }
  0x20   : > { %s293_s24 = sshll.u32 %s9875_s17, 4  ;;  %s321_s1 = sshll.u32 %s15207_s8, 4  ;;  %s294_s24 = int_to_ptr.vmem [resolvable:$true] %s293_s24  ;;  %s322_s1 = int_to_ptr.hbm [resolvable:$true] %s321_s1 }
  0x21   : > { %9123 = dma.hbm_to_vmem [thread:$0]  (!%p9994_p12), %s292_s18, 16, %s294_s24, [#allocation11]  }
  0x22   : > { %s9876_s29 = smov [#allocation15]   ;;  %344 = sbr.rel (%p9980_p10) target bundleno = 3527 (0xdc7), region = 56 }
  0x23   : > { %s323_s25 = sshll.u32 %s9876_s29, 4  ;;  %s324_s25 = int_to_ptr.vmem [resolvable:$true] %s323_s25 }
  0x24   : > { %9129 = dma.hbm_to_vmem [thread:$0]  (!%p9994_p12), %s322_s1, 32, %s324_s25, [#allocation14]  }
  0x27   : > { %9823 = dma.done.wait (%p9134_p9), [#allocation8], 288  }
  0x28   : > { %9825 = vsyncadd (%p9134_p9), [#allocation8], 4294967008 }
  0x29   : > { %9827 = dma.done.wait (%p9134_p9), [#allocation11], 32  }
  0x2a   : > { %9829 = vsyncadd (%p9134_p9), [#allocation11], 4294967264 }
  0x2b   : > { %9831 = dma.done.wait (%p9134_p9), [#allocation14], 48  }
  0x2c   : > { %9833 = vsyncadd (%p9134_p9), [#allocation14], 4294967248  ;;  %vm407_vm0 = vcmask 31744   ;;  %p401_p13 = scmp.lt.s32.totalorder %s9952_s13, 1  ;;  %v9877_v0 = vmov 0.0   ;;  %vm412_vm1 = vcmask 29696  }
  0x2d   : > { %408 = vst.msk [vmem:[#allocation2] sm:$0xff] %vm407_vm0, %v9877_v0  ;;  %s398_s21 = sand.u32 1, %s9844_s10   ;;  %s13567_s27 = smov 0  }
  0x2e   : > { %409 = vst.msk [vmem:[#allocation2 + $0x8] sm:$0xff] %vm407_vm0, %v9877_v0  ;;  %s402_s1 = scalar_select %p401_p13, %s9952_s13, 1 }
  0x2f   : > { %410 = vst.msk [vmem:[#allocation2 + $0x10] sm:$0xff] %vm407_vm0, %v9877_v0  ;;  %s12759_s14 = sshll.u32 %s398_s21, 1 }
  0x30   : > { %411 = vst.msk [vmem:[#allocation2 + $0x18] sm:$0xff] %vm407_vm0, %v9877_v0  ;;  %s8800_s2 = sshll.u32 %s402_s1, 10  ;;  %s400_s22 = scalar_lea.vmem [#allocation16], %s12759_s14 }
  0x31   : > { %413 = vst.msk [vmem:[#allocation2 + $0x20] sm:$0x3f] %vm412_vm1, %v9877_v0  ;;  %s10046_s18 = scalar_lea.vmem %s15199_s0, %s8800_s2 }
  0x32   : > { %414 = vst.msk [vmem:[#allocation2 + $0x28] sm:$0xff] %vm407_vm0, %v9877_v0  ;;  %v699_v1 = vld [vmem:[%s10046_s18 + $0x20] sm:$0xff]  ;;  %v697_v2 = vld [vmem:[%s10046_s18 + $0x10] sm:$0xff]  ;;  %v700_v7 = vld [vmem:[%s10046_s18 + $0x28] sm:$0xff] }
  0x33   : > { %415 = vst.msk [vmem:[#allocation2 + $0x30] sm:$0xff] %vm407_vm0, %v9877_v0  ;;  %v695_v3 = vld [vmem:[%s10046_s18] sm:$0xff]  ;;  %v827_v4 = vmul.f32 %v699_v1, %v699_v1  ;;  %v825_v5 = vmul.f32 %v697_v2, %v697_v2  ;;  %v698_v8 = vld [vmem:[%s10046_s18 + $0x18] sm:$0xff]  ;;  %v696_v12 = vld [vmem:[%s10046_s18 + $0x8] sm:$0xff]  ;;  %v828_v13 = vmul.f32 %v700_v7, %v700_v7 }
  0x34   : > { %416 = vst.msk [vmem:[#allocation2 + $0x38] sm:$0xff] %vm407_vm0, %v9877_v0  ;;  %v823_v6 = vmul.f32 %v695_v3, %v695_v3  ;;  %v826_v14 = vmul.f32 %v698_v8, %v698_v8  ;;  %v824_v15 = vmul.f32 %v696_v12, %v696_v12  ;;  %v703_v19 = vld [vmem:[%s10046_s18 + $0x40] sm:$0xff]  ;;  %v702_v20 = vld [vmem:[%s10046_s18 + $0x38] sm:$0xff]  ;;  %v701_v21 = vld [vmem:[%s10046_s18 + $0x30] sm:$0xff] }
  0x35   : > { %417 = vst.msk [vmem:[#allocation2 + $0x40] sm:$0xff] %vm407_vm0, %v9877_v0  ;;  %v963_v9 = vsel %vm407_vm0, %v827_v4, 0.0  ;;  %v957_v10 = vsel %vm407_vm0, %v825_v5, 0.0  ;;  %v966_v16 = vsel %vm407_vm0, %v828_v13, 0.0  ;;  %v831_v22 = vmul.f32 %v703_v19, %v703_v19  ;;  %v706_v28 = vld [vmem:[%s10046_s18 + $0x58] sm:$0xff]  ;;  %v705_v29 = vld [vmem:[%s10046_s18 + $0x50] sm:$0xff] }
  0x36   : > { %418 = vst.msk [vmem:[#allocation2 + $0x48] sm:$0x3f] %vm412_vm1, %v9877_v0  ;;  %v951_v11 = vsel %vm407_vm0, %v823_v6, 0.0  ;;  %964 = vadd.xlane.f32.xlu2 %v963_v9  ;;  %958 = vadd.xlane.f32.xlu1 %v957_v10  ;;  %v960_v17 = vsel %vm407_vm0, %v826_v14, 0.0  ;;  %v954_v18 = vsel %vm407_vm0, %v824_v15, 0.0  ;;  %v830_v23 = vmul.f32 %v702_v20, %v702_v20  ;;  %v704_v30 = vld [vmem:[%s10046_s18 + $0x48] sm:$0xff] }
  0x37   : > { %419 = vst.msk [vmem:[#allocation2 + $0x50] sm:$0xff] %vm407_vm0, %v9877_v0  ;;  %952 = vadd.xlane.f32.xlu0 %v951_v11  ;;  %v829_v24 = vmul.f32 %v701_v21, %v701_v21  ;;  %v975_v25 = vsel %vm407_vm0, %v831_v22, 0.0  ;;  %v834_v31 = vmul.f32 %v706_v28, %v706_v28  ;;  %v833_v32 = vmul.f32 %v705_v29, %v705_v29  ;;  %v709_v37 = vld [vmem:[%s10046_s18 + $0x70] sm:$0xff]  ;;  %v708_v38 = vld [vmem:[%s10046_s18 + $0x68] sm:$0xff]  ;;  %v707_v39 = vld [vmem:[%s10046_s18 + $0x60] sm:$0xff] }
  0x38   : > { %420 = vst.msk [vmem:[#allocation2 + $0x58] sm:$0xff] %vm407_vm0, %v9877_v0  ;;  %v972_v26 = vsel %vm407_vm0, %v830_v23, 0.0  ;;  %v832_v33 = vmul.f32 %v704_v30, %v704_v30  ;;  %v837_v40 = vmul.f32 %v709_v37, %v709_v37  ;;  %v836_v41 = vmul.f32 %v708_v38, %v708_v38  ;;  %v712_v46 = vld [vmem:[%s10046_s18 + $0x88] sm:$0xff]  ;;  %v711_v47 = vld [vmem:[%s10046_s18 + $0x80] sm:$0xff]  ;;  %v710_v48 = vld [vmem:[%s10046_s18 + $0x78] sm:$0xff] }
  0x39   : > { %421 = vst.msk [vmem:[#allocation2 + $0x60] sm:$0xff] %vm407_vm0, %v9877_v0  ;;  %v969_v27 = vsel %vm407_vm0, %v829_v24, 0.0  ;;  %v984_v34 = vsel %vm407_vm0, %v834_v31, 0.0  ;;  %v981_v35 = vsel %vm407_vm0, %v833_v32, 0.0  ;;  %v835_v42 = vmul.f32 %v707_v39, %v707_v39  ;;  %v715_v55 = vld [vmem:[%s10046_s18 + $0xa0] sm:$0xff]  ;;  %v714_v56 = vld [vmem:[%s10046_s18 + $0x98] sm:$0xff] }
  0x3a   : > { %422 = vst.msk [vmem:[#allocation2 + $0x68] sm:$0xff] %vm407_vm0, %v9877_v0  ;;  %v978_v36 = vsel %vm407_vm0, %v832_v33, 0.0  ;;  %v993_v43 = vsel %vm407_vm0, %v837_v40, 0.0  ;;  %v990_v44 = vsel %vm407_vm0, %v836_v41, 0.0  ;;  %v840_v49 = vmul.f32 %v712_v46, %v712_v46  ;;  %v713_v57 = vld [vmem:[%s10046_s18 + $0x90] sm:$0xff]  ;;  %v718_v1 = vld [vmem:[%s10046_s18 + $0xb8] sm:$0xff] }
  0x3b   : > { %423 = vst.msk [vmem:[#allocation2 + $0x70] sm:$0x3f] %vm412_vm1, %v9877_v0  ;;  %v987_v45 = vsel %vm407_vm0, %v835_v42, 0.0  ;;  %v839_v50 = vmul.f32 %v711_v47, %v711_v47  ;;  %v838_v51 = vmul.f32 %v710_v48, %v710_v48  ;;  %v843_v58 = vmul.f32 %v715_v55, %v715_v55  ;;  %v717_v2 = vld [vmem:[%s10046_s18 + $0xb0] sm:$0xff]  ;;  %v716_v3 = vld [vmem:[%s10046_s18 + $0xa8] sm:$0xff]  ;;  %v719_v12 = vld [vmem:[%s10046_s18 + $0xc0] sm:$0xff] }
  0x3c   : > { %584 = vst.msk [vmem:[#allocation2 + $0x578] sm:$0xff] %vm407_vm0, %v9877_v0  ;;  %v1002_v52 = vsel %vm407_vm0, %v840_v49, 0.0  ;;  %v842_v59 = vmul.f32 %v714_v56, %v714_v56  ;;  %v841_v60 = vmul.f32 %v713_v57, %v713_v57  ;;  %v846_v4 = vmul.f32 %v718_v1, %v718_v1  ;;  %v721_v10 = vld [vmem:[%s10046_s18 + $0xd0] sm:$0xff]  ;;  %v720_v11 = vld [vmem:[%s10046_s18 + $0xc8] sm:$0xff]  ;;  %v723_v20 = vld [vmem:[%s10046_s18 + $0xe0] sm:$0xff] }
  0x3d   : > { %585 = vst.msk [vmem:[#allocation2 + $0x580] sm:$0xff] %vm407_vm0, %v9877_v0  ;;  %v999_v53 = vsel %vm407_vm0, %v839_v50, 0.0  ;;  %v996_v54 = vsel %vm407_vm0, %v838_v51, 0.0  ;;  %v1011_v61 = vsel %vm407_vm0, %v843_v58, 0.0  ;;  %v845_v5 = vmul.f32 %v717_v2, %v717_v2  ;;  %v724_v19 = vld [vmem:[%s10046_s18 + $0xe8] sm:$0xff]  ;;  %v722_v21 = vld [vmem:[%s10046_s18 + $0xd8] sm:$0xff] }
  0x3e   : > { %586 = vst.msk [vmem:[#allocation2 + $0x588] sm:$0xff] %vm407_vm0, %v9877_v0  ;;  %967 = vadd.xlane.f32.xlu2 %v966_v16  ;;  %961 = vadd.xlane.f32.xlu1 %v960_v17  ;;  %v1008_v62 = vsel %vm407_vm0, %v842_v59, 0.0  ;;  %v1005_v63 = vsel %vm407_vm0, %v841_v60, 0.0  ;;  %v844_v6 = vmul.f32 %v716_v3, %v716_v3  ;;  %v1020_v7 = vsel %vm407_vm0, %v846_v4, 0.0  ;;  %v727_v28 = vld [vmem:[%s10046_s18 + $0x100] sm:$0xff]  ;;  %v726_v29 = vld [vmem:[%s10046_s18 + $0xf8] sm:$0xff] }
  0x3f   : > { %587 = vst.msk [vmem:[#allocation2 + $0x590] sm:$0xff] %vm407_vm0, %v9877_v0  ;;  %955 = vadd.xlane.f32.xlu0 %v954_v18  ;;  %v1017_v8 = vsel %vm407_vm0, %v845_v5, 0.0  ;;  %v849_v13 = vmul.f32 %v721_v10, %v721_v10  ;;  %v848_v14 = vmul.f32 %v720_v11, %v720_v11  ;;  %v847_v15 = vmul.f32 %v719_v12, %v719_v12  ;;  %v725_v30 = vld [vmem:[%s10046_s18 + $0xf0] sm:$0xff]  ;;  %v730_v37 = vld [vmem:[%s10046_s18 + $0x118] sm:$0xff]  ;;  %v728_v39 = vld [vmem:[%s10046_s18 + $0x108] sm:$0xff] }
  0x40   : > { %588 = vst.msk [vmem:[#allocation2 + $0x598] sm:$0x3f] %vm412_vm1, %v9877_v0  ;;  %v1014_v9 = vsel %vm407_vm0, %v844_v6, 0.0  ;;  %v852_v22 = vmul.f32 %v724_v19, %v724_v19  ;;  %v851_v23 = vmul.f32 %v723_v20, %v723_v20  ;;  %v850_v24 = vmul.f32 %v722_v21, %v722_v21  ;;  %v729_v38 = vld [vmem:[%s10046_s18 + $0x110] sm:$0xff]  ;;  %v732_v48 = vld [vmem:[%s10046_s18 + $0x128] sm:$0xff]  ;;  %v731_v49 = vld [vmem:[%s10046_s18 + $0x120] sm:$0xff] }
  0x41   : > { %589 = vst.msk [vmem:[#allocation2 + $0x5a0] sm:$0xff] %vm407_vm0, %v9877_v0  ;;  %v1029_v16 = vsel %vm407_vm0, %v849_v13, 0.0  ;;  %v1026_v17 = vsel %vm407_vm0, %v848_v14, 0.0  ;;  %v1023_v18 = vsel %vm407_vm0, %v847_v15, 0.0  ;;  %v855_v31 = vmul.f32 %v727_v28, %v727_v28  ;;  %v733_v47 = vld [vmem:[%s10046_s18 + $0x130] sm:$0xff]  ;;  %v736_v56 = vld [vmem:[%s10046_s18 + $0x148] sm:$0xff] }
  0x42   : > { %590 = vst.msk [vmem:[#allocation2 + $0x5a8] sm:$0xff] %vm407_vm0, %v9877_v0  ;;  %v854_v32 = vmul.f32 %v726_v29, %v726_v29  ;;  %v853_v33 = vmul.f32 %v725_v30, %v725_v30  ;;  %v858_v40 = vmul.f32 %v730_v37, %v730_v37  ;;  %v857_v41 = vmul.f32 %v729_v38, %v729_v38  ;;  %v735_v57 = vld [vmem:[%s10046_s18 + $0x140] sm:$0xff]  ;;  %v734_v58 = vld [vmem:[%s10046_s18 + $0x138] sm:$0xff]  ;;  %v737_v4 = vld [vmem:[%s10046_s18 + $0x150] sm:$0xff] }
  0x43   : > { %591 = vst.msk [vmem:[#allocation2 + $0x5b0] sm:$0xff] %vm407_vm0, %v9877_v0  ;;  %v856_v42 = vmul.f32 %v728_v39, %v728_v39  ;;  %v861_v50 = vmul.f32 %v733_v47, %v733_v47  ;;  %v860_v51 = vmul.f32 %v732_v48, %v732_v48  ;;  %v864_v59 = vmul.f32 %v736_v56, %v736_v56  ;;  %v739_v2 = vld [vmem:[%s10046_s18 + $0x160] sm:$0xff]  ;;  %v738_v3 = vld [vmem:[%s10046_s18 + $0x158] sm:$0xff]  ;;  %v741_v30 = vld [vmem:[%s10046_s18 + $0x170] sm:$0xff] }
  0x44   : > { %592 = vst.msk [vmem:[#allocation2 + $0x5b8] sm:$0xff] %vm407_vm0, %v9877_v0  ;;  %v863_v60 = vmul.f32 %v735_v57, %v735_v57  ;;  %v867_v5 = vmul.f32 %v739_v2, %v739_v2  ;;  %v866_v6 = vmul.f32 %v738_v3, %v738_v3  ;;  %v9878_v11 = vmov 4.0   ;;  %v742_v29 = vld [vmem:[%s10046_s18 + $0x178] sm:$0xff]  ;;  %v745_v47 = vld [vmem:[%s10046_s18 + $0x190] sm:$0xff]  ;;  %v744_v48 = vld [vmem:[%s10046_s18 + $0x188] sm:$0xff] }
  0x45   : > { %593 = vst.msk [vmem:[#allocation2 + $0x5c0] sm:$0x3f] %vm412_vm1, %v9877_v0  ;;  %v1050_v46 = vsel %vm407_vm0, %v856_v42, 0.0  ;;  %9220 = vrcp.f32 %v9878_v11 }
  0x46   : > { %594 = vst.msk [vmem:[#allocation2 + $0x5c8] sm:$0xff] %vm407_vm0, %v9877_v0  ;;  %976 = vadd.xlane.f32.xlu2 %v975_v25  ;;  %973 = vadd.xlane.f32.xlu1 %v972_v26  ;;  %v1038_v25 = vsel %vm407_vm0, %v852_v22, 0.0  ;;  %v1035_v26 = vsel %vm407_vm0, %v851_v23, 0.0 }
  0x47   : > { %595 = vst.msk [vmem:[#allocation2 + $0x5d0] sm:$0xff] %vm407_vm0, %v9877_v0  ;;  %970 = vadd.xlane.f32.xlu0 %v969_v27  ;;  %v1032_v27 = vsel %vm407_vm0, %v850_v24, 0.0 }
  0x48   : > { %596 = vst.msk [vmem:[#allocation2 + $0x5d8] sm:$0xff] %vm407_vm0, %v9877_v0 }
  0x49   : > { %597 = vst.msk [vmem:[#allocation2 + $0x5e0] sm:$0xff] %vm407_vm0, %v9877_v0 }
  0x4a   : > { %598 = vst.msk [vmem:[#allocation2 + $0x5e8] sm:$0x3f] %vm412_vm1, %v9877_v0 }
  0x4b   : > { %599 = vst [vmem:[#allocation3] sm:$0xff] %v9877_v0  ;;  %v9221_v12 = vpop.eup %9220 }
  0x4c   : > { %600 = vst [vmem:[#allocation3 + $0x8] sm:$0xff] %v9877_v0  ;;  %v1336_v13 = vmul.f32 4.0, %v9221_v12  ;;  %vm1340_vm2 = vweird.f32 %v9221_v12 }
  0x4d   : > { %601 = vst [vmem:[#allocation3 + $0x10] sm:$0x3f] %v9877_v0 }
  0x4e   : > { %602 = vst [vmem:[#allocation3 + $0x18] sm:$0xff] %v9877_v0  ;;  %985 = vadd.xlane.f32.xlu2 %v984_v34  ;;  %982 = vadd.xlane.f32.xlu1 %v981_v35  ;;  %v1047_v34 = vsel %vm407_vm0, %v855_v31, 0.0  ;;  %v1044_v35 = vsel %vm407_vm0, %v854_v32, 0.0  ;;  %v1337_v14 = vsub.f32 1.0, %v1336_v13  ;;  %v740_v31 = vld [vmem:[%s10046_s18 + $0x168] sm:$0xff] }
  0x4f   : > { %603 = vst [vmem:[#allocation3 + $0x20] sm:$0xff] %v9877_v0  ;;  %979 = vadd.xlane.f32.xlu0 %v978_v36  ;;  %v1041_v36 = vsel %vm407_vm0, %v853_v33, 0.0  ;;  %v870_v33 = vmul.f32 %v742_v29, %v742_v29 }
  0x50   : > { %604 = vst [vmem:[#allocation3 + $0x28] sm:$0x3f] %v9877_v0  ;;  %v1338_v15 = vmul.f32 %v9221_v12, %v1337_v14  ;;  %v748_v14 = vld [vmem:[%s10046_s18 + $0x1a8] sm:$0xff] }
  0x51   : > { %605 = vst [vmem:[#allocation3 + $0x30] sm:$0xff] %v9877_v0 }
  0x52   : > { %606 = vst [vmem:[#allocation3 + $0x38] sm:$0xff] %v9877_v0 }
  0x53   : > { %607 = vst [vmem:[#allocation3 + $0x40] sm:$0x3f] %v9877_v0 }
  0x54   : > { %608 = vst [vmem:[#allocation3 + $0x48] sm:$0xff] %v9877_v0 }
  0x55   : > { %609 = vst [vmem:[#allocation3 + $0x50] sm:$0xff] %v9877_v0 }
  0x56   : > { %610 = vst [vmem:[#allocation3 + $0x58] sm:$0x3f] %v9877_v0  ;;  %994 = vadd.xlane.f32.xlu2 %v993_v43  ;;  %991 = vadd.xlane.f32.xlu1 %v990_v44  ;;  %v10231_v43 = vld [vmem:[#allocation10] sm:$0x1]  ;;  %v1056_v44 = vsel %vm407_vm0, %v858_v40, 0.0 }
  0x57   : > { %611 = vst [vmem:[#allocation3 + $0x60] sm:$0xff] %v9877_v0  ;;  %988 = vadd.xlane.f32.xlu0 %v987_v45  ;;  %v1053_v45 = vsel %vm407_vm0, %v857_v41, 0.0 }
  0x58   : > { %612 = vst [vmem:[#allocation3 + $0x68] sm:$0xff] %v9877_v0 }
  0x59   : > { %613 = vst [vmem:[#allocation3 + $0x70] sm:$0x3f] %v9877_v0 }
  0x5a   : > { %614 = vst [vmem:[#allocation3 + $0x78] sm:$0xff] %v9877_v0 }
  0x5b   : > { %615 = vst [vmem:[#allocation3 + $0x80] sm:$0xff] %v9877_v0 }
  0x5c   : > { %616 = vst [vmem:[#allocation3 + $0x88] sm:$0x3f] %v9877_v0 }
  0x5d   : > { %617 = vst [vmem:[#allocation3 + $0x90] sm:$0xff] %v9877_v0 }
  0x5e   : > { %618 = vst [vmem:[#allocation3 + $0x98] sm:$0xff] %v9877_v0  ;;  %1003 = vadd.xlane.f32.xlu2 %v1002_v52  ;;  %1000 = vadd.xlane.f32.xlu1 %v999_v53  ;;  %v859_v52 = vmul.f32 %v731_v49, %v731_v49  ;;  %v1065_v53 = vsel %vm407_vm0, %v861_v50, 0.0 }
  0x5f   : > { %619 = vst [vmem:[#allocation3 + $0xa0] sm:$0x3f] %v9877_v0  ;;  %997 = vadd.xlane.f32.xlu0 %v996_v54  ;;  %v1062_v54 = vsel %vm407_vm0, %v860_v51, 0.0 }
  0x60   : > { %620 = vst [vmem:[#allocation3 + $0xa8] sm:$0xff] %v9877_v0  ;;  %v1059_v55 = vsel %vm407_vm0, %v859_v52, 0.0 }
  0x61   : > { %621 = vst [vmem:[#allocation3 + $0xb0] sm:$0xff] %v9877_v0 }
  0x62   : > { %622 = vst [vmem:[#allocation3 + $0xb8] sm:$0x3f] %v9877_v0 }
  0x63   : > { %623 = vst [vmem:[#allocation3 + $0xc0] sm:$0xff] %v9877_v0 }
  0x64   : > { %624 = vst [vmem:[#allocation3 + $0xc8] sm:$0xff] %v9877_v0 }
  0x65   : > { %625 = vst [vmem:[#allocation3 + $0xd0] sm:$0x3f] %v9877_v0 }
  0x66   : > { %626 = vst [vmem:[#allocation3 + $0xd8] sm:$0xff] %v9877_v0  ;;  %1012 = vadd.xlane.f32.xlu2 %v1011_v61  ;;  %1009 = vadd.xlane.f32.xlu1 %v1008_v62  ;;  %v862_v61 = vmul.f32 %v734_v58, %v734_v58  ;;  %v1074_v62 = vsel %vm407_vm0, %v864_v59, 0.0 }
  0x67   : > { %627 = vst [vmem:[#allocation3 + $0xe0] sm:$0xff] %v9877_v0  ;;  %1006 = vadd.xlane.f32.xlu0 %v1005_v63  ;;  %v1071_v63 = vsel %vm407_vm0, %v863_v60, 0.0 }
  0x68   : > { %628 = vst [vmem:[#allocation3 + $0xe8] sm:$0x3f] %v9877_v0  ;;  %v1068_v1 = vsel %vm407_vm0, %v862_v61, 0.0  ;;  %v872_v61 = vmul.f32 %v744_v48, %v744_v48 }
  0x69   : > { %629 = vst [vmem:[#allocation3 + $0xf0] sm:$0xff] %v9877_v0 }
  0x6a   : > { %630 = vst [vmem:[#allocation3 + $0xf8] sm:$0xff] %v9877_v0  ;;  %v1098_v3 = vsel %vm407_vm0, %v872_v61, 0.0  ;;  %v9479_v61 = vld [vmem:[%s10046_s18 + $0x10] sm:$0xff] }
  0x6b   : > { %631 = vst [vmem:[#allocation3 + $0x100] sm:$0x3f] %v9877_v0 }
  0x6c   : > { %632 = vst [vmem:[#allocation3 + $0x108] sm:$0xff] %v9877_v0 }
  0x6d   : > { %633 = vst [vmem:[#allocation3 + $0x110] sm:$0xff] %v9877_v0 }
  0x6e   : > { %634 = vst [vmem:[#allocation3 + $0x118] sm:$0x3f] %v9877_v0  ;;  %1021 = vadd.xlane.f32.xlu2 %v1020_v7  ;;  %1018 = vadd.xlane.f32.xlu1 %v1017_v8  ;;  %v865_v7 = vmul.f32 %v737_v4, %v737_v4  ;;  %v1083_v8 = vsel %vm407_vm0, %v867_v5, 0.0 }
  0x6f   : > { %635 = vst [vmem:[#allocation3 + $0x120] sm:$0xff] %v9877_v0  ;;  %1015 = vadd.xlane.f32.xlu0 %v1014_v9  ;;  %v1080_v9 = vsel %vm407_vm0, %v866_v6, 0.0 }
  0x70   : > { %636 = vst [vmem:[#allocation3 + $0x128] sm:$0xff] %v9877_v0  ;;  %v1077_v10 = vsel %vm407_vm0, %v865_v7, 0.0 }
  0x71   : > { %637 = vst [vmem:[#allocation3 + $0x130] sm:$0x3f] %v9877_v0 }
  0x72   : > { %638 = vst [vmem:[#allocation3 + $0x138] sm:$0xff] %v9877_v0 }
  0x73   : > { %639 = vst [vmem:[#allocation3 + $0x140] sm:$0xff] %v9877_v0 }
  0x74   : > { %640 = vst [vmem:[#allocation3 + $0x148] sm:$0x3f] %v9877_v0 }
  0x75   : > { %641 = vst [vmem:[#allocation3 + $0x150] sm:$0xff] %v9877_v0 }
  0x76   : > { %642 = vst [vmem:[#allocation3 + $0x158] sm:$0xff] %v9877_v0  ;;  %1030 = vadd.xlane.f32.xlu2 %v1029_v16  ;;  %1027 = vadd.xlane.f32.xlu1 %v1026_v17  ;;  %v1339_v16 = vadd.f32 %v9221_v12, %v1338_v15 }
  0x77   : > { %643 = vst [vmem:[#allocation3 + $0x160] sm:$0x3f] %v9877_v0  ;;  %1024 = vadd.xlane.f32.xlu0 %v1023_v18 }
  0x78   : > { %644 = vst [vmem:[#allocation3 + $0x168] sm:$0xff] %v9877_v0  ;;  %v10452_v17 = vsel %vm1340_vm2, %v9221_v12, %v1339_v16 }
  0x79   : > { %645 = vst [vmem:[#allocation3 + $0x170] sm:$0xff] %v9877_v0 }
  0x7a   : > { %646 = vst [vmem:[#allocation3 + $0x178] sm:$0x3f] %v9877_v0 }
  0x7b   : > { %647 = vst [vmem:[#allocation3 + $0x180] sm:$0xff] %v9877_v0 }
  0x7c   : > { %648 = vst [vmem:[#allocation3 + $0x188] sm:$0xff] %v9877_v0 }
  0x7d   : > { %649 = vst [vmem:[#allocation3 + $0x190] sm:$0x3f] %v9877_v0 }
  0x7e   : > { %650 = vst [vmem:[#allocation3 + $0x198] sm:$0xff] %v9877_v0  ;;  %1039 = vadd.xlane.f32.xlu2 %v1038_v25  ;;  %1036 = vadd.xlane.f32.xlu1 %v1035_v26 }
  0x7f   : > { %651 = vst [vmem:[#allocation3 + $0x1a0] sm:$0xff] %v9877_v0  ;;  %1033 = vadd.xlane.f32.xlu0 %v1032_v27 }
  0x80   : > { %652 = vst [vmem:[#allocation3 + $0x1a8] sm:$0x3f] %v9877_v0 }
  0x81   : > { %653 = vst [vmem:[#allocation3 + $0x1b0] sm:$0xff] %v9877_v0 }
  0x82   : > { %654 = vst [vmem:[#allocation3 + $0x1b8] sm:$0xff] %v9877_v0 }
  0x83   : > { %655 = vst [vmem:[#allocation3 + $0x1c0] sm:$0x3f] %v9877_v0 }
  0x84   : > { %656 = vst [vmem:[#allocation3 + $0x1c8] sm:$0xff] %v9877_v0 }
  0x85   : > { %657 = vst [vmem:[#allocation3 + $0x1d0] sm:$0xff] %v9877_v0 }
  0x86   : > { %658 = vst [vmem:[#allocation3 + $0x1d8] sm:$0x3f] %v9877_v0  ;;  %1048 = vadd.xlane.f32.xlu2 %v1047_v34  ;;  %1045 = vadd.xlane.f32.xlu1 %v1044_v35  ;;  %v869_v34 = vmul.f32 %v741_v30, %v741_v30  ;;  %v868_v35 = vmul.f32 %v740_v31, %v740_v31 }
  0x87   : > { %659 = vst [vmem:[#allocation3 + $0x1e0] sm:$0xff] %v9877_v0  ;;  %1042 = vadd.xlane.f32.xlu0 %v1041_v36  ;;  %v1092_v36 = vsel %vm407_vm0, %v870_v33, 0.0 }
  0x88   : > { %660 = vst [vmem:[#allocation3 + $0x1e8] sm:$0xff] %v9877_v0  ;;  %v1089_v37 = vsel %vm407_vm0, %v869_v34, 0.0  ;;  %v1086_v38 = vsel %vm407_vm0, %v868_v35, 0.0 }
  0x89   : > { %661 = vst [vmem:[#allocation3 + $0x1f0] sm:$0x3f] %v9877_v0 }
  0x8a   : > { %662 = vst [vmem:[#allocation3 + $0x1f8] sm:$0xff] %v9877_v0 }
  0x8b   : > { %663 = vst [vmem:[#allocation3 + $0x200] sm:$0xff] %v9877_v0 }
  0x8c   : > { %664 = vst [vmem:[#allocation3 + $0x208] sm:$0x3f] %v9877_v0 }
  0x8d   : > { %665 = vst [vmem:[#allocation4] sm:$0xff] %v9877_v0 }
  0x8e   : > { %666 = vst [vmem:[#allocation4 + $0x8] sm:$0xf] %v9877_v0  ;;  %1057 = vadd.xlane.f32.xlu2 %v1056_v44  ;;  %1054 = vadd.xlane.f32.xlu1 %v1053_v45 }
  0x8f   : > { %667 = vst [vmem:[#allocation4 + $0x10] sm:$0xff] %v9877_v0  ;;  %1051 = vadd.xlane.f32.xlu0 %v1050_v46 }
  0x90   : > { %668 = vst [vmem:[#allocation4 + $0x18] sm:$0xf] %v9877_v0 }
  0x91   : > { %669 = vst [vmem:[#allocation4 + $0x20] sm:$0xff] %v9877_v0 }
  0x92   : > { %670 = vst [vmem:[#allocation4 + $0x28] sm:$0xf] %v9877_v0 }
  0x93   : > { %671 = vst [vmem:[#allocation4 + $0x30] sm:$0xff] %v9877_v0 }
  0x94   : > { %672 = vst [vmem:[#allocation4 + $0x38] sm:$0xf] %v9877_v0 }
  0x95   : > { %673 = vst [vmem:[#allocation4 + $0x40] sm:$0xff] %v9877_v0 }
  0x96   : > { %674 = vst [vmem:[#allocation4 + $0x48] sm:$0xf] %v9877_v0  ;;  %1066 = vadd.xlane.f32.xlu2 %v1065_v53  ;;  %1063 = vadd.xlane.f32.xlu1 %v1062_v54  ;;  %v873_v53 = vmul.f32 %v745_v47, %v745_v47  ;;  %v743_v54 = vld [vmem:[%s10046_s18 + $0x180] sm:$0xff] }
  0x97   : > { %675 = vst [vmem:[#allocation4 + $0x50] sm:$0xff] %v9877_v0  ;;  %1060 = vadd.xlane.f32.xlu0 %v1059_v55 }
  0x98   : > { %676 = vst [vmem:[#allocation4 + $0x58] sm:$0xf] %v9877_v0  ;;  %v1101_v60 = vsel %vm407_vm0, %v873_v53, 0.0 }
  0x99   : > { %677 = vst [vmem:[#allocation4 + $0x60] sm:$0xff] %v9877_v0 }
  0x9a   : > { %678 = vst [vmem:[#allocation4 + $0x68] sm:$0xf] %v9877_v0 }
  0x9b   : > { %679 = vst [vmem:[#allocation4 + $0x70] sm:$0xff] %v9877_v0 }
  0x9c   : > { %680 = vst [vmem:[#allocation4 + $0x78] sm:$0xf] %v9877_v0 }
  0x9d   : > { %681 = vst [vmem:[#allocation4 + $0x80] sm:$0xff] %v9877_v0 }
  0x9e   : > { %682 = vst [vmem:[#allocation4 + $0x88] sm:$0xf] %v9877_v0  ;;  %1075 = vadd.xlane.f32.xlu2 %v1074_v62  ;;  %1072 = vadd.xlane.f32.xlu1 %v1071_v63  ;;  %v871_v63 = vmul.f32 %v743_v54, %v743_v54 }
  0x9f   : > { %683 = vst [vmem:[#allocation4 + $0x90] sm:$0xff] %v9877_v0  ;;  %1069 = vadd.xlane.f32.xlu0 %v1068_v1 }
  0xa0   : > { %684 = vst [vmem:[#allocation4 + $0x98] sm:$0xf] %v9877_v0  ;;  %v1095_v5 = vsel %vm407_vm0, %v871_v63, 0.0 }
  0xa1   : > { %685 = vst [vmem:[#allocation4 + $0xa0] sm:$0xff] %v9877_v0 }
  0xa2   : > { %686 = vst [vmem:[#allocation4 + $0xa8] sm:$0xf] %v9877_v0 }
  0xa3   : > { %687 = vst [vmem:[#allocation4 + $0xb0] sm:$0xff] %v9877_v0 }
  0xa4   : > { %688 = vst [vmem:[#allocation4 + $0xb8] sm:$0xf] %v9877_v0 }
  0xa5   : > { %689 = vst [vmem:[#allocation5] sm:$0x3f] %v9877_v0 }
  0xa6   : > { %690 = vst [vmem:[#allocation5 + $0x8] sm:$0x3f] %v9877_v0  ;;  %1084 = vadd.xlane.f32.xlu2 %v1083_v8  ;;  %1081 = vadd.xlane.f32.xlu1 %v1080_v9 }
  0xa7   : > { %691 = vst [vmem:[#allocation5 + $0x10] sm:$0x3f] %v9877_v0  ;;  %1078 = vadd.xlane.f32.xlu0 %v1077_v10 }
  0xa8   : > { %692 = vst [vmem:[#allocation5 + $0x18] sm:$0x3f] %v9877_v0 }
  0xa9   : > { %693 = vst [vmem:[#allocation5 + $0x20] sm:$0x3f] %v9877_v0  ;;  %v965_v18 = vpop.xlane.xlu2 %964  ;;  %v959_v23 = vpop.xlane.xlu1 %958 }
  0xaa   : > { %694 = vst [vmem:[#allocation5 + $0x28] sm:$0x3f] %v9877_v0  ;;  %v1346_v19 = vmul.f32 %v10452_v17, %v965_v18  ;;  %v1344_v24 = vmul.f32 %v10452_v17, %v959_v23  ;;  %v953_v25 = vpop.xlane.xlu0 %952  ;;  %v876_v18 = vmul.f32 %v748_v14, %v748_v14 }
  0xab   : > { %424 = vst.msk [vmem:[#allocation2 + $0x78] sm:$0xff] %vm407_vm0, %v9877_v0  ;;  %v1342_v26 = vmul.f32 %v10452_v17, %v953_v25 }
  0xac   : > { %425 = vst.msk [vmem:[#allocation2 + $0x80] sm:$0xff] %vm407_vm0, %v9877_v0  ;;  %v10469_v20 = vadd.f32 1e-08, %v1346_v19  ;;  %v10513_v28 = vadd.f32 1e-08, %v1344_v24  ;;  %v747_v19 = vld [vmem:[%s10046_s18 + $0x1a0] sm:$0xff] }
  0xad   : > { %426 = vst.msk [vmem:[#allocation2 + $0x88] sm:$0xff] %vm407_vm0, %v9877_v0  ;;  %v10520_v32 = vadd.f32 1e-08, %v1342_v26  ;;  %v1110_v29 = vsel %vm407_vm0, %v876_v18, 0.0  ;;  %v875_v33 = vmul.f32 %v747_v19, %v747_v19 }
  0xae   : > { %427 = vst.msk [vmem:[#allocation2 + $0x90] sm:$0xff] %vm407_vm0, %v9877_v0  ;;  %9222 = vrsqrt.f32 %v10469_v20  ;;  %1093 = vadd.xlane.f32.xlu2 %v1092_v36  ;;  %1090 = vadd.xlane.f32.xlu1 %v1089_v37  ;;  %vm1644_vm3 = vweird.f32 %v10469_v20  ;;  %vm1624_vm8 = vweird.f32 %v10513_v28  ;;  %v9478_v37 = vld [vmem:[%s10046_s18 + $0x20] sm:$0xff] }
  0xaf   : > { %428 = vst.msk [vmem:[#allocation2 + $0x98] sm:$0x3f] %vm412_vm1, %v9877_v0  ;;  %9224 = vrsqrt.f32 %v10513_v28  ;;  %1087 = vadd.xlane.f32.xlu0 %v1086_v38  ;;  %vm1604_vm10 = vweird.f32 %v10520_v32  ;;  %v1107_v48 = vsel %vm407_vm0, %v875_v33, 0.0 }
  0xb0   : > { %429 = vst.msk [vmem:[#allocation2 + $0xa0] sm:$0xff] %vm407_vm0, %v9877_v0  ;;  %9226 = vrsqrt.f32 %v10520_v32 }
  0xb1   : > { %430 = vst.msk [vmem:[#allocation2 + $0xa8] sm:$0xff] %vm407_vm0, %v9877_v0  ;;  %v968_v40 = vpop.xlane.xlu2 %967  ;;  %v962_v41 = vpop.xlane.xlu1 %961 }
  0xb2   : > { %431 = vst.msk [vmem:[#allocation2 + $0xb0] sm:$0xff] %vm407_vm0, %v9877_v0  ;;  %v1347_v44 = vmul.f32 %v10452_v17, %v968_v40  ;;  %v1345_v45 = vmul.f32 %v10452_v17, %v962_v41  ;;  %v956_v46 = vpop.xlane.xlu0 %955 }
  0xb3   : > { %432 = vst.msk [vmem:[#allocation2 + $0xb8] sm:$0xff] %vm407_vm0, %v9877_v0  ;;  %v1343_v52 = vmul.f32 %v10452_v17, %v956_v46 }
  0xb4   : > { %433 = vst.msk [vmem:[#allocation2 + $0xc0] sm:$0x3f] %vm412_vm1, %v9877_v0  ;;  %v10490_v21 = vpop.eup %9222  ;;  %v10560_v56 = vadd.f32 1e-08, %v1347_v44  ;;  %v10562_v57 = vadd.f32 1e-08, %v1345_v45 }
  0xb5   : > { %434 = vst.msk [vmem:[#allocation2 + $0xc8] sm:$0xff] %vm407_vm0, %v9877_v0  ;;  %v1639_v22 = vmul.f32 %v10490_v21, %v10469_v20  ;;  %v10539_v42 = vpop.eup %9224  ;;  %v10567_v59 = vadd.f32 1e-08, %v1343_v52  ;;  %vm1645_vm4 = vweird.f32 %v10490_v21  ;;  %v746_v20 = vld [vmem:[%s10046_s18 + $0x198] sm:$0xff] }
  0xb6   : > { %435 = vst.msk [vmem:[#allocation2 + $0xd0] sm:$0xff] %vm407_vm0, %v9877_v0  ;;  %v10547_v49 = vpop.eup %9226  ;;  %v1619_v51 = vmul.f32 %v10539_v42, %v10513_v28  ;;  %9228 = vrsqrt.f32 %v10560_v56  ;;  %1102 = vadd.xlane.f32.xlu2 %v1101_v60  ;;  %1099 = vadd.xlane.f32.xlu1 %v1098_v3  ;;  %vm10592_vm5 = vmor %vm1644_vm3, %vm1645_vm4  ;;  %vm1625_vm6 = vweird.f32 %v10539_v42  ;;  %v874_v34 = vmul.f32 %v746_v20, %v746_v20  ;;  %v749_v3 = vld [vmem:[%s10046_s18 + $0x1b0] sm:$0xff] }
  0xb7   : > { %436 = vst.msk [vmem:[#allocation2 + $0xd8] sm:$0xff] %vm407_vm0, %v9877_v0  ;;  %v1640_v27 = vmul.f32 %v10490_v21, %v1639_v22  ;;  %v1599_v55 = vmul.f32 %v10547_v49, %v10520_v32  ;;  %9230 = vrsqrt.f32 %v10562_v57  ;;  %1096 = vadd.xlane.f32.xlu0 %v1095_v5  ;;  %vm1605_vm7 = vweird.f32 %v10547_v49  ;;  %vm10637_vm9 = vmor %vm1624_vm8, %vm1625_vm6  ;;  %v9480_v5 = vld [vmem:[%s10046_s18] sm:$0xff] }
  0xb8   : > { %437 = vst.msk [vmem:[#allocation2 + $0xe0] sm:$0xff] %vm407_vm0, %v9877_v0  ;;  %v1620_v58 = vmul.f32 %v10539_v42, %v1619_v51  ;;  %9232 = vrsqrt.f32 %v10567_v59  ;;  %vm10655_vm11 = vmor %vm1604_vm10, %vm1605_vm7  ;;  %vm1634_vm12 = vweird.f32 %v10562_v57  ;;  %v751_v51 = vld [vmem:[%s10046_s18 + $0x1c0] sm:$0xff]  ;;  %vm1654_vm13 = vweird.f32 %v10560_v56 }
  0xb9   : > { %438 = vst.msk [vmem:[#allocation2 + $0xe8] sm:$0x3f] %vm412_vm1, %v9877_v0  ;;  %v1641_v39 = vmul.f32 0.5, %v1640_v27  ;;  %v1600_v62 = vmul.f32 %v10547_v49, %v1599_v55  ;;  %v977_v7 = vpop.xlane.xlu2 %976  ;;  %v974_v8 = vpop.xlane.xlu1 %973  ;;  %v879_v60 = vmul.f32 %v751_v51, %v751_v51  ;;  %vm1614_vm15 = vweird.f32 %v10567_v59 }
  0xba   : > { %439 = vst.msk [vmem:[#allocation2 + $0xf0] sm:$0xff] %vm407_vm0, %v9877_v0  ;;  %v1621_v2 = vmul.f32 0.5, %v1620_v58  ;;  %v1350_v11 = vmul.f32 %v10452_v17, %v977_v7  ;;  %v1349_v12 = vmul.f32 %v10452_v17, %v974_v8  ;;  %v971_v13 = vpop.xlane.xlu0 %970 }
  0xbb   : > { %440 = vst.msk [vmem:[#allocation2 + $0xf8] sm:$0xff] %vm407_vm0, %v9877_v0  ;;  %v1642_v50 = vsub.f32 1.5, %v1641_v39  ;;  %v1601_v4 = vmul.f32 0.5, %v1600_v62  ;;  %v1348_v16 = vmul.f32 %v10452_v17, %v971_v13  ;;  %v1119_v9 = vsel %vm407_vm0, %v879_v60, 0.0 }
  0xbc   : > { %441 = vst.msk [vmem:[#allocation2 + $0x100] sm:$0xff] %vm407_vm0, %v9877_v0  ;;  %v1622_v6 = vsub.f32 1.5, %v1621_v2  ;;  %v10607_v22 = vpop.eup %9228  ;;  %v10614_v24 = vadd.f32 1e-08, %v1350_v11  ;;  %v10623_v27 = vadd.f32 1e-08, %v1349_v12 }
  0xbd   : > { %442 = vst.msk [vmem:[#allocation2 + $0x108] sm:$0xff] %vm407_vm0, %v9877_v0  ;;  %v1643_v1 = vmul.f32 %v10490_v21, %v1642_v50  ;;  %v1602_v10 = vsub.f32 1.5, %v1601_v4  ;;  %v10616_v25 = vpop.eup %9230  ;;  %v1649_v26 = vmul.f32 %v10607_v22, %v10560_v56  ;;  %v10631_v31 = vadd.f32 1e-08, %v1348_v16  ;;  %v750_v2 = vld [vmem:[%s10046_s18 + $0x1b8] sm:$0xff]  ;;  %v10706_v11 = vld [vmem:[#allocation3] sm:$0xff] }
  0xbe   : > { %443 = vst.msk [vmem:[#allocation2 + $0x110] sm:$0x3f] %vm412_vm1, %v9877_v0  ;;  %v1623_v23 = vmul.f32 %v10539_v42, %v1622_v6  ;;  %v10626_v30 = vpop.eup %9232  ;;  %1111 = vadd.xlane.f32.xlu2 %v1110_v29  ;;  %v1629_v28 = vmul.f32 %v10616_v25, %v10562_v57  ;;  %9234 = vrsqrt.f32 %v10614_v24  ;;  %1108 = vadd.xlane.f32.xlu1 %v1107_v48  ;;  %vm1655_vm14 = vweird.f32 %v10607_v22 }
  0xbf   : > { %444 = vst.msk [vmem:[#allocation2 + $0x118] sm:$0xff] %vm407_vm0, %v9877_v0  ;;  %v1647_v15 = vsel %vm10592_vm5, %v10490_v21, %v1643_v1  ;;  %v1603_v21 = vmul.f32 %v10547_v49, %v1602_v10  ;;  %v1650_v36 = vmul.f32 %v10607_v22, %v1649_v26  ;;  %v1609_v32 = vmul.f32 %v10626_v30, %v10567_v59  ;;  %vm10714_vm2 = vmor %vm1654_vm13, %vm1655_vm14 }
  0xc0   : > { %445 = vst.msk [vmem:[#allocation2 + $0x120] sm:$0xff] %vm407_vm0, %v9877_v0  ;;  %v10648_v38 = vmul.f32 %v9478_v37, %v1647_v15  ;;  %v1627_v39 = vsel %vm10637_vm9, %v10539_v42, %v1623_v23  ;;  %v1630_v44 = vmul.f32 %v10616_v25, %v1629_v28  ;;  %9236 = vrsqrt.f32 %v10623_v27 }
  0xc1   : > { %446 = vst.msk [vmem:[#allocation2 + $0x128] sm:$0xff] %vm407_vm0, %v9877_v0  ;;  %v1607_v41 = vsel %vm10655_vm11, %v10547_v49, %v1603_v21  ;;  %v1651_v42 = vmul.f32 0.5, %v1650_v36  ;;  %v986_v45 = vpop.xlane.xlu2 %985  ;;  %v983_v46 = vpop.xlane.xlu1 %982  ;;  %v1610_v47 = vmul.f32 %v10626_v30, %v1609_v32  ;;  %9238 = vrsqrt.f32 %v10631_v31  ;;  %v9482_v36 = vld [vmem:[%s10046_s18 + $0x28] sm:$0xff] }
  0xc2   : > { %447 = vst.msk [vmem:[#allocation2 + $0x130] sm:$0xff] %vm407_vm0, %v9877_v0  ;;  %v1104_v49 = vsel %vm407_vm0, %v874_v34, 0.0  ;;  %v980_v50 = vpop.xlane.xlu0 %979  ;;  %v1631_v53 = vmul.f32 0.5, %v1630_v44  ;;  %v1353_v54 = vmul.f32 %v10452_v17, %v986_v45  ;;  %v1352_v58 = vmul.f32 %v10452_v17, %v983_v46 }
  0xc3   : > { %448 = vst.msk [vmem:[#allocation2 + $0x138] sm:$0x3f] %vm412_vm1, %v9877_v0  ;;  %v1652_v52 = vsub.f32 1.5, %v1651_v42  ;;  %1105 = vadd.xlane.f32.xlu0 %v1104_v49  ;;  %v1611_v55 = vmul.f32 0.5, %v1610_v47  ;;  %v10688_v62 = vmul.f32 %v9479_v61, %v1627_v39  ;;  %v10699_v6 = vmul.f32 %v9480_v5, %v1607_v41  ;;  %v753_v61 = vld [vmem:[%s10046_s18 + $0x1d0] sm:$0xff] }
  0xc4   : > { %449 = vst.msk [vmem:[#allocation2 + $0x140] sm:$0xff] %vm407_vm0, %v9877_v0  ;;  %v1632_v1 = vsub.f32 1.5, %v1631_v53  ;;  %v10694_v4 = vpop.eup %9234  ;;  %v10701_v8 = vadd.f32 1e-08, %v1353_v54  ;;  %vm1635_vm3 = vweird.f32 %v10616_v25  ;;  %vm1615_vm4 = vweird.f32 %v10626_v30 }
  0xc5   : > { %450 = vst.msk [vmem:[#allocation2 + $0x148] sm:$0xff] %vm407_vm0, %v9877_v0  ;;  %v1653_v63 = vmul.f32 %v10607_v22, %v1652_v52  ;;  %v1612_v7 = vsub.f32 1.5, %v1611_v55  ;;  %v1679_v13 = vmul.f32 %v10694_v4, %v10614_v24  ;;  %v1351_v14 = vmul.f32 %v10452_v17, %v980_v50  ;;  %vm10755_vm6 = vmor %vm1634_vm12, %vm1635_vm3  ;;  %v9483_v52 = vld [vmem:[%s10046_s18 + $0x18] sm:$0xff] }
  0xc6   : > { %451 = vst.msk [vmem:[#allocation2 + $0x150] sm:$0xff] %vm407_vm0, %v9877_v0  ;;  %v10704_v10 = vpop.eup %9236  ;;  %1120 = vadd.xlane.f32.xlu2 %v1119_v9  ;;  %v1633_v16 = vmul.f32 %v10616_v25, %v1632_v1  ;;  %v10733_v19 = vadd.f32 1e-08, %v1352_v58  ;;  %v878_v21 = vmul.f32 %v750_v2, %v750_v2  ;;  %v877_v26 = vmul.f32 %v749_v3, %v749_v3  ;;  %vm10777_vm10 = vmor %vm1614_vm15, %vm1615_vm4 }
  0xc7   : > { %452 = vst.msk [vmem:[#allocation2 + $0x158] sm:$0xff] %vm407_vm0, %v9877_v0  ;;  %v10723_v15 = vpop.eup %9238  ;;  %v1657_v56 = vsel %vm10714_vm2, %v10607_v22, %v1653_v63  ;;  %v1669_v18 = vmul.f32 %v10704_v10, %v10623_v27  ;;  %v1680_v20 = vmul.f32 %v10694_v4, %v1679_v13  ;;  %v1613_v33 = vmul.f32 %v10626_v30, %v1612_v7  ;;  %v9484_v63 = vld [vmem:[%s10046_s18 + $0x8] sm:$0xff] }
  0xc8   : > { %453 = vst.msk [vmem:[#allocation2 + $0x160] sm:$0x3f] %vm412_vm1, %v9877_v0  ;;  %v1659_v23 = vmul.f32 %v10723_v15, %v10631_v31  ;;  %vm1684_vm5 = vweird.f32 %v10614_v24  ;;  %9240 = vrsqrt.f32 %v10701_v8  ;;  %v10749_v28 = vmul.f32 %v9482_v36, %v1657_v56  ;;  %v752_v36 = vld [vmem:[%s10046_s18 + $0x1c8] sm:$0xff] }
  0xc9   : > { %454 = vst.msk [vmem:[#allocation2 + $0x168] sm:$0xff] %vm407_vm0, %v9877_v0  ;;  %v995_v29 = vpop.xlane.xlu2 %994  ;;  %v992_v22 = vpop.xlane.xlu1 %991  ;;  %v1670_v34 = vmul.f32 %v10704_v10, %v1669_v18  ;;  %v1681_v39 = vmul.f32 0.5, %v1680_v20  ;;  %vm1685_vm7 = vweird.f32 %v10694_v4  ;;  %vm1674_vm8 = vweird.f32 %v10623_v27  ;;  %v9485_v20 = vld [vmem:[%s10046_s18 + $0x40] sm:$0xff] }
  0xca   : > { %455 = vst.msk [vmem:[#allocation2 + $0x170] sm:$0xff] %vm407_vm0, %v9877_v0  ;;  %v989_v35 = vpop.xlane.xlu0 %988  ;;  %v1660_v40 = vmul.f32 %v10723_v15, %v1659_v23  ;;  %v1637_v32 = vsel %vm10755_vm6, %v10616_v25, %v1633_v16  ;;  %vm1664_vm9 = vweird.f32 %v10631_v31  ;;  %9242 = vrsqrt.f32 %v10733_v19  ;;  %vm10807_vm13 = vmor %vm1684_vm5, %vm1685_vm7 }
  0xcb   : > { %456 = vst.msk [vmem:[#allocation2 + $0x178] sm:$0xff] %vm407_vm0, %v9877_v0  ;;  %v1671_v41 = vmul.f32 0.5, %v1670_v34  ;;  %v10769_v57 = vadd.f32 1e-08, %v1351_v14  ;;  %v1682_v44 = vsub.f32 1.5, %v1681_v39  ;;  %v1116_v45 = vsel %vm407_vm0, %v878_v21, 0.0 }
  0xcc   : > { %457 = vst.msk [vmem:[#allocation2 + $0x180] sm:$0xff] %vm407_vm0, %v9877_v0  ;;  %v1661_v25 = vmul.f32 0.5, %v1660_v40  ;;  %v1113_v46 = vsel %vm407_vm0, %v877_v26, 0.0  ;;  %v1617_v47 = vsel %vm10777_vm10, %v10626_v30, %v1613_v33  ;;  %1117 = vadd.xlane.f32.xlu1 %v1116_v45  ;;  %v1356_v48 = vmul.f32 %v10452_v17, %v995_v29  ;;  %v754_v30 = vld [vmem:[%s10046_s18 + $0x1d8] sm:$0xff] }
  0xcd   : > { %458 = vst.msk [vmem:[#allocation2 + $0x188] sm:$0x3f] %vm412_vm1, %v9877_v0  ;;  %v1672_v59 = vsub.f32 1.5, %v1671_v41  ;;  %9244 = vrsqrt.f32 %v10769_v57  ;;  %1114 = vadd.xlane.f32.xlu0 %v1113_v46  ;;  %v1683_v49 = vmul.f32 %v10694_v4, %v1682_v44  ;;  %vm1675_vm11 = vweird.f32 %v10704_v10 }
  0xce   : > { %459 = vst.msk [vmem:[#allocation2 + $0x190] sm:$0xff] %vm407_vm0, %v9877_v0  ;;  %v1662_v50 = vsub.f32 1.5, %v1661_v25  ;;  %vm1665_vm12 = vweird.f32 %v10723_v15  ;;  %v10796_v51 = vpop.eup %9240  ;;  %v10801_v53 = vmul.f32 %v9483_v52, %v1637_v32  ;;  %v10811_v55 = vadd.f32 1e-08, %v1356_v48  ;;  %vm10853_vm2 = vmor %vm1674_vm8, %vm1675_vm11 }
  0xcf   : > { %460 = vst.msk [vmem:[#allocation2 + $0x198] sm:$0xff] %vm407_vm0, %v9877_v0  ;;  %v1355_v58 = vmul.f32 %v10452_v17, %v992_v22  ;;  %v1354_v60 = vmul.f32 %v10452_v17, %v989_v35  ;;  %v10819_v1 = vmul.f32 %v9484_v63, %v1617_v47  ;;  %v1687_v24 = vsel %vm10807_vm13, %v10694_v4, %v1683_v49  ;;  %vm10871_vm4 = vmor %vm1664_vm9, %vm1665_vm12  ;;  %v9486_v49 = vld [vmem:[%s10046_s18 + $0x38] sm:$0xff] }
  0xd0   : > { %461 = vst.msk [vmem:[#allocation2 + $0x1a0] sm:$0xff] %vm407_vm0, %v9877_v0  ;;  %v1673_v2 = vmul.f32 %v10704_v10, %v1672_v59  ;;  %v1709_v3 = vmul.f32 %v10796_v51, %v10701_v8  ;;  %v10827_v9 = vpop.eup %9242  ;;  %v1663_v12 = vmul.f32 %v10723_v15, %v1662_v50  ;;  %vm1714_vm14 = vweird.f32 %v10701_v8 }
  0xd1   : > { %462 = vst.msk [vmem:[#allocation2 + $0x1a8] sm:$0xff] %vm407_vm0, %v9877_v0  ;;  %v1004_v5 = vpop.xlane.xlu2 %1003  ;;  %v1001_v7 = vpop.xlane.xlu1 %1000  ;;  %9246 = vrsqrt.f32 %v10811_v55  ;;  %v882_v4 = vmul.f32 %v754_v30, %v754_v30  ;;  %v1699_v56 = vmul.f32 %v10827_v9, %v10733_v19  ;;  %vm1704_vm15 = vweird.f32 %v10733_v19  ;;  %v9487_v30 = vld [vmem:[%s10046_s18 + $0x30] sm:$0xff] }
  0xd2   : > { %463 = vst.msk [vmem:[#allocation2 + $0x1b0] sm:$0x3f] %vm412_vm1, %v9877_v0  ;;  %v10834_v13 = vpop.xlane.xlu0 %997  ;;  %v1710_v14 = vmul.f32 %v10796_v51, %v1709_v3  ;;  %v881_v16 = vmul.f32 %v753_v61, %v753_v61  ;;  %v10847_v23 = vmul.f32 %v9485_v20, %v1687_v24  ;;  %vm1715_vm3 = vweird.f32 %v10796_v51  ;;  %v9488_v20 = vld [vmem:[%s10046_s18 + $0x58] sm:$0xff] }
  0xd3   : > { %464 = vst.msk [vmem:[#allocation2 + $0x1b8] sm:$0xff] %vm407_vm0, %v9877_v0  ;;  %v10842_v18 = vpop.eup %9244  ;;  %v10858_v26 = vadd.f32 1e-08, %v1355_v58  ;;  %v10860_v29 = vadd.f32 1e-08, %v1354_v60  ;;  %v1677_v22 = vsel %vm10853_vm2, %v10704_v10, %v1673_v2  ;;  %v1700_v34 = vmul.f32 %v10827_v9, %v1699_v56  ;;  %vm10926_vm8 = vmor %vm1714_vm14, %vm1715_vm3 }
  0xd4   : > { %465 = vst.msk [vmem:[#allocation2 + $0x1c0] sm:$0xff] %vm407_vm0, %v9877_v0  ;;  %v1711_v33 = vmul.f32 0.5, %v1710_v14  ;;  %v1689_v35 = vmul.f32 %v10842_v18, %v10769_v57  ;;  %v1667_v10 = vsel %vm10871_vm4, %v10723_v15, %v1663_v12  ;;  %vm1705_vm5 = vweird.f32 %v10827_v9 }
  0xd5   : > { %466 = vst.msk [vmem:[#allocation2 + $0x1c8] sm:$0xff] %vm407_vm0, %v9877_v0  ;;  %vm1694_vm6 = vweird.f32 %v10769_v57  ;;  %9248 = vrsqrt.f32 %v10858_v26  ;;  %v1128_v31 = vsel %vm407_vm0, %v882_v4, 0.0  ;;  %v1701_v39 = vmul.f32 0.5, %v1700_v34  ;;  %vm10946_vm10 = vmor %vm1704_vm15, %vm1705_vm5  ;;  %v755_v34 = vld [vmem:[%s10046_s18 + $0x1e0] sm:$0xff] }
  0xd6   : > { %467 = vst.msk [vmem:[#allocation2 + $0x1d0] sm:$0xff] %vm407_vm0, %v9877_v0  ;;  %v1712_v37 = vsub.f32 1.5, %v1711_v33  ;;  %v1690_v40 = vmul.f32 %v10842_v18, %v1689_v35  ;;  %9250 = vrsqrt.f32 %v10860_v29  ;;  %1129 = vadd.xlane.f32.xlu2 %v1128_v31  ;;  %vm1744_vm7 = vweird.f32 %v10811_v55 }
  0xd7   : > { %468 = vst.msk [vmem:[#allocation2 + $0x1d8] sm:$0x3f] %vm412_vm1, %v9877_v0  ;;  %v10892_v32 = vpop.eup %9246  ;;  %v1125_v15 = vsel %vm407_vm0, %v881_v16, 0.0  ;;  %v880_v41 = vmul.f32 %v752_v36, %v752_v36  ;;  %v1359_v42 = vmul.f32 %v10452_v17, %v1004_v5  ;;  %v1358_v44 = vmul.f32 %v10452_v17, %v1001_v7  ;;  %v756_v16 = vld [vmem:[%s10046_s18 + $0x1e8] sm:$0xff] }
  0xd8   : > { %469 = vst.msk [vmem:[#allocation2 + $0x1e0] sm:$0xff] %vm407_vm0, %v9877_v0  ;;  %v1713_v25 = vmul.f32 %v10796_v51, %v1712_v37  ;;  %v1702_v45 = vsub.f32 1.5, %v1701_v39  ;;  %v1691_v46 = vmul.f32 0.5, %v1690_v40  ;;  %v1739_v47 = vmul.f32 %v10892_v32, %v10811_v55  ;;  %1126 = vadd.xlane.f32.xlu1 %v1125_v15 }
  0xd9   : > { %470 = vst.msk [vmem:[#allocation2 + $0x1e8] sm:$0xff] %vm407_vm0, %v9877_v0  ;;  %v10905_v59 = vpop.xlane.xlu2 %1012  ;;  %v10907_v48 = vpop.xlane.xlu1 %1009  ;;  %v10912_v50 = vmul.f32 %v9486_v49, %v1677_v22  ;;  %v10915_v52 = vmul.f32 %v9487_v30, %v1667_v10  ;;  %v1122_v54 = vsel %vm407_vm0, %v880_v41, 0.0  ;;  %v10918_v58 = vadd.f32 1e-08, %v1359_v42 }
  0xda   : > { %471 = vst.msk [vmem:[#allocation2 + $0x1f0] sm:$0xff] %vm407_vm0, %v9877_v0  ;;  %v1703_v61 = vmul.f32 %v10827_v9, %v1702_v45  ;;  %v1692_v63 = vsub.f32 1.5, %v1691_v46  ;;  %vm1695_vm9 = vweird.f32 %v10842_v18  ;;  %v1740_v24 = vmul.f32 %v10892_v32, %v1739_v47  ;;  %1123 = vadd.xlane.f32.xlu0 %v1122_v54  ;;  %v10933_v2 = vpop.xlane.xlu0 %1006 }
  0xdb   : > { %472 = vst.msk [vmem:[#allocation2 + $0x1f8] sm:$0xff] %vm407_vm0, %v9877_v0  ;;  %v10935_v3 = vpop.eup %9248  ;;  %v1717_v8 = vsel %vm10926_vm8, %v10796_v51, %v1713_v25  ;;  %9252 = vrsqrt.f32 %v10918_v58  ;;  %v10951_v7 = vadd.f32 1e-08, %v1358_v44  ;;  %v1357_v12 = vmul.f32 %v10452_v17, %v10834_v13  ;;  %vm10983_vm14 = vmor %vm1694_vm6, %vm1695_vm9 }
  0xdc   : > { %473 = vst.msk [vmem:[#allocation2 + $0x200] sm:$0x3f] %vm412_vm1, %v9877_v0  ;;  %v10955_v4 = vpop.eup %9250  ;;  %v1707_v19 = vsel %vm10946_vm10, %v10827_v9, %v1703_v61  ;;  %v1693_v51 = vmul.f32 %v10842_v18, %v1692_v63  ;;  %v1741_v14 = vmul.f32 0.5, %v1740_v24  ;;  %v1729_v56 = vmul.f32 %v10935_v3, %v10858_v26  ;;  %v757_v9 = vld [vmem:[%s10046_s18 + $0x1f0] sm:$0xff]  ;;  %v9496_v63 = vld [vmem:[%s10046_s18 + $0x78] sm:$0xff] }
  0xdd   : > { %474 = vst.msk [vmem:[#allocation2 + $0x208] sm:$0xff] %vm407_vm0, %v9877_v0  ;;  %vm1745_vm11 = vweird.f32 %v10892_v32  ;;  %vm1734_vm12 = vweird.f32 %v10858_v26  ;;  %v1719_v13 = vmul.f32 %v10955_v4, %v10860_v29  ;;  %vm1724_vm13 = vweird.f32 %v10860_v29 }
  0xde   : > { %475 = vst.msk [vmem:[#allocation2 + $0x210] sm:$0xff] %vm407_vm0, %v9877_v0  ;;  %v10977_v21 = vmul.f32 %v9488_v20, %v1717_v8  ;;  %v1742_v27 = vsub.f32 1.5, %v1741_v14  ;;  %v1730_v33 = vmul.f32 %v10935_v3, %v1729_v56  ;;  %9254 = vrsqrt.f32 %v10951_v7  ;;  %vm11019_vm15 = vmor %vm1744_vm7, %vm1745_vm11  ;;  %v759_v56 = vld [vmem:[%s10046_s18 + $0x200] sm:$0xff] }
  0xdf   : > { %476 = vst.msk [vmem:[#allocation2 + $0x218] sm:$0xff] %vm407_vm0, %v9877_v0  ;;  %v1697_v57 = vsel %vm10983_vm14, %v10842_v18, %v1693_v51  ;;  %v1720_v36 = vmul.f32 %v10955_v4, %v1719_v13  ;;  %v10999_v10 = vadd.f32 1e-08, %v1357_v12  ;;  %v885_v39 = vmul.f32 %v757_v9, %v757_v9 }
  0xe0   : > { %477 = vst.msk [vmem:[#allocation2 + $0x220] sm:$0xff] %vm407_vm0, %v9877_v0  ;;  %v1743_v31 = vmul.f32 %v10892_v32, %v1742_v27  ;;  %v1731_v37 = vmul.f32 0.5, %v1730_v33  ;;  %v883_v41 = vmul.f32 %v755_v34, %v755_v34  ;;  %vm1725_vm2 = vweird.f32 %v10955_v4 }
  0xe1   : > { %478 = vst.msk [vmem:[#allocation2 + $0x228] sm:$0x3f] %vm412_vm1, %v9877_v0  ;;  %v11004_v40 = vpop.xlane.xlu1 %1018  ;;  %v11006_v15 = vpop.eup %9252  ;;  %v1721_v18 = vmul.f32 0.5, %v1720_v36  ;;  %9256 = vrsqrt.f32 %v10999_v10  ;;  %v1137_v46 = vsel %vm407_vm0, %v885_v39, 0.0  ;;  %vm1774_vm3 = vweird.f32 %v10918_v58  ;;  %vm11070_vm6 = vmor %vm1724_vm13, %vm1725_vm2 }
  0xe2   : > { %479 = vst.msk [vmem:[#allocation2 + $0x230] sm:$0xff] %vm407_vm0, %v9877_v0  ;;  %v1769_v25 = vmul.f32 %v11006_v15, %v10918_v58  ;;  %v11026_v45 = vpop.xlane.xlu2 %1021  ;;  %1138 = vadd.xlane.f32.xlu2 %v1137_v46  ;;  %vm1764_vm5 = vweird.f32 %v10951_v7  ;;  %vm1775_vm7 = vweird.f32 %v11006_v15 }
  0xe3   : > { %480 = vst.msk [vmem:[#allocation2 + $0x238] sm:$0xff] %vm407_vm0, %v9877_v0  ;;  %v1722_v55 = vsub.f32 1.5, %v1721_v18  ;;  %vm1776_vm8 = vmor %vm1774_vm3, %vm1775_vm7  ;;  %v1365_v44 = vmul.f32 %v10452_v17, %v11026_v45  ;;  %v9495_v45 = vld [vmem:[%s10046_s18 + $0x80] sm:$0xff] }
  0xe4   : > { %481 = vst.msk [vmem:[#allocation2 + $0x240] sm:$0xff] %vm407_vm0, %v9877_v0  ;;  %v11035_v49 = vpop.eup %9254  ;;  %v1770_v54 = vmul.f32 %v11006_v15, %v1769_v25  ;;  %v762_v25 = vld [vmem:[%s10046_s18 + $0x218] sm:$0xff] }
  0xe5   : > { %482 = vst.msk [vmem:[#allocation2 + $0x248] sm:$0xff] %vm407_vm0, %v9877_v0  ;;  %v1723_v60 = vmul.f32 %v10955_v4, %v1722_v55  ;;  %v1759_v61 = vmul.f32 %v11035_v49, %v10951_v7  ;;  %vm1765_vm9 = vweird.f32 %v11035_v49 }
  0xe6   : > { %483 = vst.msk [vmem:[#allocation2 + $0x250] sm:$0x3f] %vm412_vm1, %v9877_v0  ;;  %v1771_v24 = vmul.f32 0.5, %v1770_v54  ;;  %vm11132_vm11 = vmor %vm1764_vm5, %vm1765_vm9 }
  0xe7   : > { %484 = vst.msk [vmem:[#allocation2 + $0x258] sm:$0xff] %vm407_vm0, %v9877_v0  ;;  %v11078_v8 = vpop.eup %9256  ;;  %v1727_v5 = vsel %vm11070_vm6, %v10955_v4, %v1723_v60  ;;  %v1760_v12 = vmul.f32 %v11035_v49, %v1759_v61  ;;  %v9493_v4 = vld [vmem:[%s10046_s18 + $0x60] sm:$0xff]  ;;  %v890_v60 = vmul.f32 %v762_v25, %v762_v25 }
  0xe8   : > { %485 = vst.msk [vmem:[#allocation2 + $0x260] sm:$0xff] %vm407_vm0, %v9877_v0  ;;  %v1772_v14 = vsub.f32 1.5, %v1771_v24  ;;  %v2890_v13 = vmul.f32 %v9493_v4, %v1727_v5  ;;  %vm1755_vm10 = vweird.f32 %v11078_v8 }
  0xe9   : > { %486 = vst.msk [vmem:[#allocation2 + $0x268] sm:$0xff] %vm407_vm0, %v9877_v0  ;;  %v1761_v9 = vmul.f32 0.5, %v1760_v12  ;;  %v11108_v33 = vpop.xlane.xlu1 %1027 }
  0xea   : > { %487 = vst.msk [vmem:[#allocation2 + $0x270] sm:$0xff] %vm407_vm0, %v9877_v0  ;;  %v1773_v20 = vmul.f32 %v11006_v15, %v1772_v14  ;;  %v1031_v58 = vpop.xlane.xlu2 %1030 }
  0xeb   : > { %488 = vst.msk [vmem:[#allocation2 + $0x278] sm:$0x3f] %vm412_vm1, %v9877_v0  ;;  %v1762_v34 = vsub.f32 1.5, %v1761_v9  ;;  %v1367_v9 = vmul.f32 %v10452_v17, %v11108_v33 }
  0xec   : > { %489 = vst.msk [vmem:[#allocation2 + $0x280] sm:$0xff] %vm407_vm0, %v9877_v0 }
  0xed   : > { %490 = vst.msk [vmem:[#allocation2 + $0x288] sm:$0xff] %vm407_vm0, %v9877_v0  ;;  %v11213_v33 = vadd.f32 1e-08, %v1367_v9  ;;  %v9500_v9 = vld [vmem:[%s10046_s18 + $0xb8] sm:$0xff] }
  0xee   : > { %491 = vst.msk [vmem:[#allocation2 + $0x290] sm:$0xff] %vm407_vm0, %v9877_v0 }
  0xef   : > { %492 = vst.msk [vmem:[#allocation2 + $0x298] sm:$0xff] %vm407_vm0, %v9877_v0 }
  0xf0   : > { %493 = vst.msk [vmem:[#allocation2 + $0x2a0] sm:$0x3f] %vm412_vm1, %v9877_v0 }
  0xf1   : > { %494 = vst.msk [vmem:[#allocation2 + $0x2a8] sm:$0xff] %vm407_vm0, %v9877_v0  ;;  %v11183_v5 = vpop.xlane.xlu1 %1036 }
  0xf2   : > { %495 = vst.msk [vmem:[#allocation2 + $0x2b0] sm:$0xff] %vm407_vm0, %v9877_v0  ;;  %v11192_v4 = vpop.xlane.xlu2 %1039 }
  0xf3   : > { %496 = vst.msk [vmem:[#allocation2 + $0x2b8] sm:$0xff] %vm407_vm0, %v9877_v0 }
  0xf4   : > { %497 = vst.msk [vmem:[#allocation2 + $0x2c0] sm:$0xff] %vm407_vm0, %v9877_v0 }
  0xf5   : > { %498 = vst.msk [vmem:[#allocation2 + $0x2c8] sm:$0x3f] %vm412_vm1, %v9877_v0 }
  0xf6   : > { %499 = vst.msk [vmem:[#allocation2 + $0x2d0] sm:$0xff] %vm407_vm0, %v9877_v0 }
  0xf7   : > { %500 = vst.msk [vmem:[#allocation2 + $0x2d8] sm:$0xff] %vm407_vm0, %v9877_v0 }
  0xf8   : > { %501 = vst.msk [vmem:[#allocation2 + $0x2e0] sm:$0xff] %vm407_vm0, %v9877_v0 }
  0xf9   : > { %502 = vst.msk [vmem:[#allocation2 + $0x2e8] sm:$0xff] %vm407_vm0, %v9877_v0 }
  0xfa   : > { %503 = vst.msk [vmem:[#allocation2 + $0x2f0] sm:$0x3f] %vm412_vm1, %v9877_v0 }
  0xfb   : > { %504 = vst.msk [vmem:[#allocation2 + $0x2f8] sm:$0xff] %vm407_vm0, %v9877_v0 }
  0xfc   : > { %505 = vst.msk [vmem:[#allocation2 + $0x300] sm:$0xff] %vm407_vm0, %v9877_v0 }
  0xfd   : > { %506 = vst.msk [vmem:[#allocation2 + $0x308] sm:$0xff] %vm407_vm0, %v9877_v0 }
  0xfe   : > { %507 = vst.msk [vmem:[#allocation2 + $0x310] sm:$0xff] %vm407_vm0, %v9877_v0 }
  0xff   : > { %508 = vst.msk [vmem:[#allocation2 + $0x318] sm:$0x3f] %vm412_vm1, %v9877_v0 }
 0x100   : > { %509 = vst.msk [vmem:[#allocation2 + $0x320] sm:$0xff] %vm407_vm0, %v9877_v0 }
 0x101   : > { %510 = vst.msk [vmem:[#allocation2 + $0x328] sm:$0xff] %vm407_vm0, %v9877_v0 }
 0x102   : > { %511 = vst.msk [vmem:[#allocation2 + $0x330] sm:$0xff] %vm407_vm0, %v9877_v0 }
 0x103   : > { %512 = vst.msk [vmem:[#allocation2 + $0x338] sm:$0xff] %vm407_vm0, %v9877_v0 }
 0x104   : > { %513 = vst.msk [vmem:[#allocation2 + $0x340] sm:$0x3f] %vm412_vm1, %v9877_v0 }
 0x105   : > { %514 = vst.msk [vmem:[#allocation2 + $0x348] sm:$0xff] %vm407_vm0, %v9877_v0 }
 0x106   : > { %515 = vst.msk [vmem:[#allocation2 + $0x350] sm:$0xff] %vm407_vm0, %v9877_v0 }
 0x107   : > { %516 = vst.msk [vmem:[#allocation2 + $0x358] sm:$0xff] %vm407_vm0, %v9877_v0 }
 0x108   : > { %517 = vst.msk [vmem:[#allocation2 + $0x360] sm:$0xff] %vm407_vm0, %v9877_v0 }
 0x109   : > { %518 = vst.msk [vmem:[#allocation2 + $0x368] sm:$0x3f] %vm412_vm1, %v9877_v0 }
 0x10a   : > { %519 = vst.msk [vmem:[#allocation2 + $0x370] sm:$0xff] %vm407_vm0, %v9877_v0 }
 0x10b   : > { %520 = vst.msk [vmem:[#allocation2 + $0x378] sm:$0xff] %vm407_vm0, %v9877_v0 }
 0x10c   : > { %521 = vst.msk [vmem:[#allocation2 + $0x380] sm:$0xff] %vm407_vm0, %v9877_v0 }
 0x10d   : > { %522 = vst.msk [vmem:[#allocation2 + $0x388] sm:$0xff] %vm407_vm0, %v9877_v0 }
 0x10e   : > { %523 = vst.msk [vmem:[#allocation2 + $0x390] sm:$0x3f] %vm412_vm1, %v9877_v0 }
 0x10f   : > { %524 = vst.msk [vmem:[#allocation2 + $0x398] sm:$0xff] %vm407_vm0, %v9877_v0 }
 0x110   : > { %525 = vst.msk [vmem:[#allocation2 + $0x3a0] sm:$0xff] %vm407_vm0, %v9877_v0 }
 0x111   : > { %526 = vst.msk [vmem:[#allocation2 + $0x3a8] sm:$0xff] %vm407_vm0, %v9877_v0 }
 0x112   : > { %527 = vst.msk [vmem:[#allocation2 + $0x3b0] sm:$0xff] %vm407_vm0, %v9877_v0 }
 0x113   : > { %528 = vst.msk [vmem:[#allocation2 + $0x3b8] sm:$0x3f] %vm412_vm1, %v9877_v0 }
 0x114   : > { %529 = vst.msk [vmem:[#allocation2 + $0x3c0] sm:$0xff] %vm407_vm0, %v9877_v0 }
 0x115   : > { %530 = vst.msk [vmem:[#allocation2 + $0x3c8] sm:$0xff] %vm407_vm0, %v9877_v0 }
 0x116   : > { %531 = vst.msk [vmem:[#allocation2 + $0x3d0] sm:$0xff] %vm407_vm0, %v9877_v0 }
 0x117   : > { %532 = vst.msk [vmem:[#allocation2 + $0x3d8] sm:$0xff] %vm407_vm0, %v9877_v0 }
 0x118   : > { %533 = vst.msk [vmem:[#allocation2 + $0x3e0] sm:$0x3f] %vm412_vm1, %v9877_v0 }
 0x119   : > { %534 = vst.msk [vmem:[#allocation2 + $0x3e8] sm:$0xff] %vm407_vm0, %v9877_v0 }
 0x11a   : > { %535 = vst.msk [vmem:[#allocation2 + $0x3f0] sm:$0xff] %vm407_vm0, %v9877_v0 }
 0x11b   : > { %536 = vst.msk [vmem:[#allocation2 + $0x3f8] sm:$0xff] %vm407_vm0, %v9877_v0 }
 0x11c   : > { %537 = vst.msk [vmem:[#allocation2 + $0x400] sm:$0xff] %vm407_vm0, %v9877_v0 }
 0x11d   : > { %538 = vst.msk [vmem:[#allocation2 + $0x408] sm:$0x3f] %vm412_vm1, %v9877_v0 }
 0x11e   : > { %539 = vst.msk [vmem:[#allocation2 + $0x410] sm:$0xff] %vm407_vm0, %v9877_v0 }
 0x11f   : > { %540 = vst.msk [vmem:[#allocation2 + $0x418] sm:$0xff] %vm407_vm0, %v9877_v0 }
 0x120   : > { %541 = vst.msk [vmem:[#allocation2 + $0x420] sm:$0xff] %vm407_vm0, %v9877_v0 }
 0x121   : > { %542 = vst.msk [vmem:[#allocation2 + $0x428] sm:$0xff] %vm407_vm0, %v9877_v0 }
 0x122   : > { %543 = vst.msk [vmem:[#allocation2 + $0x430] sm:$0x3f] %vm412_vm1, %v9877_v0 }
 0x123   : > { %544 = vst.msk [vmem:[#allocation2 + $0x438] sm:$0xff] %vm407_vm0, %v9877_v0 }
 0x124   : > { %545 = vst.msk [vmem:[#allocation2 + $0x440] sm:$0xff] %vm407_vm0, %v9877_v0 }
 0x125   : > { %546 = vst.msk [vmem:[#allocation2 + $0x448] sm:$0xff] %vm407_vm0, %v9877_v0 }
 0x126   : > { %547 = vst.msk [vmem:[#allocation2 + $0x450] sm:$0xff] %vm407_vm0, %v9877_v0 }
 0x127   : > { %548 = vst.msk [vmem:[#allocation2 + $0x458] sm:$0x3f] %vm412_vm1, %v9877_v0 }
 0x128   : > { %549 = vst.msk [vmem:[#allocation2 + $0x460] sm:$0xff] %vm407_vm0, %v9877_v0 }
 0x129   : > { %550 = vst.msk [vmem:[#allocation2 + $0x468] sm:$0xff] %vm407_vm0, %v9877_v0 }
 0x12a   : > { %551 = vst.msk [vmem:[#allocation2 + $0x470] sm:$0xff] %vm407_vm0, %v9877_v0 }
 0x12b   : > { %552 = vst.msk [vmem:[#allocation2 + $0x478] sm:$0xff] %vm407_vm0, %v9877_v0 }
 0x12c   : > { %553 = vst.msk [vmem:[#allocation2 + $0x480] sm:$0x3f] %vm412_vm1, %v9877_v0 }
 0x12d   : > { %554 = vst.msk [vmem:[#allocation2 + $0x488] sm:$0xff] %vm407_vm0, %v9877_v0 }
 0x12e   : > { %555 = vst.msk [vmem:[#allocation2 + $0x490] sm:$0xff] %vm407_vm0, %v9877_v0 }
 0x12f   : > { %556 = vst.msk [vmem:[#allocation2 + $0x498] sm:$0xff] %vm407_vm0, %v9877_v0 }
 0x130   : > { %557 = vst.msk [vmem:[#allocation2 + $0x4a0] sm:$0xff] %vm407_vm0, %v9877_v0 }
 0x131   : > { %558 = vst.msk [vmem:[#allocation2 + $0x4a8] sm:$0x3f] %vm412_vm1, %v9877_v0 }
 0x132   : > { %559 = vst.msk [vmem:[#allocation2 + $0x4b0] sm:$0xff] %vm407_vm0, %v10706_v11 }
 0x133   : > { %560 = vst.msk [vmem:[#allocation2 + $0x4b8] sm:$0xff] %vm407_vm0, %v10706_v11 }
 0x134   : > { %561 = vst.msk [vmem:[#allocation2 + $0x4c0] sm:$0xff] %vm407_vm0, %v10706_v11 }
 0x135   : > { %562 = vst.msk [vmem:[#allocation2 + $0x4c8] sm:$0xff] %vm407_vm0, %v10706_v11 }
 0x136   : > { %563 = vst.msk [vmem:[#allocation2 + $0x4d0] sm:$0x3f] %vm412_vm1, %v10706_v11 }
 0x137   : > { %564 = vst.msk [vmem:[#allocation2 + $0x4d8] sm:$0xff] %vm407_vm0, %v10706_v11 }
 0x138   : > { %565 = vst.msk [vmem:[#allocation2 + $0x4e0] sm:$0xff] %vm407_vm0, %v10706_v11 }
 0x139   : > { %566 = vst.msk [vmem:[#allocation2 + $0x4e8] sm:$0xff] %vm407_vm0, %v10706_v11 }
 0x13a   : > { %567 = vst.msk [vmem:[#allocation2 + $0x4f0] sm:$0xff] %vm407_vm0, %v10706_v11 }
 0x13b   : > { %568 = vst.msk [vmem:[#allocation2 + $0x4f8] sm:$0x3f] %vm412_vm1, %v10706_v11 }
 0x13c   : > { %569 = vst.msk [vmem:[#allocation2 + $0x500] sm:$0xff] %vm407_vm0, %v10706_v11 }
 0x13d   : > { %570 = vst.msk [vmem:[#allocation2 + $0x508] sm:$0xff] %vm407_vm0, %v10706_v11 }
 0x13e   : > { %571 = vst.msk [vmem:[#allocation2 + $0x510] sm:$0xff] %vm407_vm0, %v10706_v11 }
 0x13f   : > { %572 = vst.msk [vmem:[#allocation2 + $0x518] sm:$0xff] %vm407_vm0, %v10706_v11 }
 0x140   : > { %573 = vst.msk [vmem:[#allocation2 + $0x520] sm:$0x3f] %vm412_vm1, %v10706_v11 }
 0x141   : > { %574 = vst.msk [vmem:[#allocation2 + $0x528] sm:$0xff] %vm407_vm0, %v10706_v11 }
 0x142   : > { %575 = vst.msk [vmem:[#allocation2 + $0x530] sm:$0xff] %vm407_vm0, %v10706_v11 }
 0x143   : > { %576 = vst.msk [vmem:[#allocation2 + $0x538] sm:$0xff] %vm407_vm0, %v10706_v11 }
 0x144   : > { %577 = vst.msk [vmem:[#allocation2 + $0x540] sm:$0xff] %vm407_vm0, %v10706_v11 }
 0x145   : > { %578 = vst.msk [vmem:[#allocation2 + $0x548] sm:$0x3f] %vm412_vm1, %v10706_v11 }
 0x146   : > { %579 = vst.msk [vmem:[#allocation2 + $0x550] sm:$0xff] %vm407_vm0, %v10706_v11 }
 0x147   : > { %580 = vst.msk [vmem:[#allocation2 + $0x558] sm:$0xff] %vm407_vm0, %v10706_v11 }
 0x148   : > { %581 = vst.msk [vmem:[#allocation2 + $0x560] sm:$0xff] %vm407_vm0, %v10706_v11 }
 0x149   : > { %582 = vst.msk [vmem:[#allocation2 + $0x568] sm:$0xff] %vm407_vm0, %v10706_v11 }
 0x14a   : > { %583 = vst.msk [vmem:[#allocation2 + $0x570] sm:$0x3f] %vm412_vm1, %v10706_v11  ;;  %v9489_v11 = vld [vmem:[%s10046_s18 + $0x50] sm:$0xff]  ;;  %vm1735_vm1 = vweird.f32 %v10935_v3 }
 0x14b   : > { %3011 = vst.msk [vmem:[#allocation2 + $0xa3] sm:$0xff] %vm407_vm0, %v10648_v38  ;;  %v10993_v35 = vmul.f32 %v9489_v11, %v1707_v19  ;;  %v884_v38 = vmul.f32 %v756_v16, %v756_v16  ;;  %vm11051_vm4 = vmor %vm1734_vm12, %vm1735_vm1  ;;  %v887_v11 = vmul.f32 %v759_v56, %v759_v56  ;;  %vm1754_vm12 = vweird.f32 %v10999_v10 }
 0x14c   : > { %3009 = vst.msk [vmem:[#allocation2 + $0x8b] sm:$0xff] %vm407_vm0, %v10688_v62  ;;  %v9490_v62 = vld [vmem:[%s10046_s18 + $0x48] sm:$0xff]  ;;  %vm1756_vm14 = vmor %vm1754_vm12, %vm1755_vm10  ;;  %v1368_v56 = vmul.f32 %v10452_v17, %v1031_v58 }
 0x14d   : > { %3007 = vst.msk [vmem:[#allocation2 + $0x7b] sm:$0xff] %vm407_vm0, %v10699_v6  ;;  %v2887_v42 = vmul.f32 %v9490_v62, %v1697_v57  ;;  %v1732_v6 = vsub.f32 1.5, %v1731_v37  ;;  %v1134_v47 = vsel %vm407_vm0, %v884_v38, 0.0  ;;  %v1777_v57 = vsel %vm1776_vm8, %v11006_v15, %v1773_v20  ;;  %v9494_v37 = vld [vmem:[%s10046_s18 + $0x88] sm:$0xff] }
 0x14e   : > { %3012 = vst.msk [vmem:[#allocation2 + $0xab] sm:$0xff] %vm407_vm0, %v10749_v28  ;;  %v1747_v28 = vsel %vm11019_vm15, %v10892_v32, %v1743_v31  ;;  %1135 = vadd.xlane.f32.xlu1 %v1134_v47  ;;  %v11043_v32 = vpop.xlane.xlu0 %1015  ;;  %v763_v31 = vld [vmem:[%s10046_s18 + $0x220] sm:$0xff]  ;;  %v2895_v39 = vmul.f32 %v9494_v37, %v1777_v57  ;;  %v1763_v38 = vmul.f32 %v11035_v49, %v1762_v34  ;;  %v11200_v34 = vadd.f32 1e-08, %v1368_v56 }
 0x14f   : > { %3010 = vst.msk [vmem:[#allocation2 + $0x93] sm:$0xff] %vm407_vm0, %v10801_v53  ;;  %v1733_v30 = vmul.f32 %v10935_v3, %v1732_v6  ;;  %v1131_v53 = vsel %vm407_vm0, %v883_v41, 0.0  ;;  %v1143_v41 = vsel %vm407_vm0, %v887_v11, 0.0  ;;  %v1364_v6 = vmul.f32 %v10452_v17, %v11004_v40  ;;  %v766_v11 = vld [vmem:[%s10046_s18 + $0x238] sm:$0xff] }
 0x150   : > { %3008 = vst.msk [vmem:[#allocation2 + $0x83] sm:$0xff] %vm407_vm0, %v10819_v1  ;;  %1132 = vadd.xlane.f32.xlu0 %v1131_v53  ;;  %v1767_v7 = vsel %vm11132_vm11, %v11035_v49, %v1763_v38  ;;  %v891_v46 = vmul.f32 %v763_v31, %v763_v31  ;;  %v1363_v54 = vmul.f32 %v10452_v17, %v11043_v32  ;;  %v11162_v49 = vadd.f32 1e-08, %v1365_v44  ;;  %v9497_v38 = vld [vmem:[%s10046_s18 + $0xa0] sm:$0xff] }
 0x151   : > { %3015 = vst.msk [vmem:[#allocation2 + $0xcb] sm:$0xff] %vm407_vm0, %v10847_v23  ;;  %v1362_v23 = vmul.f32 %v10452_v17, %v10905_v59  ;;  %v1737_v26 = vsel %vm11051_vm4, %v10935_v3, %v1733_v30  ;;  %v1361_v59 = vmul.f32 %v10452_v17, %v10907_v48  ;;  %v9491_v3 = vld [vmem:[%s10046_s18 + $0x70] sm:$0xff]  ;;  %v760_v48 = vld [vmem:[%s10046_s18 + $0x208] sm:$0xff]  ;;  %v2894_v47 = vmul.f32 %v9495_v45, %v1767_v7 }
 0x152   : > { %3014 = vst.msk [vmem:[#allocation2 + $0xbb] sm:$0xff] %vm407_vm0, %v10912_v50  ;;  %v1360_v50 = vmul.f32 %v10452_v17, %v10933_v2  ;;  %v2892_v29 = vmul.f32 %v9491_v3, %v1747_v28  ;;  %v9492_v2 = vld [vmem:[%s10046_s18 + $0x68] sm:$0xff]  ;;  %v888_v27 = vmul.f32 %v760_v48, %v760_v48  ;;  %v11164_v1 = vadd.f32 1e-08, %v1364_v6  ;;  %v761_v3 = vld [vmem:[%s10046_s18 + $0x210] sm:$0xff]  ;;  %v9498_v6 = vld [vmem:[%s10046_s18 + $0x98] sm:$0xff] }
 0x153   : > { %3013 = vst.msk [vmem:[#allocation2 + $0xb3] sm:$0xff] %vm407_vm0, %v10915_v52  ;;  %v11087_v19 = vadd.f32 1e-08, %v1362_v23  ;;  %v2891_v51 = vmul.f32 %v9492_v2, %v1737_v26  ;;  %v1749_v52 = vmul.f32 %v11078_v8, %v10999_v10  ;;  %v11101_v16 = vadd.f32 1e-08, %v1361_v59  ;;  %v764_v7 = vld [vmem:[%s10046_s18 + $0x228] sm:$0xff] }
 0x154   : > { %3018 = vst.msk [vmem:[#allocation2 + $0xe3] sm:$0xff] %vm407_vm0, %v10977_v21  ;;  %v11106_v22 = vadd.f32 1e-08, %v1360_v50  ;;  %v1146_v18 = vsel %vm407_vm0, %v888_v27, 0.0  ;;  %v1155_v50 = vsel %vm407_vm0, %v891_v46, 0.0  ;;  %v1152_v2 = vsel %vm407_vm0, %v890_v60, 0.0 }
 0x155   : > { %3017 = vst.msk [vmem:[#allocation2 + $0xdb] sm:$0xff] %vm407_vm0, %v10993_v35  ;;  %9258 = vrsqrt.f32 %v11087_v19  ;;  %v1750_v21 = vmul.f32 %v11078_v8, %v1749_v52  ;;  %v758_v35 = vld [vmem:[%s10046_s18 + $0x1f8] sm:$0xff]  ;;  %1147 = vadd.xlane.f32.xlu2 %v1146_v18  ;;  %vm1804_vm13 = vweird.f32 %v11087_v19  ;;  %vm1794_vm1 = vweird.f32 %v11101_v16  ;;  %v9499_v46 = vld [vmem:[%s10046_s18 + $0x90] sm:$0xff] }
 0x156   : > { %3016 = vst.msk [vmem:[#allocation2 + $0xd3] sm:$0xff] %vm407_vm0, %v2887_v42  ;;  %9260 = vrsqrt.f32 %v11101_v16  ;;  %1144 = vadd.xlane.f32.xlu1 %v1143_v41  ;;  %v886_v42 = vmul.f32 %v758_v35, %v758_v35  ;;  %v11141_v28 = vpop.xlane.xlu0 %1024  ;;  %vm1784_vm15 = vweird.f32 %v11106_v22  ;;  %v11188_v48 = vadd.f32 1e-08, %v1363_v54 }
 0x157   : > { %3021 = vst.msk [vmem:[#allocation2 + $0x103] sm:$0xff] %vm407_vm0, %v2892_v29  ;;  %v1751_v36 = vmul.f32 0.5, %v1750_v21  ;;  %9262 = vrsqrt.f32 %v11106_v22  ;;  %v889_v52 = vmul.f32 %v761_v3, %v761_v3  ;;  %vm1834_vm6 = vweird.f32 %v11162_v49 }
 0x158   : > { %3020 = vst.msk [vmem:[#allocation2 + $0xfb] sm:$0xff] %vm407_vm0, %v2891_v51  ;;  %v1140_v10 = vsel %vm407_vm0, %v886_v42, 0.0  ;;  %9264 = vrsqrt.f32 %v11162_v49  ;;  %vm1824_vm9 = vweird.f32 %v11164_v1  ;;  %vm1814_vm11 = vweird.f32 %v11188_v48 }
 0x159   : > { %3019 = vst.msk [vmem:[#allocation2 + $0xf3] sm:$0xff] %vm407_vm0, %v2890_v13  ;;  %v1752_v62 = vsub.f32 1.5, %v1751_v36  ;;  %1141 = vadd.xlane.f32.xlu0 %v1140_v10  ;;  %9266 = vrsqrt.f32 %v11164_v1  ;;  %v1149_v27 = vsel %vm407_vm0, %v889_v52, 0.0 }
 0x15a   : > { %3024 = vst.msk [vmem:[#allocation2 + $0x123] sm:$0xff] %vm407_vm0, %v2895_v39  ;;  %9268 = vrsqrt.f32 %v11188_v48 }
 0x15b   : > { %v11143_v55 = vpop.eup %9258  ;;  %v1753_v40 = vmul.f32 %v11078_v8, %v1752_v62  ;;  %3023 = vst.msk [vmem:[#allocation2 + $0x11b] sm:$0xff] %vm407_vm0, %v2894_v47  ;;  %v894_v62 = vmul.f32 %v766_v11, %v766_v11  ;;  %9270 = vrsqrt.f32 %v11200_v34  ;;  %v9501_v11 = vld [vmem:[%s10046_s18 + $0xb0] sm:$0xff] }
 0x15c   : > { %v1799_v30 = vmul.f32 %v11143_v55, %v11087_v19  ;;  %v11157_v53 = vpop.eup %9260  ;;  %vm1805_vm2 = vweird.f32 %v11143_v55  ;;  %v1366_v19 = vmul.f32 %v10452_v17, %v11141_v28  ;;  %9272 = vrsqrt.f32 %v11213_v33 }
 0x15d   : > { %v11166_v61 = vpop.eup %9262  ;;  %v1757_v23 = vsel %vm1756_vm14, %v11078_v8, %v1753_v40  ;;  %v1789_v26 = vmul.f32 %v11157_v53, %v11101_v16  ;;  %1156 = vadd.xlane.f32.xlu2 %v1155_v50  ;;  %vm1795_vm3 = vweird.f32 %v11157_v53  ;;  %vm1806_vm4 = vmor %vm1804_vm13, %vm1805_vm2  ;;  %v1164_v10 = vsel %vm407_vm0, %v894_v62, 0.0  ;;  %v9502_v62 = vld [vmem:[%s10046_s18 + $0xa8] sm:$0xff] }
 0x15e   : > { %v1800_v32 = vmul.f32 %v11143_v55, %v1799_v30  ;;  %v2893_v24 = vmul.f32 %v9496_v63, %v1757_v23  ;;  %v1779_v59 = vmul.f32 %v11166_v61, %v11106_v22  ;;  %1153 = vadd.xlane.f32.xlu1 %v1152_v2  ;;  %v11203_v35 = vpop.xlane.xlu0 %1033  ;;  %v11205_v57 = vpop.eup %9264  ;;  %vm1785_vm5 = vweird.f32 %v11166_v61  ;;  %vm1796_vm7 = vmor %vm1794_vm1, %vm1795_vm3  ;;  %v765_v22 = vld [vmem:[%s10046_s18 + $0x230] sm:$0xff] }
 0x15f   : > { %v1790_v8 = vmul.f32 %v11157_v53, %v1789_v26  ;;  %v11215_v31 = vpop.eup %9266  ;;  %v1829_v39 = vmul.f32 %v11205_v57, %v11162_v49  ;;  %vm1786_vm8 = vmor %vm1784_vm15, %vm1785_vm5  ;;  %vm1835_vm10 = vweird.f32 %v11205_v57  ;;  %v11253_v30 = vpop.xlane.xlu1 %1045  ;;  %v893_v23 = vmul.f32 %v765_v22, %v765_v22 }
 0x160   : > { %v1801_v29 = vmul.f32 0.5, %v1800_v32  ;;  %3022 = vst.msk [vmem:[#allocation2 + $0x10b] sm:$0xff] %vm407_vm0, %v2893_v24  ;;  %v1780_v12 = vmul.f32 %v11166_v61, %v1779_v59  ;;  %v1819_v15 = vmul.f32 %v11215_v31, %v11164_v1  ;;  %v11239_v16 = vpop.eup %9268  ;;  %vm1825_vm12 = vweird.f32 %v11215_v31  ;;  %v11262_v26 = vpop.xlane.xlu2 %1048  ;;  %vm1836_vm14 = vmor %vm1834_vm6, %vm1835_vm10 }
 0x161   : > { %v1791_v14 = vmul.f32 0.5, %v1790_v8  ;;  %1150 = vadd.xlane.f32.xlu0 %v1149_v27  ;;  %v1830_v44 = vmul.f32 %v11205_v57, %v1829_v39  ;;  %v1809_v40 = vmul.f32 %v11239_v16, %v11188_v48  ;;  %v892_v32 = vmul.f32 %v764_v7, %v764_v7  ;;  %v11268_v59 = vpop.eup %9270  ;;  %vm1826_vm15 = vmor %vm1824_vm9, %vm1825_vm12 }
 0x162   : > { %v1802_v51 = vsub.f32 1.5, %v1801_v29  ;;  %v1781_v13 = vmul.f32 0.5, %v1780_v12  ;;  %vm1864_vm13 = vweird.f32 %v11200_v34  ;;  %v1371_v24 = vmul.f32 %v10452_v17, %v11192_v4  ;;  %v11275_v2 = vpop.eup %9272 }
 0x163   : > { %v1792_v21 = vsub.f32 1.5, %v1791_v14  ;;  %v1831_v47 = vmul.f32 0.5, %v1830_v44  ;;  %v1161_v29 = vsel %vm407_vm0, %v893_v23, 0.0  ;;  %v1158_v8 = vsel %vm407_vm0, %v892_v32, 0.0 }
 0x164   : > { %v1803_v20 = vmul.f32 %v11143_v55, %v1802_v51  ;;  %v1782_v36 = vsub.f32 1.5, %v1781_v13  ;;  %vm1815_vm1 = vweird.f32 %v11239_v16  ;;  %v1859_v14 = vmul.f32 %v11268_v59, %v11200_v34  ;;  %v769_v13 = vld [vmem:[%s10046_s18 + $0x250] sm:$0xff] }
 0x165   : > { %v1793_v37 = vmul.f32 %v11157_v53, %v1792_v21  ;;  %v1832_v60 = vsub.f32 1.5, %v1831_v47  ;;  %1165 = vadd.xlane.f32.xlu2 %v1164_v10  ;;  %v11285_v52 = vadd.f32 1e-08, %v1371_v24  ;;  %v1849_v4 = vmul.f32 %v11275_v2, %v11213_v33 }
 0x166   : > { %v1807_v58 = vsel %vm1806_vm4, %v11143_v55, %v1803_v20  ;;  %v1783_v41 = vmul.f32 %v11166_v61, %v1782_v36  ;;  %v1820_v55 = vmul.f32 %v11215_v31, %v1819_v15  ;;  %v11273_v12 = vpop.xlane.xlu0 %1042  ;;  %1162 = vadd.xlane.f32.xlu1 %v1161_v29  ;;  %vm1854_vm2 = vweird.f32 %v11213_v33  ;;  %vm1816_vm4 = vmor %vm1814_vm11, %vm1815_vm1 }
 0x167   : > { %v2898_v18 = vmul.f32 %v9497_v38, %v1807_v58  ;;  %v1797_v42 = vsel %vm1796_vm7, %v11157_v53, %v1793_v37  ;;  %v11257_v53 = vadd.f32 1e-08, %v1366_v19  ;;  %v1833_v50 = vmul.f32 %v11205_v57, %v1832_v60  ;;  %v768_v38 = vld [vmem:[%s10046_s18 + $0x248] sm:$0xff]  ;;  %v11321_v15 = vpop.xlane.xlu1 %1054 }
 0x168   : > { %v2897_v25 = vmul.f32 %v9498_v6, %v1797_v42  ;;  %v1787_v28 = vsel %vm1786_vm8, %v11166_v61, %v1783_v41  ;;  %v1821_v54 = vmul.f32 0.5, %v1820_v55  ;;  %v1810_v61 = vmul.f32 %v11239_v16, %v1809_v40  ;;  %v767_v55 = vld [vmem:[%s10046_s18 + $0x240] sm:$0xff]  ;;  %v11331_v22 = vpop.xlane.xlu2 %1057 }
 0x169   : > { %3027 = vst.msk [vmem:[#allocation2 + $0x143] sm:$0xff] %vm407_vm0, %v2898_v18  ;;  %v2896_v45 = vmul.f32 %v9499_v46, %v1787_v28  ;;  %9274 = vrsqrt.f32 %v11257_v53  ;;  %1159 = vadd.xlane.f32.xlu0 %v1158_v8  ;;  %v1837_v56 = vsel %vm1836_vm14, %v11205_v57, %v1833_v50  ;;  %v1860_v27 = vmul.f32 %v11268_v59, %v1859_v14  ;;  %v771_v50 = vld [vmem:[%s10046_s18 + $0x260] sm:$0xff]  ;;  %v770_v14 = vld [vmem:[%s10046_s18 + $0x258] sm:$0xff] }
 0x16a   : > { %3026 = vst.msk [vmem:[#allocation2 + $0x133] sm:$0xff] %vm407_vm0, %v2897_v25  ;;  %v1822_v63 = vsub.f32 1.5, %v1821_v54  ;;  %v1811_v3 = vmul.f32 0.5, %v1810_v61  ;;  %v2901_v20 = vmul.f32 %v9500_v9, %v1837_v56  ;;  %9276 = vrsqrt.f32 %v11285_v52  ;;  %v9503_v61 = vld [vmem:[%s10046_s18 + $0xd0] sm:$0xff] }
 0x16b   : > { %3025 = vst.msk [vmem:[#allocation2 + $0x12b] sm:$0xff] %vm407_vm0, %v2896_v45  ;;  %vm1865_vm3 = vweird.f32 %v11268_v59  ;;  %v1850_v36 = vmul.f32 %v11275_v2, %v1849_v4  ;;  %v1370_v37 = vmul.f32 %v10452_v17, %v11183_v5  ;;  %v1369_v39 = vmul.f32 %v10452_v17, %v11203_v35 }
 0x16c   : > { %v1823_v51 = vmul.f32 %v11215_v31, %v1822_v63  ;;  %v1812_v49 = vsub.f32 1.5, %v1811_v3  ;;  %3030 = vst.msk [vmem:[#allocation2 + $0x15b] sm:$0xff] %vm407_vm0, %v2901_v20  ;;  %v897_v19 = vmul.f32 %v769_v13, %v769_v13  ;;  %vm1855_vm5 = vweird.f32 %v11275_v2  ;;  %vm1866_vm8 = vmor %vm1864_vm13, %vm1865_vm3  ;;  %v9504_v3 = vld [vmem:[%s10046_s18 + $0xc8] sm:$0xff] }
 0x16d   : > { %v1851_v41 = vmul.f32 0.5, %v1850_v36  ;;  %v11324_v44 = vadd.f32 1e-08, %v1370_v37  ;;  %v11326_v35 = vadd.f32 1e-08, %v1369_v39  ;;  %v896_v28 = vmul.f32 %v768_v38, %v768_v38  ;;  %vm1856_vm10 = vmor %vm1854_vm2, %vm1855_vm5 }
 0x16e   : > { %v1827_v21 = vsel %vm1826_vm15, %v11215_v31, %v1823_v51  ;;  %v1813_v1 = vmul.f32 %v11239_v16, %v1812_v49  ;;  %v1861_v31 = vmul.f32 0.5, %v1860_v27  ;;  %vm1844_vm6 = vweird.f32 %v11257_v53  ;;  %v11348_v54 = vpop.xlane.xlu0 %1051 }
 0x16f   : > { %v2900_v57 = vmul.f32 %v9501_v11, %v1827_v21  ;;  %v11304_v58 = vpop.eup %9274  ;;  %v1852_v6 = vsub.f32 1.5, %v1851_v41  ;;  %vm1894_vm7 = vweird.f32 %v11285_v52  ;;  %9278 = vrsqrt.f32 %v11324_v44  ;;  %v11388_v11 = vpop.xlane.xlu1 %1063 }
 0x170   : > { %v1817_v18 = vsel %vm1816_vm4, %v11239_v16, %v1813_v1  ;;  %v1839_v48 = vmul.f32 %v11304_v58, %v11257_v53  ;;  %v1862_v42 = vsub.f32 1.5, %v1861_v31  ;;  %v1173_v16 = vsel %vm407_vm0, %v897_v19, 0.0  ;;  %v11333_v7 = vpop.eup %9276  ;;  %v9505_v1 = vld [vmem:[%s10046_s18 + $0xc0] sm:$0xff]  ;;  %v11398_v37 = vpop.xlane.xlu2 %1066 }
 0x171   : > { %3029 = vst.msk [vmem:[#allocation2 + $0x153] sm:$0xff] %vm407_vm0, %v2900_v57  ;;  %v2899_v5 = vmul.f32 %v9502_v62, %v1817_v18  ;;  %1174 = vadd.xlane.f32.xlu2 %v1173_v16  ;;  %v1853_v45 = vmul.f32 %v11275_v2, %v1852_v6  ;;  %vm1845_vm9 = vweird.f32 %v11304_v58  ;;  %v1889_v40 = vmul.f32 %v11333_v7, %v11285_v52 }
 0x172   : > { %v1840_v25 = vmul.f32 %v11304_v58, %v1839_v48  ;;  %v1863_v46 = vmul.f32 %v11268_v59, %v1862_v42  ;;  %9280 = vrsqrt.f32 %v11326_v35  ;;  %v1170_v34 = vsel %vm407_vm0, %v896_v28, 0.0  ;;  %vm1846_vm12 = vmor %vm1844_vm6, %vm1845_vm9 }
 0x173   : > { %3028 = vst.msk [vmem:[#allocation2 + $0x14b] sm:$0xff] %vm407_vm0, %v2899_v5  ;;  %v895_v60 = vmul.f32 %v767_v55, %v767_v55  ;;  %v1857_v32 = vsel %vm1856_vm10, %v11275_v2, %v1853_v45  ;;  %v1890_v24 = vmul.f32 %v11333_v7, %v1889_v40  ;;  %1171 = vadd.xlane.f32.xlu1 %v1170_v34  ;;  %vm1895_vm11 = vweird.f32 %v11333_v7  ;;  %v9506_v5 = vld [vmem:[%s10046_s18 + $0xe8] sm:$0xff]  ;;  %v774_v40 = vld [vmem:[%s10046_s18 + $0x278] sm:$0xff] }
 0x174   : > { %v1841_v47 = vmul.f32 0.5, %v1840_v25  ;;  %v1867_v10 = vsel %vm1866_vm8, %v11268_v59, %v1863_v46  ;;  %v772_v59 = vld [vmem:[%s10046_s18 + $0x268] sm:$0xff]  ;;  %v2903_v29 = vmul.f32 %v9504_v3, %v1857_v32  ;;  %v1374_v8 = vmul.f32 %v10452_v17, %v11262_v26  ;;  %vm1896_vm13 = vmor %vm1894_vm7, %vm1895_vm11 }
 0x175   : > { %v2904_v23 = vmul.f32 %v9503_v61, %v1867_v10  ;;  %v1167_v33 = vsel %vm407_vm0, %v895_v60, 0.0  ;;  %v1373_v51 = vmul.f32 %v10452_v17, %v11253_v30  ;;  %v1891_v56 = vmul.f32 0.5, %v1890_v24  ;;  %v11374_v4 = vpop.eup %9278 }
 0x176   : > { %v1842_v63 = vsub.f32 1.5, %v1841_v47  ;;  %1168 = vadd.xlane.f32.xlu0 %v1167_v33  ;;  %v1372_v49 = vmul.f32 %v10452_v17, %v11273_v12  ;;  %3032 = vst.msk [vmem:[#allocation2 + $0x173] sm:$0xff] %vm407_vm0, %v2903_v29  ;;  %v11381_v30 = vadd.f32 1e-08, %v1374_v8  ;;  %v900_v13 = vmul.f32 %v772_v59, %v772_v59  ;;  %v11413_v52 = vpop.xlane.xlu0 %1060 }
 0x177   : > { %3033 = vst.msk [vmem:[#allocation2 + $0x17b] sm:$0xff] %vm407_vm0, %v2904_v23  ;;  %v11383_v26 = vadd.f32 1e-08, %v1373_v51  ;;  %v899_v9 = vmul.f32 %v771_v50, %v771_v50  ;;  %v1892_v21 = vsub.f32 1.5, %v1891_v56  ;;  %v1879_v12 = vmul.f32 %v11374_v4, %v11324_v44  ;;  %v11454_v24 = vpop.xlane.xlu1 %1072  ;;  %v9507_v50 = vld [vmem:[%s10046_s18 + $0xe0] sm:$0xff] }
 0x178   : > { %v1843_v2 = vmul.f32 %v11304_v58, %v1842_v63  ;;  %v898_v27 = vmul.f32 %v770_v14, %v770_v14  ;;  %v11390_v57 = vpop.eup %9280  ;;  %9282 = vrsqrt.f32 %v11381_v30  ;;  %v11406_v39 = vadd.f32 1e-08, %v1372_v49  ;;  %v11469_v56 = vpop.xlane.xlu2 %1075 }
 0x179   : > { %v1893_v36 = vmul.f32 %v11333_v7, %v1892_v21  ;;  %v1880_v31 = vmul.f32 %v11374_v4, %v1879_v12  ;;  %9284 = vrsqrt.f32 %v11383_v26  ;;  %v1182_v19 = vsel %vm407_vm0, %v900_v13, 0.0 }
 0x17a   : > { %v1847_v20 = vsel %vm1846_vm12, %v11304_v58, %v1843_v2  ;;  %v1869_v58 = vmul.f32 %v11390_v57, %v11326_v35  ;;  %v1179_v38 = vsel %vm407_vm0, %v899_v9, 0.0  ;;  %1183 = vadd.xlane.f32.xlu2 %v1182_v19  ;;  %v1176_v62 = vsel %vm407_vm0, %v898_v27, 0.0 }
 0x17b   : > { %v2902_v53 = vmul.f32 %v9505_v1, %v1847_v20  ;;  %v1897_v18 = vsel %vm1896_vm13, %v11333_v7, %v1893_v36  ;;  %v1881_v41 = vmul.f32 0.5, %v1880_v31  ;;  %1180 = vadd.xlane.f32.xlu1 %v1179_v38  ;;  %vm1885_vm14 = vweird.f32 %v11374_v4  ;;  %v775_v7 = vld [vmem:[%s10046_s18 + $0x280] sm:$0xff] }
 0x17c   : > { %v1870_v48 = vmul.f32 %v11390_v57, %v1869_v58  ;;  %v2907_v42 = vmul.f32 %v9506_v5, %v1897_v18  ;;  %9286 = vrsqrt.f32 %v11406_v39  ;;  %v1377_v6 = vmul.f32 %v10452_v17, %v11331_v22 }
 0x17d   : > { %3031 = vst.msk [vmem:[#allocation2 + $0x16b] sm:$0xff] %vm407_vm0, %v2902_v53  ;;  %v1882_v25 = vsub.f32 1.5, %v1881_v41  ;;  %v1376_v28 = vmul.f32 %v10452_v17, %v11321_v15  ;;  %v1375_v55 = vmul.f32 %v10452_v17, %v11348_v54  ;;  %vm1884_vm1 = vweird.f32 %v11324_v44  ;;  %v773_v54 = vld [vmem:[%s10046_s18 + $0x270] sm:$0xff] }
 0x17e   : > { %v1871_v16 = vmul.f32 0.5, %v1870_v48  ;;  %1177 = vadd.xlane.f32.xlu0 %v1176_v62  ;;  %v11425_v46 = vpop.eup %9282  ;;  %3036 = vst.msk [vmem:[#allocation2 + $0x19b] sm:$0xff] %vm407_vm0, %v2907_v42  ;;  %vm1874_vm15 = vweird.f32 %v11326_v35  ;;  %vm1924_vm2 = vweird.f32 %v11381_v30  ;;  %v11431_v22 = vadd.f32 1e-08, %v1377_v6  ;;  %vm1886_vm4 = vmor %vm1884_vm1, %vm1885_vm14  ;;  %v9508_v35 = vld [vmem:[%s10046_s18 + $0xd8] sm:$0xff]  ;;  %v11478_v21 = vpop.xlane.xlu0 %1069 }
 0x17f   : > { %v1883_v45 = vmul.f32 %v11374_v4, %v1882_v25  ;;  %vm1875_vm3 = vweird.f32 %v11390_v57  ;;  %v1919_v15 = vmul.f32 %v11425_v46, %v11381_v30  ;;  %v11439_v10 = vpop.eup %9284  ;;  %v11444_v44 = vadd.f32 1e-08, %v1376_v28  ;;  %v9509_v30 = vld [vmem:[%s10046_s18 + $0x100] sm:$0xff] }
 0x180   : > { %v1872_v47 = vsub.f32 1.5, %v1871_v16  ;;  %9288 = vrsqrt.f32 %v11431_v22  ;;  %v11446_v34 = vadd.f32 1e-08, %v1375_v55  ;;  %v903_v60 = vmul.f32 %v775_v7, %v775_v7  ;;  %vm1876_vm6 = vmor %vm1874_vm15, %vm1875_vm3  ;;  %v11523_v7 = vpop.xlane.xlu1 %1081 }
 0x181   : > { %v1887_v61 = vsel %vm1886_vm4, %v11374_v4, %v1883_v45  ;;  %v1920_v32 = vmul.f32 %v11425_v46, %v1919_v15  ;;  %v1909_v63 = vmul.f32 %v11439_v10, %v11383_v26  ;;  %vm1914_vm5 = vweird.f32 %v11383_v26  ;;  %v777_v15 = vld [vmem:[%s10046_s18 + $0x290] sm:$0xff] }
 0x182   : > { %v1873_v23 = vmul.f32 %v11390_v57, %v1872_v47  ;;  %v11456_v59 = vpop.eup %9286  ;;  %v2906_v3 = vmul.f32 %v9507_v50, %v1887_v61  ;;  %9290 = vrsqrt.f32 %v11444_v44  ;;  %v902_v29 = vmul.f32 %v774_v40, %v774_v40  ;;  %v778_v47 = vld [vmem:[%s10046_s18 + $0x298] sm:$0xff]  ;;  %v11540_v61 = vpop.xlane.xlu2 %1084 }
 0x183   : > { %v901_v33 = vmul.f32 %v773_v54, %v773_v54  ;;  %v1921_v51 = vmul.f32 0.5, %v1920_v32  ;;  %v1910_v14 = vmul.f32 %v11439_v10, %v1909_v63  ;;  %v1899_v2 = vmul.f32 %v11456_v59, %v11406_v39 }
 0x184   : > { %v1877_v8 = vsel %vm1876_vm6, %v11390_v57, %v1873_v23  ;;  %vm1904_vm7 = vweird.f32 %v11406_v39  ;;  %3035 = vst.msk [vmem:[#allocation2 + $0x193] sm:$0xff] %vm407_vm0, %v2906_v3  ;;  %vm1925_vm8 = vweird.f32 %v11425_v46  ;;  %vm1915_vm9 = vweird.f32 %v11439_v10  ;;  %v9511_v39 = vld [vmem:[%s10046_s18 + $0xf0] sm:$0xff] }
 0x185   : > { %v2905_v49 = vmul.f32 %v9508_v35, %v1877_v8  ;;  %9292 = vrsqrt.f32 %v11446_v34  ;;  %v1922_v4 = vsub.f32 1.5, %v1921_v51  ;;  %v1911_v13 = vmul.f32 0.5, %v1910_v14  ;;  %vm1926_vm10 = vmor %vm1924_vm2, %vm1925_vm8 }
 0x186   : > { %v1900_v9 = vmul.f32 %v11456_v59, %v1899_v2  ;;  %v1191_v20 = vsel %vm407_vm0, %v903_v60, 0.0  ;;  %v11480_v12 = vpop.eup %9288  ;;  %v1188_v27 = vsel %vm407_vm0, %v902_v29, 0.0  ;;  %v1185_v57 = vsel %vm407_vm0, %v901_v33, 0.0  ;;  %vm1916_vm13 = vmor %vm1914_vm5, %vm1915_vm9  ;;  %v776_v60 = vld [vmem:[%s10046_s18 + $0x288] sm:$0xff]  ;;  %v11548_v33 = vpop.xlane.xlu0 %1078 }
 0x187   : > { %3034 = vst.msk [vmem:[#allocation2 + $0x183] sm:$0xff] %vm407_vm0, %v2905_v49  ;;  %1192 = vadd.xlane.f32.xlu2 %v1191_v20  ;;  %v1380_v1 = vmul.f32 %v10452_v17, %v11398_v37  ;;  %v1379_v53 = vmul.f32 %v10452_v17, %v11388_v11  ;;  %v1923_v36 = vmul.f32 %v11425_v46, %v1922_v4  ;;  %v1912_v31 = vsub.f32 1.5, %v1911_v13  ;;  %v9512_v4 = vld [vmem:[%s10046_s18 + $0x118] sm:$0xff] }
 0x188   : > { %v1901_v58 = vmul.f32 0.5, %v1900_v9  ;;  %v1949_v19 = vmul.f32 %v11480_v12, %v11431_v22  ;;  %1189 = vadd.xlane.f32.xlu1 %v1188_v27  ;;  %1186 = vadd.xlane.f32.xlu0 %v1185_v57  ;;  %v11492_v38 = vpop.eup %9290  ;;  %vm1905_vm11 = vweird.f32 %v11456_v59  ;;  %vm1954_vm12 = vweird.f32 %v11431_v22 }
 0x189   : > { %v11500_v11 = vadd.f32 1e-08, %v1380_v1  ;;  %v11502_v37 = vadd.f32 1e-08, %v1379_v53  ;;  %v1927_v18 = vsel %vm1926_vm10, %v11425_v46, %v1923_v36  ;;  %v1913_v41 = vmul.f32 %v11439_v10, %v1912_v31  ;;  %v9510_v46 = vld [vmem:[%s10046_s18 + $0xf8] sm:$0xff]  ;;  %vm1906_vm14 = vmor %vm1904_vm7, %vm1905_vm11 }
 0x18a   : > { %v1902_v48 = vsub.f32 1.5, %v1901_v58  ;;  %v1950_v62 = vmul.f32 %v11480_v12, %v1949_v19  ;;  %v2910_v42 = vmul.f32 %v9509_v30, %v1927_v18  ;;  %v1939_v6 = vmul.f32 %v11492_v38, %v11444_v44 }
 0x18b   : > { %v11507_v5 = vpop.eup %9292  ;;  %9294 = vrsqrt.f32 %v11500_v11  ;;  %v1378_v25 = vmul.f32 %v10452_v17, %v11413_v52  ;;  %v1917_v16 = vsel %vm1916_vm13, %v11439_v10, %v1913_v41  ;;  %vm1955_vm1 = vweird.f32 %v11480_v12 }
 0x18c   : > { %v1903_v28 = vmul.f32 %v11456_v59, %v1902_v48  ;;  %v1951_v55 = vmul.f32 0.5, %v1950_v62  ;;  %v1929_v26 = vmul.f32 %v11507_v5, %v11446_v34  ;;  %3039 = vst.msk [vmem:[#allocation2 + $0x1bb] sm:$0xff] %vm407_vm0, %v2910_v42  ;;  %v2909_v45 = vmul.f32 %v9510_v46, %v1917_v16  ;;  %vm1956_vm3 = vmor %vm1954_vm12, %vm1955_vm1  ;;  %v9514_v48 = vld [vmem:[%s10046_s18 + $0x108] sm:$0xff] }
 0x18d   : > { %v1940_v52 = vmul.f32 %v11492_v38, %v1939_v6  ;;  %vm1944_vm15 = vweird.f32 %v11444_v44  ;;  %9296 = vrsqrt.f32 %v11502_v37  ;;  %vm1934_vm2 = vweird.f32 %v11446_v34  ;;  %v11591_v34 = vpop.xlane.xlu1 %1090  ;;  %v781_v6 = vld [vmem:[%s10046_s18 + $0x2b0] sm:$0xff]  ;;  %v780_v16 = vld [vmem:[%s10046_s18 + $0x2a8] sm:$0xff] }
 0x18e   : > { %v1907_v40 = vsel %vm1906_vm14, %v11456_v59, %v1903_v28  ;;  %v1952_v54 = vsub.f32 1.5, %v1951_v55  ;;  %v1930_v10 = vmul.f32 %v11507_v5, %v1929_v26  ;;  %3038 = vst.msk [vmem:[#allocation2 + $0x1ab] sm:$0xff] %vm407_vm0, %v2909_v45  ;;  %v11545_v63 = vadd.f32 1e-08, %v1378_v25  ;;  %v779_v28 = vld [vmem:[%s10046_s18 + $0x2a0] sm:$0xff]  ;;  %v11609_v55 = vpop.xlane.xlu2 %1093 }
 0x18f   : > { %v2908_v23 = vmul.f32 %v9511_v39, %v1907_v40  ;;  %v1941_v32 = vmul.f32 0.5, %v1940_v52  ;;  %v906_v3 = vmul.f32 %v778_v47, %v778_v47  ;;  %v905_v29 = vmul.f32 %v777_v15, %v777_v15  ;;  %v11619_v47 = vpop.xlane.xlu0 %1087 }
 0x190   : > { %v1953_v50 = vmul.f32 %v11480_v12, %v1952_v54  ;;  %v1931_v59 = vmul.f32 0.5, %v1930_v10  ;;  %vm1945_vm4 = vweird.f32 %v11492_v38  ;;  %9298 = vrsqrt.f32 %v11545_v63 }
 0x191   : > { %v11550_v8 = vpop.eup %9294  ;;  %3037 = vst.msk [vmem:[#allocation2 + $0x1a3] sm:$0xff] %vm407_vm0, %v2908_v23  ;;  %v1942_v51 = vsub.f32 1.5, %v1941_v32  ;;  %v904_v14 = vmul.f32 %v776_v60, %v776_v60  ;;  %vm1935_vm5 = vweird.f32 %v11507_v5  ;;  %v1200_v22 = vsel %vm407_vm0, %v906_v3, 0.0  ;;  %vm1946_vm6 = vmor %vm1944_vm15, %vm1945_vm4  ;;  %v9515_v23 = vld [vmem:[%s10046_s18 + $0x130] sm:$0xff] }
 0x192   : > { %v1957_v2 = vsel %vm1956_vm3, %v11480_v12, %v1953_v50  ;;  %v1932_v35 = vsub.f32 1.5, %v1931_v59  ;;  %v1979_v49 = vmul.f32 %v11550_v8, %v11500_v11  ;;  %v1197_v20 = vsel %vm407_vm0, %v905_v29, 0.0  ;;  %1201 = vadd.xlane.f32.xlu2 %v1200_v22  ;;  %vm1936_vm7 = vmor %vm1934_vm2, %vm1935_vm5 }
 0x193   : > { %v2913_v13 = vmul.f32 %v9512_v4, %v1957_v2  ;;  %v1943_v9 = vmul.f32 %v11492_v38, %v1942_v51  ;;  %v11567_v27 = vpop.eup %9296  ;;  %1198 = vadd.xlane.f32.xlu1 %v1197_v20  ;;  %v1194_v1 = vsel %vm407_vm0, %v904_v14, 0.0  ;;  %v1383_v53 = vmul.f32 %v10452_v17, %v11469_v56  ;;  %v9513_v56 = vld [vmem:[%s10046_s18 + $0x110] sm:$0xff]  ;;  %v9516_v4 = vld [vmem:[%s10046_s18 + $0x128] sm:$0xff] }
 0x194   : > { %v1933_v12 = vmul.f32 %v11507_v5, %v1932_v35  ;;  %v1980_v57 = vmul.f32 %v11550_v8, %v1979_v49  ;;  %vm1984_vm8 = vweird.f32 %v11500_v11  ;;  %v1969_v44 = vmul.f32 %v11567_v27, %v11502_v37  ;;  %1195 = vadd.xlane.f32.xlu0 %v1194_v1  ;;  %v784_v49 = vld [vmem:[%s10046_s18 + $0x2c8] sm:$0xff] }
 0x195   : > { %3042 = vst.msk [vmem:[#allocation2 + $0x1d3] sm:$0xff] %vm407_vm0, %v2913_v13  ;;  %v1947_v36 = vsel %vm1946_vm6, %v11492_v38, %v1943_v9  ;;  %v1382_v31 = vmul.f32 %v10452_v17, %v11454_v24  ;;  %v11589_v18 = vadd.f32 1e-08, %v1383_v53  ;;  %v1381_v24 = vmul.f32 %v10452_v17, %v11478_v21  ;;  %v11659_v22 = vpop.xlane.xlu1 %1099 }
 0x196   : > { %v2912_v58 = vmul.f32 %v9513_v56, %v1947_v36  ;;  %v1937_v19 = vsel %vm1936_vm7, %v11507_v5, %v1933_v12  ;;  %v1981_v38 = vmul.f32 0.5, %v1980_v57  ;;  %v11593_v41 = vpop.eup %9298  ;;  %v1970_v30 = vmul.f32 %v11567_v27, %v1969_v44  ;;  %v11675_v53 = vpop.xlane.xlu2 %1102  ;;  %v9517_v36 = vld [vmem:[%s10046_s18 + $0x120] sm:$0xff] }
 0x197   : > { %v2911_v62 = vmul.f32 %v9514_v48, %v1937_v19  ;;  %v11597_v42 = vadd.f32 1e-08, %v1382_v31  ;;  %vm1985_vm9 = vweird.f32 %v11550_v8  ;;  %v1959_v25 = vmul.f32 %v11593_v41, %v11545_v63  ;;  %v782_v19 = vld [vmem:[%s10046_s18 + $0x2b8] sm:$0xff] }
 0x198   : > { %3041 = vst.msk [vmem:[#allocation2 + $0x1cb] sm:$0xff] %vm407_vm0, %v2912_v58  ;;  %v1982_v5 = vsub.f32 1.5, %v1981_v38  ;;  %9300 = vrsqrt.f32 %v11589_v18  ;;  %v1971_v26 = vmul.f32 0.5, %v1970_v30  ;;  %vm1974_vm10 = vweird.f32 %v11502_v37  ;;  %vm1986_vm12 = vmor %vm1984_vm8, %vm1985_vm9  ;;  %v783_v58 = vld [vmem:[%s10046_s18 + $0x2c0] sm:$0xff] }
 0x199   : > { %3040 = vst.msk [vmem:[#allocation2 + $0x1c3] sm:$0xff] %vm407_vm0, %v2911_v62  ;;  %vm1975_vm11 = vweird.f32 %v11567_v27  ;;  %9302 = vrsqrt.f32 %v11597_v42  ;;  %v1960_v46 = vmul.f32 %v11593_v41, %v1959_v25  ;;  %v11617_v45 = vadd.f32 1e-08, %v1381_v24 }
 0x19a   : > { %v1983_v21 = vmul.f32 %v11550_v8, %v1982_v5  ;;  %v909_v52 = vmul.f32 %v781_v6, %v781_v6  ;;  %v1972_v15 = vsub.f32 1.5, %v1971_v26  ;;  %v908_v40 = vmul.f32 %v780_v16, %v780_v16  ;;  %vm1976_vm14 = vmor %vm1974_vm10, %vm1975_vm11 }
 0x19b   : > { %v907_v54 = vmul.f32 %v779_v28, %v779_v28  ;;  %v1386_v10 = vmul.f32 %v10452_v17, %v11540_v61  ;;  %v1961_v39 = vmul.f32 0.5, %v1960_v46  ;;  %vm1965_vm13 = vweird.f32 %v11593_v41 }
 0x19c   : > { %v1987_v60 = vsel %vm1986_vm12, %v11550_v8, %v1983_v21  ;;  %9304 = vrsqrt.f32 %v11617_v45  ;;  %v1973_v50 = vmul.f32 %v11567_v27, %v1972_v15  ;;  %v1209_v11 = vsel %vm407_vm0, %v909_v52, 0.0 }
 0x19d   : > { %v2916_v32 = vmul.f32 %v9515_v23, %v1987_v60  ;;  %v1206_v59 = vsel %vm407_vm0, %v908_v40, 0.0  ;;  %v1962_v61 = vsub.f32 1.5, %v1961_v39  ;;  %1210 = vadd.xlane.f32.xlu2 %v1209_v11  ;;  %v1203_v29 = vsel %vm407_vm0, %v907_v54, 0.0  ;;  %v9519_v11 = vld [vmem:[%s10046_s18 + $0x140] sm:$0xff] }
 0x19e   : > { %v11634_v3 = vpop.eup %9300  ;;  %1207 = vadd.xlane.f32.xlu1 %v1206_v59  ;;  %v11641_v8 = vadd.f32 1e-08, %v1386_v10  ;;  %v1385_v51 = vmul.f32 %v10452_v17, %v11523_v7  ;;  %v1977_v2 = vsel %vm1976_vm14, %v11567_v27, %v1973_v50  ;;  %1204 = vadd.xlane.f32.xlu0 %v1203_v29  ;;  %v1384_v35 = vmul.f32 %v10452_v17, %v11548_v33  ;;  %v9518_v10 = vld [vmem:[%s10046_s18 + $0x148] sm:$0xff] }
 0x19f   : > { %v11645_v14 = vpop.eup %9302  ;;  %3045 = vst.msk [vmem:[#allocation2 + $0x1f3] sm:$0xff] %vm407_vm0, %v2916_v32  ;;  %v2009_v37 = vmul.f32 %v11634_v3, %v11589_v18  ;;  %v2915_v13 = vmul.f32 %v9516_v4, %v1977_v2  ;;  %v1963_v9 = vmul.f32 %v11593_v41, %v1962_v61  ;;  %vm1964_vm1 = vweird.f32 %v11545_v63  ;;  %v787_v2 = vld [vmem:[%s10046_s18 + $0x2e0] sm:$0xff]  ;;  %v9520_v4 = vld [vmem:[%s10046_s18 + $0x138] sm:$0xff] }
 0x1a0   : > { %v1999_v7 = vmul.f32 %v11645_v14, %v11597_v42  ;;  %vm1966_vm15 = vmor %vm1964_vm1, %vm1965_vm13  ;;  %vm2014_vm2 = vweird.f32 %v11589_v18  ;;  %9306 = vrsqrt.f32 %v11641_v8  ;;  %v11666_v33 = vadd.f32 1e-08, %v1385_v51 }
 0x1a1   : > { %v2010_v20 = vmul.f32 %v11634_v3, %v2009_v37  ;;  %3044 = vst.msk [vmem:[#allocation2 + $0x1eb] sm:$0xff] %vm407_vm0, %v2915_v13  ;;  %v1967_v63 = vsel %vm1966_vm15, %v11593_v41, %v1963_v9  ;;  %v11673_v57 = vadd.f32 1e-08, %v1384_v35  ;;  %v912_v1 = vmul.f32 %v784_v49, %v784_v49  ;;  %v11686_v41 = vpop.xlane.xlu0 %1096  ;;  %v786_v37 = vld [vmem:[%s10046_s18 + $0x2d8] sm:$0xff]  ;;  %v11745_v35 = vpop.xlane.xlu2 %1111  ;;  %v785_v49 = vld [vmem:[%s10046_s18 + $0x2d0] sm:$0xff] }
 0x1a2   : > { %v11668_v27 = vpop.eup %9304  ;;  %v2000_v12 = vmul.f32 %v11645_v14, %v1999_v7  ;;  %v2914_v44 = vmul.f32 %v9517_v36, %v1967_v63  ;;  %vm2004_vm3 = vweird.f32 %v11597_v42  ;;  %vm2015_vm4 = vweird.f32 %v11634_v3  ;;  %v11724_v42 = vpop.xlane.xlu1 %1108 }
 0x1a3   : > { %v2011_v31 = vmul.f32 0.5, %v2010_v20  ;;  %v1989_v56 = vmul.f32 %v11668_v27, %v11617_v45  ;;  %vm2005_vm5 = vweird.f32 %v11645_v14  ;;  %9308 = vrsqrt.f32 %v11666_v33  ;;  %vm2016_vm7 = vmor %vm2014_vm2, %vm2015_vm4 }
 0x1a4   : > { %v2001_v38 = vmul.f32 0.5, %v2000_v12  ;;  %3043 = vst.msk [vmem:[#allocation2 + $0x1e3] sm:$0xff] %vm407_vm0, %v2914_v44  ;;  %9310 = vrsqrt.f32 %v11673_v57  ;;  %v1218_v30 = vsel %vm407_vm0, %v912_v1, 0.0  ;;  %v911_v6 = vmul.f32 %v783_v58, %v783_v58  ;;  %vm2006_vm9 = vmor %vm2004_vm3, %vm2005_vm5 }
 0x1a5   : > { %v2012_v48 = vsub.f32 1.5, %v2011_v31  ;;  %v1990_v62 = vmul.f32 %v11668_v27, %v1989_v56  ;;  %1219 = vadd.xlane.f32.xlu2 %v1218_v30  ;;  %v910_v5 = vmul.f32 %v782_v19, %v782_v19  ;;  %v1389_v25 = vmul.f32 %v10452_v17, %v11609_v55 }
 0x1a6   : > { %v2002_v24 = vsub.f32 1.5, %v2001_v38  ;;  %v11694_v16 = vpop.eup %9306  ;;  %vm1994_vm6 = vweird.f32 %v11617_v45  ;;  %v1388_v21 = vmul.f32 %v10452_v17, %v11591_v34  ;;  %vm1995_vm8 = vweird.f32 %v11668_v27 }
 0x1a7   : > { %v2013_v28 = vmul.f32 %v11634_v3, %v2012_v48  ;;  %v1991_v26 = vmul.f32 0.5, %v1990_v62  ;;  %v2039_v55 = vmul.f32 %v11694_v16, %v11641_v8  ;;  %v1215_v52 = vsel %vm407_vm0, %v911_v6, 0.0  ;;  %vm1996_vm10 = vmor %vm1994_vm6, %vm1995_vm8 }
 0x1a8   : > { %v2003_v46 = vmul.f32 %v11645_v14, %v2002_v24  ;;  %1216 = vadd.xlane.f32.xlu1 %v1215_v52  ;;  %v1212_v18 = vsel %vm407_vm0, %v910_v5, 0.0  ;;  %v11715_v40 = vadd.f32 1e-08, %v1389_v25  ;;  %v11722_v32 = vadd.f32 1e-08, %v1388_v21  ;;  %v9522_v52 = vld [vmem:[%s10046_s18 + $0x158] sm:$0xff] }
 0x1a9   : > { %v2017_v15 = vsel %vm2016_vm7, %v11634_v3, %v2013_v28  ;;  %v1992_v34 = vsub.f32 1.5, %v1991_v26  ;;  %v11717_v54 = vpop.eup %9308  ;;  %v2040_v23 = vmul.f32 %v11694_v16, %v2039_v55  ;;  %1213 = vadd.xlane.f32.xlu0 %v1212_v18  ;;  %v1387_v29 = vmul.f32 %v10452_v17, %v11619_v47  ;;  %v11756_v20 = vpop.xlane.xlu0 %1105 }
 0x1aa   : > { %v2919_v60 = vmul.f32 %v9518_v10, %v2017_v15  ;;  %v2007_v39 = vsel %vm2006_vm9, %v11645_v14, %v2003_v46  ;;  %v11726_v50 = vpop.eup %9310  ;;  %v2029_v61 = vmul.f32 %v11717_v54, %v11666_v33  ;;  %vm2044_vm11 = vweird.f32 %v11641_v8  ;;  %v9521_v8 = vld [vmem:[%s10046_s18 + $0x160] sm:$0xff]  ;;  %v11807_v10 = vpop.xlane.xlu2 %1120 }
 0x1ab   : > { %v2918_v59 = vmul.f32 %v9519_v11, %v2007_v39  ;;  %v1993_v3 = vmul.f32 %v11668_v27, %v1992_v34  ;;  %v2041_v51 = vmul.f32 0.5, %v2040_v23  ;;  %v2019_v14 = vmul.f32 %v11726_v50, %v11673_v57  ;;  %v9523_v39 = vld [vmem:[%s10046_s18 + $0x150] sm:$0xff] }
 0x1ac   : > { %3048 = vst.msk [vmem:[#allocation2 + $0x213] sm:$0xff] %vm407_vm0, %v2919_v60  ;;  %9312 = vrsqrt.f32 %v11715_v40  ;;  %vm2045_vm12 = vweird.f32 %v11694_v16  ;;  %v2030_v45 = vmul.f32 %v11717_v54, %v2029_v61  ;;  %vm2035_vm13 = vweird.f32 %v11717_v54  ;;  %v788_v61 = vld [vmem:[%s10046_s18 + $0x2e8] sm:$0xff] }
 0x1ad   : > { %3047 = vst.msk [vmem:[#allocation2 + $0x20b] sm:$0xff] %vm407_vm0, %v2918_v59  ;;  %v1997_v47 = vsel %vm1996_vm10, %v11668_v27, %v1993_v3  ;;  %9314 = vrsqrt.f32 %v11722_v32  ;;  %v2042_v9 = vsub.f32 1.5, %v2041_v51  ;;  %v2020_v7 = vmul.f32 %v11726_v50, %v2019_v14  ;;  %vm2046_vm14 = vmor %vm2044_vm11, %vm2045_vm12  ;;  %v789_v3 = vld [vmem:[%s10046_s18 + $0x2f0] sm:$0xff] }
 0x1ae   : > { %v2917_v13 = vmul.f32 %v9520_v4, %v1997_v47  ;;  %v2031_v63 = vmul.f32 0.5, %v2030_v45  ;;  %v11758_v12 = vadd.f32 1e-08, %v1387_v29  ;;  %v915_v27 = vmul.f32 %v787_v2, %v787_v2 }
 0x1af   : > { %v914_v1 = vmul.f32 %v786_v37, %v786_v37  ;;  %v2043_v36 = vmul.f32 %v11694_v16, %v2042_v9  ;;  %v2021_v44 = vmul.f32 0.5, %v2020_v7  ;;  %v913_v31 = vmul.f32 %v785_v49, %v785_v49 }
 0x1b0   : > { %3046 = vst.msk [vmem:[#allocation2 + $0x1fb] sm:$0xff] %vm407_vm0, %v2917_v13  ;;  %v1392_v56 = vmul.f32 %v10452_v17, %v11675_v53  ;;  %v2032_v58 = vsub.f32 1.5, %v2031_v63  ;;  %vm2025_vm1 = vweird.f32 %v11726_v50  ;;  %9316 = vrsqrt.f32 %v11758_v12 }
 0x1b1   : > { %v1227_v19 = vsel %vm407_vm0, %v915_v27, 0.0  ;;  %v2047_v48 = vsel %vm2046_vm14, %v11694_v16, %v2043_v36  ;;  %v2022_v62 = vsub.f32 1.5, %v2021_v44  ;;  %v1224_v53 = vsel %vm407_vm0, %v914_v1, 0.0  ;;  %v11823_v29 = vpop.xlane.xlu0 %1114  ;;  %v9524_v44 = vld [vmem:[%s10046_s18 + $0x178] sm:$0xff] }
 0x1b2   : > { %v11771_v38 = vpop.eup %9312  ;;  %1228 = vadd.xlane.f32.xlu2 %v1227_v19  ;;  %v1221_v30 = vsel %vm407_vm0, %v913_v31, 0.0  ;;  %v2922_v6 = vmul.f32 %v9521_v8, %v2047_v48  ;;  %v2033_v5 = vmul.f32 %v11717_v54, %v2032_v58  ;;  %vm2034_vm15 = vweird.f32 %v11666_v33  ;;  %1225 = vadd.xlane.f32.xlu1 %v1224_v53  ;;  %v11791_v33 = vpop.xlane.xlu1 %1117 }
 0x1b3   : > { %v11776_v24 = vpop.eup %9314  ;;  %v2069_v25 = vmul.f32 %v11771_v38, %v11715_v40  ;;  %1222 = vadd.xlane.f32.xlu0 %v1221_v30  ;;  %vm2036_vm2 = vmor %vm2034_vm15, %vm2035_vm13  ;;  %v2023_v16 = vmul.f32 %v11726_v50, %v2022_v62  ;;  %vm2024_vm3 = vweird.f32 %v11673_v57  ;;  %v11789_v26 = vadd.f32 1e-08, %v1392_v56 }
 0x1b4   : > { %v2059_v28 = vmul.f32 %v11776_v24, %v11722_v32  ;;  %3051 = vst.msk [vmem:[#allocation2 + $0x233] sm:$0xff] %vm407_vm0, %v2922_v6  ;;  %v2037_v21 = vsel %vm2036_vm2, %v11717_v54, %v2033_v5  ;;  %vm2026_vm4 = vmor %vm2024_vm3, %vm2025_vm1  ;;  %v1391_v57 = vmul.f32 %v10452_v17, %v11659_v22  ;;  %v1390_v55 = vmul.f32 %v10452_v17, %v11686_v41  ;;  %v790_v54 = vld [vmem:[%s10046_s18 + $0x2f8] sm:$0xff]  ;;  %v11873_v5 = vpop.xlane.xlu2 %1129 }
 0x1b5   : > { %v2070_v46 = vmul.f32 %v11771_v38, %v2069_v25  ;;  %v2921_v15 = vmul.f32 %v9522_v52, %v2037_v21  ;;  %v2027_v34 = vsel %vm2026_vm4, %v11726_v50, %v2023_v16  ;;  %9318 = vrsqrt.f32 %v11789_v26  ;;  %v793_v16 = vld [vmem:[%s10046_s18 + $0x310] sm:$0xff] }
 0x1b6   : > { %v2060_v18 = vmul.f32 %v11776_v24, %v2059_v28  ;;  %v11809_v60 = vpop.eup %9316  ;;  %v2920_v22 = vmul.f32 %v9523_v39, %v2027_v34  ;;  %vm2074_vm5 = vweird.f32 %v11715_v40  ;;  %v11813_v41 = vadd.f32 1e-08, %v1391_v57  ;;  %v792_v28 = vld [vmem:[%s10046_s18 + $0x308] sm:$0xff] }
 0x1b7   : > { %v2071_v23 = vmul.f32 0.5, %v2070_v46  ;;  %3050 = vst.msk [vmem:[#allocation2 + $0x223] sm:$0xff] %vm407_vm0, %v2921_v15  ;;  %vm2064_vm6 = vweird.f32 %v11722_v32  ;;  %v2049_v11 = vmul.f32 %v11809_v60, %v11758_v12  ;;  %v11819_v59 = vadd.f32 1e-08, %v1390_v55  ;;  %v9525_v32 = vld [vmem:[%s10046_s18 + $0x170] sm:$0xff]  ;;  %v791_v46 = vld [vmem:[%s10046_s18 + $0x300] sm:$0xff] }
 0x1b8   : > { %v2061_v50 = vmul.f32 0.5, %v2060_v18  ;;  %3049 = vst.msk [vmem:[#allocation2 + $0x21b] sm:$0xff] %vm407_vm0, %v2920_v22  ;;  %vm2075_vm7 = vweird.f32 %v11771_v38  ;;  %9320 = vrsqrt.f32 %v11813_v41  ;;  %v918_v14 = vmul.f32 %v790_v54, %v790_v54  ;;  %v9526_v55 = vld [vmem:[%s10046_s18 + $0x168] sm:$0xff] }
 0x1b9   : > { %v2072_v51 = vsub.f32 1.5, %v2071_v23  ;;  %vm2065_vm8 = vweird.f32 %v11776_v24  ;;  %v2050_v37 = vmul.f32 %v11809_v60, %v2049_v11  ;;  %9322 = vrsqrt.f32 %v11819_v59  ;;  %vm2076_vm9 = vmor %vm2074_vm5, %vm2075_vm7  ;;  %v11889_v57 = vpop.xlane.xlu0 %1123 }
 0x1ba   : > { %v2062_v2 = vsub.f32 1.5, %v2061_v50  ;;  %v1236_v45 = vsel %vm407_vm0, %v918_v14, 0.0  ;;  %v917_v49 = vmul.f32 %v789_v3, %v789_v3  ;;  %v916_v4 = vmul.f32 %v788_v61, %v788_v61  ;;  %vm2066_vm10 = vmor %vm2064_vm6, %vm2065_vm8  ;;  %v11854_v58 = vpop.xlane.xlu1 %1126 }
 0x1bb   : > { %v2073_v47 = vmul.f32 %v11771_v38, %v2072_v51  ;;  %v11833_v13 = vpop.eup %9318  ;;  %v2051_v7 = vmul.f32 0.5, %v2050_v37  ;;  %1237 = vadd.xlane.f32.xlu2 %v1236_v45  ;;  %v1395_v63 = vmul.f32 %v10452_v17, %v11745_v35  ;;  %v1394_v27 = vmul.f32 %v10452_v17, %v11724_v42 }
 0x1bc   : > { %v2063_v9 = vmul.f32 %v11776_v24, %v2062_v2  ;;  %vm2055_vm11 = vweird.f32 %v11809_v60  ;;  %v2099_v40 = vmul.f32 %v11833_v13, %v11789_v26  ;;  %v1233_v36 = vsel %vm407_vm0, %v917_v49, 0.0 }
 0x1bd   : > { %v2077_v1 = vsel %vm2076_vm9, %v11771_v38, %v2073_v47  ;;  %v2052_v56 = vsub.f32 1.5, %v2051_v7  ;;  %1234 = vadd.xlane.f32.xlu1 %v1233_v36  ;;  %v1230_v42 = vsel %vm407_vm0, %v916_v4, 0.0  ;;  %v11860_v62 = vadd.f32 1e-08, %v1395_v63  ;;  %v9528_v36 = vld [vmem:[%s10046_s18 + $0x188] sm:$0xff] }
 0x1be   : > { %v2925_v31 = vmul.f32 %v9524_v44, %v2077_v1  ;;  %v2067_v35 = vsel %vm2066_vm10, %v11776_v24, %v2063_v9  ;;  %v11856_v19 = vpop.eup %9320  ;;  %v2100_v48 = vmul.f32 %v11833_v13, %v2099_v40  ;;  %1231 = vadd.xlane.f32.xlu0 %v1230_v42  ;;  %v11862_v53 = vadd.f32 1e-08, %v1394_v27  ;;  %v11938_v40 = vpop.xlane.xlu2 %1138 }
 0x1bf   : > { %v2924_v38 = vmul.f32 %v9525_v32, %v2067_v35  ;;  %v11864_v30 = vpop.eup %9322  ;;  %v2053_v24 = vmul.f32 %v11809_v60, %v2052_v56  ;;  %vm2054_vm12 = vweird.f32 %v11758_v12  ;;  %v2089_v8 = vmul.f32 %v11856_v19, %v11813_v41  ;;  %v796_v56 = vld [vmem:[%s10046_s18 + $0x328] sm:$0xff] }
 0x1c0   : > { %3054 = vst.msk [vmem:[#allocation2 + $0x24b] sm:$0xff] %vm407_vm0, %v2925_v31  ;;  %v1393_v6 = vmul.f32 %v10452_v17, %v11756_v20  ;;  %vm2056_vm13 = vmor %vm2054_vm12, %vm2055_vm11  ;;  %v2101_v25 = vmul.f32 0.5, %v2100_v48  ;;  %vm2104_vm14 = vweird.f32 %v11789_v26  ;;  %v2079_v12 = vmul.f32 %v11864_v30, %v11819_v59  ;;  %v9527_v26 = vld [vmem:[%s10046_s18 + $0x190] sm:$0xff] }
 0x1c1   : > { %3053 = vst.msk [vmem:[#allocation2 + $0x243] sm:$0xff] %vm407_vm0, %v2924_v38  ;;  %9324 = vrsqrt.f32 %v11860_v62  ;;  %v2057_v20 = vsel %vm2056_vm13, %v11809_v60, %v2053_v24  ;;  %vm2105_vm1 = vweird.f32 %v11833_v13  ;;  %v2090_v21 = vmul.f32 %v11856_v19, %v2089_v8  ;;  %v795_v8 = vld [vmem:[%s10046_s18 + $0x320] sm:$0xff] }
 0x1c2   : > { %9326 = vrsqrt.f32 %v11862_v53  ;;  %v2923_v52 = vmul.f32 %v9526_v55, %v2057_v20  ;;  %v2102_v15 = vsub.f32 1.5, %v2101_v25  ;;  %vm2095_vm15 = vweird.f32 %v11856_v19  ;;  %vm2106_vm2 = vmor %vm2104_vm14, %vm2105_vm1 }
 0x1c3   : > { %v2080_v34 = vmul.f32 %v11864_v30, %v2079_v12  ;;  %v2091_v18 = vmul.f32 0.5, %v2090_v21  ;;  %v11894_v54 = vadd.f32 1e-08, %v1393_v6  ;;  %v921_v60 = vmul.f32 %v793_v16, %v793_v16  ;;  %v11951_v38 = vpop.xlane.xlu0 %1132  ;;  %v794_v6 = vld [vmem:[%s10046_s18 + $0x318] sm:$0xff] }
 0x1c4   : > { %v920_v39 = vmul.f32 %v792_v28, %v792_v28  ;;  %3052 = vst.msk [vmem:[#allocation2 + $0x23b] sm:$0xff] %vm407_vm0, %v2923_v52  ;;  %v2103_v22 = vmul.f32 %v11833_v13, %v2102_v15  ;;  %v919_v50 = vmul.f32 %v791_v46, %v791_v46  ;;  %v1398_v11 = vmul.f32 %v10452_v17, %v11807_v10 }
 0x1c5   : > { %v2081_v23 = vmul.f32 0.5, %v2080_v34  ;;  %v2092_v3 = vsub.f32 1.5, %v2091_v18  ;;  %vm2085_vm3 = vweird.f32 %v11864_v30  ;;  %9328 = vrsqrt.f32 %v11894_v54 }
 0x1c6   : > { %v1245_v61 = vsel %vm407_vm0, %v921_v60, 0.0  ;;  %v2107_v14 = vsel %vm2106_vm2, %v11833_v13, %v2103_v22  ;;  %v1242_v10 = vsel %vm407_vm0, %v920_v39, 0.0  ;;  %v1239_v37 = vsel %vm407_vm0, %v919_v50, 0.0  ;;  %v11919_v13 = vpop.xlane.xlu1 %1135 }
 0x1c7   : > { %v11907_v51 = vpop.eup %9324  ;;  %v2082_v2 = vsub.f32 1.5, %v2081_v23  ;;  %1246 = vadd.xlane.f32.xlu2 %v1245_v61  ;;  %v2928_v45 = vmul.f32 %v9527_v26, %v2107_v14  ;;  %v2093_v49 = vmul.f32 %v11856_v19, %v2092_v3  ;;  %vm2094_vm4 = vweird.f32 %v11813_v41  ;;  %1243 = vadd.xlane.f32.xlu1 %v1242_v10 }
 0x1c8   : > { %v11912_v47 = vpop.eup %9326  ;;  %v2129_v4 = vmul.f32 %v11907_v51, %v11860_v62  ;;  %1240 = vadd.xlane.f32.xlu0 %v1239_v37  ;;  %vm2096_vm5 = vmor %vm2094_vm4, %vm2095_vm15  ;;  %vm2084_vm6 = vweird.f32 %v11819_v59  ;;  %v11927_v41 = vadd.f32 1e-08, %v1398_v11  ;;  %v1397_v1 = vmul.f32 %v10452_v17, %v11791_v33  ;;  %v12000_v37 = vpop.xlane.xlu2 %1147 }
 0x1c9   : > { %v2083_v9 = vmul.f32 %v11864_v30, %v2082_v2  ;;  %v2119_v7 = vmul.f32 %v11912_v47, %v11862_v53  ;;  %3057 = vst.msk [vmem:[#allocation2 + $0x26b] sm:$0xff] %vm407_vm0, %v2928_v45  ;;  %v2097_v63 = vsel %vm2096_vm5, %v11856_v19, %v2093_v49  ;;  %vm2086_vm7 = vmor %vm2084_vm6, %vm2085_vm3  ;;  %v1396_v59 = vmul.f32 %v10452_v17, %v11823_v29  ;;  %v9529_v19 = vld [vmem:[%s10046_s18 + $0x180] sm:$0xff] }
 0x1ca   : > { %v2130_v27 = vmul.f32 %v11907_v51, %v2129_v4  ;;  %v2927_v44 = vmul.f32 %v9528_v36, %v2097_v63  ;;  %9330 = vrsqrt.f32 %v11927_v41  ;;  %vm2134_vm8 = vweird.f32 %v11860_v62 }
 0x1cb   : > { %v2087_v31 = vsel %vm2086_vm7, %v11864_v30, %v2083_v9  ;;  %v2120_v35 = vmul.f32 %v11912_v47, %v2119_v7  ;;  %v11945_v42 = vpop.eup %9328  ;;  %v11949_v29 = vadd.f32 1e-08, %v1397_v1  ;;  %vm2124_vm9 = vweird.f32 %v11862_v53  ;;  %v9531_v53 = vld [vmem:[%s10046_s18 + $0x1a0] sm:$0xff]  ;;  %v798_v7 = vld [vmem:[%s10046_s18 + $0x338] sm:$0xff]  ;;  %v797_v1 = vld [vmem:[%s10046_s18 + $0x330] sm:$0xff] }
 0x1cc   : > { %v2926_v33 = vmul.f32 %v9529_v19, %v2087_v31  ;;  %v2131_v32 = vmul.f32 0.5, %v2130_v27  ;;  %3056 = vst.msk [vmem:[#allocation2 + $0x263] sm:$0xff] %vm407_vm0, %v2927_v44  ;;  %v2109_v30 = vmul.f32 %v11945_v42, %v11894_v54  ;;  %v11957_v24 = vadd.f32 1e-08, %v1396_v59  ;;  %v12020_v63 = vpop.xlane.xlu0 %1141  ;;  %v9532_v59 = vld [vmem:[%s10046_s18 + $0x198] sm:$0xff] }
 0x1cd   : > { %v2121_v48 = vmul.f32 0.5, %v2120_v35  ;;  %vm2135_vm10 = vweird.f32 %v11907_v51  ;;  %9332 = vrsqrt.f32 %v11949_v29  ;;  %v924_v12 = vmul.f32 %v796_v56, %v796_v56 }
 0x1ce   : > { %3055 = vst.msk [vmem:[#allocation2 + $0x25b] sm:$0xff] %vm407_vm0, %v2926_v33  ;;  %v2132_v25 = vsub.f32 1.5, %v2131_v32  ;;  %vm2125_vm11 = vweird.f32 %v11912_v47  ;;  %v2110_v28 = vmul.f32 %v11945_v42, %v2109_v30  ;;  %9334 = vrsqrt.f32 %v11957_v24  ;;  %vm2136_vm12 = vmor %vm2134_vm8, %vm2135_vm10  ;;  %v11987_v23 = vpop.xlane.xlu1 %1144 }
 0x1cf   : > { %v2122_v16 = vsub.f32 1.5, %v2121_v48  ;;  %v1254_v21 = vsel %vm407_vm0, %v924_v12, 0.0  ;;  %v923_v46 = vmul.f32 %v795_v8, %v795_v8  ;;  %v922_v55 = vmul.f32 %v794_v6, %v794_v6  ;;  %vm2126_vm13 = vmor %vm2124_vm9, %vm2125_vm11 }
 0x1d0   : > { %v2133_v20 = vmul.f32 %v11907_v51, %v2132_v25  ;;  %v11969_v52 = vpop.eup %9330  ;;  %v2111_v34 = vmul.f32 0.5, %v2110_v28  ;;  %1255 = vadd.xlane.f32.xlu2 %v1254_v21  ;;  %v1401_v18 = vmul.f32 %v10452_v17, %v11873_v5  ;;  %v1400_v60 = vmul.f32 %v10452_v17, %v11854_v58  ;;  %v9530_v5 = vld [vmem:[%s10046_s18 + $0x1a8] sm:$0xff]  ;;  %v9533_v21 = vld [vmem:[%s10046_s18 + $0x1c0] sm:$0xff] }
 0x1d1   : > { %v2123_v15 = vmul.f32 %v11912_v47, %v2122_v16  ;;  %vm2115_vm14 = vweird.f32 %v11945_v42  ;;  %v2159_v62 = vmul.f32 %v11969_v52, %v11927_v41  ;;  %v1251_v22 = vsel %vm407_vm0, %v923_v46, 0.0 }
 0x1d2   : > { %v2137_v39 = vsel %vm2136_vm12, %v11907_v51, %v2133_v20  ;;  %v2112_v11 = vsub.f32 1.5, %v2111_v34  ;;  %1252 = vadd.xlane.f32.xlu1 %v1251_v22  ;;  %v1248_v3 = vsel %vm407_vm0, %v922_v55, 0.0  ;;  %v11996_v2 = vadd.f32 1e-08, %v1401_v18  ;;  %v9534_v22 = vld [vmem:[%s10046_s18 + $0x1b8] sm:$0xff] }
 0x1d3   : > { %v2931_v50 = vmul.f32 %v9530_v5, %v2137_v39  ;;  %v2127_v58 = vsel %vm2126_vm13, %v11912_v47, %v2123_v15  ;;  %v11992_v61 = vpop.eup %9332  ;;  %v2160_v14 = vmul.f32 %v11969_v52, %v2159_v62  ;;  %1249 = vadd.xlane.f32.xlu0 %v1248_v3  ;;  %v11998_v10 = vadd.f32 1e-08, %v1400_v60 }
 0x1d4   : > { %v2930_v51 = vmul.f32 %v9531_v53, %v2127_v58  ;;  %v12002_v47 = vpop.eup %9334  ;;  %v2113_v26 = vmul.f32 %v11945_v42, %v2112_v11  ;;  %vm2114_vm1 = vweird.f32 %v11894_v54  ;;  %v2149_v45 = vmul.f32 %v11992_v61, %v11949_v29  ;;  %v799_v54 = vld [vmem:[%s10046_s18 + $0x340] sm:$0xff]  ;;  %v802_v11 = vld [vmem:[%s10046_s18 + $0x358] sm:$0xff]  ;;  %v12081_v3 = vpop.xlane.xlu0 %1150  ;;  %v9535_v53 = vld [vmem:[%s10046_s18 + $0x1b0] sm:$0xff] }
 0x1d5   : > { %3060 = vst.msk [vmem:[#allocation2 + $0x28b] sm:$0xff] %vm407_vm0, %v2931_v50  ;;  %v1399_v49 = vmul.f32 %v10452_v17, %v11889_v57  ;;  %vm2116_vm15 = vmor %vm2114_vm1, %vm2115_vm14  ;;  %v2161_v4 = vmul.f32 0.5, %v2160_v14  ;;  %vm2164_vm2 = vweird.f32 %v11927_v41  ;;  %v2139_v9 = vmul.f32 %v12002_v47, %v11957_v24 }
 0x1d6   : > { %3059 = vst.msk [vmem:[#allocation2 + $0x283] sm:$0xff] %vm407_vm0, %v2930_v51  ;;  %9336 = vrsqrt.f32 %v11996_v2  ;;  %v2117_v27 = vsel %vm2116_vm15, %v11945_v42, %v2113_v26  ;;  %vm2165_vm3 = vweird.f32 %v11969_v52  ;;  %v2150_v57 = vmul.f32 %v11992_v61, %v2149_v45  ;;  %v12048_v20 = vpop.xlane.xlu1 %1153  ;;  %v801_v45 = vld [vmem:[%s10046_s18 + $0x350] sm:$0xff] }
 0x1d7   : > { %9338 = vrsqrt.f32 %v11998_v10  ;;  %v2929_v36 = vmul.f32 %v9532_v59, %v2117_v27  ;;  %v2162_v44 = vsub.f32 1.5, %v2161_v4  ;;  %vm2155_vm4 = vweird.f32 %v11992_v61  ;;  %vm2166_vm5 = vmor %vm2164_vm2, %vm2165_vm3 }
 0x1d8   : > { %v2140_v31 = vmul.f32 %v12002_v47, %v2139_v9  ;;  %v2151_v35 = vmul.f32 0.5, %v2150_v57  ;;  %v12030_v56 = vadd.f32 1e-08, %v1399_v49  ;;  %v927_v19 = vmul.f32 %v799_v54, %v799_v54  ;;  %v800_v49 = vld [vmem:[%s10046_s18 + $0x348] sm:$0xff] }
 0x1d9   : > { %v926_v33 = vmul.f32 %v798_v7, %v798_v7  ;;  %3058 = vst.msk [vmem:[#allocation2 + $0x273] sm:$0xff] %vm407_vm0, %v2929_v36  ;;  %v2163_v42 = vmul.f32 %v11969_v52, %v2162_v44  ;;  %v925_v48 = vmul.f32 %v797_v1, %v797_v1  ;;  %v1404_v30 = vmul.f32 %v10452_v17, %v11938_v40 }
 0x1da   : > { %v2141_v32 = vmul.f32 0.5, %v2140_v31  ;;  %v2152_v8 = vsub.f32 1.5, %v2151_v35  ;;  %vm2145_vm6 = vweird.f32 %v12002_v47  ;;  %9340 = vrsqrt.f32 %v12030_v56 }
 0x1db   : > { %v1263_v6 = vsel %vm407_vm0, %v927_v19, 0.0  ;;  %v2167_v12 = vsel %vm2166_vm5, %v11969_v52, %v2163_v42  ;;  %v1260_v40 = vsel %vm407_vm0, %v926_v33, 0.0  ;;  %v1257_v28 = vsel %vm407_vm0, %v925_v48, 0.0 }
 0x1dc   : > { %v12043_v25 = vpop.eup %9336  ;;  %v2142_v16 = vsub.f32 1.5, %v2141_v32  ;;  %1264 = vadd.xlane.f32.xlu2 %v1263_v6  ;;  %v2934_v46 = vmul.f32 %v9533_v21, %v2167_v12  ;;  %v2153_v55 = vmul.f32 %v11992_v61, %v2152_v8  ;;  %vm2154_vm7 = vweird.f32 %v11949_v29  ;;  %1261 = vadd.xlane.f32.xlu1 %v1260_v40  ;;  %v12065_v29 = vpop.xlane.xlu2 %1156  ;;  %v9536_v32 = vld [vmem:[%s10046_s18 + $0x1d8] sm:$0xff] }
 0x1dd   : > { %v12050_v41 = vpop.eup %9338  ;;  %v2189_v52 = vmul.f32 %v12043_v25, %v11996_v2  ;;  %1258 = vadd.xlane.f32.xlu0 %v1257_v28  ;;  %vm2156_vm8 = vmor %vm2154_vm7, %vm2155_vm4  ;;  %vm2144_vm9 = vweird.f32 %v11957_v24  ;;  %v12063_v18 = vadd.f32 1e-08, %v1404_v30  ;;  %v1403_v24 = vmul.f32 %v10452_v17, %v11919_v13 }
 0x1de   : > { %v2143_v15 = vmul.f32 %v12002_v47, %v2142_v16  ;;  %v2179_v34 = vmul.f32 %v12050_v41, %v11998_v10  ;;  %3063 = vst.msk [vmem:[#allocation2 + $0x2ab] sm:$0xff] %vm407_vm0, %v2934_v46  ;;  %v2157_v60 = vsel %vm2156_vm8, %v11992_v61, %v2153_v55  ;;  %vm2146_vm10 = vmor %vm2144_vm9, %vm2145_vm6  ;;  %v1402_v62 = vmul.f32 %v10452_v17, %v11951_v38  ;;  %v12114_v33 = vpop.xlane.xlu1 %1162 }
 0x1df   : > { %v2190_v39 = vmul.f32 %v12043_v25, %v2189_v52  ;;  %v2933_v5 = vmul.f32 %v9534_v22, %v2157_v60  ;;  %9342 = vrsqrt.f32 %v12063_v18  ;;  %vm2194_vm11 = vweird.f32 %v11996_v2  ;;  %v12147_v52 = vpop.xlane.xlu0 %1159  ;;  %v804_v60 = vld [vmem:[%s10046_s18 + $0x368] sm:$0xff] }
 0x1e0   : > { %v2147_v50 = vsel %vm2146_vm10, %v12002_v47, %v2143_v15  ;;  %v2180_v58 = vmul.f32 %v12050_v41, %v2179_v34  ;;  %v12083_v61 = vpop.eup %9340  ;;  %v12087_v38 = vadd.f32 1e-08, %v1403_v24  ;;  %vm2184_vm12 = vweird.f32 %v11998_v10  ;;  %v9537_v10 = vld [vmem:[%s10046_s18 + $0x1d0] sm:$0xff]  ;;  %v803_v24 = vld [vmem:[%s10046_s18 + $0x360] sm:$0xff] }
 0x1e1   : > { %v2932_v13 = vmul.f32 %v9535_v53, %v2147_v50  ;;  %v2191_v51 = vmul.f32 0.5, %v2190_v39  ;;  %3062 = vst.msk [vmem:[#allocation2 + $0x29b] sm:$0xff] %vm407_vm0, %v2933_v5  ;;  %v2169_v47 = vmul.f32 %v12083_v61, %v12030_v56  ;;  %v12093_v26 = vadd.f32 1e-08, %v1402_v62  ;;  %v805_v34 = vld [vmem:[%s10046_s18 + $0x370] sm:$0xff]  ;;  %v9538_v62 = vld [vmem:[%s10046_s18 + $0x1c8] sm:$0xff] }
 0x1e2   : > { %v2181_v14 = vmul.f32 0.5, %v2180_v58  ;;  %vm2195_vm13 = vweird.f32 %v12043_v25  ;;  %9344 = vrsqrt.f32 %v12087_v38  ;;  %v930_v9 = vmul.f32 %v802_v11, %v802_v11 }
 0x1e3   : > { %3061 = vst.msk [vmem:[#allocation2 + $0x293] sm:$0xff] %vm407_vm0, %v2932_v13  ;;  %v2192_v4 = vsub.f32 1.5, %v2191_v51  ;;  %vm2185_vm14 = vweird.f32 %v12050_v41  ;;  %v2170_v7 = vmul.f32 %v12083_v61, %v2169_v47  ;;  %9346 = vrsqrt.f32 %v12093_v26  ;;  %vm2196_vm1 = vmor %vm2194_vm11, %vm2195_vm13 }
 0x1e4   : > { %v2182_v54 = vsub.f32 1.5, %v2181_v14  ;;  %v1272_v57 = vsel %vm407_vm0, %v930_v9, 0.0  ;;  %v929_v1 = vmul.f32 %v801_v45, %v801_v45  ;;  %v928_v59 = vmul.f32 %v800_v49, %v800_v49  ;;  %vm2186_vm15 = vmor %vm2184_vm12, %vm2185_vm14  ;;  %v12128_v6 = vpop.xlane.xlu2 %1165 }
 0x1e5   : > { %v2193_v27 = vmul.f32 %v12043_v25, %v2192_v4  ;;  %v12105_v36 = vpop.eup %9342  ;;  %v2171_v31 = vmul.f32 0.5, %v2170_v7  ;;  %1273 = vadd.xlane.f32.xlu2 %v1272_v57  ;;  %v1407_v35 = vmul.f32 %v10452_v17, %v12000_v37  ;;  %v1406_v19 = vmul.f32 %v10452_v17, %v11987_v23  ;;  %v9539_v57 = vld [vmem:[%s10046_s18 + $0x1f0] sm:$0xff] }
 0x1e6   : > { %v2183_v44 = vmul.f32 %v12050_v41, %v2182_v54  ;;  %vm2175_vm2 = vweird.f32 %v12083_v61  ;;  %v2219_v2 = vmul.f32 %v12105_v36, %v12063_v18  ;;  %v1269_v37 = vsel %vm407_vm0, %v929_v1, 0.0  ;;  %v12179_v4 = vpop.xlane.xlu1 %1171 }
 0x1e7   : > { %v2197_v42 = vsel %vm2196_vm1, %v12043_v25, %v2193_v27  ;;  %v2172_v30 = vsub.f32 1.5, %v2171_v31  ;;  %1270 = vadd.xlane.f32.xlu1 %v1269_v37  ;;  %v1266_v8 = vsel %vm407_vm0, %v928_v59, 0.0  ;;  %v12134_v40 = vadd.f32 1e-08, %v1407_v35 }
 0x1e8   : > { %v2937_v48 = vmul.f32 %v9536_v32, %v2197_v42  ;;  %v2187_v23 = vsel %vm2186_vm15, %v12050_v41, %v2183_v44  ;;  %v12130_v25 = vpop.eup %9344  ;;  %v2220_v16 = vmul.f32 %v12105_v36, %v2219_v2  ;;  %1267 = vadd.xlane.f32.xlu0 %v1266_v8  ;;  %v12136_v28 = vadd.f32 1e-08, %v1406_v19  ;;  %v9540_v32 = vld [vmem:[%s10046_s18 + $0x1e8] sm:$0xff] }
 0x1e9   : > { %v2936_v12 = vmul.f32 %v9537_v10, %v2187_v23  ;;  %v12138_v41 = vpop.eup %9346  ;;  %v2173_v21 = vmul.f32 %v12083_v61, %v2172_v30  ;;  %vm2174_vm3 = vweird.f32 %v12030_v56  ;;  %v2209_v46 = vmul.f32 %v12130_v25, %v12087_v38  ;;  %v12212_v37 = vpop.xlane.xlu0 %1168  ;;  %v808_v8 = vld [vmem:[%s10046_s18 + $0x388] sm:$0xff]  ;;  %v9541_v10 = vld [vmem:[%s10046_s18 + $0x1e0] sm:$0xff] }
 0x1ea   : > { %3066 = vst.msk [vmem:[#allocation2 + $0x2c3] sm:$0xff] %vm407_vm0, %v2937_v48  ;;  %v1405_v55 = vmul.f32 %v10452_v17, %v12020_v63  ;;  %vm2176_vm4 = vmor %vm2174_vm3, %vm2175_vm2  ;;  %v2221_v15 = vmul.f32 0.5, %v2220_v16  ;;  %vm2224_vm5 = vweird.f32 %v12063_v18  ;;  %v2199_v56 = vmul.f32 %v12138_v41, %v12093_v26 }
 0x1eb   : > { %3065 = vst.msk [vmem:[#allocation2 + $0x2bb] sm:$0xff] %vm407_vm0, %v2936_v12  ;;  %9348 = vrsqrt.f32 %v12134_v40  ;;  %v2177_v39 = vsel %vm2176_vm4, %v12083_v61, %v2173_v21  ;;  %vm2225_vm6 = vweird.f32 %v12105_v36  ;;  %v2210_v63 = vmul.f32 %v12130_v25, %v2209_v46  ;;  %v807_v46 = vld [vmem:[%s10046_s18 + $0x380] sm:$0xff] }
 0x1ec   : > { %9350 = vrsqrt.f32 %v12136_v28  ;;  %v2935_v22 = vmul.f32 %v9538_v62, %v2177_v39  ;;  %v2222_v5 = vsub.f32 1.5, %v2221_v15  ;;  %vm2215_vm7 = vweird.f32 %v12130_v25  ;;  %vm2226_vm8 = vmor %vm2224_vm5, %vm2225_vm6 }
 0x1ed   : > { %v2200_v50 = vmul.f32 %v12138_v41, %v2199_v56  ;;  %v2211_v58 = vmul.f32 0.5, %v2210_v63  ;;  %v12166_v11 = vadd.f32 1e-08, %v1405_v55  ;;  %v933_v53 = vmul.f32 %v805_v34, %v805_v34  ;;  %v806_v55 = vld [vmem:[%s10046_s18 + $0x378] sm:$0xff] }
 0x1ee   : > { %v932_v13 = vmul.f32 %v804_v60, %v804_v60  ;;  %3064 = vst.msk [vmem:[#allocation2 + $0x2b3] sm:$0xff] %vm407_vm0, %v2935_v22  ;;  %v2223_v61 = vmul.f32 %v12105_v36, %v2222_v5  ;;  %v931_v14 = vmul.f32 %v803_v24, %v803_v24  ;;  %v1410_v47 = vmul.f32 %v10452_v17, %v12065_v29  ;;  %v12241_v22 = vpop.xlane.xlu1 %1180 }
 0x1ef   : > { %v2201_v51 = vmul.f32 0.5, %v2200_v50  ;;  %v2212_v45 = vsub.f32 1.5, %v2211_v58  ;;  %vm2205_vm9 = vweird.f32 %v12138_v41  ;;  %9352 = vrsqrt.f32 %v12166_v11 }
 0x1f0   : > { %v1281_v49 = vsel %vm407_vm0, %v933_v53, 0.0  ;;  %v2227_v54 = vsel %vm2226_vm8, %v12105_v36, %v2223_v61  ;;  %v1278_v29 = vsel %vm407_vm0, %v932_v13, 0.0  ;;  %v1275_v18 = vsel %vm407_vm0, %v931_v14, 0.0  ;;  %v12193_v36 = vpop.xlane.xlu2 %1174 }
 0x1f1   : > { %v12181_v9 = vpop.eup %9348  ;;  %v2202_v7 = vsub.f32 1.5, %v2201_v51  ;;  %1282 = vadd.xlane.f32.xlu2 %v1281_v49  ;;  %v2940_v1 = vmul.f32 %v9539_v57, %v2227_v54  ;;  %v2213_v59 = vmul.f32 %v12130_v25, %v2212_v45  ;;  %vm2214_vm10 = vweird.f32 %v12087_v38  ;;  %1279 = vadd.xlane.f32.xlu1 %v1278_v29  ;;  %v12274_v57 = vpop.xlane.xlu0 %1177 }
 0x1f2   : > { %v12186_v27 = vpop.eup %9350  ;;  %v2249_v44 = vmul.f32 %v12181_v9, %v12134_v40  ;;  %1276 = vadd.xlane.f32.xlu0 %v1275_v18  ;;  %vm2216_vm11 = vmor %vm2214_vm10, %vm2215_vm7  ;;  %vm2204_vm12 = vweird.f32 %v12093_v26  ;;  %v12201_v38 = vadd.f32 1e-08, %v1410_v47  ;;  %v1409_v2 = vmul.f32 %v10452_v17, %v12048_v20 }
 0x1f3   : > { %v2203_v31 = vmul.f32 %v12138_v41, %v2202_v7  ;;  %v2239_v35 = vmul.f32 %v12186_v27, %v12136_v28  ;;  %3069 = vst.msk [vmem:[#allocation2 + $0x2e3] sm:$0xff] %vm407_vm0, %v2940_v1  ;;  %v2217_v19 = vsel %vm2216_vm11, %v12130_v25, %v2213_v59  ;;  %vm2206_vm13 = vmor %vm2204_vm12, %vm2205_vm9  ;;  %v1408_v26 = vmul.f32 %v10452_v17, %v12081_v3 }
 0x1f4   : > { %v2250_v42 = vmul.f32 %v12181_v9, %v2249_v44  ;;  %v2939_v48 = vmul.f32 %v9540_v32, %v2217_v19  ;;  %9354 = vrsqrt.f32 %v12201_v38  ;;  %vm2254_vm14 = vweird.f32 %v12134_v40  ;;  %v810_v19 = vld [vmem:[%s10046_s18 + $0x398] sm:$0xff] }
 0x1f5   : > { %v2207_v23 = vsel %vm2206_vm13, %v12138_v41, %v2203_v31  ;;  %v2240_v30 = vmul.f32 %v12186_v27, %v2239_v35  ;;  %v12219_v25 = vpop.eup %9352  ;;  %v12223_v3 = vadd.f32 1e-08, %v1409_v2  ;;  %vm2244_vm1 = vweird.f32 %v12136_v28  ;;  %v9543_v28 = vld [vmem:[%s10046_s18 + $0x200] sm:$0xff]  ;;  %v809_v2 = vld [vmem:[%s10046_s18 + $0x390] sm:$0xff] }
 0x1f6   : > { %v2938_v20 = vmul.f32 %v9541_v10, %v2207_v23  ;;  %v2251_v12 = vmul.f32 0.5, %v2250_v42  ;;  %3068 = vst.msk [vmem:[#allocation2 + $0x2db] sm:$0xff] %vm407_vm0, %v2939_v48  ;;  %v2229_v41 = vmul.f32 %v12219_v25, %v12166_v11  ;;  %v12229_v21 = vadd.f32 1e-08, %v1408_v26  ;;  %v9544_v26 = vld [vmem:[%s10046_s18 + $0x1f8] sm:$0xff] }
 0x1f7   : > { %v2241_v16 = vmul.f32 0.5, %v2240_v30  ;;  %vm2255_vm15 = vweird.f32 %v12181_v9  ;;  %9356 = vrsqrt.f32 %v12223_v3  ;;  %v936_v56 = vmul.f32 %v808_v8, %v808_v8 }
 0x1f8   : > { %3067 = vst.msk [vmem:[#allocation2 + $0x2d3] sm:$0xff] %vm407_vm0, %v2938_v20  ;;  %v2252_v15 = vsub.f32 1.5, %v2251_v12  ;;  %vm2245_vm2 = vweird.f32 %v12186_v27  ;;  %v2230_v60 = vmul.f32 %v12219_v25, %v2229_v41  ;;  %9358 = vrsqrt.f32 %v12229_v21  ;;  %vm2256_vm3 = vmor %vm2254_vm14, %vm2255_vm15  ;;  %v12261_v14 = vpop.xlane.xlu2 %1183 }
 0x1f9   : > { %v2242_v34 = vsub.f32 1.5, %v2241_v16  ;;  %v1290_v63 = vsel %vm407_vm0, %v936_v56, 0.0  ;;  %v935_v24 = vmul.f32 %v807_v46, %v807_v46  ;;  %v934_v62 = vmul.f32 %v806_v55, %v806_v55  ;;  %vm2246_vm4 = vmor %vm2244_vm1, %vm2245_vm2 }
 0x1fa   : > { %v2253_v39 = vmul.f32 %v12181_v9, %v2252_v15  ;;  %v12243_v5 = vpop.eup %9354  ;;  %v2231_v58 = vmul.f32 0.5, %v2230_v60  ;;  %1291 = vadd.xlane.f32.xlu2 %v1290_v63  ;;  %v1413_v53 = vmul.f32 %v10452_v17, %v12128_v6  ;;  %v1412_v13 = vmul.f32 %v10452_v17, %v12114_v33  ;;  %v9542_v6 = vld [vmem:[%s10046_s18 + $0x208] sm:$0xff] }
 0x1fb   : > { %v2243_v50 = vmul.f32 %v12186_v27, %v2242_v34  ;;  %vm2235_vm5 = vweird.f32 %v12219_v25  ;;  %v2279_v40 = vmul.f32 %v12243_v5, %v12201_v38  ;;  %v1287_v51 = vsel %vm407_vm0, %v935_v24, 0.0  ;;  %v12308_v46 = vpop.xlane.xlu1 %1189  ;;  %v9545_v24 = vld [vmem:[%s10046_s18 + $0x220] sm:$0xff] }
 0x1fc   : > { %v2257_v61 = vsel %vm2256_vm3, %v12181_v9, %v2253_v39  ;;  %v2232_v45 = vsub.f32 1.5, %v2231_v58  ;;  %1288 = vadd.xlane.f32.xlu1 %v1287_v51  ;;  %v1284_v49 = vsel %vm407_vm0, %v934_v62, 0.0  ;;  %v12270_v29 = vadd.f32 1e-08, %v1413_v53 }
 0x1fd   : > { %v2943_v47 = vmul.f32 %v9542_v6, %v2257_v61  ;;  %v2247_v33 = vsel %vm2246_vm4, %v12186_v27, %v2243_v50  ;;  %v12266_v9 = vpop.eup %9356  ;;  %v2280_v7 = vmul.f32 %v12243_v5, %v2279_v40  ;;  %1285 = vadd.xlane.f32.xlu0 %v1284_v49  ;;  %v12272_v18 = vadd.f32 1e-08, %v1412_v13  ;;  %v9546_v6 = vld [vmem:[%s10046_s18 + $0x218] sm:$0xff] }
 0x1fe   : > { %v2942_v54 = vmul.f32 %v9543_v28, %v2247_v33  ;;  %v12276_v27 = vpop.eup %9358  ;;  %v2233_v1 = vmul.f32 %v12219_v25, %v2232_v45  ;;  %vm2234_vm6 = vweird.f32 %v12166_v11  ;;  %v2269_v59 = vmul.f32 %v12266_v9, %v12223_v3  ;;  %v811_v11 = vld [vmem:[%s10046_s18 + $0x3a0] sm:$0xff]  ;;  %v814_v49 = vld [vmem:[%s10046_s18 + $0x3b8] sm:$0xff]  ;;  %v9547_v28 = vld [vmem:[%s10046_s18 + $0x210] sm:$0xff] }
 0x1ff   : > { %3072 = vst.msk [vmem:[#allocation2 + $0x303] sm:$0xff] %vm407_vm0, %v2943_v47  ;;  %v1411_v44 = vmul.f32 %v10452_v17, %v12147_v52  ;;  %vm2236_vm7 = vmor %vm2234_vm6, %vm2235_vm5  ;;  %v2281_v31 = vmul.f32 0.5, %v2280_v7  ;;  %vm2284_vm8 = vweird.f32 %v12201_v38  ;;  %v2259_v35 = vmul.f32 %v12276_v27, %v12229_v21 }
 0x200   : > { %3071 = vst.msk [vmem:[#allocation2 + $0x2fb] sm:$0xff] %vm407_vm0, %v2942_v54  ;;  %9360 = vrsqrt.f32 %v12270_v29  ;;  %v2237_v42 = vsel %vm2236_vm7, %v12219_v25, %v2233_v1  ;;  %vm2285_vm9 = vweird.f32 %v12243_v5  ;;  %v2270_v52 = vmul.f32 %v12266_v9, %v2269_v59  ;;  %v12322_v63 = vpop.xlane.xlu2 %1192  ;;  %v813_v59 = vld [vmem:[%s10046_s18 + $0x3b0] sm:$0xff] }
 0x201   : > { %9362 = vrsqrt.f32 %v12272_v18  ;;  %v2941_v32 = vmul.f32 %v9544_v26, %v2237_v42  ;;  %v2282_v48 = vsub.f32 1.5, %v2281_v31  ;;  %vm2275_vm10 = vweird.f32 %v12266_v9  ;;  %vm2286_vm11 = vmor %vm2284_vm8, %vm2285_vm9 }
 0x202   : > { %v2260_v23 = vmul.f32 %v12276_v27, %v2259_v35  ;;  %v2271_v30 = vmul.f32 0.5, %v2270_v52  ;;  %v12302_v8 = vadd.f32 1e-08, %v1411_v44  ;;  %v939_v10 = vmul.f32 %v811_v11, %v811_v11  ;;  %v812_v44 = vld [vmem:[%s10046_s18 + $0x3a8] sm:$0xff] }
 0x203   : > { %v938_v20 = vmul.f32 %v810_v19, %v810_v19  ;;  %3070 = vst.msk [vmem:[#allocation2 + $0x2eb] sm:$0xff] %vm407_vm0, %v2941_v32  ;;  %v2283_v25 = vmul.f32 %v12243_v5, %v2282_v48  ;;  %v937_v16 = vmul.f32 %v809_v2, %v809_v2  ;;  %v1416_v41 = vmul.f32 %v10452_v17, %v12193_v36 }
 0x204   : > { %v2261_v12 = vmul.f32 0.5, %v2260_v23  ;;  %v2272_v55 = vsub.f32 1.5, %v2271_v30  ;;  %vm2265_vm12 = vweird.f32 %v12276_v27  ;;  %9364 = vrsqrt.f32 %v12302_v8 }
 0x205   : > { %v1299_v15 = vsel %vm407_vm0, %v939_v10, 0.0  ;;  %v2287_v34 = vsel %vm2286_vm11, %v12243_v5, %v2283_v25  ;;  %v1296_v36 = vsel %vm407_vm0, %v938_v20, 0.0  ;;  %v1293_v39 = vsel %vm407_vm0, %v937_v16, 0.0  ;;  %v9548_v16 = vld [vmem:[%s10046_s18 + $0x238] sm:$0xff] }
 0x206   : > { %v12317_v56 = vpop.eup %9360  ;;  %v2262_v60 = vsub.f32 1.5, %v2261_v12  ;;  %1300 = vadd.xlane.f32.xlu2 %v1299_v15  ;;  %v2946_v62 = vmul.f32 %v9545_v24, %v2287_v34  ;;  %v2273_v50 = vmul.f32 %v12266_v9, %v2272_v55  ;;  %vm2274_vm13 = vweird.f32 %v12223_v3  ;;  %1297 = vadd.xlane.f32.xlu1 %v1296_v36  ;;  %v12339_v3 = vpop.xlane.xlu0 %1186 }
 0x207   : > { %v12324_v38 = vpop.eup %9362  ;;  %v2309_v5 = vmul.f32 %v12317_v56, %v12270_v29  ;;  %1294 = vadd.xlane.f32.xlu0 %v1293_v39  ;;  %vm2276_vm14 = vmor %vm2274_vm13, %vm2275_vm10  ;;  %vm2264_vm1 = vweird.f32 %v12229_v21  ;;  %v12337_v13 = vadd.f32 1e-08, %v1416_v41  ;;  %v1415_v21 = vmul.f32 %v10452_v17, %v12179_v4  ;;  %v12375_v42 = vpop.xlane.xlu1 %1198 }
 0x208   : > { %v2263_v58 = vmul.f32 %v12276_v27, %v2262_v60  ;;  %v2299_v53 = vmul.f32 %v12324_v38, %v12272_v18  ;;  %3075 = vst.msk [vmem:[#allocation2 + $0x323] sm:$0xff] %vm407_vm0, %v2946_v62  ;;  %v2277_v61 = vsel %vm2276_vm14, %v12266_v9, %v2273_v50  ;;  %vm2266_vm15 = vmor %vm2264_vm1, %vm2265_vm12  ;;  %v1414_v51 = vmul.f32 %v10452_v17, %v12212_v37  ;;  %v12388_v25 = vpop.xlane.xlu2 %1201 }
 0x209   : > { %v2310_v40 = vmul.f32 %v12317_v56, %v2309_v5  ;;  %v2945_v47 = vmul.f32 %v9546_v6, %v2277_v61  ;;  %9366 = vrsqrt.f32 %v12337_v13  ;;  %vm2314_vm2 = vweird.f32 %v12270_v29  ;;  %v816_v61 = vld [vmem:[%s10046_s18 + $0x3c8] sm:$0xff] }
 0x20a   : > { %v2267_v33 = vsel %vm2266_vm15, %v12276_v27, %v2263_v58  ;;  %v2300_v45 = vmul.f32 %v12324_v38, %v2299_v53  ;;  %v12355_v9 = vpop.eup %9364  ;;  %v12359_v4 = vadd.f32 1e-08, %v1415_v21  ;;  %vm2304_vm3 = vweird.f32 %v12272_v18  ;;  %v9549_v18 = vld [vmem:[%s10046_s18 + $0x230] sm:$0xff]  ;;  %v815_v21 = vld [vmem:[%s10046_s18 + $0x3c0] sm:$0xff] }
 0x20b   : > { %v2944_v54 = vmul.f32 %v9547_v28, %v2267_v33  ;;  %v2311_v7 = vmul.f32 0.5, %v2310_v40  ;;  %3074 = vst.msk [vmem:[#allocation2 + $0x313] sm:$0xff] %vm407_vm0, %v2945_v47  ;;  %v2289_v27 = vmul.f32 %v12355_v9, %v12302_v8  ;;  %v12365_v1 = vadd.f32 1e-08, %v1414_v51  ;;  %v9550_v51 = vld [vmem:[%s10046_s18 + $0x228] sm:$0xff] }
 0x20c   : > { %v2301_v37 = vmul.f32 0.5, %v2300_v45  ;;  %vm2315_vm4 = vweird.f32 %v12317_v56  ;;  %9368 = vrsqrt.f32 %v12359_v4  ;;  %v942_v35 = vmul.f32 %v814_v49, %v814_v49 }
 0x20d   : > { %3073 = vst.msk [vmem:[#allocation2 + $0x30b] sm:$0xff] %vm407_vm0, %v2944_v54  ;;  %v2312_v31 = vsub.f32 1.5, %v2311_v7  ;;  %vm2305_vm5 = vweird.f32 %v12324_v38  ;;  %v2290_v19 = vmul.f32 %v12355_v9, %v2289_v27  ;;  %9370 = vrsqrt.f32 %v12365_v1  ;;  %vm2316_vm6 = vmor %vm2314_vm2, %vm2315_vm4 }
 0x20e   : > { %v2302_v11 = vsub.f32 1.5, %v2301_v37  ;;  %v1308_v2 = vsel %vm407_vm0, %v942_v35, 0.0  ;;  %v941_v26 = vmul.f32 %v813_v59, %v813_v59  ;;  %v940_v32 = vmul.f32 %v812_v44, %v812_v44  ;;  %vm2306_vm7 = vmor %vm2304_vm3, %vm2305_vm5 }
 0x20f   : > { %v2313_v52 = vmul.f32 %v12317_v56, %v2312_v31  ;;  %v12379_v48 = vpop.eup %9366  ;;  %v2291_v30 = vmul.f32 0.5, %v2290_v19  ;;  %1309 = vadd.xlane.f32.xlu2 %v1308_v2  ;;  %v1419_v10 = vmul.f32 %v10452_v17, %v12261_v14  ;;  %v1418_v20 = vmul.f32 %v10452_v17, %v12241_v22 }
 0x210   : > { %v2303_v23 = vmul.f32 %v12324_v38, %v2302_v11  ;;  %vm2295_vm8 = vweird.f32 %v12355_v9  ;;  %v2339_v29 = vmul.f32 %v12379_v48, %v12337_v13  ;;  %v1305_v14 = vsel %vm407_vm0, %v941_v26, 0.0  ;;  %v12453_v35 = vpop.xlane.xlu2 %1210  ;;  %v9551_v26 = vld [vmem:[%s10046_s18 + $0x250] sm:$0xff] }
 0x211   : > { %v2317_v12 = vsel %vm2316_vm6, %v12317_v56, %v2313_v52  ;;  %v2292_v55 = vsub.f32 1.5, %v2291_v30  ;;  %1306 = vadd.xlane.f32.xlu1 %v1305_v14  ;;  %v1302_v15 = vsel %vm407_vm0, %v940_v32, 0.0  ;;  %v12402_v56 = vpop.xlane.xlu0 %1195  ;;  %v12408_v39 = vadd.f32 1e-08, %v1419_v10 }
 0x212   : > { %v2949_v41 = vmul.f32 %v9548_v16, %v2317_v12  ;;  %v2307_v22 = vsel %vm2306_vm7, %v12324_v38, %v2303_v23  ;;  %v12404_v34 = vpop.eup %9368  ;;  %v2340_v36 = vmul.f32 %v12379_v48, %v2339_v29  ;;  %1303 = vadd.xlane.f32.xlu0 %v1302_v15  ;;  %v12410_v24 = vadd.f32 1e-08, %v1418_v20  ;;  %v9552_v16 = vld [vmem:[%s10046_s18 + $0x248] sm:$0xff] }
 0x213   : > { %v2948_v60 = vmul.f32 %v9549_v18, %v2307_v22  ;;  %v12412_v38 = vpop.eup %9370  ;;  %v2293_v62 = vmul.f32 %v12355_v9, %v2292_v55  ;;  %vm2294_vm9 = vweird.f32 %v12302_v8  ;;  %v2329_v50 = vmul.f32 %v12404_v34, %v12359_v4  ;;  %v817_v8 = vld [vmem:[%s10046_s18 + $0x3d0] sm:$0xff]  ;;  %v820_v15 = vld [vmem:[%s10046_s18 + $0x3e8] sm:$0xff]  ;;  %v9553_v18 = vld [vmem:[%s10046_s18 + $0x240] sm:$0xff] }
 0x214   : > { %3078 = vst.msk [vmem:[#allocation2 + $0x33b] sm:$0xff] %vm407_vm0, %v2949_v41  ;;  %v1417_v5 = vmul.f32 %v10452_v17, %v12274_v57  ;;  %vm2296_vm10 = vmor %vm2294_vm9, %vm2295_vm8  ;;  %v2341_v58 = vmul.f32 0.5, %v2340_v36  ;;  %vm2344_vm11 = vweird.f32 %v12337_v13  ;;  %v2319_v53 = vmul.f32 %v12412_v38, %v12365_v1 }
 0x215   : > { %3077 = vst.msk [vmem:[#allocation2 + $0x333] sm:$0xff] %vm407_vm0, %v2948_v60  ;;  %9372 = vrsqrt.f32 %v12408_v39  ;;  %v2297_v40 = vsel %vm2296_vm10, %v12355_v9, %v2293_v62  ;;  %vm2345_vm12 = vweird.f32 %v12379_v48  ;;  %v2330_v57 = vmul.f32 %v12404_v34, %v2329_v50  ;;  %v12440_v9 = vpop.xlane.xlu1 %1207  ;;  %v819_v50 = vld [vmem:[%s10046_s18 + $0x3e0] sm:$0xff] }
 0x216   : > { %9374 = vrsqrt.f32 %v12410_v24  ;;  %v2947_v6 = vmul.f32 %v9550_v51, %v2297_v40  ;;  %v2342_v47 = vsub.f32 1.5, %v2341_v58  ;;  %vm2335_vm13 = vweird.f32 %v12404_v34  ;;  %vm2346_vm14 = vmor %vm2344_vm11, %vm2345_vm12 }
 0x217   : > { %v2320_v33 = vmul.f32 %v12412_v38, %v2319_v53  ;;  %v2331_v45 = vmul.f32 0.5, %v2330_v57  ;;  %v12438_v49 = vadd.f32 1e-08, %v1417_v5  ;;  %v945_v28 = vmul.f32 %v817_v8, %v817_v8  ;;  %v818_v5 = vld [vmem:[%s10046_s18 + $0x3d8] sm:$0xff] }
 0x218   : > { %v944_v54 = vmul.f32 %v816_v61, %v816_v61  ;;  %3076 = vst.msk [vmem:[#allocation2 + $0x32b] sm:$0xff] %vm407_vm0, %v2947_v6  ;;  %v2343_v7 = vmul.f32 %v12379_v48, %v2342_v47  ;;  %v943_v27 = vmul.f32 %v815_v21, %v815_v21  ;;  %v1422_v59 = vmul.f32 %v10452_v17, %v12322_v63  ;;  %v12515_v47 = vpop.xlane.xlu2 %1219 }
 0x219   : > { %v2321_v37 = vmul.f32 0.5, %v2320_v33  ;;  %v2332_v44 = vsub.f32 1.5, %v2331_v45  ;;  %vm2325_vm1 = vweird.f32 %v12412_v38  ;;  %9376 = vrsqrt.f32 %v12438_v49 }
 0x21a   : > { %v1317_v31 = vsel %vm407_vm0, %v945_v28, 0.0  ;;  %v2347_v19 = vsel %vm2346_vm14, %v12379_v48, %v2343_v7  ;;  %v1314_v63 = vsel %vm407_vm0, %v944_v54, 0.0  ;;  %v1311_v13 = vsel %vm407_vm0, %v943_v27, 0.0  ;;  %v12467_v48 = vpop.xlane.xlu0 %1204 }
 0x21b   : > { %v12455_v11 = vpop.eup %9372  ;;  %v2322_v52 = vsub.f32 1.5, %v2321_v37  ;;  %1318 = vadd.xlane.f32.xlu2 %v1317_v31  ;;  %v2952_v32 = vmul.f32 %v9551_v26, %v2347_v19  ;;  %v2333_v23 = vmul.f32 %v12404_v34, %v2332_v44  ;;  %vm2334_vm15 = vweird.f32 %v12359_v4  ;;  %1315 = vadd.xlane.f32.xlu1 %v1314_v63 }
 0x21c   : > { %v12460_v2 = vpop.eup %9374  ;;  %v2369_v30 = vmul.f32 %v12455_v11, %v12408_v39  ;;  %1312 = vadd.xlane.f32.xlu0 %v1311_v13  ;;  %vm2336_vm2 = vmor %vm2334_vm15, %vm2335_vm13  ;;  %vm2324_vm3 = vweird.f32 %v12365_v1  ;;  %v12475_v20 = vadd.f32 1e-08, %v1422_v59  ;;  %v1421_v14 = vmul.f32 %v10452_v17, %v12308_v46 }
 0x21d   : > { %v2323_v10 = vmul.f32 %v12412_v38, %v2322_v52  ;;  %v2359_v4 = vmul.f32 %v12460_v2, %v12410_v24  ;;  %3081 = vst.msk [vmem:[#allocation2 + $0x35b] sm:$0xff] %vm407_vm0, %v2952_v32  ;;  %v2337_v12 = vsel %vm2336_vm2, %v12404_v34, %v2333_v23  ;;  %vm2326_vm4 = vmor %vm2324_vm3, %vm2325_vm1  ;;  %v1420_v1 = vmul.f32 %v10452_v17, %v12339_v3  ;;  %v12508_v8 = vpop.xlane.xlu1 %1216 }
 0x21e   : > { %v2370_v29 = vmul.f32 %v12455_v11, %v2369_v30  ;;  %v2951_v41 = vmul.f32 %v9552_v16, %v2337_v12  ;;  %9378 = vrsqrt.f32 %v12475_v20  ;;  %vm2374_vm5 = vweird.f32 %v12408_v39  ;;  %v821_v12 = vld [vmem:[%s10046_s18 + $0x3f0] sm:$0xff] }
 0x21f   : > { %v2327_v22 = vsel %vm2326_vm4, %v12412_v38, %v2323_v10  ;;  %v2360_v55 = vmul.f32 %v12460_v2, %v2359_v4  ;;  %v12491_v34 = vpop.eup %9376  ;;  %v12495_v46 = vadd.f32 1e-08, %v1421_v14  ;;  %vm2364_vm6 = vweird.f32 %v12410_v24  ;;  %v9555_v24 = vld [vmem:[%s10046_s18 + $0x260] sm:$0xff]  ;;  %v9556_v14 = vld [vmem:[%s10046_s18 + $0x258] sm:$0xff] }
 0x220   : > { %v2950_v60 = vmul.f32 %v9553_v18, %v2327_v22  ;;  %v2371_v36 = vmul.f32 0.5, %v2370_v29  ;;  %3080 = vst.msk [vmem:[#allocation2 + $0x353] sm:$0xff] %vm407_vm0, %v2951_v41  ;;  %v2349_v38 = vmul.f32 %v12491_v34, %v12438_v49  ;;  %v12501_v62 = vadd.f32 1e-08, %v1420_v1 }
 0x221   : > { %v2361_v3 = vmul.f32 0.5, %v2360_v55  ;;  %vm2375_vm7 = vweird.f32 %v12455_v11  ;;  %9380 = vrsqrt.f32 %v12495_v46  ;;  %v948_v53 = vmul.f32 %v820_v15, %v820_v15 }
 0x222   : > { %3079 = vst.msk [vmem:[#allocation2 + $0x34b] sm:$0xff] %vm407_vm0, %v2950_v60  ;;  %v2372_v58 = vsub.f32 1.5, %v2371_v36  ;;  %vm2365_vm8 = vweird.f32 %v12460_v2  ;;  %v2350_v40 = vmul.f32 %v12491_v34, %v2349_v38  ;;  %9382 = vrsqrt.f32 %v12501_v62  ;;  %vm2376_vm9 = vmor %vm2374_vm5, %vm2375_vm7  ;;  %v12535_v59 = vpop.xlane.xlu0 %1213 }
 0x223   : > { %v2362_v61 = vsub.f32 1.5, %v2361_v3  ;;  %v1326_v21 = vsel %vm407_vm0, %v948_v53, 0.0  ;;  %v947_v51 = vmul.f32 %v819_v50, %v819_v50  ;;  %v946_v6 = vmul.f32 %v818_v5, %v818_v5  ;;  %vm2366_vm10 = vmor %vm2364_vm6, %vm2365_vm8 }
 0x224   : > { %v2373_v57 = vmul.f32 %v12455_v11, %v2372_v58  ;;  %v12517_v33 = vpop.eup %9378  ;;  %v2351_v28 = vmul.f32 0.5, %v2350_v40  ;;  %1327 = vadd.xlane.f32.xlu2 %v1326_v21  ;;  %v1425_v54 = vmul.f32 %v10452_v17, %v12388_v25  ;;  %v1424_v7 = vmul.f32 %v10452_v17, %v12375_v42  ;;  %v9554_v25 = vld [vmem:[%s10046_s18 + $0x268] sm:$0xff] }
 0x225   : > { %v2363_v45 = vmul.f32 %v12460_v2, %v2362_v61  ;;  %vm2355_vm11 = vweird.f32 %v12491_v34  ;;  %v2399_v39 = vmul.f32 %v12517_v33, %v12475_v20  ;;  %v1323_v27 = vsel %vm407_vm0, %v947_v51, 0.0  ;;  %v12573_v22 = vpop.xlane.xlu1 %1225  ;;  %v12582_v38 = vpop.xlane.xlu2 %1228  ;;  %v9557_v51 = vld [vmem:[%s10046_s18 + $0x280] sm:$0xff] }
 0x226   : > { %v2377_v37 = vsel %vm2376_vm9, %v12455_v11, %v2373_v57  ;;  %v2352_v31 = vsub.f32 1.5, %v2351_v28  ;;  %1324 = vadd.xlane.f32.xlu1 %v1323_v27  ;;  %v1320_v11 = vsel %vm407_vm0, %v946_v6, 0.0  ;;  %v12544_v13 = vadd.f32 1e-08, %v1425_v54 }
 0x227   : > { %v2955_v44 = vmul.f32 %v9554_v25, %v2377_v37  ;;  %v2367_v42 = vsel %vm2366_vm10, %v12460_v2, %v2363_v45  ;;  %v12540_v19 = vpop.eup %9380  ;;  %v2400_v63 = vmul.f32 %v12517_v33, %v2399_v39  ;;  %1321 = vadd.xlane.f32.xlu0 %v1320_v11  ;;  %v12546_v26 = vadd.f32 1e-08, %v1424_v7  ;;  %v9558_v37 = vld [vmem:[%s10046_s18 + $0x278] sm:$0xff] }
 0x228   : > { %v2954_v52 = vmul.f32 %v9555_v24, %v2367_v42  ;;  %v12548_v32 = vpop.eup %9382  ;;  %v2353_v2 = vmul.f32 %v12491_v34, %v2352_v31  ;;  %vm2354_vm12 = vweird.f32 %v12438_v49  ;;  %v2389_v23 = vmul.f32 %v12540_v19, %v12495_v46  ;;  %v822_v49 = vld [vmem:[%s10046_s18 + $0x3f8] sm:$0xff]  ;;  %v9559_v42 = vld [vmem:[%s10046_s18 + $0x270] sm:$0xff] }
 0x229   : > { %3084 = vst.msk [vmem:[#allocation2 + $0x37b] sm:$0xff] %vm407_vm0, %v2955_v44  ;;  %v1423_v30 = vmul.f32 %v10452_v17, %v12402_v56  ;;  %vm2356_vm13 = vmor %vm2354_vm12, %vm2355_vm11  ;;  %v2401_v10 = vmul.f32 0.5, %v2400_v63  ;;  %vm2404_vm14 = vweird.f32 %v12475_v20  ;;  %v2379_v4 = vmul.f32 %v12548_v32, %v12501_v62 }
 0x22a   : > { %3083 = vst.msk [vmem:[#allocation2 + $0x373] sm:$0xff] %vm407_vm0, %v2954_v52  ;;  %9384 = vrsqrt.f32 %v12544_v13  ;;  %v2357_v29 = vsel %vm2356_vm13, %v12491_v34, %v2353_v2  ;;  %vm2405_vm1 = vweird.f32 %v12517_v33  ;;  %v2390_v56 = vmul.f32 %v12540_v19, %v2389_v23  ;;  %v12598_v20 = vpop.xlane.xlu0 %1222 }
 0x22b   : > { %9386 = vrsqrt.f32 %v12546_v26  ;;  %v2953_v1 = vmul.f32 %v9556_v14, %v2357_v29  ;;  %v2402_v16 = vsub.f32 1.5, %v2401_v10  ;;  %vm2395_vm15 = vweird.f32 %v12540_v19  ;;  %vm2406_vm3 = vmor %vm2404_vm14, %vm2405_vm1 }
 0x22c   : > { %v2380_v41 = vmul.f32 %v12548_v32, %v2379_v4  ;;  %v2391_v55 = vmul.f32 0.5, %v2390_v56  ;;  %v12575_v15 = vadd.f32 1e-08, %v1423_v30  ;;  %v950_v18 = vmul.f32 %v822_v49, %v822_v49 }
 0x22d   : > { %v949_v34 = vmul.f32 %v821_v12, %v821_v12  ;;  %3082 = vst.msk [vmem:[#allocation2 + $0x363] sm:$0xff] %vm407_vm0, %v2953_v1  ;;  %v2403_v60 = vmul.f32 %v12517_v33, %v2402_v16  ;;  %vm2385_vm2 = vweird.f32 %v12548_v32  ;;  %v1428_v3 = vmul.f32 %v10452_v17, %v12453_v35 }
 0x22e   : > { %v2381_v36 = vmul.f32 0.5, %v2380_v41  ;;  %v2392_v50 = vsub.f32 1.5, %v2391_v55  ;;  %9388 = vrsqrt.f32 %v12575_v15  ;;  %v1332_v5 = vsel %vm407_vm0, %v950_v18, 0.0  ;;  %v12652_v49 = vpop.xlane.xlu2 %1237  ;;  %v9560_v55 = vld [vmem:[%s10046_s18 + $0x298] sm:$0xff] }
 0x22f   : > { %v1427_v58 = vmul.f32 %v10452_v17, %v12440_v9  ;;  %v2407_v61 = vsel %vm2406_vm3, %v12517_v33, %v2403_v60  ;;  %1333 = vadd.xlane.f32.xlu1 %v1332_v5  ;;  %v1329_v40 = vsel %vm407_vm0, %v949_v34, 0.0  ;;  %v12596_v57 = vadd.f32 1e-08, %v1428_v3  ;;  %v9561_v3 = vld [vmem:[%s10046_s18 + $0x290] sm:$0xff] }
 0x230   : > { %v12592_v53 = vpop.eup %9384  ;;  %v2382_v35 = vsub.f32 1.5, %v2381_v36  ;;  %v2958_v6 = vmul.f32 %v9557_v51, %v2407_v61  ;;  %v2393_v45 = vmul.f32 %v12540_v19, %v2392_v50  ;;  %vm2394_vm4 = vweird.f32 %v12495_v46  ;;  %1330 = vadd.xlane.f32.xlu0 %v1329_v40 }
 0x231   : > { %v12600_v21 = vpop.eup %9386  ;;  %v2429_v9 = vmul.f32 %v12592_v53, %v12544_v13  ;;  %vm2396_vm5 = vmor %vm2394_vm4, %vm2395_vm15  ;;  %vm2384_vm6 = vweird.f32 %v12501_v62  ;;  %9390 = vrsqrt.f32 %v12596_v57  ;;  %vm2434_vm8 = vweird.f32 %v12544_v13 }
 0x232   : > { %v2383_v33 = vmul.f32 %v12548_v32, %v2382_v35  ;;  %v2419_v28 = vmul.f32 %v12600_v21, %v12546_v26  ;;  %3087 = vst.msk [vmem:[#allocation2 + $0x39b] sm:$0xff] %vm407_vm0, %v2958_v6  ;;  %v2397_v46 = vsel %vm2396_vm5, %v12540_v19, %v2393_v45  ;;  %vm2386_vm7 = vmor %vm2384_vm6, %vm2385_vm2  ;;  %v12620_v7 = vadd.f32 1e-08, %v1427_v58  ;;  %v12669_v1 = vpop.xlane.xlu0 %1231 }
 0x233   : > { %v2430_v54 = vmul.f32 %v12592_v53, %v2429_v9  ;;  %v2957_v62 = vmul.f32 %v9558_v37, %v2397_v46  ;;  %v1426_v25 = vmul.f32 %v10452_v17, %v12467_v48  ;;  %vm2424_vm9 = vweird.f32 %v12546_v26  ;;  %v12638_v48 = vpop.xlane.xlu1 %1234  ;;  %v9562_v9 = vld [vmem:[%s10046_s18 + $0x288] sm:$0xff] }
 0x234   : > { %v2387_v39 = vsel %vm2386_vm7, %v12548_v32, %v2383_v33  ;;  %v2420_v27 = vmul.f32 %v12600_v21, %v2419_v28  ;;  %v12627_v44 = vpop.eup %9388  ;;  %9392 = vrsqrt.f32 %v12620_v7  ;;  %vm2435_vm10 = vweird.f32 %v12592_v53 }
 0x235   : > { %v2956_v31 = vmul.f32 %v9559_v42, %v2387_v39  ;;  %v2431_v11 = vmul.f32 0.5, %v2430_v54  ;;  %3086 = vst.msk [vmem:[#allocation2 + $0x38b] sm:$0xff] %vm407_vm0, %v2957_v62  ;;  %v2409_v24 = vmul.f32 %v12627_v44, %v12575_v15  ;;  %v12636_v52 = vadd.f32 1e-08, %v1426_v25  ;;  %vm2436_vm13 = vmor %vm2434_vm8, %vm2435_vm10 }
 0x236   : > { %v2421_v19 = vmul.f32 0.5, %v2420_v27  ;;  %v1431_v32 = vmul.f32 %v10452_v17, %v12515_v47  ;;  %v1430_v2 = vmul.f32 %v10452_v17, %v12508_v8  ;;  %v1429_v23 = vmul.f32 %v10452_v17, %v12535_v59 }
 0x237   : > { %3085 = vst.msk [vmem:[#allocation2 + $0x383] sm:$0xff] %vm407_vm0, %v2956_v31  ;;  %v2432_v63 = vsub.f32 1.5, %v2431_v11  ;;  %v12647_v30 = vpop.eup %9390  ;;  %vm2425_vm11 = vweird.f32 %v12600_v21  ;;  %v2410_v4 = vmul.f32 %v12627_v44, %v2409_v24  ;;  %9394 = vrsqrt.f32 %v12636_v52 }
 0x238   : > { %v2422_v10 = vsub.f32 1.5, %v2421_v19  ;;  %vm2414_vm12 = vweird.f32 %v12575_v15  ;;  %v2459_v8 = vmul.f32 %v12647_v30, %v12596_v57  ;;  %v12658_v47 = vadd.f32 1e-08, %v1431_v32  ;;  %vm2426_vm14 = vmor %vm2424_vm9, %vm2425_vm11 }
 0x239   : > { %v2433_v12 = vmul.f32 %v12592_v53, %v2432_v63  ;;  %v2411_v29 = vmul.f32 0.5, %v2410_v4  ;;  %v12665_v56 = vadd.f32 1e-08, %v1430_v2  ;;  %v12667_v14 = vadd.f32 1e-08, %v1429_v23 }
 0x23a   : > { %v2423_v59 = vmul.f32 %v12600_v21, %v2422_v10  ;;  %v12671_v16 = vpop.eup %9392  ;;  %vm2415_vm1 = vweird.f32 %v12627_v44  ;;  %v2460_v13 = vmul.f32 %v12647_v30, %v2459_v8  ;;  %9396 = vrsqrt.f32 %v12658_v47  ;;  %v12725_v62 = vpop.xlane.xlu2 %1246 }
 0x23b   : > { %v2437_v41 = vsel %vm2436_vm13, %v12592_v53, %v2433_v12  ;;  %v2412_v60 = vsub.f32 1.5, %v2411_v29  ;;  %v2449_v36 = vmul.f32 %v12671_v16, %v12620_v7  ;;  %vm2464_vm15 = vweird.f32 %v12596_v57  ;;  %vm2416_vm3 = vmor %vm2414_vm12, %vm2415_vm1  ;;  %v12709_v45 = vpop.xlane.xlu1 %1243  ;;  %v12741_v24 = vpop.xlane.xlu0 %1240 }
 0x23c   : > { %v2961_v18 = vmul.f32 %v9560_v55, %v2437_v41  ;;  %v2427_v34 = vsel %vm2426_vm14, %v12600_v21, %v2423_v59  ;;  %v2461_v5 = vmul.f32 0.5, %v2460_v13  ;;  %9398 = vrsqrt.f32 %v12665_v56  ;;  %v9565_v13 = vld [vmem:[%s10046_s18 + $0x2a0] sm:$0xff] }
 0x23d   : > { %v2960_v50 = vmul.f32 %v9561_v3, %v2427_v34  ;;  %v12688_v26 = vpop.eup %9394  ;;  %v2413_v58 = vmul.f32 %v12627_v44, %v2412_v60  ;;  %v2450_v53 = vmul.f32 %v12671_v16, %v2449_v36  ;;  %vm2454_vm2 = vweird.f32 %v12620_v7  ;;  %v9564_v7 = vld [vmem:[%s10046_s18 + $0x2a8] sm:$0xff] }
 0x23e   : > { %3090 = vst.msk [vmem:[#allocation2 + $0x3b3] sm:$0xff] %vm407_vm0, %v2961_v18  ;;  %9400 = vrsqrt.f32 %v12667_v14  ;;  %v2462_v61 = vsub.f32 1.5, %v2461_v5  ;;  %vm2465_vm4 = vweird.f32 %v12647_v30  ;;  %v2439_v35 = vmul.f32 %v12688_v26, %v12636_v52 }
 0x23f   : > { %3089 = vst.msk [vmem:[#allocation2 + $0x3ab] sm:$0xff] %vm407_vm0, %v2960_v50  ;;  %vm2444_vm5 = vweird.f32 %v12636_v52  ;;  %v2417_v40 = vsel %vm2416_vm3, %v12627_v44, %v2413_v58  ;;  %v2451_v21 = vmul.f32 0.5, %v2450_v53  ;;  %v1434_v51 = vmul.f32 %v10452_v17, %v12582_v38  ;;  %vm2466_vm6 = vmor %vm2464_vm15, %vm2465_vm4  ;;  %v9563_v44 = vld [vmem:[%s10046_s18 + $0x2b0] sm:$0xff]  ;;  %v9566_v53 = vld [vmem:[%s10046_s18 + $0x2c8] sm:$0xff] }
 0x240   : > { %v1433_v6 = vmul.f32 %v10452_v17, %v12573_v22  ;;  %v12711_v15 = vpop.eup %9396  ;;  %v2959_v33 = vmul.f32 %v9562_v9, %v2417_v40  ;;  %v2463_v28 = vmul.f32 %v12647_v30, %v2462_v61  ;;  %v2440_v46 = vmul.f32 %v12688_v26, %v2439_v35  ;;  %v9567_v9 = vld [vmem:[%s10046_s18 + $0x2c0] sm:$0xff] }
 0x241   : > { %v1432_v54 = vmul.f32 %v10452_v17, %v12598_v20  ;;  %v2452_v38 = vsub.f32 1.5, %v2451_v21  ;;  %vm2455_vm7 = vweird.f32 %v12671_v16  ;;  %v2489_v22 = vmul.f32 %v12711_v15, %v12658_v47 }
 0x242   : > { %v12723_v37 = vadd.f32 1e-08, %v1434_v51  ;;  %v12727_v39 = vpop.eup %9398  ;;  %3088 = vst.msk [vmem:[#allocation2 + $0x3a3] sm:$0xff] %vm407_vm0, %v2959_v33  ;;  %v2467_v27 = vsel %vm2466_vm6, %v12647_v30, %v2463_v28  ;;  %v2441_v20 = vmul.f32 0.5, %v2440_v46  ;;  %vm2494_vm8 = vweird.f32 %v12658_v47  ;;  %vm2456_vm9 = vmor %vm2454_vm2, %vm2455_vm7 }
 0x243   : > { %v12732_v57 = vadd.f32 1e-08, %v1433_v6  ;;  %v2964_v42 = vmul.f32 %v9563_v44, %v2467_v27  ;;  %v2453_v31 = vmul.f32 %v12671_v16, %v2452_v38  ;;  %v2490_v11 = vmul.f32 %v12711_v15, %v2489_v22  ;;  %v1256_v58 = vpop.xlane.xlu2 %1255 }
 0x244   : > { %v12734_v25 = vpop.eup %9400  ;;  %v2479_v19 = vmul.f32 %v12727_v39, %v12665_v56  ;;  %v2442_v63 = vsub.f32 1.5, %v2441_v20  ;;  %vm2445_vm10 = vweird.f32 %v12688_v26  ;;  %v12750_v2 = vadd.f32 1e-08, %v1432_v54  ;;  %v9568_v54 = vld [vmem:[%s10046_s18 + $0x2b8] sm:$0xff] }
 0x245   : > { %v2469_v32 = vmul.f32 %v12734_v25, %v12667_v14  ;;  %3093 = vst.msk [vmem:[#allocation2 + $0x3d3] sm:$0xff] %vm407_vm0, %v2964_v42  ;;  %v2457_v23 = vsel %vm2456_vm9, %v12671_v16, %v2453_v31  ;;  %v2491_v30 = vmul.f32 0.5, %v2490_v11  ;;  %9402 = vrsqrt.f32 %v12723_v37  ;;  %vm2446_vm12 = vmor %vm2444_vm5, %vm2445_vm10  ;;  %v12779_v60 = vpop.xlane.xlu1 %1252 }
 0x246   : > { %v2480_v10 = vmul.f32 %v12727_v39, %v2479_v19  ;;  %v2963_v4 = vmul.f32 %v9564_v7, %v2457_v23  ;;  %v2443_v12 = vmul.f32 %v12688_v26, %v2442_v63  ;;  %vm2484_vm11 = vweird.f32 %v12665_v56  ;;  %v12818_v6 = vpop.xlane.xlu0 %1249 }
 0x247   : > { %v2470_v8 = vmul.f32 %v12734_v25, %v2469_v32  ;;  %v2492_v59 = vsub.f32 1.5, %v2491_v30  ;;  %vm2495_vm13 = vweird.f32 %v12711_v15  ;;  %9404 = vrsqrt.f32 %v12732_v57 }
 0x248   : > { %v2481_v29 = vmul.f32 0.5, %v2480_v10  ;;  %3092 = vst.msk [vmem:[#allocation2 + $0x3cb] sm:$0xff] %vm407_vm0, %v2963_v4  ;;  %v2447_v16 = vsel %vm2446_vm12, %v12688_v26, %v2443_v12  ;;  %vm2485_vm14 = vweird.f32 %v12727_v39  ;;  %9406 = vrsqrt.f32 %v12750_v2  ;;  %vm2496_vm1 = vmor %vm2494_vm8, %vm2495_vm13 }
 0x249   : > { %v2471_v41 = vmul.f32 0.5, %v2470_v8  ;;  %v2962_v55 = vmul.f32 %v9565_v13, %v2447_v16  ;;  %v2493_v52 = vmul.f32 %v12711_v15, %v2492_v59  ;;  %v1437_v34 = vmul.f32 %v10452_v17, %v12652_v49  ;;  %vm2486_vm3 = vmor %vm2484_vm11, %vm2485_vm14 }
 0x24a   : > { %v2482_v18 = vsub.f32 1.5, %v2481_v29  ;;  %vm2474_vm15 = vweird.f32 %v12667_v14  ;;  %vm2475_vm2 = vweird.f32 %v12734_v25  ;;  %v1436_v3 = vmul.f32 %v10452_v17, %v12638_v48 }
 0x24b   : > { %v2472_v36 = vsub.f32 1.5, %v2471_v41  ;;  %v12787_v50 = vpop.eup %9402  ;;  %3091 = vst.msk [vmem:[#allocation2 + $0x3c3] sm:$0xff] %vm407_vm0, %v2962_v55  ;;  %v2497_v5 = vsel %vm2496_vm1, %v12711_v15, %v2493_v52  ;;  %v12792_v26 = vadd.f32 1e-08, %v1437_v34  ;;  %v1435_v47 = vmul.f32 %v10452_v17, %v12669_v1  ;;  %vm2476_vm4 = vmor %vm2474_vm15, %vm2475_vm2  ;;  %v9570_v34 = vld [vmem:[%s10046_s18 + $0x2d8] sm:$0xff] }
 0x24c   : > { %v2483_v49 = vmul.f32 %v12727_v39, %v2482_v18  ;;  %v2967_v61 = vmul.f32 %v9566_v53, %v2497_v5  ;;  %v2519_v35 = vmul.f32 %v12787_v50, %v12723_v37  ;;  %v1440_v40 = vmul.f32 %v10452_v17, %v12725_v62 }
 0x24d   : > { %v2473_v48 = vmul.f32 %v12734_v25, %v2472_v36  ;;  %v12806_v21 = vpop.eup %9404  ;;  %9408 = vrsqrt.f32 %v12792_v26  ;;  %v12814_v56 = vadd.f32 1e-08, %v1436_v3  ;;  %v1439_v51 = vmul.f32 %v10452_v17, %v12709_v45 }
 0x24e   : > { %v2487_v1 = vsel %vm2486_vm3, %v12727_v39, %v2483_v49  ;;  %v12820_v15 = vpop.eup %9406  ;;  %3096 = vst.msk [vmem:[#allocation2 + $0x3f3] sm:$0xff] %vm407_vm0, %v2967_v61  ;;  %v2520_v14 = vmul.f32 %v12787_v50, %v2519_v35  ;;  %v2509_v46 = vmul.f32 %v12806_v21, %v12732_v57  ;;  %vm2524_vm5 = vweird.f32 %v12723_v37  ;;  %v9569_v37 = vld [vmem:[%s10046_s18 + $0x2e0] sm:$0xff]  ;;  %v9571_v49 = vld [vmem:[%s10046_s18 + $0x2d0] sm:$0xff] }
 0x24f   : > { %v2966_v33 = vmul.f32 %v9567_v9, %v2487_v1  ;;  %v2477_v28 = vsel %vm2476_vm4, %v12734_v25, %v2473_v48  ;;  %v2499_v45 = vmul.f32 %v12820_v15, %v12750_v2  ;;  %vm2514_vm6 = vweird.f32 %v12732_v57  ;;  %v12852_v63 = vpop.xlane.xlu1 %1261  ;;  %v12864_v4 = vpop.xlane.xlu2 %1264 }
 0x250   : > { %v2965_v38 = vmul.f32 %v9568_v54, %v2477_v28  ;;  %v2521_v22 = vmul.f32 0.5, %v2520_v14  ;;  %v2510_v62 = vmul.f32 %v12806_v21, %v2509_v46  ;;  %9410 = vrsqrt.f32 %v12814_v56  ;;  %v12881_v55 = vpop.xlane.xlu0 %1258  ;;  %v9572_v54 = vld [vmem:[%s10046_s18 + $0x2f8] sm:$0xff] }
 0x251   : > { %3095 = vst.msk [vmem:[#allocation2 + $0x3eb] sm:$0xff] %vm407_vm0, %v2966_v33  ;;  %v2500_v39 = vmul.f32 %v12820_v15, %v2499_v45  ;;  %v12838_v27 = vadd.f32 1e-08, %v1435_v47  ;;  %v12840_v20 = vadd.f32 1e-08, %v1440_v40  ;;  %v1438_v25 = vmul.f32 %v10452_v17, %v12741_v24 }
 0x252   : > { %3094 = vst.msk [vmem:[#allocation2 + $0x3db] sm:$0xff] %vm407_vm0, %v2965_v38  ;;  %v2522_v44 = vsub.f32 1.5, %v2521_v22  ;;  %vm2525_vm7 = vweird.f32 %v12787_v50  ;;  %v2511_v42 = vmul.f32 0.5, %v2510_v62  ;;  %v12845_v31 = vadd.f32 1e-08, %v1439_v51 }
 0x253   : > { %v12847_v11 = vpop.eup %9408  ;;  %vm2515_vm8 = vweird.f32 %v12806_v21  ;;  %v2501_v19 = vmul.f32 0.5, %v2500_v39  ;;  %vm2504_vm9 = vweird.f32 %v12750_v2  ;;  %9412 = vrsqrt.f32 %v12838_v27  ;;  %vm2526_vm11 = vmor %vm2524_vm5, %vm2525_vm7 }
 0x254   : > { %v2523_v24 = vmul.f32 %v12787_v50, %v2522_v44  ;;  %v2512_v32 = vsub.f32 1.5, %v2511_v42  ;;  %vm2505_vm10 = vweird.f32 %v12820_v15  ;;  %v2549_v23 = vmul.f32 %v12847_v11, %v12792_v26  ;;  %vm2516_vm12 = vmor %vm2514_vm6, %vm2515_vm8 }
 0x255   : > { %v2502_v30 = vsub.f32 1.5, %v2501_v19  ;;  %9414 = vrsqrt.f32 %v12840_v20  ;;  %v12861_v10 = vadd.f32 1e-08, %v1438_v25  ;;  %v1443_v7 = vmul.f32 %v10452_v17, %v1256_v58  ;;  %vm2506_vm14 = vmor %vm2504_vm9, %vm2505_vm10 }
 0x256   : > { %v12866_v12 = vpop.eup %9410  ;;  %v2527_v8 = vsel %vm2526_vm11, %v12787_v50, %v2523_v24  ;;  %v2513_v59 = vmul.f32 %v12806_v21, %v2512_v32  ;;  %v2550_v29 = vmul.f32 %v12847_v11, %v2549_v23  ;;  %9416 = vrsqrt.f32 %v12845_v31 }
 0x257   : > { %v2970_v16 = vmul.f32 %v9569_v37, %v2527_v8  ;;  %v2503_v41 = vmul.f32 %v12820_v15, %v2502_v30  ;;  %vm2554_vm13 = vweird.f32 %v12792_v26  ;;  %v2539_v13 = vmul.f32 %v12866_v12, %v12814_v56 }
 0x258   : > { %v2517_v52 = vsel %vm2516_vm12, %v12806_v21, %v2513_v59  ;;  %v2551_v18 = vmul.f32 0.5, %v2550_v29  ;;  %vm2544_vm1 = vweird.f32 %v12814_v56  ;;  %9418 = vrsqrt.f32 %v12861_v10  ;;  %v12942_v39 = vpop.xlane.xlu2 %1273  ;;  %v9573_v56 = vld [vmem:[%s10046_s18 + $0x2f0] sm:$0xff] }
 0x259   : > { %v12890_v57 = vpop.eup %9412  ;;  %3099 = vst.msk [vmem:[#allocation2 + $0x413] sm:$0xff] %vm407_vm0, %v2970_v16  ;;  %v2969_v36 = vmul.f32 %v9570_v34, %v2517_v52  ;;  %v2507_v3 = vsel %vm2506_vm14, %v12820_v15, %v2503_v41  ;;  %v2540_v50 = vmul.f32 %v12866_v12, %v2539_v13  ;;  %v12896_v5 = vadd.f32 1e-08, %v1443_v7 }
 0x25a   : > { %v2968_v2 = vmul.f32 %v9571_v49, %v2507_v3  ;;  %v2552_v47 = vsub.f32 1.5, %v2551_v18  ;;  %vm2555_vm15 = vweird.f32 %v12847_v11  ;;  %v2529_v58 = vmul.f32 %v12890_v57, %v12838_v27  ;;  %v12928_v9 = vpop.xlane.xlu1 %1270 }
 0x25b   : > { %vm2534_vm2 = vweird.f32 %v12838_v27  ;;  %v12903_v53 = vpop.eup %9414  ;;  %3098 = vst.msk [vmem:[#allocation2 + $0x403] sm:$0xff] %vm407_vm0, %v2969_v36  ;;  %v2541_v61 = vmul.f32 0.5, %v2540_v50  ;;  %vm2584_vm3 = vweird.f32 %v12840_v20  ;;  %9420 = vrsqrt.f32 %v12896_v5  ;;  %vm2556_vm5 = vmor %vm2554_vm13, %vm2555_vm15  ;;  %v1268_v24 = vpop.xlane.xlu0 %1267  ;;  %v9574_v27 = vld [vmem:[%s10046_s18 + $0x2e8] sm:$0xff]  ;;  %v9575_v36 = vld [vmem:[%s10046_s18 + $0x310] sm:$0xff] }
 0x25c   : > { %v1442_v48 = vmul.f32 %v10452_v17, %v12779_v60  ;;  %v12910_v35 = vpop.eup %9416  ;;  %3097 = vst.msk [vmem:[#allocation2 + $0x3fb] sm:$0xff] %vm407_vm0, %v2968_v2  ;;  %v2553_v40 = vmul.f32 %v12847_v11, %v2552_v47  ;;  %vm2545_vm4 = vweird.f32 %v12866_v12  ;;  %v2530_v21 = vmul.f32 %v12890_v57, %v2529_v58 }
 0x25d   : > { %v2579_v1 = vmul.f32 %v12903_v53, %v12840_v20  ;;  %v2542_v60 = vsub.f32 1.5, %v2541_v61  ;;  %vm2535_vm6 = vweird.f32 %v12890_v57  ;;  %v2569_v51 = vmul.f32 %v12910_v35, %v12845_v31  ;;  %vm2546_vm9 = vmor %vm2544_vm1, %vm2545_vm4 }
 0x25e   : > { %vm2574_vm7 = vweird.f32 %v12845_v31  ;;  %v12926_v15 = vadd.f32 1e-08, %v1442_v48  ;;  %v12930_v33 = vpop.eup %9418  ;;  %v2557_v28 = vsel %vm2556_vm5, %v12847_v11, %v2553_v40  ;;  %v2531_v14 = vmul.f32 0.5, %v2530_v21  ;;  %vm2536_vm12 = vmor %vm2534_vm2, %vm2535_vm6  ;;  %v9576_v31 = vld [vmem:[%s10046_s18 + $0x308] sm:$0xff]  ;;  %v9577_v21 = vld [vmem:[%s10046_s18 + $0x300] sm:$0xff] }
 0x25f   : > { %v2580_v26 = vmul.f32 %v12903_v53, %v2579_v1  ;;  %v1441_v46 = vmul.f32 %v10452_v17, %v12818_v6  ;;  %v2973_v38 = vmul.f32 %v9572_v54, %v2557_v28  ;;  %v2543_v45 = vmul.f32 %v12866_v12, %v2542_v60 }
 0x260   : > { %v2570_v22 = vmul.f32 %v12910_v35, %v2569_v51  ;;  %v2559_v62 = vmul.f32 %v12930_v33, %v12861_v10  ;;  %vm2564_vm8 = vweird.f32 %v12861_v10  ;;  %v2532_v6 = vsub.f32 1.5, %v2531_v14 }
 0x261   : > { %v2581_v25 = vmul.f32 0.5, %v2580_v26  ;;  %vm2585_vm10 = vweird.f32 %v12903_v53  ;;  %9422 = vrsqrt.f32 %v12926_v15  ;;  %v12950_v44 = vpop.eup %9420  ;;  %3102 = vst.msk [vmem:[#allocation2 + $0x42b] sm:$0xff] %vm407_vm0, %v2973_v38  ;;  %v2547_v42 = vsel %vm2546_vm9, %v12866_v12, %v2543_v45 }
 0x262   : > { %v2571_v11 = vmul.f32 0.5, %v2570_v22  ;;  %vm2575_vm11 = vweird.f32 %v12910_v35  ;;  %v2560_v19 = vmul.f32 %v12930_v33, %v2559_v62  ;;  %v2972_v32 = vmul.f32 %v9573_v56, %v2547_v42  ;;  %vm2586_vm14 = vmor %vm2584_vm3, %vm2585_vm10 }
 0x263   : > { %v2533_v23 = vmul.f32 %v12890_v57, %v2532_v6  ;;  %v2582_v30 = vsub.f32 1.5, %v2581_v25  ;;  %v2609_v7 = vmul.f32 %v12950_v44, %v12896_v5  ;;  %vm2565_vm13 = vweird.f32 %v12930_v33  ;;  %vm2576_vm1 = vmor %vm2574_vm7, %vm2575_vm11 }
 0x264   : > { %v2572_v12 = vsub.f32 1.5, %v2571_v11  ;;  %v2561_v8 = vmul.f32 0.5, %v2560_v19  ;;  %v12965_v59 = vadd.f32 1e-08, %v1441_v46  ;;  %3101 = vst.msk [vmem:[#allocation2 + $0x423] sm:$0xff] %vm407_vm0, %v2972_v32  ;;  %v1446_v41 = vmul.f32 %v10452_v17, %v12864_v4  ;;  %v12996_v47 = vpop.xlane.xlu1 %1279  ;;  %vm2566_vm2 = vmor %vm2564_vm8, %vm2565_vm13  ;;  %v1283_v40 = vpop.xlane.xlu2 %1282 }
 0x265   : > { %v2537_v29 = vsel %vm2536_vm12, %v12890_v57, %v2533_v23  ;;  %v2583_v37 = vmul.f32 %v12903_v53, %v2582_v30  ;;  %v2610_v16 = vmul.f32 %v12950_v44, %v2609_v7  ;;  %vm2614_vm15 = vweird.f32 %v12896_v5  ;;  %v1277_v26 = vpop.xlane.xlu0 %1276  ;;  %v9578_v5 = vld [vmem:[%s10046_s18 + $0x328] sm:$0xff] }
 0x266   : > { %v2971_v13 = vmul.f32 %v9574_v27, %v2537_v29  ;;  %v2573_v52 = vmul.f32 %v12910_v35, %v2572_v12  ;;  %v2562_v18 = vsub.f32 1.5, %v2561_v8  ;;  %9424 = vrsqrt.f32 %v12965_v59 }
 0x267   : > { %v12980_v57 = vpop.eup %9422  ;;  %v2587_v34 = vsel %vm2586_vm14, %v12903_v53, %v2583_v37  ;;  %v2611_v4 = vmul.f32 0.5, %v2610_v16  ;;  %v12988_v20 = vadd.f32 1e-08, %v1446_v41  ;;  %vm2615_vm3 = vweird.f32 %v12950_v44 }
 0x268   : > { %3100 = vst.msk [vmem:[#allocation2 + $0x41b] sm:$0xff] %vm407_vm0, %v2971_v13  ;;  %v2976_v3 = vmul.f32 %v9575_v36, %v2587_v34  ;;  %v2577_v50 = vsel %vm2576_vm1, %v12910_v35, %v2573_v52  ;;  %v2563_v49 = vmul.f32 %v12930_v33, %v2562_v18  ;;  %v2599_v2 = vmul.f32 %v12980_v57, %v12926_v15  ;;  %vm2616_vm4 = vmor %vm2614_vm15, %vm2615_vm3 }
 0x269   : > { %v2975_v58 = vmul.f32 %v9576_v31, %v2577_v50  ;;  %v2612_v53 = vsub.f32 1.5, %v2611_v4  ;;  %9426 = vrsqrt.f32 %v12988_v20  ;;  %v1445_v35 = vmul.f32 %v10452_v17, %v12852_v63  ;;  %v9580_v50 = vld [vmem:[%s10046_s18 + $0x318] sm:$0xff] }
 0x26a   : > { %3105 = vst.msk [vmem:[#allocation2 + $0x44b] sm:$0xff] %vm407_vm0, %v2976_v3  ;;  %v2567_v61 = vsel %vm2566_vm2, %v12930_v33, %v2563_v49  ;;  %v2600_v48 = vmul.f32 %v12980_v57, %v2599_v2  ;;  %v1444_v60 = vmul.f32 %v10452_v17, %v12881_v55  ;;  %v1449_v51 = vmul.f32 %v10452_v17, %v12942_v39 }
 0x26b   : > { %3104 = vst.msk [vmem:[#allocation2 + $0x443] sm:$0xff] %vm407_vm0, %v2975_v58  ;;  %v2974_v10 = vmul.f32 %v9577_v21, %v2567_v61  ;;  %v2613_v1 = vmul.f32 %v12950_v44, %v2612_v53  ;;  %v13021_v28 = vadd.f32 1e-08, %v1445_v35  ;;  %v1448_v14 = vmul.f32 %v10452_v17, %v12928_v9 }
 0x26c   : > { %v13017_v33 = vpop.eup %9424  ;;  %v2601_v63 = vmul.f32 0.5, %v2600_v48  ;;  %v13029_v54 = vadd.f32 1e-08, %v1444_v60  ;;  %v1447_v38 = vmul.f32 %v10452_v17, %v1268_v24  ;;  %vm2605_vm5 = vweird.f32 %v12980_v57 }
 0x26d   : > { %3103 = vst.msk [vmem:[#allocation2 + $0x43b] sm:$0xff] %vm407_vm0, %v2974_v10  ;;  %v2617_v46 = vsel %vm2616_vm4, %v12950_v44, %v2613_v1  ;;  %v2589_v55 = vmul.f32 %v13017_v33, %v12965_v59  ;;  %9428 = vrsqrt.f32 %v13021_v28  ;;  %v13039_v39 = vadd.f32 1e-08, %v1449_v51  ;;  %v1292_v8 = vpop.xlane.xlu2 %1291  ;;  %v9581_v10 = vld [vmem:[%s10046_s18 + $0x340] sm:$0xff] }
 0x26e   : > { %v2979_v45 = vmul.f32 %v9578_v5, %v2617_v46  ;;  %v2602_v22 = vsub.f32 1.5, %v2601_v63  ;;  %9430 = vrsqrt.f32 %v13029_v54  ;;  %vm2604_vm6 = vweird.f32 %v12926_v15  ;;  %v9579_v15 = vld [vmem:[%s10046_s18 + $0x320] sm:$0xff] }
 0x26f   : > { %v13035_v9 = vpop.eup %9426  ;;  %v2590_v62 = vmul.f32 %v13017_v33, %v2589_v55  ;;  %v13046_v44 = vadd.f32 1e-08, %v1448_v14  ;;  %vm2606_vm7 = vmor %vm2604_vm6, %vm2605_vm5  ;;  %9432 = vrsqrt.f32 %v13039_v39  ;;  %v13049_v11 = vadd.f32 1e-08, %v1447_v38  ;;  %v13054_v56 = vpop.xlane.xlu1 %1288 }
 0x270   : > { %3108 = vst.msk [vmem:[#allocation2 + $0x46b] sm:$0xff] %vm407_vm0, %v2979_v45  ;;  %v2603_v6 = vmul.f32 %v12980_v57, %v2602_v22  ;;  %v2639_v25 = vmul.f32 %v13035_v9, %v12988_v20  ;;  %vm2595_vm8 = vweird.f32 %v13017_v33  ;;  %vm2594_vm9 = vweird.f32 %v12965_v59  ;;  %v13082_v52 = vpop.xlane.xlu0 %1285 }
 0x271   : > { %v2591_v42 = vmul.f32 0.5, %v2590_v62  ;;  %9434 = vrsqrt.f32 %v13046_v44  ;;  %vm2644_vm10 = vweird.f32 %v12988_v20  ;;  %v1452_v12 = vmul.f32 %v10452_v17, %v1283_v40  ;;  %vm2596_vm13 = vmor %vm2594_vm9, %vm2595_vm8 }
 0x272   : > { %v2607_v19 = vsel %vm2606_vm7, %v12980_v57, %v2603_v6  ;;  %v2640_v24 = vmul.f32 %v13035_v9, %v2639_v25  ;;  %9436 = vrsqrt.f32 %v13049_v11  ;;  %vm2645_vm11 = vweird.f32 %v13035_v9 }
 0x273   : > { %v2978_v32 = vmul.f32 %v9579_v15, %v2607_v19  ;;  %v2592_v23 = vsub.f32 1.5, %v2591_v42  ;;  %v13059_v30 = vpop.eup %9428  ;;  %vm2634_vm12 = vweird.f32 %v13021_v28  ;;  %v1451_v59 = vmul.f32 %v10452_v17, %v12996_v47  ;;  %vm2646_vm2 = vmor %vm2644_vm10, %vm2645_vm11 }
 0x274   : > { %v2641_v7 = vmul.f32 0.5, %v2640_v24  ;;  %v13064_v29 = vpop.eup %9430  ;;  %v2629_v16 = vmul.f32 %v13059_v30, %v13021_v28  ;;  %vm2635_vm14 = vweird.f32 %v13059_v30  ;;  %vm2624_vm1 = vweird.f32 %v13029_v54  ;;  %v9582_v28 = vld [vmem:[%s10046_s18 + $0x338] sm:$0xff] }
 0x275   : > { %3107 = vst.msk [vmem:[#allocation2 + $0x463] sm:$0xff] %vm407_vm0, %v2978_v32  ;;  %v2593_v37 = vmul.f32 %v13017_v33, %v2592_v23  ;;  %v2619_v27 = vmul.f32 %v13064_v29, %v13029_v54  ;;  %vm2674_vm15 = vweird.f32 %v13039_v39  ;;  %v1450_v13 = vmul.f32 %v10452_v17, %v1277_v26  ;;  %v13084_v18 = vpop.eup %9432  ;;  %vm2636_vm6 = vmor %vm2634_vm12, %vm2635_vm14  ;;  %v9583_v32 = vld [vmem:[%s10046_s18 + $0x330] sm:$0xff] }
 0x276   : > { %v2642_v41 = vsub.f32 1.5, %v2641_v7  ;;  %v2630_v34 = vmul.f32 %v13059_v30, %v2629_v16  ;;  %v13088_v4 = vadd.f32 1e-08, %v1452_v12  ;;  %v1455_v36 = vmul.f32 %v10452_v17, %v1292_v8 }
 0x277   : > { %v2597_v57 = vsel %vm2596_vm13, %v13017_v33, %v2593_v37  ;;  %v13091_v3 = vpop.eup %9434  ;;  %v2620_v47 = vmul.f32 %v13064_v29, %v2619_v27  ;;  %v2669_v31 = vmul.f32 %v13084_v18, %v13039_v39  ;;  %vm2625_vm3 = vweird.f32 %v13064_v29  ;;  %v9584_v37 = vld [vmem:[%s10046_s18 + $0x358] sm:$0xff] }
 0x278   : > { %v2977_v49 = vmul.f32 %v9580_v50, %v2597_v57  ;;  %v2643_v2 = vmul.f32 %v13035_v9, %v2642_v41  ;;  %v13098_v58 = vpop.eup %9436  ;;  %v2631_v53 = vmul.f32 0.5, %v2630_v34  ;;  %v2659_v61 = vmul.f32 %v13091_v3, %v13046_v44  ;;  %vm2626_vm8 = vmor %vm2624_vm1, %vm2625_vm3  ;;  %v9585_v41 = vld [vmem:[%s10046_s18 + $0x350] sm:$0xff]  ;;  %v9586_v57 = vld [vmem:[%s10046_s18 + $0x348] sm:$0xff] }
 0x279   : > { %vm2664_vm4 = vweird.f32 %v13046_v44  ;;  %v13108_v48 = vadd.f32 1e-08, %v1451_v59  ;;  %v2621_v40 = vmul.f32 0.5, %v2620_v47  ;;  %v2670_v21 = vmul.f32 %v13084_v18, %v2669_v31  ;;  %v13121_v46 = vpop.xlane.xlu1 %1297 }
 0x27a   : > { %3106 = vst.msk [vmem:[#allocation2 + $0x453] sm:$0xff] %vm407_vm0, %v2977_v49  ;;  %v2647_v35 = vsel %vm2646_vm2, %v13035_v9, %v2643_v2  ;;  %v2649_v20 = vmul.f32 %v13098_v58, %v13049_v11  ;;  %v2632_v60 = vsub.f32 1.5, %v2631_v53  ;;  %v2660_v51 = vmul.f32 %v13091_v3, %v2659_v61  ;;  %v1301_v9 = vpop.xlane.xlu2 %1300  ;;  %v1295_v15 = vpop.xlane.xlu0 %1294 }
 0x27b   : > { %v2982_v1 = vmul.f32 %v9581_v10, %v2647_v35  ;;  %v13117_v33 = vadd.f32 1e-08, %v1450_v13  ;;  %v2622_v63 = vsub.f32 1.5, %v2621_v40  ;;  %v2671_v14 = vmul.f32 0.5, %v2670_v21 }
 0x27c   : > { %v2650_v26 = vmul.f32 %v13098_v58, %v2649_v20  ;;  %9438 = vrsqrt.f32 %v13088_v4  ;;  %v2633_v55 = vmul.f32 %v13059_v30, %v2632_v60  ;;  %vm2675_vm5 = vweird.f32 %v13084_v18 }
 0x27d   : > { %3111 = vst.msk [vmem:[#allocation2 + $0x48b] sm:$0xff] %vm407_vm0, %v2982_v1  ;;  %v2661_v38 = vmul.f32 0.5, %v2660_v51  ;;  %9440 = vrsqrt.f32 %v13108_v48  ;;  %v2623_v5 = vmul.f32 %v13064_v29, %v2622_v63  ;;  %v2672_v45 = vsub.f32 1.5, %v2671_v14  ;;  %vm2676_vm10 = vmor %vm2674_vm15, %vm2675_vm5 }
 0x27e   : > { %vm2665_vm7 = vweird.f32 %v13091_v3  ;;  %v2651_v22 = vmul.f32 0.5, %v2650_v26  ;;  %v2637_v62 = vsel %vm2636_vm6, %v13059_v30, %v2633_v55  ;;  %vm2655_vm9 = vweird.f32 %v13098_v58 }
 0x27f   : > { %v2662_v6 = vsub.f32 1.5, %v2661_v38  ;;  %9442 = vrsqrt.f32 %v13117_v33  ;;  %v2981_v25 = vmul.f32 %v9582_v28, %v2637_v62  ;;  %v2627_v42 = vsel %vm2626_vm8, %v13064_v29, %v2623_v5  ;;  %vm2666_vm12 = vmor %vm2664_vm4, %vm2665_vm7 }
 0x280   : > { %v2673_v19 = vmul.f32 %v13084_v18, %v2672_v45  ;;  %v2652_v24 = vsub.f32 1.5, %v2651_v22  ;;  %v2980_v23 = vmul.f32 %v9583_v32, %v2627_v42  ;;  %vm2654_vm11 = vweird.f32 %v13049_v11  ;;  %v9587_v22 = vld [vmem:[%s10046_s18 + $0x370] sm:$0xff] }
 0x281   : > { %v2663_v54 = vmul.f32 %v13091_v3, %v2662_v6  ;;  %v13150_v30 = vadd.f32 1e-08, %v1455_v36  ;;  %3110 = vst.msk [vmem:[#allocation2 + $0x47b] sm:$0xff] %vm407_vm0, %v2981_v25  ;;  %v1454_v8 = vmul.f32 %v10452_v17, %v13054_v56  ;;  %v1453_v11 = vmul.f32 %v10452_v17, %v13082_v52  ;;  %vm2656_vm13 = vmor %vm2654_vm11, %vm2655_vm9 }
 0x282   : > { %v13152_v7 = vpop.eup %9438  ;;  %v2677_v12 = vsel %vm2676_vm10, %v13084_v18, %v2673_v19  ;;  %v2653_v39 = vmul.f32 %v13098_v58, %v2652_v24  ;;  %3109 = vst.msk [vmem:[#allocation2 + $0x473] sm:$0xff] %vm407_vm0, %v2980_v23  ;;  %v1458_v56 = vmul.f32 %v10452_v17, %v1301_v9  ;;  %vm2704_vm14 = vweird.f32 %v13088_v4  ;;  %v1310_v40 = vpop.xlane.xlu2 %1309 }
 0x283   : > { %v13165_v29 = vpop.eup %9440  ;;  %v2985_v16 = vmul.f32 %v9584_v37, %v2677_v12  ;;  %v2667_v59 = vsel %vm2666_vm12, %v13091_v3, %v2663_v54  ;;  %v2699_v44 = vmul.f32 %v13152_v7, %v13088_v4  ;;  %9444 = vrsqrt.f32 %v13150_v30 }
 0x284   : > { %v2984_v27 = vmul.f32 %v9585_v41, %v2667_v59  ;;  %v2657_v13 = vsel %vm2656_vm13, %v13098_v58, %v2653_v39  ;;  %v2689_v52 = vmul.f32 %v13165_v29, %v13108_v48  ;;  %v13190_v49 = vadd.f32 1e-08, %v1454_v8  ;;  %v1307_v2 = vpop.xlane.xlu1 %1306 }
 0x285   : > { %v13179_v18 = vpop.eup %9442  ;;  %3114 = vst.msk [vmem:[#allocation2 + $0x4a3] sm:$0xff] %vm407_vm0, %v2985_v16  ;;  %v2983_v34 = vmul.f32 %v9586_v57, %v2657_v13  ;;  %v2700_v36 = vmul.f32 %v13152_v7, %v2699_v44  ;;  %v13193_v31 = vadd.f32 1e-08, %v1453_v11  ;;  %v13195_v58 = vadd.f32 1e-08, %v1458_v56  ;;  %v13208_v60 = vpop.xlane.xlu0 %1303 }
 0x286   : > { %3113 = vst.msk [vmem:[#allocation2 + $0x49b] sm:$0xff] %vm407_vm0, %v2984_v27  ;;  %v2690_v3 = vmul.f32 %v13165_v29, %v2689_v52  ;;  %v2679_v50 = vmul.f32 %v13179_v18, %v13117_v33  ;;  %v1457_v53 = vmul.f32 %v10452_v17, %v13121_v46  ;;  %vm2694_vm1 = vweird.f32 %v13108_v48  ;;  %v9588_v48 = vld [vmem:[%s10046_s18 + $0x368] sm:$0xff] }
 0x287   : > { %3112 = vst.msk [vmem:[#allocation2 + $0x493] sm:$0xff] %vm407_vm0, %v2983_v34  ;;  %v2701_v47 = vmul.f32 0.5, %v2700_v36  ;;  %9446 = vrsqrt.f32 %v13190_v49  ;;  %vm2705_vm15 = vweird.f32 %v13152_v7  ;;  %vm2695_vm2 = vweird.f32 %v13165_v29 }
 0x288   : > { %v2691_v61 = vmul.f32 0.5, %v2690_v3  ;;  %v2680_v35 = vmul.f32 %v13179_v18, %v2679_v50  ;;  %9448 = vrsqrt.f32 %v13193_v31  ;;  %v13206_v1 = vadd.f32 1e-08, %v1457_v53  ;;  %vm2706_vm5 = vmor %vm2704_vm14, %vm2705_vm15 }
 0x289   : > { %v2702_v21 = vsub.f32 1.5, %v2701_v47  ;;  %9450 = vrsqrt.f32 %v13195_v58  ;;  %v13210_v51 = vpop.eup %9444  ;;  %vm2684_vm3 = vweird.f32 %v13117_v33  ;;  %vm2734_vm4 = vweird.f32 %v13150_v30  ;;  %vm2696_vm7 = vmor %vm2694_vm1, %vm2695_vm2 }
 0x28a   : > { %v2692_v20 = vsub.f32 1.5, %v2691_v61  ;;  %v2681_v10 = vmul.f32 0.5, %v2680_v35  ;;  %v1456_v14 = vmul.f32 %v10452_v17, %v1295_v15  ;;  %vm2685_vm6 = vweird.f32 %v13179_v18  ;;  %v9590_v61 = vld [vmem:[%s10046_s18 + $0x388] sm:$0xff] }
 0x28b   : > { %v2703_v63 = vmul.f32 %v13152_v7, %v2702_v21  ;;  %v2729_v55 = vmul.f32 %v13210_v51, %v13150_v30  ;;  %9452 = vrsqrt.f32 %v13206_v1  ;;  %v1461_v5 = vmul.f32 %v10452_v17, %v1310_v40  ;;  %vm2686_vm8 = vmor %vm2684_vm3, %vm2685_vm6 }
 0x28c   : > { %v2693_v26 = vmul.f32 %v13165_v29, %v2692_v20  ;;  %v2682_v46 = vsub.f32 1.5, %v2681_v10  ;;  %v13228_v4 = vadd.f32 1e-08, %v1456_v14  ;;  %vm2724_vm9 = vweird.f32 %v13190_v49 }
 0x28d   : > { %v2707_v38 = vsel %vm2706_vm5, %v13152_v7, %v2703_v63  ;;  %v13231_v45 = vpop.eup %9446  ;;  %v2730_v28 = vmul.f32 %v13210_v51, %v2729_v55  ;;  %vm2714_vm10 = vweird.f32 %v13193_v31  ;;  %v1460_v33 = vmul.f32 %v10452_v17, %v1307_v2  ;;  %v9589_v7 = vld [vmem:[%s10046_s18 + $0x360] sm:$0xff] }
 0x28e   : > { %v2988_v9 = vmul.f32 %v9587_v22, %v2707_v38  ;;  %v2697_v62 = vsel %vm2696_vm7, %v13165_v29, %v2693_v26  ;;  %v2683_v6 = vmul.f32 %v13179_v18, %v2682_v46  ;;  %v13237_v25 = vpop.eup %9448  ;;  %v2719_v19 = vmul.f32 %v13231_v45, %v13190_v49  ;;  %v13256_v54 = vpop.xlane.xlu1 %1315  ;;  %v9591_v63 = vld [vmem:[%s10046_s18 + $0x380] sm:$0xff] }
 0x28f   : > { %v2987_v42 = vmul.f32 %v9588_v48, %v2697_v62  ;;  %9454 = vrsqrt.f32 %v13228_v4  ;;  %v13248_v24 = vpop.eup %9450  ;;  %v2731_v32 = vmul.f32 0.5, %v2730_v28  ;;  %v2709_v23 = vmul.f32 %v13237_v25, %v13193_v31  ;;  %v1319_v16 = vpop.xlane.xlu2 %1318 }
 0x290   : > { %3117 = vst.msk [vmem:[#allocation2 + $0x4c3] sm:$0xff] %vm407_vm0, %v2988_v9  ;;  %v2687_v15 = vsel %vm2686_vm8, %v13179_v18, %v2683_v6  ;;  %v2720_v39 = vmul.f32 %v13231_v45, %v2719_v19  ;;  %v2759_v8 = vmul.f32 %v13248_v24, %v13195_v58  ;;  %vm2764_vm11 = vweird.f32 %v13195_v58  ;;  %v1313_v18 = vpop.xlane.xlu0 %1312  ;;  %v9593_v9 = vld [vmem:[%s10046_s18 + $0x3a0] sm:$0xff] }
 0x291   : > { %3116 = vst.msk [vmem:[#allocation2 + $0x4bb] sm:$0xff] %vm407_vm0, %v2987_v42  ;;  %v2986_v12 = vmul.f32 %v9589_v7, %v2687_v15  ;;  %v2732_v11 = vsub.f32 1.5, %v2731_v32  ;;  %vm2735_vm12 = vweird.f32 %v13210_v51  ;;  %v2710_v29 = vmul.f32 %v13237_v25, %v2709_v23  ;;  %v13268_v59 = vpop.eup %9452 }
 0x292   : > { %v13266_v37 = vadd.f32 1e-08, %v1461_v5  ;;  %v2721_v44 = vmul.f32 0.5, %v2720_v39  ;;  %vm2725_vm13 = vweird.f32 %v13231_v45  ;;  %vm2715_vm14 = vweird.f32 %v13237_v25  ;;  %vm2736_vm15 = vmor %vm2734_vm4, %vm2735_vm12  ;;  %v9592_v5 = vld [vmem:[%s10046_s18 + $0x378] sm:$0xff] }
 0x293   : > { %3115 = vst.msk [vmem:[#allocation2 + $0x4b3] sm:$0xff] %vm407_vm0, %v2986_v12  ;;  %v2760_v56 = vmul.f32 %v13248_v24, %v2759_v8  ;;  %v2733_v41 = vmul.f32 %v13210_v51, %v2732_v11  ;;  %v2711_v27 = vmul.f32 0.5, %v2710_v29  ;;  %v2749_v13 = vmul.f32 %v13268_v59, %v13206_v1  ;;  %vm2726_vm3 = vmor %vm2724_vm9, %vm2725_vm13 }
 0x294   : > { %vm2754_vm1 = vweird.f32 %v13206_v1  ;;  %v13278_v52 = vadd.f32 1e-08, %v1460_v33  ;;  %v2722_v34 = vsub.f32 1.5, %v2721_v44  ;;  %9456 = vrsqrt.f32 %v13266_v37  ;;  %vm2716_vm4 = vmor %vm2714_vm10, %vm2715_vm14  ;;  %v9594_v33 = vld [vmem:[%s10046_s18 + $0x398] sm:$0xff] }
 0x295   : > { %v13280_v57 = vpop.eup %9454  ;;  %v2761_v36 = vmul.f32 0.5, %v2760_v56  ;;  %v1459_v3 = vmul.f32 %v10452_v17, %v13208_v60  ;;  %v2737_v50 = vsel %vm2736_vm15, %v13210_v51, %v2733_v41  ;;  %v2712_v2 = vsub.f32 1.5, %v2711_v27 }
 0x296   : > { %v2750_v47 = vmul.f32 %v13268_v59, %v2749_v13  ;;  %v2739_v53 = vmul.f32 %v13280_v57, %v13228_v4  ;;  %v2991_v35 = vmul.f32 %v9590_v61, %v2737_v50  ;;  %v2723_v30 = vmul.f32 %v13231_v45, %v2722_v34 }
 0x297   : > { %v2762_v40 = vsub.f32 1.5, %v2761_v36  ;;  %vm2765_vm2 = vweird.f32 %v13248_v24  ;;  %v2713_v21 = vmul.f32 %v13237_v25, %v2712_v2  ;;  %9458 = vrsqrt.f32 %v13278_v52 }
 0x298   : > { %v2751_v20 = vmul.f32 0.5, %v2750_v47  ;;  %v2740_v10 = vmul.f32 %v13280_v57, %v2739_v53  ;;  %3120 = vst.msk [vmem:[#allocation2 + $0x4e3] sm:$0xff] %vm407_vm0, %v2991_v35  ;;  %v2727_v60 = vsel %vm2726_vm3, %v13231_v45, %v2723_v30  ;;  %vm2755_vm5 = vweird.f32 %v13268_v59  ;;  %vm2766_vm6 = vmor %vm2764_vm11, %vm2765_vm2  ;;  %v9596_v30 = vld [vmem:[%s10046_s18 + $0x3b8] sm:$0xff] }
 0x299   : > { %v2763_v49 = vmul.f32 %v13248_v24, %v2762_v40  ;;  %v13311_v51 = vadd.f32 1e-08, %v1459_v3  ;;  %v2990_v14 = vmul.f32 %v9591_v63, %v2727_v60  ;;  %v2717_v26 = vsel %vm2716_vm4, %v13237_v25, %v2713_v21  ;;  %v1325_v31 = vpop.xlane.xlu1 %1324  ;;  %v1328_v25 = vpop.xlane.xlu2 %1327  ;;  %vm2756_vm8 = vmor %vm2754_vm1, %vm2755_vm5 }
 0x29a   : > { %v2752_v46 = vsub.f32 1.5, %v2751_v20  ;;  %v2741_v55 = vmul.f32 0.5, %v2740_v10  ;;  %v13319_v38 = vpop.eup %9456  ;;  %v2989_v45 = vmul.f32 %v9592_v5, %v2717_v26  ;;  %vm2745_vm7 = vweird.f32 %v13280_v57  ;;  %v1322_v23 = vpop.xlane.xlu0 %1321 }
 0x29b   : > { %v2767_v22 = vsel %vm2766_vm6, %v13248_v24, %v2763_v49  ;;  %9460 = vrsqrt.f32 %v13311_v51  ;;  %3119 = vst.msk [vmem:[#allocation2 + $0x4db] sm:$0xff] %vm407_vm0, %v2990_v14  ;;  %v2789_v28 = vmul.f32 %v13319_v38, %v13266_v37  ;;  %v1464_v48 = vmul.f32 %v10452_v17, %v1319_v16 }
 0x29c   : > { %v2994_v62 = vmul.f32 %v9593_v9, %v2767_v22  ;;  %v2753_v58 = vmul.f32 %v13268_v59, %v2752_v46  ;;  %v2742_v6 = vsub.f32 1.5, %v2741_v55  ;;  %3118 = vst.msk [vmem:[#allocation2 + $0x4cb] sm:$0xff] %vm407_vm0, %v2989_v45  ;;  %v1463_v42 = vmul.f32 %v10452_v17, %v13256_v54  ;;  %v9597_v55 = vld [vmem:[%s10046_s18 + $0x3b0] sm:$0xff] }
 0x29d   : > { %v1462_v19 = vmul.f32 %v10452_v17, %v1313_v18  ;;  %v13339_v24 = vpop.eup %9458  ;;  %vm2744_vm9 = vweird.f32 %v13228_v4  ;;  %v2790_v1 = vmul.f32 %v13319_v38, %v2789_v28  ;;  %v13351_v12 = vadd.f32 1e-08, %v1464_v48 }
 0x29e   : > { %3123 = vst.msk [vmem:[#allocation2 + $0x503] sm:$0xff] %vm407_vm0, %v2994_v62  ;;  %v2757_v15 = vsel %vm2756_vm8, %v13268_v59, %v2753_v58  ;;  %v2743_v32 = vmul.f32 %v13280_v57, %v2742_v6  ;;  %vm2746_vm10 = vmor %vm2744_vm9, %vm2745_vm7  ;;  %v2779_v54 = vmul.f32 %v13339_v24, %v13278_v52  ;;  %v1467_v39 = vmul.f32 %v10452_v17, %v1328_v25  ;;  %v9595_v59 = vld [vmem:[%s10046_s18 + $0x390] sm:$0xff] }
 0x29f   : > { %v2993_v7 = vmul.f32 %v9594_v33, %v2757_v15  ;;  %v2791_v11 = vmul.f32 0.5, %v2790_v1  ;;  %v13355_v29 = vadd.f32 1e-08, %v1463_v42  ;;  %v13357_v4 = vadd.f32 1e-08, %v1462_v19 }
 0x2a0   : > { %v2747_v8 = vsel %vm2746_vm10, %v13280_v57, %v2743_v32  ;;  %vm2794_vm11 = vweird.f32 %v13266_v37  ;;  %v2780_v56 = vmul.f32 %v13339_v24, %v2779_v54  ;;  %9462 = vrsqrt.f32 %v13351_v12 }
 0x2a1   : > { %v13359_v16 = vpop.eup %9460  ;;  %3122 = vst.msk [vmem:[#allocation2 + $0x4f3] sm:$0xff] %vm407_vm0, %v2993_v7  ;;  %v2992_v44 = vmul.f32 %v9595_v59, %v2747_v8  ;;  %v2792_v41 = vsub.f32 1.5, %v2791_v11  ;;  %vm2795_vm12 = vweird.f32 %v13319_v38  ;;  %9464 = vrsqrt.f32 %v13355_v29 }
 0x2a2   : > { %v2769_v27 = vmul.f32 %v13359_v16, %v13311_v51  ;;  %v2781_v13 = vmul.f32 0.5, %v2780_v56  ;;  %vm2784_vm13 = vweird.f32 %v13278_v52  ;;  %9466 = vrsqrt.f32 %v13357_v4  ;;  %v1334_v18 = vpop.xlane.xlu1 %1333  ;;  %vm2796_vm14 = vmor %vm2794_vm11, %vm2795_vm12  ;;  %v9599_v56 = vld [vmem:[%s10046_s18 + $0x3d0] sm:$0xff] }
 0x2a3   : > { %3121 = vst.msk [vmem:[#allocation2 + $0x4eb] sm:$0xff] %vm407_vm0, %v2992_v44  ;;  %v2793_v57 = vmul.f32 %v13319_v38, %v2792_v41  ;;  %v13375_v36 = vadd.f32 1e-08, %v1467_v39  ;;  %v1466_v3 = vmul.f32 %v10452_v17, %v1325_v31  ;;  %vm2785_vm1 = vweird.f32 %v13339_v24  ;;  %v1331_v63 = vpop.xlane.xlu0 %1330 }
 0x2a4   : > { %v2770_v34 = vmul.f32 %v13359_v16, %v2769_v27  ;;  %v2782_v50 = vsub.f32 1.5, %v2781_v13  ;;  %v1465_v2 = vmul.f32 %v10452_v17, %v1322_v23  ;;  %v1469_v47 = vmul.f32 %v10452_v17, %v1334_v18  ;;  %vm2786_vm2 = vmor %vm2784_vm13, %vm2785_vm1  ;;  %v9600_v18 = vld [vmem:[%s10046_s18 + $0x3c8] sm:$0xff] }
 0x2a5   : > { %v2797_v53 = vsel %vm2796_vm14, %v13319_v38, %v2793_v57  ;;  %vm2774_vm15 = vweird.f32 %v13311_v51  ;;  %9468 = vrsqrt.f32 %v13375_v36  ;;  %v13390_v21 = vadd.f32 1e-08, %v1466_v3  ;;  %v9598_v51 = vld [vmem:[%s10046_s18 + $0x3a8] sm:$0xff] }
 0x2a6   : > { %v2771_v61 = vmul.f32 0.5, %v2770_v34  ;;  %v13386_v35 = vpop.eup %9462  ;;  %v2997_v40 = vmul.f32 %v9596_v30, %v2797_v53  ;;  %v2783_v37 = vmul.f32 %v13339_v24, %v2782_v50  ;;  %v13392_v20 = vadd.f32 1e-08, %v1465_v2  ;;  %v9601_v2 = vld [vmem:[%s10046_s18 + $0x3c0] sm:$0xff] }
 0x2a7   : > { %v13394_v10 = vpop.eup %9464  ;;  %vm2775_vm3 = vweird.f32 %v13359_v16  ;;  %v2819_v49 = vmul.f32 %v13386_v35, %v13351_v12  ;;  %vm2824_vm4 = vweird.f32 %v13351_v12  ;;  %vm2814_vm5 = vweird.f32 %v13355_v29 }
 0x2a8   : > { %v2772_v60 = vsub.f32 1.5, %v2771_v61  ;;  %v13402_v14 = vpop.eup %9466  ;;  %3126 = vst.msk [vmem:[#allocation2 + $0x51b] sm:$0xff] %vm407_vm0, %v2997_v40  ;;  %v2787_v26 = vsel %vm2786_vm2, %v13339_v24, %v2783_v37  ;;  %v2809_v46 = vmul.f32 %v13394_v10, %v13355_v29  ;;  %9470 = vrsqrt.f32 %v13390_v21  ;;  %vm2776_vm6 = vmor %vm2774_vm15, %vm2775_vm3 }
 0x2a9   : > { %v13410_v52 = vadd.f32 1e-08, %v1469_v47  ;;  %v2996_v31 = vmul.f32 %v9597_v55, %v2787_v26  ;;  %v2820_v5 = vmul.f32 %v13386_v35, %v2819_v49  ;;  %v2799_v45 = vmul.f32 %v13402_v14, %v13357_v4 }
 0x2aa   : > { %v2773_v38 = vmul.f32 %v13359_v16, %v2772_v60  ;;  %v2810_v22 = vmul.f32 %v13394_v10, %v2809_v46  ;;  %vm2804_vm7 = vweird.f32 %v13357_v4  ;;  %9472 = vrsqrt.f32 %v13392_v20  ;;  %v9602_v60 = vld [vmem:[%s10046_s18 + $0x3e8] sm:$0xff] }
 0x2ab   : > { %v1468_v9 = vmul.f32 %v10452_v17, %v1331_v63  ;;  %v13425_v62 = vpop.eup %9468  ;;  %3125 = vst.msk [vmem:[#allocation2 + $0x513] sm:$0xff] %vm407_vm0, %v2996_v31  ;;  %v2821_v6 = vmul.f32 0.5, %v2820_v5  ;;  %v2800_v28 = vmul.f32 %v13402_v14, %v2799_v45  ;;  %vm2854_vm8 = vweird.f32 %v13375_v36 }
 0x2ac   : > { %v2777_v58 = vsel %vm2776_vm6, %v13359_v16, %v2773_v38  ;;  %vm2825_vm9 = vweird.f32 %v13386_v35  ;;  %v2811_v48 = vmul.f32 0.5, %v2810_v22  ;;  %v2849_v42 = vmul.f32 %v13425_v62, %v13375_v36 }
 0x2ad   : > { %v2995_v25 = vmul.f32 %v9598_v51, %v2777_v58  ;;  %v2822_v17 = vsub.f32 1.5, %v2821_v6  ;;  %vm2815_vm10 = vweird.f32 %v13394_v10  ;;  %v2801_v19 = vmul.f32 0.5, %v2800_v28  ;;  %vm2826_vm13 = vmor %vm2824_vm4, %vm2825_vm9 }
 0x2ae   : > { %9474 = vrsqrt.f32 %v13410_v52  ;;  %v13437_v24 = vpop.eup %9470  ;;  %v2812_v15 = vsub.f32 1.5, %v2811_v48  ;;  %vm2805_vm11 = vweird.f32 %v13402_v14  ;;  %v2850_v32 = vmul.f32 %v13425_v62, %v2849_v42  ;;  %vm2816_vm14 = vmor %vm2814_vm5, %vm2815_vm10  ;;  %v9604_v48 = vld [vmem:[%s10046_s18 + $0x3d8] sm:$0xff] }
 0x2af   : > { %3124 = vst.msk [vmem:[#allocation2 + $0x50b] sm:$0xff] %vm407_vm0, %v2995_v25  ;;  %v13442_v1 = vadd.f32 1e-08, %v1468_v9  ;;  %v2823_v23 = vmul.f32 %v13386_v35, %v2822_v17  ;;  %v2802_v33 = vsub.f32 1.5, %v2801_v19  ;;  %v2839_v7 = vmul.f32 %v13437_v24, %v13390_v21  ;;  %vm2806_vm15 = vmor %vm2804_vm7, %vm2805_vm11  ;;  %v9605_v19 = vld [vmem:[#allocation3] sm:$0xff] }
 0x2b0   : > { %vm2844_vm12 = vweird.f32 %v13390_v21  ;;  %v13448_v54 = vpop.eup %9472  ;;  %v2813_v39 = vmul.f32 %v13394_v10, %v2812_v15  ;;  %v2851_v8 = vmul.f32 0.5, %v2850_v32  ;;  %v3135_v11 = vlaneseq  ;;  %v9603_v21 = vld [vmem:[%s10046_s18 + $0x3e0] sm:$0xff] }
 0x2b1   : > { %9476 = vrsqrt.f32 %v13442_v1  ;;  %v2827_v16 = vsel %vm2826_vm13, %v13386_v35, %v2823_v23  ;;  %v2803_v59 = vmul.f32 %v13402_v14, %v2802_v33  ;;  %v2840_v44 = vmul.f32 %v13437_v24, %v2839_v7 }
 0x2b2   : > { %v2829_v12 = vmul.f32 %v13448_v54, %v13392_v20  ;;  %vm2834_vm1 = vweird.f32 %v13392_v20  ;;  %v3000_v41 = vmul.f32 %v9599_v56, %v2827_v16  ;;  %v2817_v27 = vsel %vm2816_vm14, %v13394_v10, %v2813_v39  ;;  %v9606_v39 = vld [vmem:[%s10046_s18 + $0x3f8] sm:$0xff] }
 0x2b3   : > { %v2852_v29 = vsub.f32 1.5, %v2851_v8  ;;  %vm2855_vm2 = vweird.f32 %v13425_v62  ;;  %v2999_v57 = vmul.f32 %v9600_v18, %v2817_v27  ;;  %v2807_v34 = vsel %vm2806_vm15, %v13402_v14, %v2803_v59 }
 0x2b4   : > { %v13473_v13 = vpop.eup %9474  ;;  %v2841_v3 = vmul.f32 0.5, %v2840_v44  ;;  %v2830_v50 = vmul.f32 %v13448_v54, %v2829_v12  ;;  %3129 = vst.msk [vmem:[#allocation2 + $0x53b] sm:$0xff] %vm407_vm0, %v3000_v41  ;;  %v2998_v47 = vmul.f32 %v9601_v2, %v2807_v34  ;;  %vm2845_vm3 = vweird.f32 %v13437_v24  ;;  %vm2856_vm5 = vmor %vm2854_vm8, %vm2855_vm2 }
 0x2b5   : > { %v2853_v53 = vmul.f32 %v13425_v62, %v2852_v29  ;;  %v2869_v4 = vmul.f32 %v13473_v13, %v13410_v52  ;;  %vm2874_vm4 = vweird.f32 %v13410_v52  ;;  %3128 = vst.msk [vmem:[#allocation2 + $0x533] sm:$0xff] %vm407_vm0, %v2999_v57  ;;  %vm2835_vm6 = vweird.f32 %v13448_v54  ;;  %vm2846_vm9 = vmor %vm2844_vm12, %vm2845_vm3  ;;  %v9607_v29 = vld [vmem:[%s10046_s18 + $0x3f0] sm:$0xff] }
 0x2b6   : > { %v2842_v61 = vsub.f32 1.5, %v2841_v3  ;;  %v2831_v35 = vmul.f32 0.5, %v2830_v50  ;;  %v13492_v30 = vshrl.u32 %v3135_v11, 7  ;;  %3127 = vst.msk [vmem:[#allocation2 + $0x52b] sm:$0xff] %vm407_vm0, %v2998_v47  ;;  %vm2875_vm7 = vweird.f32 %v13473_v13  ;;  %vm2836_vm11 = vmor %vm2834_vm1, %vm2835_vm6 }
 0x2b7   : > { %v13494_v40 = vpop.eup %9476  ;;  %v2857_v37 = vsel %vm2856_vm5, %v13425_v62, %v2853_v53  ;;  %v2870_v10 = vmul.f32 %v13473_v13, %v2869_v4  ;;  %v13501_v36 = vand.u32 127, %v3135_v11  ;;  %vm2864_vm8 = vweird.f32 %v13442_v1  ;;  %vm2876_vm1 = vmor %vm2874_vm4, %vm2875_vm7 }
 0x2b8   : > { %v3003_v49 = vmul.f32 %v9602_v60, %v2857_v37  ;;  %v2843_v63 = vmul.f32 %v13437_v24, %v2842_v61  ;;  %v2832_v14 = vsub.f32 1.5, %v2831_v35  ;;  %v2859_v26 = vmul.f32 %v13494_v40, %v13442_v1 }
 0x2b9   : > { %v2871_v46 = vmul.f32 0.5, %v2870_v10  ;;  %vm2865_vm10 = vweird.f32 %v13494_v40  ;;  %v3137_v55 = vadd.s32 8, %v13492_v30  ;;  %v3138_v31 = vadd.s32 16, %v13492_v30 }
 0x2ba   : > { %3132 = vst.msk [vmem:[#allocation2 + $0x55b] sm:$0xff] %vm407_vm0, %v3003_v49  ;;  %v2847_v38 = vsel %vm2846_vm9, %v13437_v24, %v2843_v63  ;;  %v2833_v5 = vmul.f32 %v13448_v54, %v2832_v14  ;;  %v2860_v45 = vmul.f32 %v13494_v40, %v2859_v26  ;;  %v3141_v22 = vmul.u32 2, %v13492_v30  ;;  %vm2866_vm2 = vmor %vm2864_vm8, %vm2865_vm10 }
 0x2bb   : > { %v3002_v9 = vmul.f32 %v9603_v21, %v2847_v38  ;;  %v2872_v62 = vsub.f32 1.5, %v2871_v46  ;;  %v3142_v58 = vmul.u32 2, %v3137_v55  ;;  %v3143_v6 = vmul.u32 2, %v3138_v31 }
 0x2bc   : > { %v2837_v28 = vsel %vm2836_vm11, %v13448_v54, %v2833_v5  ;;  %v2861_v51 = vmul.f32 0.5, %v2860_v45  ;;  %vm3144_vm12 = vcmp.eq.s32.totalorder %v13501_v36, %v3141_v22  ;;  %v3152_v25 = vadd.s32 1, %v3141_v22 }
 0x2bd   : > { %3131 = vst.msk [vmem:[#allocation2 + $0x553] sm:$0xff] %vm407_vm0, %v3002_v9  ;;  %v3001_v42 = vmul.f32 %v9604_v48, %v2837_v28  ;;  %v2873_v17 = vmul.f32 %v13473_v13, %v2872_v62  ;;  %vm3145_vm13 = vcmp.eq.s32.totalorder %v13501_v36, %v3142_v58  ;;  %vm3146_vm14 = vcmp.eq.s32.totalorder %v13501_v36, %v3143_v6 }
 0x2be   : > { %v2862_v20 = vsub.f32 1.5, %v2861_v51  ;;  %v3147_v24 = vsel %vm3144_vm12, 1.0, %v9605_v19  ;;  %v3148_v15 = vsel %vm3145_vm13, 1.0, %v9605_v19  ;;  %v3149_v32 = vsel %vm3146_vm14, 1.0, %v9605_v19 }
 0x2bf   : > { %3130 = vst.msk [vmem:[#allocation2 + $0x543] sm:$0xff] %vm407_vm0, %v3001_v42  ;;  %v2877_v23 = vsel %vm2876_vm1, %v13473_v13, %v2873_v17  ;;  %v13538_v33 = vpack.c.bf16 %v3148_v15, %v3147_v24  ;;  %v13540_v7 = vpack.c.bf16 %v3149_v32, %v3149_v32  ;;  %v3153_v54 = vadd.s32 1, %v3142_v58 }
 0x2c0   : > { %v3005_v8 = vmul.f32 %v9606_v39, %v2877_v23  ;;  %v2863_v52 = vmul.f32 %v13494_v40, %v2862_v20  ;;  %v3154_v16 = vadd.s32 1, %v3143_v6  ;;  %vm3155_vm15 = vcmp.eq.s32.totalorder %v13501_v36, %v3152_v25 }
 0x2c1   : > { %vm3156_vm3 = vcmp.eq.s32.totalorder %v13501_v36, %v3153_v54  ;;  %v3158_v59 = vsel %vm3155_vm15, 1.0, %v9605_v19  ;;  %v3163_v44 = vadd.s32 2, %v3141_v22  ;;  %v3164_v12 = vadd.s32 2, %v3142_v58 }
 0x2c2   : > { %3134 = vst.msk [vmem:[#allocation2 + $0x56b] sm:$0xff] %vm407_vm0, %v3005_v8  ;;  %v2867_v56 = vsel %vm2866_vm2, %v13494_v40, %v2863_v52  ;;  %vm3157_vm4 = vcmp.eq.s32.totalorder %v13501_v36, %v3154_v16  ;;  %v3159_v41 = vsel %vm3156_vm3, 1.0, %v9605_v19  ;;  %v3165_v27 = vadd.s32 2, %v3143_v6 }
 0x2c3   : > { %v3004_v13 = vmul.f32 %v9607_v29, %v2867_v56  ;;  %v3160_v18 = vsel %vm3157_vm4, 1.0, %v9605_v19  ;;  %v13554_v57 = vpack.c.bf16 %v3159_v41, %v3158_v59  ;;  %vm3166_vm5 = vcmp.eq.s32.totalorder %v13501_v36, %v3163_v44 }
 0x2c4   : > { %v13557_v1 = vpack.c.bf16 %v3160_v18, %v3160_v18  ;;  %vm3167_vm6 = vcmp.eq.s32.totalorder %v13501_v36, %v3164_v12  ;;  %vm3168_vm7 = vcmp.eq.s32.totalorder %v13501_v36, %v3165_v27  ;;  %v3169_v34 = vsel %vm3166_vm5, 1.0, %v9605_v19 }
 0x2c5   : > { %3133 = vst.msk [vmem:[#allocation2 + $0x563] sm:$0xff] %vm407_vm0, %v3004_v13  ;;  %v3170_v3 = vsel %vm3167_vm6, 1.0, %v9605_v19  ;;  %v3171_v50 = vsel %vm3168_vm7, 1.0, %v9605_v19 }
 0x2c6   : > { %v13562_v2 = vpack.c.bf16 %v3170_v3, %v3169_v34  ;;  %v13564_v47 = vpack.c.bf16 %v3171_v50, %v3171_v50 }
 0x2c7 LB: >> { %s7146_s28 = smul.u32 80, %s9856_s27  ;;  %vm3199_vm8 = vcmask 1042432   ;;  %vm3192_vm9 = vcmask 310272   ;;  %v3251_v63 = vld [vmem:[#allocation7 + $0x2] sm:$0x3]  ;;  %vm3258_vm10 = vcmask 1041408   ;;  %s9856_s27 = sphi %s13567_s27, %s3180_s27  }
 0x2c8   : >> { %v3223_v14 = vld [vmem:[#allocation7] sm:$0x3]  ;;  %v3260_v26 = vsel %vm3258_vm10, %v3251_v63, 0  ;;  %v3334_v12 = vld [vmem:[#allocation7 + $0x4] sm:$0x3]  ;;  %s6993_s17 = smul.u32 24, %s9856_s27 }
 0x2c9   : >> { %s13573_s16 = scalar_lea.vmem [#allocation2], %s7146_s28  ;;  %v3287_v46 = vsel %vm3258_vm10, %v3223_v14, 0  ;;  %9090 = vmatpush.bf16.msra.mxu2 %v3260_v26  ;;  %v3342_v56 = vsel %vm3258_vm10, %v3334_v12, 0  ;;  %v3452_v18 = vld [vmem:[#allocation7 + $0x8] sm:$0x3]  ;;  %s3180_s27 = sadd.s32 1, %s9856_s27  }
 0x2ca   : >> { %9091 = vmatpush.bf16.msra.mxu3 %v3287_v46  ;;  %v3460_v34 = vsel %vm3258_vm10, %v3452_v18, 0  ;;  %v3400_v3 = vld [vmem:[#allocation7 + $0x6] sm:$0x3]  ;;  %s6994_s24 = scalar_lea.vmem [#allocation3], %s6993_s17  ;;  %p3177_p0 = scmp.ge.s32.totalorder %s3180_s27, 18  }
 0x2cb   : >> { %v3408_v50 = vsel %vm3258_vm10, %v3400_v3, 0  ;;  %s13672_s26 = smov (%p3177_p0), 0  }
 0x2cc   : >> { %v3188_v53 = vld [vmem:[%s13573_s16 + $0x20] sm:$0x3f]  ;;  %v3186_v61 = vld [vmem:[%s13573_s16 + $0x10] sm:$0xff]  ;;  %v3187_v35 = vld [vmem:[%s13573_s16 + $0x18] sm:$0xff] }
 0x2cd   : >> { %v3191_v4 = vpack.c.bf16 %v3188_v53, %v3188_v53  ;;  %v3190_v37 = vpack.c.bf16 %v3187_v35, %v3186_v61  ;;  %v3184_v10 = vld [vmem:[%s13573_s16] sm:$0xff]  ;;  %v3185_v60 = vld [vmem:[%s13573_s16 + $0x8] sm:$0xff]  ;;  %v7163_v45 = vld [vmem:[%s13573_s16 + $0x38] sm:$0xff] }
 0x2ce   : >> { %v3189_v49 = vpack.c.bf16 %v3185_v60, %v3184_v10  ;;  %v7165_v38 = vld [vmem:[%s13573_s16 + $0x48] sm:$0x3f]  ;;  %v7164_v22 = vld [vmem:[%s13573_s16 + $0x40] sm:$0xff]  ;;  %v7162_v58 = vld [vmem:[%s13573_s16 + $0x30] sm:$0xff]  ;;  %3351 = vmatpush.bf16.msrb.mxu3 %v3342_v56 }
 0x2cf   : >> { %v3201_v40 = vsel %vm3199_vm8, %v3191_v4, 0  ;;  %v3375_v5 = vpack.c.bf16 %v7165_v38, %v7165_v38  ;;  %v3374_v9 = vpack.c.bf16 %v7164_v22, %v7163_v45  ;;  %v7161_v62 = vld [vmem:[%s13573_s16 + $0x28] sm:$0xff]  ;;  %v7184_v32 = vld [vmem:[%s13573_s16 + $0x70] sm:$0x3f]  ;;  %v7182_v54 = vld [vmem:[%s13573_s16 + $0x60] sm:$0xff] }
 0x2d0   : >> { %3208 = vmatpush.bf16.msra.mxu0 %v3201_v40  ;;  %3235 = vmatpush.bf16.msra.mxu1 %v3201_v40  ;;  %v3373_v48 = vpack.c.bf16 %v7162_v58, %v7161_v62  ;;  %v3545_v23 = vpack.c.bf16 %v7184_v32, %v7184_v32  ;;  %v7183_v39 = vld [vmem:[%s13573_s16 + $0x68] sm:$0xff]  ;;  %v7180_v16 = vld [vmem:[%s13573_s16 + $0x50] sm:$0xff]  ;;  %v7181_v59 = vld [vmem:[%s13573_s16 + $0x58] sm:$0xff] }
 0x2d1   : >> { %3318 = vmatpush.bf16.msrb.mxu2 %v3201_v40  ;;  %v3377_v21 = vsel %vm3199_vm8, %v3375_v5, 0  ;;  %v3544_v52 = vpack.c.bf16 %v7183_v39, %v7182_v54  ;;  %v3543_v44 = vpack.c.bf16 %v7181_v59, %v7180_v16  ;;  %v3504_v38 = vld [vmem:[#allocation7 + $0xa] sm:$0x3] }
 0x2d2   : >> { %v3547_v8 = vsel %vm3199_vm8, %v3545_v23, 0  ;;  %v3512_v45 = vsel %vm3258_vm10, %v3504_v38, 0 }
 0x2d4   : >> { %3209 = vmatpush.bf16.msra.mxu0 %v3190_v37  ;;  %3236 = vmatpush.bf16.msra.mxu1 %v3190_v37 }
 0x2d5   : >> { %3319 = vmatpush.bf16.msrb.mxu2 %v3190_v37 }
 0x2d8   : >> { %3210 = vmatpush.bf16.msra.mxu0 %v3189_v49  ;;  %3237 = vmatpush.bf16.msra.mxu1 %v3189_v49 }
 0x2d9   : >> { %3320 = vmatpush.bf16.msrb.mxu2 %v3189_v49 }
 0x2db   : >> { %7147 = vmatmul.msk.bf16.vlgmr.msra.gmra.mxu0 %vm3192_vm9, %v13538_v33  ;;  %7149 = vmatmul.msk.bf16.vlgmr.msra.gmra.mxu1 %vm3192_vm9, %v13554_v57 }
 0x2dc   : >> { %3269 = vmatpush.bf16.msrb.mxu0 %v3260_v26  ;;  %3296 = vmatpush.bf16.msrb.mxu1 %v3287_v46 }
 0x2e0   : >> { %3384 = vmatpush.bf16.msra.mxu0 %v3377_v21  ;;  %3417 = vmatpush.bf16.msra.mxu1 %v3408_v50 }
 0x2e4   : >> { %3385 = vmatpush.bf16.msra.mxu0 %v3374_v9 }
 0x2e8   : >> { %3386 = vmatpush.bf16.msra.mxu0 %v3373_v48 }
 0x2eb   : >> { %7148 = vmatmul.msk.bf16.gmra.mxu0 %vm3192_vm9, %v13540_v7  ;;  %7150 = vmatmul.msk.bf16.gmra.mxu1 %vm3192_vm9, %v13557_v1 }
 0x358   : >> { %v3212_v55 = vpop.f32.mrf.mxu0  ;;  %v3239_v31 = vpop.f32.mrf.mxu1 }
 0x360   : >> { %v3214_v6 = vpop.f32.mrf.mxu0  ;;  %v3241_v28 = vpop.f32.mrf.mxu1 }
 0x361   : >> { %v3221_v51 = vpack.c.bf16 %v3214_v6, %v3212_v55  ;;  %v3248_v25 = vpack.c.bf16 %v3241_v28, %v3239_v31  ;;  %v3570_v31 = vld [vmem:[#allocation7 + $0xc] sm:$0x3] }
 0x362   : >> { %v3578_v5 = vsel %vm3258_vm10, %v3570_v31, 0 }
 0x363   : >> { %7151 = vmatmul.msk.bf16.vlgmr.msrb.gmra.mxu0 %vm407_vm0, %v3248_v25  ;;  %7153 = vmatmul.msk.bf16.vlgmr.msrb.gmra.mxu1 %vm407_vm0, %v3221_v51 }
 0x364   : >> { %3488 = vmatpush.bf16.msrb.mxu0 %v3377_v21  ;;  %3521 = vmatpush.bf16.msrb.mxu1 %v3512_v45 }
 0x368   : >> { %v3217_v42 = vpop.f32.mrf.mxu0  ;;  %v3244_v17 = vpop.f32.mrf.mxu1  ;;  %3489 = vmatpush.bf16.msrb.mxu0 %v3374_v9 }
 0x369   : >> { %v3222_v20 = vpack.c.bf16 %v3217_v42, %v3217_v42  ;;  %v3249_v19 = vpack.c.bf16 %v3244_v17, %v3244_v17 }
 0x36b   : >> { %7152 = vmatmul.msk.bf16.vlgmr.msra.gmra.mxu2 %vm407_vm0, %v3249_v19  ;;  %7154 = vmatmul.msk.bf16.vlgmr.msra.gmra.mxu3 %vm407_vm0, %v3222_v20  ;;  %v3674_v20 = vld [vmem:[#allocation7 + $0x10] sm:$0x3]  ;;  %v3622_v19 = vld [vmem:[#allocation7 + $0xe] sm:$0x3] }
 0x36c   : >> { %3436 = vmatpush.bf16.msra.mxu2 %v3377_v21  ;;  %3490 = vmatpush.bf16.msrb.mxu0 %v3373_v48 }
 0x36d   : >> { %3469 = vmatpush.bf16.msra.mxu3 %v3460_v34 }
 0x370   : >> { %v3246_v24 = vpop.f32.mrf.mxu1  ;;  %3437 = vmatpush.bf16.msra.mxu2 %v3374_v9  ;;  %v3219_v15 = vpop.f32.mrf.mxu0 }
 0x371   : >> { %v3682_v24 = vsel %vm3258_vm10, %v3674_v20, 0  ;;  %v3630_v15 = vsel %vm3258_vm10, %v3622_v19, 0 }
 0x373   : >> { %7166 = vmatmul.msk.bf16.vlgmr.msra.gmra.mxu0 %vm3192_vm9, %v13538_v33 }
 0x374   : >> { %3438 = vmatpush.bf16.msra.mxu2 %v3373_v48  ;;  %3606 = vmatpush.bf16.msra.mxu0 %v3547_v8 }
 0x378   : >> { %3607 = vmatpush.bf16.msra.mxu0 %v3544_v52 }
 0x37b   : >> { %7155 = vmatmul.msk.bf16.vlgmr.msrb.gmra.mxu2 %vm3192_vm9, %v13562_v2 }
 0x37c   : >> { %3554 = vmatpush.bf16.msrb.mxu2 %v3547_v8  ;;  %3608 = vmatpush.bf16.msra.mxu0 %v3543_v44 }
 0x380   : >> { %3555 = vmatpush.bf16.msrb.mxu2 %v3544_v52 }
 0x383   : >> { %7167 = vmatmul.msk.bf16.gmra.mxu0 %vm3192_vm9, %v13540_v7 }
 0x384   : >> { %3556 = vmatpush.bf16.msrb.mxu2 %v3543_v44 }
 0x38b   : >> { %7156 = vmatmul.msk.bf16.gmra.mxu2 %vm3192_vm9, %v13564_v47 }
 0x393   : >> { %7174 = vmatmul.msk.bf16.vlgmr.msrb.gmra.mxu0 %vm3192_vm9, %v13562_v2 }
 0x39b   : >> { %7170 = vmatmul.msk.bf16.vlgmr.msra.gmra.mxu2 %vm3192_vm9, %v13554_v57 }
 0x39c   : >> { %3658 = vmatpush.bf16.msra.mxu2 %v3547_v8 }
 0x3a0   : >> { %3659 = vmatpush.bf16.msra.mxu2 %v3544_v52 }
 0x3a3   : >> { %7175 = vmatmul.msk.bf16.gmra.mxu0 %vm3192_vm9, %v13564_v47 }
 0x3a4   : >> { %3660 = vmatpush.bf16.msra.mxu2 %v3543_v44 }
 0x3ab   : >> { %7171 = vmatmul.msk.bf16.gmra.mxu2 %vm3192_vm9, %v13557_v1 }
 0x3b3   : >> { %7189 = vmatmul.msk.bf16.vlgmr.msra.gmra.mxu0 %vm3192_vm9, %v13554_v57 }
 0x3bb   : >> { %7185 = vmatmul.msk.bf16.vlgmr.msrb.gmra.mxu2 %vm3192_vm9, %v13538_v33 }
 0x3c3   : >> { %7190 = vmatmul.msk.bf16.gmra.mxu0 %vm3192_vm9, %v13557_v1 }
 0x3cb   : >> { %7186 = vmatmul.msk.bf16.gmra.mxu2 %vm3192_vm9, %v13540_v7 }
 0x3db   : >> { %7193 = vmatmul.msk.bf16.vlgmr.msra.gmra.mxu2 %vm3192_vm9, %v13562_v2 }
 0x3e0   : >> { %v3271_v41 = vpop.f32.mrf.mxu0  ;;  %v3298_v27 = vpop.f32.mrf.mxu1 }
 0x3e1   : >> { %v13634_v29 = vadd.f32 %v3298_v27, %v3271_v41 }
 0x3e8   : >> { %v13636_v13 = vpop.f32.mrf.mxu0 }
 0x3eb   : >> { %7194 = vmatmul.msk.bf16.gmra.mxu2 %vm3192_vm9, %v13564_v47 }
 0x3ee   : >> { %v3276_v53 = vpop.f32.mrf.mxu2  ;;  %v3303_v4 = vpop.f32.mrf.mxu3 }
 0x3ef   : >> { %v13642_v61 = vadd.f32 %v3303_v4, %v3276_v53 }
 0x3f0   : >> { %v3388_v35 = vpop.f32.mrf.mxu0 }
 0x3f6   : >> { %v3278_v40 = vpop.f32.mrf.mxu2  ;;  %v3305_v37 = vpop.f32.mrf.mxu3 }
 0x3f8   : >> { %v3390_v10 = vpop.f32.mrf.mxu0 }
 0x3f9   : >> { %v3397_v60 = vpack.c.bf16 %v3390_v10, %v3388_v35  ;;  %v3300_v35 = vpop.f32.mrf.mxu1 }
 0x3fb   : >> { %7168 = vmatmul.msk.bf16.vlgmr.msra.gmra.mxu1 %vm407_vm0, %v3397_v60 }
 0x3fc   : >> { %3639 = vmatpush.bf16.msra.mxu1 %v3630_v15 }
 0x3fe   : >> { %v3322_v49 = vpop.f32.mrf.mxu2 }
 0x400   : >> { %v3393_v63 = vpop.f32.mrf.mxu0 }
 0x401   : >> { %v3398_v46 = vpack.c.bf16 %v3393_v63, %v3393_v63 }
 0x406   : >> { %v3324_v14 = vpop.f32.mrf.mxu2 }
 0x407   : >> { %v3331_v26 = vpack.c.bf16 %v3324_v14, %v3322_v49 }
 0x408   : >> { %v3395_v55 = vpop.f32.mrf.mxu0 }
 0x409   : >> { %7157 = vmatmul.msk.bf16.vlgmr.msrb.gmra.mxu3 %vm407_vm0, %v3331_v26  ;;  %v3301_v55 = vadd.f32 %v3300_v35, %v13636_v13 }
 0x40a   : >> { %3587 = vmatpush.bf16.msrb.mxu3 %v3578_v5 }
 0x40b   : >> { %7169 = vmatmul.msk.bf16.gmra.mxu1 %vm407_vm0, %v3398_v46 }
 0x40e   : >> { %v3327_v22 = vpop.f32.mrf.mxu2 }
 0x40f   : >> { %v3332_v62 = vpack.c.bf16 %v3327_v22, %v3327_v22 }
 0x410   : >> { %v3492_v21 = vpop.f32.mrf.mxu0 }
 0x416   : >> { %v3329_v9 = vpop.f32.mrf.mxu2 }
 0x418   : >> { %v3494_v58 = vpop.f32.mrf.mxu0 }
 0x419   : >> { %7158 = vmatmul.msk.bf16.gmra.mxu3 %vm407_vm0, %v3332_v62  ;;  %v3501_v6 = vpack.c.bf16 %v3494_v58, %v3492_v21 }
 0x41b   : >> { %7176 = vmatmul.msk.bf16.vlgmr.msrb.gmra.mxu1 %vm407_vm0, %v3501_v6 }
 0x41e   : >> { %v3440_v28 = vpop.f32.mrf.mxu2 }
 0x420   : >> { %v3497_v51 = vpop.f32.mrf.mxu0 }
 0x421   : >> { %v3502_v42 = vpack.c.bf16 %v3497_v51, %v3497_v51 }
 0x426   : >> { %v3442_v25 = vpop.f32.mrf.mxu2 }
 0x427   : >> { %v3449_v48 = vpack.c.bf16 %v3442_v25, %v3440_v28 }
 0x428   : >> { %v3499_v17 = vpop.f32.mrf.mxu0 }
 0x429   : >> { %7172 = vmatmul.msk.bf16.vlgmr.msra.gmra.mxu3 %vm407_vm0, %v3449_v48 }
 0x42a   : >> { %3691 = vmatpush.bf16.msra.mxu3 %v3682_v24 }
 0x42b   : >> { %7177 = vmatmul.msk.bf16.gmra.mxu1 %vm407_vm0, %v3502_v42 }
 0x42e   : >> { %v3445_v32 = vpop.f32.mrf.mxu2 }
 0x42f   : >> { %v3450_v39 = vpack.c.bf16 %v3445_v32, %v3445_v32 }
 0x430   : >> { %v3610_v23 = vpop.f32.mrf.mxu0 }
 0x436   : >> { %v3447_v54 = vpop.f32.mrf.mxu2 }
 0x438   : >> { %v3612_v8 = vpop.f32.mrf.mxu0 }
 0x439   : >> { %7173 = vmatmul.msk.bf16.gmra.mxu3 %vm407_vm0, %v3450_v39  ;;  %v3619_v52 = vpack.c.bf16 %v3612_v8, %v3610_v23 }
 0x43b   : >> { %7191 = vmatmul.msk.bf16.vlgmr.msra.gmra.mxu1 %vm407_vm0, %v3619_v52 }
 0x43e   : >> { %v3558_v16 = vpop.f32.mrf.mxu2 }
 0x440   : >> { %v3615_v59 = vpop.f32.mrf.mxu0 }
 0x441   : >> { %v3620_v56 = vpack.c.bf16 %v3615_v59, %v3615_v59 }
 0x446   : >> { %v3560_v44 = vpop.f32.mrf.mxu2 }
 0x447   : >> { %v3567_v12 = vpack.c.bf16 %v3560_v44, %v3558_v16  ;;  %v3706_v44 = vperm.slane %v10231_v43, 0 }
 0x448   : >> { %v3617_v41 = vpop.f32.mrf.mxu0 }
 0x449   : >> { %7187 = vmatmul.msk.bf16.vlgmr.msrb.gmra.mxu3 %vm407_vm0, %v3567_v12 }
 0x44b   : >> { %7192 = vmatmul.msk.bf16.gmra.mxu1 %vm407_vm0, %v3620_v56 }
 0x44e   : >> { %v3563_v27 = vpop.f32.mrf.mxu2 }
 0x44f   : >> { %v3568_v34 = vpack.c.bf16 %v3563_v27, %v3563_v27 }
 0x456   : >> { %v3565_v18 = vpop.f32.mrf.mxu2 }
 0x459   : >> { %7188 = vmatmul.msk.bf16.gmra.mxu3 %vm407_vm0, %v3568_v34 }
 0x45e   : >> { %v3662_v3 = vpop.f32.mrf.mxu2 }
 0x466   : >> { %v3664_v50 = vpop.f32.mrf.mxu2 }
 0x467   : >> { %v3671_v53 = vpack.c.bf16 %v3664_v50, %v3662_v3 }
 0x469   : >> { %7195 = vmatmul.msk.bf16.vlgmr.msra.gmra.mxu3 %vm407_vm0, %v3671_v53 }
 0x46e   : >> { %v3667_v4 = vpop.f32.mrf.mxu2 }
 0x46f   : >> { %v3672_v40 = vpack.c.bf16 %v3667_v4, %v3667_v4 }
 0x476   : >> { %v3669_v37 = vpop.f32.mrf.mxu2 }
 0x478   : >> { %v3419_v10 = vpop.f32.mrf.mxu1 }
 0x479   : >> { %7196 = vmatmul.msk.bf16.gmra.mxu3 %vm407_vm0, %v3672_v40 }
 0x480   : >> { %v3421_v60 = vpop.f32.mrf.mxu1 }
 0x488   : >> { %v3424_v49 = vpop.f32.mrf.mxu1 }
 0x48c   : >> { %v3353_v63 = vpop.f32.mrf.mxu3 }
 0x48d   : >> { %v3362_v14 = vadd.f32 %v3353_v63, %v13634_v29 }
 0x48f   : >> { %v3428_v26 = vadd.f32 %v3419_v10, %v3362_v14 }
 0x490   : >> { %v3426_v46 = vpop.f32.mrf.mxu1 }
 0x494   : >> { %v3355_v31 = vpop.f32.mrf.mxu3 }
 0x495   : >> { %v3363_v38 = vadd.f32 %v3355_v31, %v3301_v55  ;;  %v13670_v55 = vld [vmem:[#allocation12] sm:$0x1] (%p3177_p0) }
 0x497   : >> { %v3429_v5 = vadd.f32 %v3421_v60, %v3363_v38 }
 0x498   : >> { %v3523_v45 = vpop.f32.mrf.mxu1 }
 0x49c   : >> { %v3358_v22 = vpop.f32.mrf.mxu3 }
 0x49d   : >> { %v3364_v21 = vadd.f32 %v3358_v22, %v13642_v61 }
 0x49f   : >> { %v3430_v9 = vadd.f32 %v3424_v49, %v3364_v21 }
 0x4a0   : >> { %v3525_v62 = vpop.f32.mrf.mxu1 }
 0x4a4   : >> { %v3360_v58 = vpop.f32.mrf.mxu3 }
 0x4a8   : >> { %v3528_v6 = vpop.f32.mrf.mxu1 }
 0x4ac   : >> { %v3471_v28 = vpop.f32.mrf.mxu3 }
 0x4ad   : >> { %v3480_v51 = vadd.f32 %v3471_v28, %v3428_v26 }
 0x4af   : >> { %v3532_v25 = vadd.f32 %v3523_v45, %v3480_v51 }
 0x4b0   : >> { %v3530_v48 = vpop.f32.mrf.mxu1 }
 0x4b4   : >> { %v3473_v29 = vpop.f32.mrf.mxu3 }
 0x4b5   : >> { %v3481_v42 = vadd.f32 %v3473_v29, %v3429_v5 }
 0x4b7   : >> { %v3533_v17 = vadd.f32 %v3525_v62, %v3481_v42 }
 0x4b8   : >> { %v3641_v20 = vpop.f32.mrf.mxu1 }
 0x4bc   : >> { %v3476_v13 = vpop.f32.mrf.mxu3 }
 0x4bd   : >> { %v3482_v19 = vadd.f32 %v3476_v13, %v3430_v9 }
 0x4bf   : >> { %v3534_v24 = vadd.f32 %v3528_v6, %v3482_v19 }
 0x4c0   : >> { %v3643_v15 = vpop.f32.mrf.mxu1 }
 0x4c4   : >> { %v3478_v32 = vpop.f32.mrf.mxu3 }
 0x4c8   : >> { %v3646_v23 = vpop.f32.mrf.mxu1 }
 0x4cc   : >> { %v3589_v61 = vpop.f32.mrf.mxu3 }
 0x4cd   : >> { %v3598_v16 = vadd.f32 %v3589_v61, %v3532_v25 }
 0x4cf   : >> { %v3650_v59 = vadd.f32 %v3641_v20, %v3598_v16 }
 0x4d0   : >> { %v3648_v54 = vpop.f32.mrf.mxu1 }
 0x4d4   : >> { %v3591_v39 = vpop.f32.mrf.mxu3 }
 0x4d5   : >> { %v3599_v41 = vadd.f32 %v3591_v39, %v3533_v17 }
 0x4d7   : >> { %v3651_v34 = vadd.f32 %v3643_v15, %v3599_v41 }
 0x4dc   : >> { %v3594_v8 = vpop.f32.mrf.mxu3 }
 0x4dd   : >> { %v3600_v4 = vadd.f32 %v3594_v8, %v3534_v24 }
 0x4df   : >> { %v3652_v37 = vadd.f32 %v3646_v23, %v3600_v4 }
 0x4e4   : >> { %v3596_v52 = vpop.f32.mrf.mxu3 }
 0x4ec   : >> { %v3693_v12 = vpop.f32.mrf.mxu3 }
 0x4ed   : >> { %v3702_v56 = vadd.f32 %v3693_v12, %v3650_v59 }
 0x4ef   : >> { %v3708_v27 = vadd.f32 %v3706_v44, %v3702_v56 }
 0x4f1   : >> { %vm3711_vm11 = vcmp.gt.f32.partialorder %v3708_v27, 0.0  ;;  %v3714_v18 = vmul.f32 0.2, %v3708_v27 }
 0x4f3   : >> { %v3717_v3 = vsel %vm3711_vm11, %v3708_v27, %v3714_v18 }
 0x4f4   : >> { %7197 = vst [vmem:[%s6994_s24 + $0x32] sm:$0xff] %v3717_v3  ;;  %v3695_v50 = vpop.f32.mrf.mxu3 }
 0x4f5   : >> { %v3703_v53 = vadd.f32 %v3695_v50, %v3651_v34 }
 0x4f7   : >> { %v3709_v35 = vadd.f32 %v3706_v44, %v3703_v53 }
 0x4f9   : >> { %vm3712_vm12 = vcmp.gt.f32.partialorder %v3709_v35, 0.0  ;;  %v3715_v40 = vmul.f32 0.2, %v3709_v35 }
 0x4fb   : >> { %v3718_v10 = vsel %vm3712_vm12, %v3709_v35, %v3715_v40 }
 0x4fc   : >> { %7198 = vst [vmem:[%s6994_s24 + $0x3a] sm:$0xff] %v3718_v10  ;;  %v3698_v60 = vpop.f32.mrf.mxu3 }
 0x4fd   : >> { %v3704_v49 = vadd.f32 %v3698_v60, %v3652_v37 }
 0x4ff   : >> { %v3710_v63 = vadd.f32 %v3706_v44, %v3704_v49 }
 0x500   : > { %3179 = sbr.rel (!%p3177_p0) target bundleno = 711 (0x2c7), region = 189 }
 0x501   : >> { %vm3713_vm13 = vcmp.gt.f32.partialorder %v3710_v63, 0.0  ;;  %v3716_v14 = vmul.f32 0.2, %v3710_v63 }
 0x503   : >> { %v3719_v26 = vsel %vm3713_vm13, %v3710_v63, %v3716_v14 }
 0x504   : >> { %7199 = vst [vmem:[%s6994_s24 + $0x42] sm:$0x3] %v3719_v26  ;;  %v3700_v46 = vpop.f32.mrf.mxu3 }
 0x505 LB: >> { %s7201_s23 = smul.u32 48, %s9860_s26  ;;  %v8808_v31 = vld [vmem:[%s15202_s3 + $0x38] sm:$0xff]  ;;  %v8807_v7 = vld [vmem:[%s15202_s3 + $0x30] sm:$0xff]  ;;  %vm3741_vm0 = vcmask 179200   ;;  %v8806_v51 = vld [vmem:[%s15202_s3 + $0x28] sm:$0xff]  ;;  %s9860_s26 = sphi %s13672_s26, %s3732_s26  }
 0x506   : >> { %3925 = vmatpush.bf16.msra.mxu3 %v8808_v31  ;;  %v8816_v9 = vld [vmem:[%s15202_s3 + $0x78] sm:$0xff]  ;;  %v8815_v25 = vld [vmem:[%s15202_s3 + $0x70] sm:$0xff]  ;;  %v8805_v42 = vld [vmem:[%s15202_s3 + $0x20] sm:$0xff] }
 0x507   : >> { %s13681_s1 = scalar_lea.vmem [#allocation3], %s7201_s23  ;;  %v8824_v62 = vld [vmem:[%s15202_s3 + $0xb8] sm:$0xff]  ;;  %v8823_v29 = vld [vmem:[%s15202_s3 + $0xb0] sm:$0xff]  ;;  %v8814_v17 = vld [vmem:[%s15202_s3 + $0x68] sm:$0xff] }
 0x508   : >> { %v8822_v20 = vld [vmem:[%s15202_s3 + $0xa8] sm:$0xff]  ;;  %v8813_v13 = vld [vmem:[%s15202_s3 + $0x60] sm:$0xff]  ;;  %v8812_v24 = vld [vmem:[%s15202_s3 + $0x58] sm:$0xff] }
 0x509   : >> { %v8821_v19 = vld [vmem:[%s15202_s3 + $0xa0] sm:$0xff]  ;;  %v8820_v15 = vld [vmem:[%s15202_s3 + $0x98] sm:$0xff]  ;;  %v8811_v32 = vld [vmem:[%s15202_s3 + $0x50] sm:$0xff] }
 0x50a   : >> { %3926 = vmatpush.bf16.msra.mxu3 %v8807_v7  ;;  %v8810_v23 = vld [vmem:[%s15202_s3 + $0x48] sm:$0xff]  ;;  %v8809_v61 = vld [vmem:[%s15202_s3 + $0x40] sm:$0xff]  ;;  %v8832_v54 = vld [vmem:[%s15202_s3 + $0xf8] sm:$0xff] }
 0x50b   : >> { %v3738_v43 = vld [vmem:[%s13681_s1 + $0x10] sm:$0x3f]  ;;  %v3736_v47 = vld [vmem:[%s13681_s1] sm:$0xff]  ;;  %v3737_v38 = vld [vmem:[%s13681_s1 + $0x8] sm:$0xff] }
 0x50c   : >> { %v3740_v1 = vpack.c.bf16 %v3738_v43, %v3738_v43  ;;  %v7337_v5 = vld [vmem:[%s13681_s1 + $0x28] sm:$0x3f]  ;;  %v3739_v21 = vpack.c.bf16 %v3737_v38, %v3736_v47  ;;  %v7335_v6 = vld [vmem:[%s13681_s1 + $0x18] sm:$0xff]  ;;  %v7336_v28 = vld [vmem:[%s13681_s1 + $0x20] sm:$0xff] }
 0x50d   : >> { %v4045_v22 = vpack.c.bf16 %v7337_v5, %v7337_v5  ;;  %v4044_v48 = vpack.c.bf16 %v7336_v28, %v7335_v6  ;;  %v8819_v39 = vld [vmem:[%s15202_s3 + $0x90] sm:$0xff]  ;;  %v8804_v52 = vld [vmem:[%s15202_s3 + $0x18] sm:$0xff]  ;;  %v8818_v16 = vld [vmem:[%s15202_s3 + $0x88] sm:$0xff] }
 0x50e   : >> { %v3747_v45 = vsel %vm3199_vm8, %v3740_v1, 0  ;;  %3927 = vmatpush.bf16.msra.mxu3 %v8806_v51  ;;  %v8831_v8 = vld [vmem:[%s15202_s3 + $0xf0] sm:$0xff]  ;;  %v8830_v59 = vld [vmem:[%s15202_s3 + $0xe8] sm:$0xff]  ;;  %v8817_v12 = vld [vmem:[%s15202_s3 + $0x80] sm:$0xff] }
 0x50f   : >> { %3755 = vmatpush.bf16.msra.mxu2 %v3747_v45  ;;  %3789 = vmatpush.bf16.msra.mxu1 %v3747_v45  ;;  %v13698_v58 = vsel %vm3199_vm8, %v4045_v22, 0  ;;  %v8803_v44 = vld [vmem:[%s15202_s3 + $0x10] sm:$0xff]  ;;  %v8829_v56 = vld [vmem:[%s15202_s3 + $0xe0] sm:$0xff]  ;;  %v8802_v41 = vld [vmem:[%s15202_s3 + $0x8] sm:$0xff] }
 0x510   : >> { %3948 = vmatpush.bf16.msra.mxu0 %v3747_v45  ;;  %v8828_v27 = vld [vmem:[%s15202_s3 + $0xd8] sm:$0xff]  ;;  %v8801_v18 = vld [vmem:[%s15202_s3] sm:$0xff]  ;;  %v8827_v34 = vld [vmem:[%s15202_s3 + $0xd0] sm:$0xff] }
 0x511   : >> { %v8826_v3 = vld [vmem:[%s15202_s3 + $0xc8] sm:$0xff]  ;;  %v8825_v50 = vld [vmem:[%s15202_s3 + $0xc0] sm:$0xff]  ;;  %v7487_v26 = vld [vmem:[%s13681_s1 + $0x30] sm:$0xff] }
 0x512   : >> { %3928 = vmatpush.bf16.msra.mxu3 %v8805_v42  ;;  %v7489_v35 = vld [vmem:[%s13681_s1 + $0x40] sm:$0x3f]  ;;  %v7488_v46 = vld [vmem:[%s13681_s1 + $0x38] sm:$0xff]  ;;  %v8847_v45 = vld [vmem:[%s15202_s3 + $0x170] sm:$0xff]  ;;  %s7637_s1 = sshll.u32 %s9860_s26, 4  ;;  %s3732_s26 = sadd.s32 1, %s9860_s26  }
 0x513   : >> { %3756 = vmatpush.bf16.msra.mxu2 %v3739_v21  ;;  %3790 = vmatpush.bf16.msra.mxu1 %v3739_v21  ;;  %v4344_v37 = vpack.c.bf16 %v7489_v35, %v7489_v35  ;;  %v13804_v31 = vpack.c.bf16 %v7488_v46, %v7487_v26  ;;  %v8848_v7 = vld [vmem:[%s15202_s3 + $0x178] sm:$0xff]  ;;  %v8846_v22 = vld [vmem:[%s15202_s3 + $0x168] sm:$0xff]  ;;  %v8843_v51 = vld [vmem:[%s15202_s3 + $0x150] sm:$0xff]  ;;  %s7007_s27 = scalar_lea.vmem [#allocation4], %s7637_s1  ;;  %p3729_p1 = scmp.ge.s32.totalorder %s3732_s26, 10  }
 0x514   : >> { %3949 = vmatpush.bf16.msra.mxu0 %v3739_v21  ;;  %v8840_v21 = vld [vmem:[%s15202_s3 + $0x138] sm:$0xff]  ;;  %v8838_v28 = vld [vmem:[%s15202_s3 + $0x128] sm:$0xff]  ;;  %v8869_v26 = vld [vmem:[%s15202_s3 + $0x220] sm:$0xff]  ;;  %s13961_s26 = smov (%p3729_p1), 0  }
 0x515   : >> { %v13799_v14 = vsel %vm3199_vm8, %v4344_v37, 0  ;;  %v8856_v6 = vld [vmem:[%s15202_s3 + $0x1b8] sm:$0xff]  ;;  %v8854_v42 = vld [vmem:[%s15202_s3 + $0x1a8] sm:$0xff] }
 0x516   : >> { %7202 = vmatmul.msk.bf16.vlgmr.msra.gmra.mxu2 %vm3741_vm0, %v13538_v33  ;;  %7203 = vmatmul.msk.bf16.vlgmr.msra.gmra.mxu1 %vm3741_vm0, %v13554_v57  ;;  %v8872_v35 = vld [vmem:[%s15202_s3 + $0x238] sm:$0xff]  ;;  %v8862_v46 = vld [vmem:[%s15202_s3 + $0x1e8] sm:$0xff] }
 0x517   : >> { %3863 = vmatpush.bf16.msrb.mxu2 %v8816_v9  ;;  %4022 = vmatpush.bf16.msrb.mxu1 %v8824_v62  ;;  %v8845_v9 = vld [vmem:[%s15202_s3 + $0x160] sm:$0xff]  ;;  %v8839_v62 = vld [vmem:[%s15202_s3 + $0x130] sm:$0xff] }
 0x518   : >> { %4055 = vmatpush.bf16.msrb.mxu0 %v13698_v58  ;;  %3929 = vmatpush.bf16.msra.mxu3 %v8804_v52 }
 0x519   : >> { %7284 = vmatmul.msk.bf16.vlgmr.msra.gmra.mxu0 %vm3741_vm0, %v13562_v2 }
 0x51b   : >> { %3864 = vmatpush.bf16.msrb.mxu2 %v8815_v25  ;;  %4023 = vmatpush.bf16.msrb.mxu1 %v8823_v29  ;;  %v8855_v25 = vld [vmem:[%s15202_s3 + $0x1b0] sm:$0xff]  ;;  %v8842_v29 = vld [vmem:[%s15202_s3 + $0x148] sm:$0xff] }
 0x51c   : >> { %4056 = vmatpush.bf16.msrb.mxu0 %v4044_v48  ;;  %3930 = vmatpush.bf16.msra.mxu3 %v8803_v44 }
 0x51f   : >> { %3865 = vmatpush.bf16.msrb.mxu2 %v8814_v17  ;;  %4024 = vmatpush.bf16.msrb.mxu1 %v8822_v20  ;;  %v8836_v17 = vld [vmem:[%s15202_s3 + $0x118] sm:$0xff]  ;;  %v8841_v20 = vld [vmem:[%s15202_s3 + $0x140] sm:$0xff] }
 0x520   : >> { %3931 = vmatpush.bf16.msra.mxu3 %v8802_v41  ;;  %4225 = vmatpush.bf16.msra.mxu0 %v8840_v21 }
 0x523   : >> { %3866 = vmatpush.bf16.msrb.mxu2 %v8813_v13  ;;  %4025 = vmatpush.bf16.msrb.mxu1 %v8821_v19  ;;  %v8853_v13 = vld [vmem:[%s15202_s3 + $0x1a0] sm:$0xff]  ;;  %v8835_v19 = vld [vmem:[%s15202_s3 + $0x110] sm:$0xff] }
 0x524   : >> { %3932 = vmatpush.bf16.msra.mxu3 %v8801_v18  ;;  %4226 = vmatpush.bf16.msra.mxu0 %v8839_v62 }
 0x527   : >> { %3867 = vmatpush.bf16.msrb.mxu2 %v8812_v24  ;;  %4026 = vmatpush.bf16.msrb.mxu1 %v8820_v15  ;;  %v8852_v24 = vld [vmem:[%s15202_s3 + $0x198] sm:$0xff]  ;;  %v8834_v15 = vld [vmem:[%s15202_s3 + $0x108] sm:$0xff] }
 0x528   : >> { %4151 = vmatpush.bf16.msrb.mxu3 %v13698_v58  ;;  %4227 = vmatpush.bf16.msra.mxu0 %v8838_v28 }
 0x529   : >> { %7338 = vmatmul.msk.bf16.vlgmr.msrb.gmra.mxu0 %vm3741_vm0, %v13538_v33 }
 0x52b   : >> { %3868 = vmatpush.bf16.msrb.mxu2 %v8811_v32  ;;  %4027 = vmatpush.bf16.msrb.mxu1 %v8819_v39  ;;  %v8851_v32 = vld [vmem:[%s15202_s3 + $0x190] sm:$0xff]  ;;  %v8849_v39 = vld [vmem:[%s15202_s3 + $0x180] sm:$0xff] }
 0x52c   : >> { %4152 = vmatpush.bf16.msrb.mxu3 %v4044_v48 }
 0x52f   : >> { %3869 = vmatpush.bf16.msrb.mxu2 %v8810_v23  ;;  %4028 = vmatpush.bf16.msrb.mxu1 %v8818_v16 }
 0x533   : >> { %3870 = vmatpush.bf16.msrb.mxu2 %v8809_v61  ;;  %4029 = vmatpush.bf16.msrb.mxu1 %v8817_v12  ;;  %v8833_v61 = vld [vmem:[%s15202_s3 + $0x100] sm:$0xff] }
 0x537   : >> { %4129 = vmatpush.bf16.msra.mxu2 %v8832_v54  ;;  %4247 = vmatpush.bf16.msra.mxu1 %v13698_v58  ;;  %v8844_v58 = vld [vmem:[%s15202_s3 + $0x158] sm:$0xff]  ;;  %v8850_v54 = vld [vmem:[%s15202_s3 + $0x188] sm:$0xff] }
 0x53b   : >> { %4130 = vmatpush.bf16.msra.mxu2 %v8831_v8  ;;  %4248 = vmatpush.bf16.msra.mxu1 %v4044_v48  ;;  %v8837_v48 = vld [vmem:[%s15202_s3 + $0x120] sm:$0xff] }
 0x53c   : >> { %4228 = vmatpush.bf16.msra.mxu0 %v8837_v48 }
 0x53f   : >> { %4131 = vmatpush.bf16.msra.mxu2 %v8830_v59 }
 0x540   : >> { %4229 = vmatpush.bf16.msra.mxu0 %v8836_v17 }
 0x543   : >> { %4132 = vmatpush.bf16.msra.mxu2 %v8829_v56 }
 0x544   : >> { %4230 = vmatpush.bf16.msra.mxu0 %v8835_v19 }
 0x547   : >> { %4133 = vmatpush.bf16.msra.mxu2 %v8828_v27 }
 0x548   : >> { %4231 = vmatpush.bf16.msra.mxu0 %v8834_v15 }
 0x54b   : >> { %4134 = vmatpush.bf16.msra.mxu2 %v8827_v34 }
 0x54c   : >> { %4232 = vmatpush.bf16.msra.mxu0 %v8833_v61 }
 0x54f   : >> { %4135 = vmatpush.bf16.msra.mxu2 %v8826_v3 }
 0x550   : >> { %4450 = vmatpush.bf16.msrb.mxu0 %v13799_v14 }
 0x553   : >> { %4136 = vmatpush.bf16.msra.mxu2 %v8825_v50 }
 0x554   : >> { %4451 = vmatpush.bf16.msrb.mxu0 %v13804_v31 }
 0x593   : >> { %v3792_v53 = vpop.f32.mrf.mxu1 }
 0x596   : >> { %v3951_v4 = vpop.f32.mrf.mxu0 }
 0x599   : >> { %v3758_v40 = vpop.f32.mrf.mxu2 }
 0x59b   : >> { %v3794_v10 = vpop.f32.mrf.mxu1 }
 0x59c   : >> { %v3797_v60 = vpack.c.bf16 %v3794_v10, %v3792_v53 }
 0x59e   : >> { %v3953_v49 = vpop.f32.mrf.mxu0  ;;  %3871 = vmatmul.bf16.vlgmr.msrb.gmra.mxu2 %v3797_v60  ;;  %v8871_v60 = vld [vmem:[%s15202_s3 + $0x230] sm:$0xff] }
 0x59f   : >> { %v3956_v63 = vpack.c.bf16 %v3953_v49, %v3951_v4  ;;  %4428 = vmatpush.bf16.msrb.mxu2 %v8856_v6  ;;  %v8864_v49 = vld [vmem:[%s15202_s3 + $0x1f8] sm:$0xff] }
 0x5a1   : >> { %4030 = vmatmul.bf16.vlgmr.msrb.gmra.mxu1 %v3956_v63  ;;  %v3760_v43 = vpop.f32.mrf.mxu2  ;;  %v8870_v63 = vld [vmem:[%s15202_s3 + $0x228] sm:$0xff] }
 0x5a2   : >> { %4354 = vmatpush.bf16.msrb.mxu1 %v13799_v14  ;;  %v3763_v1 = vpack.c.bf16 %v3760_v43, %v3758_v40  ;;  %v8861_v43 = vld [vmem:[%s15202_s3 + $0x1e0] sm:$0xff] }
 0x5a3   : >> { %4429 = vmatpush.bf16.msrb.mxu2 %v8855_v25 }
 0x5a4   : >> { %3933 = vmatmul.bf16.vlgmr.msra.gmra.mxu3 %v3763_v1  ;;  %v8860_v1 = vld [vmem:[%s15202_s3 + $0x1d8] sm:$0xff] }
 0x5a5   : >> { %4321 = vmatpush.bf16.msra.mxu3 %v8848_v7  ;;  %v8867_v7 = vld [vmem:[%s15202_s3 + $0x210] sm:$0xff] }
 0x5a6   : >> { %v4058_v47 = vpop.f32.mrf.mxu0  ;;  %4355 = vmatpush.bf16.msrb.mxu1 %v13804_v31 }
 0x5a7   : >> { %4430 = vmatpush.bf16.msrb.mxu2 %v8854_v42 }
 0x5a9   : >> { %4322 = vmatpush.bf16.msra.mxu3 %v8847_v45  ;;  %v8858_v45 = vld [vmem:[%s15202_s3 + $0x1c8] sm:$0xff] }
 0x5ab   : >> { %4431 = vmatpush.bf16.msrb.mxu2 %v8853_v13 }
 0x5ad   : >> { %4323 = vmatpush.bf16.msra.mxu3 %v8846_v22  ;;  %v8857_v22 = vld [vmem:[%s15202_s3 + $0x1c0] sm:$0xff] }
 0x5ae   : >> { %v4060_v38 = vpop.f32.mrf.mxu0 }
 0x5af   : >> { %v4063_v5 = vpack.c.bf16 %v4060_v38, %v4058_v47  ;;  %4432 = vmatpush.bf16.msrb.mxu2 %v8852_v24  ;;  %v8866_v47 = vld [vmem:[%s15202_s3 + $0x208] sm:$0xff]  ;;  %v8859_v38 = vld [vmem:[%s15202_s3 + $0x1d0] sm:$0xff] }
 0x5b1   : >> { %4137 = vmatmul.bf16.vlgmr.msra.gmra.mxu2 %v4063_v5  ;;  %7436 = vmatmul.msk.bf16.vlgmr.msra.gmra.mxu1 %vm3741_vm0, %v13562_v2  ;;  %v8865_v5 = vld [vmem:[%s15202_s3 + $0x200] sm:$0xff] }
 0x5b2   : >> { %4324 = vmatpush.bf16.msra.mxu3 %v8845_v9  ;;  %4524 = vmatpush.bf16.msra.mxu1 %v8864_v49 }
 0x5b3   : >> { %4433 = vmatpush.bf16.msrb.mxu2 %v8851_v32 }
 0x5b4   : >> { %7387 = vmatmul.msk.bf16.vlgmr.msrb.gmra.mxu3 %vm3741_vm0, %v13554_v57 }
 0x5b6   : >> { %4325 = vmatpush.bf16.msra.mxu3 %v8844_v58 }
 0x5b7   : >> { %4434 = vmatpush.bf16.msrb.mxu2 %v8850_v54 }
 0x5ba   : >> { %4326 = vmatpush.bf16.msra.mxu3 %v8843_v51 }
 0x5bb   : >> { %4435 = vmatpush.bf16.msrb.mxu2 %v8849_v39 }
 0x5be   : >> { %4327 = vmatpush.bf16.msra.mxu3 %v8842_v29 }
 0x5c1   : >> { %7490 = vmatmul.msk.bf16.vlgmr.msrb.gmra.mxu1 %vm3741_vm0, %v13538_v33 }
 0x5c2   : >> { %4328 = vmatpush.bf16.msra.mxu3 %v8841_v20 }
 0x5c6   : >> { %4546 = vmatpush.bf16.msrb.mxu3 %v13799_v14  ;;  %v8863_v14 = vld [vmem:[%s15202_s3 + $0x1f0] sm:$0xff] }
 0x5c7   : >> { %4525 = vmatpush.bf16.msra.mxu1 %v8863_v14 }
 0x5ca   : >> { %4547 = vmatpush.bf16.msrb.mxu3 %v13804_v31  ;;  %v8868_v31 = vld [vmem:[%s15202_s3 + $0x218] sm:$0xff] }
 0x5cb   : >> { %4526 = vmatpush.bf16.msra.mxu1 %v8862_v46 }
 0x5cf   : >> { %4527 = vmatpush.bf16.msra.mxu1 %v8861_v43 }
 0x5d3   : >> { %4528 = vmatpush.bf16.msra.mxu1 %v8860_v1 }
 0x5d7   : >> { %4529 = vmatpush.bf16.msra.mxu1 %v8859_v38 }
 0x5db   : >> { %4530 = vmatpush.bf16.msra.mxu1 %v8858_v45 }
 0x5df   : >> { %4531 = vmatpush.bf16.msra.mxu1 %v8857_v22 }
 0x61e   : >> { %v4031_v23 = vpop.f32.mrf.mxu1 }
 0x621   : >> { %v3872_v52 = vpop.f32.mrf.mxu2 }
 0x626   : >> { %v4033_v8 = vpop.f32.mrf.mxu1 }
 0x627   : >> { %v3934_v16 = vpop.f32.mrf.mxu3 }
 0x628   : >> { %v3935_v59 = vadd.f32 %v3934_v16, %v3872_v52  ;;  %v4637_v52 = vperm.slane %v13670_v55, 0 }
 0x629   : >> { %v3874_v56 = vpop.f32.mrf.mxu2 }
 0x62a   : >> { %v4036_v44 = vadd.f32 %v4031_v23, %v3935_v59 }
 0x62e   : >> { %v4250_v12 = vpop.f32.mrf.mxu1 }
 0x62f   : >> { %v3936_v41 = vpop.f32.mrf.mxu3 }
 0x630   : >> { %v3937_v27 = vadd.f32 %v3936_v41, %v3874_v56 }
 0x632   : >> { %v4037_v18 = vadd.f32 %v4033_v8, %v3937_v27 }
 0x634   : >> { %v4138_v21 = vpop.f32.mrf.mxu2 }
 0x635   : >> { %v4143_v62 = vadd.f32 %v4138_v21, %v4036_v44 }
 0x636   : >> { %v4252_v34 = vpop.f32.mrf.mxu1 }
 0x637   : >> { %v4255_v3 = vpack.c.bf16 %v4252_v34, %v4250_v12  ;;  %v4154_v50 = vpop.f32.mrf.mxu3 }
 0x639   : >> { %4329 = vmatmul.bf16.vlgmr.msra.gmra.mxu3 %v4255_v3 }
 0x63c   : >> { %v4140_v25 = vpop.f32.mrf.mxu2 }
 0x63d   : >> { %v4144_v48 = vadd.f32 %v4140_v25, %v4037_v18 }
 0x63e   : >> { %v4357_v53 = vpop.f32.mrf.mxu1 }
 0x63f   : >> { %v4156_v4 = vpop.f32.mrf.mxu3 }
 0x640   : >> { %v4159_v40 = vpack.c.bf16 %v4156_v4, %v4154_v50 }
 0x642   : >> { %4233 = vmatmul.bf16.vlgmr.msra.gmra.mxu0 %v4159_v40  ;;  %v13947_v40 = vld [vmem:[#allocation13] sm:$0x1] (%p3729_p1) }
 0x643   : >> { %4620 = vmatpush.bf16.msra.mxu0 %v8872_v35  ;;  %v4652_v35 = vmul.u32 (%p3729_p1), 3, %v13492_v30 }
 0x645   : > { %vm4653_vm15 = vcmp.eq.s32.totalorder (%p3729_p1), %v13501_v36, %v4652_v35 }
 0x646   : >> { %v4359_v37 = vpop.f32.mrf.mxu1 }
 0x647   : >> { %v4362_v10 = vpack.c.bf16 %v4359_v37, %v4357_v53  ;;  %4621 = vmatpush.bf16.msra.mxu0 %v8871_v60  ;;  %v4656_v37 = vadd.s32 (%p3729_p1), 1, %v4652_v35  ;;  %v4654_v60 = vsel (%p3729_p1), %vm4653_vm15, 1.0, %v9877_v0 }
 0x648   : > { %v13951_v49 = vpack.c.bf16 (%p3729_p1), %v4654_v60, %v4654_v60 }
 0x649   : >> { %4436 = vmatmul.bf16.vlgmr.msrb.gmra.mxu2 %v4362_v10  ;;  %7588 = vmatmul.msk.bf16.vlgmr.msrb.gmra.mxu3 %vm3741_vm0, %v13562_v2  ;;  %v4660_v10 = vadd.s32 (%p3729_p1), 2, %v4652_v35  ;;  %vm4657_vm2 = vcmp.eq.s32.totalorder (%p3729_p1), %v13501_v36, %v4656_v37 }
 0x64b   : >> { %4622 = vmatpush.bf16.msra.mxu0 %v8870_v63  ;;  %vm4661_vm3 = vcmp.eq.s32.totalorder (%p3729_p1), %v13501_v36, %v4660_v10  ;;  %v4658_v63 = vsel (%p3729_p1), %vm4657_vm2, 1.0, %v9877_v0 }
 0x64c   : > { %v4662_v14 = vsel (%p3729_p1), %vm4661_vm3, 1.0, %v9877_v0  ;;  %v13957_v33 = vpack.c.bf16 (%p3729_p1), %v4658_v63, %v4658_v63 }
 0x64d   : > { %v13959_v30 = vpack.c.bf16 (%p3729_p1), %v4662_v14, %v4662_v14 }
 0x64f   : >> { %4623 = vmatpush.bf16.msra.mxu0 %v8869_v26 }
 0x652   : >> { %7539 = vmatmul.msk.bf16.vlgmr.msrb.gmra.mxu0 %vm3741_vm0, %v13554_v57 }
 0x653   : >> { %4624 = vmatpush.bf16.msra.mxu0 %v8868_v31 }
 0x657   : >> { %4625 = vmatpush.bf16.msra.mxu0 %v8867_v7 }
 0x65b   : >> { %4626 = vmatpush.bf16.msra.mxu0 %v8866_v47 }
 0x65f   : >> { %4627 = vmatpush.bf16.msra.mxu0 %v8865_v5 }
 0x6bc   : >> { %v4330_v9 = vpop.f32.mrf.mxu3 }
 0x6bf   : >> { %v4234_v58 = vpop.f32.mrf.mxu0 }
 0x6c0   : >> { %v4239_v6 = vadd.f32 %v4234_v58, %v4143_v62 }
 0x6c2   : >> { %v4335_v51 = vadd.f32 %v4330_v9, %v4239_v6 }
 0x6c4   : >> { %v4332_v28 = vpop.f32.mrf.mxu3 }
 0x6c7   : >> { %v4236_v29 = vpop.f32.mrf.mxu0 }
 0x6c8   : >> { %v4240_v42 = vadd.f32 %v4236_v29, %v4144_v48 }
 0x6ca   : >> { %v4336_v20 = vadd.f32 %v4332_v28, %v4240_v42 }
 0x6cc   : >> { %v4549_v17 = vpop.f32.mrf.mxu3  ;;  %v4437_v23 = vpop.f32.mrf.mxu2 }
 0x6cd   : >> { %v4442_v61 = vadd.f32 %v4437_v23, %v4335_v51 }
 0x6cf   : >> { %v4453_v13 = vpop.f32.mrf.mxu0 }
 0x6d4   : >> { %v4551_v19 = vpop.f32.mrf.mxu3  ;;  %v4439_v59 = vpop.f32.mrf.mxu2 }
 0x6d5   : >> { %v4554_v24 = vpack.c.bf16 %v4551_v19, %v4549_v17  ;;  %v4443_v12 = vadd.f32 %v4439_v59, %v4336_v20 }
 0x6d7   : >> { %4628 = vmatmul.bf16.vlgmr.msra.gmra.mxu0 %v4554_v24  ;;  %v4455_v15 = vpop.f32.mrf.mxu0 }
 0x6d8   : >> { %v4458_v32 = vpack.c.bf16 %v4455_v15, %v4453_v13 }
 0x6da   : >> { %4532 = vmatmul.bf16.vlgmr.msra.gmra.mxu1 %v4458_v32 }
 0x754   : >> { %v4629_v54 = vpop.f32.mrf.mxu0 }
 0x757   : >> { %v4533_v39 = vpop.f32.mrf.mxu1 }
 0x758   : >> { %v4538_v8 = vadd.f32 %v4533_v39, %v4442_v61 }
 0x75a   : >> { %v4634_v16 = vadd.f32 %v4629_v54, %v4538_v8 }
 0x75c   : >> { %v4639_v44 = vadd.f32 %v4637_v52, %v4634_v16  ;;  %v4631_v34 = vpop.f32.mrf.mxu0 }
 0x75e   : >> { %vm4641_vm14 = vcmp.gt.f32.partialorder %v4639_v44, 0.0  ;;  %v4643_v56 = vmul.f32 0.2, %v4639_v44 }
 0x75f   : >> { %v4535_v41 = vpop.f32.mrf.mxu1 }
 0x760   : >> { %v4645_v27 = vsel %vm4641_vm14, %v4639_v44, %v4643_v56  ;;  %v4539_v18 = vadd.f32 %v4535_v41, %v4443_v12 }
 0x761   : >> { %7638 = vst [vmem:[%s7007_s27 + $0x11] sm:$0xff] %v4645_v27 }
 0x762   : >> { %v4635_v3 = vadd.f32 %v4631_v34, %v4539_v18 }
 0x764   : >> { %v4640_v50 = vadd.f32 %v4637_v52, %v4635_v3 }
 0x765   : > { %3731 = sbr.rel (!%p3729_p1) target bundleno = 1285 (0x505), region = 200 }
 0x766   : >> { %vm4642_vm1 = vcmp.gt.f32.partialorder %v4640_v50, 0.0  ;;  %v4644_v53 = vmul.f32 0.2, %v4640_v50 }
 0x768   : >> { %v4646_v4 = vsel %vm4642_vm1, %v4640_v50, %v4644_v53 }
 0x769   : >> { %7639 = vst [vmem:[%s7007_s27 + $0x19] sm:$0x3] %v4646_v4 }
 0x76a LB: >> { %s7640_s28 = smul.u32 48, %s9864_s26  ;;  %v8880_v36 = vld [vmem:[%s15204_s5 + $0x38] sm:$0xff]  ;;  %v8879_v0 = vld [vmem:[%s15204_s5 + $0x30] sm:$0xff]  ;;  %vm4681_vm4 = vcmask 1045504   ;;  %vm4677_vm5 = vcmask 97280   ;;  %v8878_v38 = vld [vmem:[%s15204_s5 + $0x28] sm:$0xff]  ;;  %s9864_s26 = sphi %s13961_s26, %s4670_s26  }
 0x76b   : >> { %4858 = vmatpush.bf16.msra.mxu3 %v8880_v36  ;;  %v8888_v31 = vld [vmem:[%s15204_s5 + $0x78] sm:$0xff]  ;;  %v8887_v5 = vld [vmem:[%s15204_s5 + $0x70] sm:$0xff]  ;;  %v8877_v22 = vld [vmem:[%s15204_s5 + $0x20] sm:$0xff] }
 0x76c   : >> { %s13973_s29 = scalar_lea.vmem [#allocation4], %s7640_s28  ;;  %v8896_v7 = vld [vmem:[%s15204_s5 + $0xb8] sm:$0xff]  ;;  %v8895_v45 = vld [vmem:[%s15204_s5 + $0xb0] sm:$0xff]  ;;  %v8886_v21 = vld [vmem:[%s15204_s5 + $0x68] sm:$0xff] }
 0x76d   : >> { %v8894_v9 = vld [vmem:[%s15204_s5 + $0xa8] sm:$0xff]  ;;  %v8876_v62 = vld [vmem:[%s15204_s5 + $0x18] sm:$0xff]  ;;  %v8885_v58 = vld [vmem:[%s15204_s5 + $0x60] sm:$0xff] }
 0x76e   : >> { %v8893_v6 = vld [vmem:[%s15204_s5 + $0xa0] sm:$0xff]  ;;  %v8875_v28 = vld [vmem:[%s15204_s5 + $0x10] sm:$0xff]  ;;  %v8884_v51 = vld [vmem:[%s15204_s5 + $0x58] sm:$0xff] }
 0x76f   : >> { %4859 = vmatpush.bf16.msra.mxu3 %v8879_v0  ;;  %v8892_v25 = vld [vmem:[%s15204_s5 + $0x98] sm:$0xff]  ;;  %v8883_v48 = vld [vmem:[%s15204_s5 + $0x50] sm:$0xff]  ;;  %v8882_v42 = vld [vmem:[%s15204_s5 + $0x48] sm:$0xff] }
 0x770   : >> { %v4674_v57 = vld [vmem:[%s13973_s29] sm:$0xff]  ;;  %v4675_v2 = vld [vmem:[%s13973_s29 + $0x8] sm:$0xf]  ;;  %v7773_v55 = vld [vmem:[%s13973_s29 + $0x10] sm:$0xff] }
 0x771   : >> { %v4676_v26 = vpack.c.bf16 %v4675_v2, %v4674_v57  ;;  %v7774_v46 = vld [vmem:[%s13973_s29 + $0x18] sm:$0xf]  ;;  %v8891_v29 = vld [vmem:[%s15204_s5 + $0x90] sm:$0xff]  ;;  %v8890_v17 = vld [vmem:[%s15204_s5 + $0x88] sm:$0xff] }
 0x772   : >> { %v4972_v43 = vpack.c.bf16 %v7774_v46, %v7773_v55  ;;  %v8881_v20 = vld [vmem:[%s15204_s5 + $0x40] sm:$0xff]  ;;  %v8904_v13 = vld [vmem:[%s15204_s5 + $0xf8] sm:$0xff]  ;;  %v8903_v19 = vld [vmem:[%s15204_s5 + $0xf0] sm:$0xff] }
 0x773   : >> { %v4683_v1 = vsel %vm4681_vm4, %v4676_v26, 0  ;;  %4860 = vmatpush.bf16.msra.mxu3 %v8878_v38  ;;  %v8902_v24 = vld [vmem:[%s15204_s5 + $0xe8] sm:$0xff]  ;;  %v8889_v15 = vld [vmem:[%s15204_s5 + $0x80] sm:$0xff]  ;;  %v8900_v61 = vld [vmem:[%s15204_s5 + $0xd8] sm:$0xff] }
 0x774   : >> { %4692 = vmatpush.bf16.msra.mxu2 %v4683_v1  ;;  %4725 = vmatpush.bf16.msra.mxu1 %v4683_v1  ;;  %v4974_v47 = vsel %vm4681_vm4, %v4972_v43, 0  ;;  %v8901_v32 = vld [vmem:[%s15204_s5 + $0xe0] sm:$0xff]  ;;  %v8874_v23 = vld [vmem:[%s15204_s5 + $0x8] sm:$0xff]  ;;  %v8899_v39 = vld [vmem:[%s15204_s5 + $0xd0] sm:$0xff] }
 0x775   : >> { %4881 = vmatpush.bf16.msra.mxu0 %v4683_v1  ;;  %v8873_v54 = vld [vmem:[%s15204_s5] sm:$0xff]  ;;  %v8898_v8 = vld [vmem:[%s15204_s5 + $0xc8] sm:$0xff]  ;;  %v8920_v3 = vld [vmem:[%s15204_s5 + $0x178] sm:$0xff] }
 0x776   : >> { %v8897_v52 = vld [vmem:[%s15204_s5 + $0xc0] sm:$0xff]  ;;  %v7924_v59 = vld [vmem:[%s13973_s29 + $0x28] sm:$0xf]  ;;  %v8919_v35 = vld [vmem:[%s15204_s5 + $0x170] sm:$0xff] }
 0x777   : >> { %7641 = vmatmul.msk.bf16.vlgmr.msra.gmra.mxu2 %vm4677_vm5, %v13951_v49  ;;  %7642 = vmatmul.msk.bf16.vlgmr.msra.gmra.mxu1 %vm4677_vm5, %v13957_v33  ;;  %v7923_v16 = vld [vmem:[%s13973_s29 + $0x20] sm:$0xff]  ;;  %v8918_v10 = vld [vmem:[%s15204_s5 + $0x168] sm:$0xff]  ;;  %v8912_v36 = vld [vmem:[%s15204_s5 + $0x138] sm:$0xff]  ;;  %s8072_s29 = sshll.u32 %s9864_s26, 3  ;;  %s4670_s26 = sadd.s32 1, %s9864_s26  }
 0x778   : >> { %4797 = vmatpush.bf16.msrb.mxu2 %v8888_v31  ;;  %4953 = vmatpush.bf16.msrb.mxu1 %v8896_v7  ;;  %v5260_v44 = vpack.c.bf16 %v7924_v59, %v7923_v16  ;;  %v8917_v0 = vld [vmem:[%s15204_s5 + $0x160] sm:$0xff]  ;;  %v8911_v57 = vld [vmem:[%s15204_s5 + $0x130] sm:$0xff]  ;;  %v8916_v2 = vld [vmem:[%s15204_s5 + $0x158] sm:$0xff]  ;;  %s7020_s6 = scalar_lea.vmem [#allocation5], %s8072_s29  ;;  %p4667_p2 = scmp.ge.s32.totalorder %s4670_s26, 4  }
 0x779   : >> { %4983 = vmatpush.bf16.msrb.mxu0 %v4974_v47  ;;  %4861 = vmatpush.bf16.msra.mxu3 %v8877_v22  ;;  %v8928_v55 = vld [vmem:[%s15204_s5 + $0x1b8] sm:$0xff]  ;;  %v8910_v26 = vld [vmem:[%s15204_s5 + $0x128] sm:$0xff]  ;;  %v8915_v46 = vld [vmem:[%s15204_s5 + $0x150] sm:$0xff]  ;;  %s14224_s11 = smov (%p4667_p2), 0  }
 0x77a   : >> { %7723 = vmatmul.msk.bf16.vlgmr.msra.gmra.mxu0 %vm4677_vm5, %v13959_v30  ;;  %v14082_v18 = vsel %vm4681_vm4, %v5260_v44, 0  ;;  %v8927_v31 = vld [vmem:[%s15204_s5 + $0x1b0] sm:$0xff]  ;;  %v8909_v43 = vld [vmem:[%s15204_s5 + $0x120] sm:$0xff]  ;;  %v8914_v7 = vld [vmem:[%s15204_s5 + $0x148] sm:$0xff] }
 0x77b   : >> { %v8926_v1 = vld [vmem:[%s15204_s5 + $0x1a8] sm:$0xff]  ;;  %v8913_v38 = vld [vmem:[%s15204_s5 + $0x140] sm:$0xff]  ;;  %v8924_v22 = vld [vmem:[%s15204_s5 + $0x198] sm:$0xff] }
 0x77c   : >> { %4798 = vmatpush.bf16.msrb.mxu2 %v8887_v5  ;;  %4954 = vmatpush.bf16.msrb.mxu1 %v8895_v45  ;;  %v8925_v5 = vld [vmem:[%s15204_s5 + $0x1a0] sm:$0xff]  ;;  %v8907_v45 = vld [vmem:[%s15204_s5 + $0x110] sm:$0xff] }
 0x77d   : >> { %4862 = vmatpush.bf16.msra.mxu3 %v8876_v62  ;;  %5148 = vmatpush.bf16.msra.mxu0 %v8912_v36  ;;  %v8905_v62 = vld [vmem:[%s15204_s5 + $0x100] sm:$0xff]  ;;  %v8943_v59 = vld [vmem:[%s15204_s5 + $0x230] sm:$0xff] }
 0x780   : >> { %4799 = vmatpush.bf16.msrb.mxu2 %v8886_v21  ;;  %4955 = vmatpush.bf16.msrb.mxu1 %v8894_v9  ;;  %v8906_v21 = vld [vmem:[%s15204_s5 + $0x108] sm:$0xff]  ;;  %v8923_v9 = vld [vmem:[%s15204_s5 + $0x190] sm:$0xff] }
 0x781   : >> { %4863 = vmatpush.bf16.msra.mxu3 %v8875_v28  ;;  %5149 = vmatpush.bf16.msra.mxu0 %v8911_v57 }
 0x784   : >> { %4800 = vmatpush.bf16.msrb.mxu2 %v8885_v58  ;;  %4956 = vmatpush.bf16.msrb.mxu1 %v8893_v6  ;;  %v8922_v58 = vld [vmem:[%s15204_s5 + $0x188] sm:$0xff]  ;;  %v8921_v6 = vld [vmem:[%s15204_s5 + $0x180] sm:$0xff] }
 0x785   : >> { %4864 = vmatpush.bf16.msra.mxu3 %v8874_v23  ;;  %5150 = vmatpush.bf16.msra.mxu0 %v8910_v26 }
 0x788   : >> { %4801 = vmatpush.bf16.msrb.mxu2 %v8884_v51  ;;  %4957 = vmatpush.bf16.msrb.mxu1 %v8892_v25 }
 0x789   : >> { %4865 = vmatpush.bf16.msra.mxu3 %v8873_v54  ;;  %5151 = vmatpush.bf16.msra.mxu0 %v8909_v43 }
 0x78a   : >> { %7775 = vmatmul.msk.bf16.vlgmr.msrb.gmra.mxu0 %vm4677_vm5, %v13951_v49 }
 0x78c   : >> { %4802 = vmatpush.bf16.msrb.mxu2 %v8883_v48  ;;  %4958 = vmatpush.bf16.msrb.mxu1 %v8891_v29 }
 0x78d   : >> { %5076 = vmatpush.bf16.msrb.mxu3 %v4974_v47 }
 0x790   : >> { %4803 = vmatpush.bf16.msrb.mxu2 %v8882_v42  ;;  %4959 = vmatpush.bf16.msrb.mxu1 %v8890_v17 }
 0x794   : >> { %4804 = vmatpush.bf16.msrb.mxu2 %v8881_v20  ;;  %4960 = vmatpush.bf16.msrb.mxu1 %v8889_v15  ;;  %v8936_v20 = vld [vmem:[%s15204_s5 + $0x1f8] sm:$0xff] }
 0x798   : >> { %5055 = vmatpush.bf16.msra.mxu2 %v8904_v13  ;;  %5169 = vmatpush.bf16.msra.mxu1 %v4974_v47  ;;  %v8908_v47 = vld [vmem:[%s15204_s5 + $0x118] sm:$0xff] }
 0x799   : >> { %5152 = vmatpush.bf16.msra.mxu0 %v8908_v47 }
 0x79c   : >> { %5056 = vmatpush.bf16.msra.mxu2 %v8903_v19  ;;  %v8935_v19 = vld [vmem:[%s15204_s5 + $0x1f0] sm:$0xff] }
 0x79d   : >> { %5153 = vmatpush.bf16.msra.mxu0 %v8907_v45 }
 0x7a0   : >> { %5057 = vmatpush.bf16.msra.mxu2 %v8902_v24 }
 0x7a1   : >> { %5154 = vmatpush.bf16.msra.mxu0 %v8906_v21  ;;  %v5544_v21 = vperm.slane %v13947_v40, 0 }
 0x7a4   : >> { %5058 = vmatpush.bf16.msra.mxu2 %v8901_v32 }
 0x7a5   : >> { %5155 = vmatpush.bf16.msra.mxu0 %v8905_v62 }
 0x7a8   : >> { %5059 = vmatpush.bf16.msra.mxu2 %v8900_v61 }
 0x7a9   : >> { %5364 = vmatpush.bf16.msrb.mxu0 %v14082_v18 }
 0x7ac   : >> { %5060 = vmatpush.bf16.msra.mxu2 %v8899_v39  ;;  %v8944_v39 = vld [vmem:[%s15204_s5 + $0x238] sm:$0xff] }
 0x7b0   : >> { %5061 = vmatpush.bf16.msra.mxu2 %v8898_v8 }
 0x7b4   : >> { %5062 = vmatpush.bf16.msra.mxu2 %v8897_v52 }
 0x7f4   : >> { %v4727_v12 = vpop.f32.mrf.mxu1 }
 0x7f5   : >> { %v4731_v56 = vpack.c.bf16 %v4727_v12, %v4727_v12 }
 0x7f7   : >> { %v4883_v41 = vpop.f32.mrf.mxu0  ;;  %4805 = vmatmul.bf16.vlgmr.msrb.gmra.mxu2 %v4731_v56  ;;  %v8942_v56 = vld [vmem:[%s15204_s5 + $0x228] sm:$0xff] }
 0x7f8   : >> { %v4887_v27 = vpack.c.bf16 %v4883_v41, %v4883_v41  ;;  %5343 = vmatpush.bf16.msrb.mxu2 %v8928_v55 }
 0x7fa   : >> { %4961 = vmatmul.bf16.vlgmr.msrb.gmra.mxu1 %v4887_v27  ;;  %v4694_v34 = vpop.f32.mrf.mxu2  ;;  %v8941_v27 = vld [vmem:[%s15204_s5 + $0x220] sm:$0xff] }
 0x7fb   : >> { %5271 = vmatpush.bf16.msrb.mxu1 %v14082_v18  ;;  %v4698_v50 = vpack.c.bf16 %v4694_v34, %v4694_v34  ;;  %v8940_v34 = vld [vmem:[%s15204_s5 + $0x218] sm:$0xff] }
 0x7fc   : >> { %v4729_v53 = vpop.f32.mrf.mxu1  ;;  %5344 = vmatpush.bf16.msrb.mxu2 %v8927_v31 }
 0x7fd   : >> { %4866 = vmatmul.bf16.vlgmr.msra.gmra.mxu3 %v4698_v50  ;;  %v8939_v50 = vld [vmem:[%s15204_s5 + $0x210] sm:$0xff]  ;;  %v8932_v53 = vld [vmem:[%s15204_s5 + $0x1d8] sm:$0xff] }
 0x7fe   : >> { %5241 = vmatpush.bf16.msra.mxu3 %v8920_v3  ;;  %v8933_v3 = vld [vmem:[%s15204_s5 + $0x1e0] sm:$0xff] }
 0x7ff   : >> { %v4885_v4 = vpop.f32.mrf.mxu0 }
 0x800   : >> { %5345 = vmatpush.bf16.msrb.mxu2 %v8926_v1  ;;  %v8938_v4 = vld [vmem:[%s15204_s5 + $0x208] sm:$0xff] }
 0x802   : >> { %v4696_v37 = vpop.f32.mrf.mxu2  ;;  %5242 = vmatpush.bf16.msra.mxu3 %v8919_v35  ;;  %v8931_v35 = vld [vmem:[%s15204_s5 + $0x1d0] sm:$0xff] }
 0x803   : >> { %v8937_v37 = vld [vmem:[%s15204_s5 + $0x200] sm:$0xff] }
 0x804   : >> { %5346 = vmatpush.bf16.msrb.mxu2 %v8925_v5 }
 0x806   : >> { %5243 = vmatpush.bf16.msra.mxu3 %v8918_v10  ;;  %v8930_v10 = vld [vmem:[%s15204_s5 + $0x1c8] sm:$0xff] }
 0x807   : >> { %v4985_v60 = vpop.f32.mrf.mxu0 }
 0x808   : >> { %v4989_v63 = vpack.c.bf16 %v4985_v60, %v4985_v60  ;;  %5347 = vmatpush.bf16.msrb.mxu2 %v8924_v22  ;;  %v8929_v60 = vld [vmem:[%s15204_s5 + $0x1c0] sm:$0xff] }
 0x80a   : >> { %5063 = vmatmul.bf16.vlgmr.msra.gmra.mxu2 %v4989_v63  ;;  %7873 = vmatmul.msk.bf16.vlgmr.msra.gmra.mxu1 %vm4677_vm5, %v13959_v30 }
 0x80b   : >> { %5244 = vmatpush.bf16.msra.mxu3 %v8917_v0  ;;  %5436 = vmatpush.bf16.msra.mxu1 %v8936_v20 }
 0x80c   : >> { %5348 = vmatpush.bf16.msrb.mxu2 %v8923_v9 }
 0x80d   : >> { %7824 = vmatmul.msk.bf16.vlgmr.msrb.gmra.mxu3 %vm4677_vm5, %v13957_v33 }
 0x80f   : >> { %v4987_v14 = vpop.f32.mrf.mxu0  ;;  %5245 = vmatpush.bf16.msra.mxu3 %v8916_v2  ;;  %5437 = vmatpush.bf16.msra.mxu1 %v8935_v19 }
 0x810   : >> { %5349 = vmatpush.bf16.msrb.mxu2 %v8922_v58 }
 0x813   : >> { %5246 = vmatpush.bf16.msra.mxu3 %v8915_v46 }
 0x814   : >> { %5350 = vmatpush.bf16.msrb.mxu2 %v8921_v6 }
 0x817   : >> { %5247 = vmatpush.bf16.msra.mxu3 %v8914_v7 }
 0x81a   : >> { %7925 = vmatmul.msk.bf16.vlgmr.msrb.gmra.mxu1 %vm4677_vm5, %v13951_v49 }
 0x81b   : >> { %5248 = vmatpush.bf16.msra.mxu3 %v8913_v38 }
 0x81f   : >> { %5457 = vmatpush.bf16.msrb.mxu3 %v14082_v18  ;;  %v8934_v18 = vld [vmem:[%s15204_s5 + $0x1e8] sm:$0xff] }
 0x820   : >> { %5438 = vmatpush.bf16.msra.mxu1 %v8934_v18 }
 0x824   : >> { %5439 = vmatpush.bf16.msra.mxu1 %v8933_v3 }
 0x828   : >> { %5440 = vmatpush.bf16.msra.mxu1 %v8932_v53 }
 0x82c   : >> { %5441 = vmatpush.bf16.msra.mxu1 %v8931_v35 }
 0x830   : >> { %5442 = vmatpush.bf16.msra.mxu1 %v8930_v10 }
 0x834   : >> { %5443 = vmatpush.bf16.msra.mxu1 %v8929_v60 }
 0x877   : >> { %v4962_v28 = vpop.f32.mrf.mxu1 }
 0x87a   : >> { %v4806_v51 = vpop.f32.mrf.mxu2 }
 0x87f   : >> { %v4964_v25 = vpop.f32.mrf.mxu1 }
 0x880   : >> { %v4867_v48 = vpop.f32.mrf.mxu3  ;;  %v14222_v25 = vld [vmem:[#allocation15] sm:$0x3] (%p4667_p2) }
 0x881   : >> { %v4868_v29 = vadd.f32 %v4867_v48, %v4806_v51 }
 0x882   : >> { %v4808_v42 = vpop.f32.mrf.mxu2 }
 0x883   : >> { %v4966_v17 = vadd.f32 %v4962_v28, %v4868_v29 }
 0x887   : >> { %v5171_v13 = vpop.f32.mrf.mxu1 }
 0x888   : >> { %v5175_v24 = vpack.c.bf16 %v5171_v13, %v5171_v13  ;;  %v4869_v15 = vpop.f32.mrf.mxu3 }
 0x88a   : >> { %5249 = vmatmul.bf16.vlgmr.msra.gmra.mxu3 %v5175_v24 }
 0x88d   : >> { %v5064_v32 = vpop.f32.mrf.mxu2 }
 0x88e   : >> { %v5068_v23 = vadd.f32 %v5064_v32, %v4966_v17 }
 0x88f   : >> { %v5173_v61 = vpop.f32.mrf.mxu1 }
 0x890   : >> { %v5078_v54 = vpop.f32.mrf.mxu3 }
 0x891   : >> { %v5082_v8 = vpack.c.bf16 %v5078_v54, %v5078_v54 }
 0x893   : >> { %5156 = vmatmul.bf16.vlgmr.msra.gmra.mxu0 %v5082_v8 }
 0x894   : >> { %5529 = vmatpush.bf16.msra.mxu0 %v8944_v39 }
 0x895   : >> { %v5066_v52 = vpop.f32.mrf.mxu2 }
 0x897   : >> { %v5273_v16 = vpop.f32.mrf.mxu1 }
 0x898   : >> { %v5277_v44 = vpack.c.bf16 %v5273_v16, %v5273_v16  ;;  %v5080_v12 = vpop.f32.mrf.mxu3  ;;  %5530 = vmatpush.bf16.msra.mxu0 %v8943_v59 }
 0x89a   : >> { %5351 = vmatmul.bf16.vlgmr.msrb.gmra.mxu2 %v5277_v44  ;;  %8023 = vmatmul.msk.bf16.vlgmr.msrb.gmra.mxu3 %vm4677_vm5, %v13959_v30 }
 0x89c   : >> { %5531 = vmatpush.bf16.msra.mxu0 %v8942_v56 }
 0x89f   : >> { %v5275_v41 = vpop.f32.mrf.mxu1 }
 0x8a0   : >> { %5532 = vmatpush.bf16.msra.mxu0 %v8941_v27 }
 0x8a3   : >> { %7974 = vmatmul.msk.bf16.vlgmr.msrb.gmra.mxu0 %vm4677_vm5, %v13957_v33 }
 0x8a4   : >> { %5533 = vmatpush.bf16.msra.mxu0 %v8940_v34 }
 0x8a8   : >> { %5534 = vmatpush.bf16.msra.mxu0 %v8939_v50 }
 0x8ac   : >> { %5535 = vmatpush.bf16.msra.mxu0 %v8938_v4 }
 0x8b0   : >> { %5536 = vmatpush.bf16.msra.mxu0 %v8937_v37 }
 0x90d   : >> { %v5250_v63 = vpop.f32.mrf.mxu3 }
 0x910   : >> { %v5157_v14 = vpop.f32.mrf.mxu0 }
 0x911   : >> { %v5161_v36 = vadd.f32 %v5157_v14, %v5068_v23 }
 0x913   : >> { %v5254_v57 = vadd.f32 %v5250_v63, %v5161_v36 }
 0x915   : >> { %v5252_v0 = vpop.f32.mrf.mxu3 }
 0x918   : >> { %v5159_v2 = vpop.f32.mrf.mxu0 }
 0x91d   : >> { %v5352_v55 = vpop.f32.mrf.mxu2  ;;  %v5459_v26 = vpop.f32.mrf.mxu3 }
 0x91e   : >> { %v5356_v46 = vadd.f32 %v5352_v55, %v5254_v57  ;;  %v5463_v31 = vpack.c.bf16 %v5459_v26, %v5459_v26 }
 0x920   : >> { %5537 = vmatmul.bf16.vlgmr.msra.gmra.mxu0 %v5463_v31  ;;  %v5366_v43 = vpop.f32.mrf.mxu0 }
 0x921   : >> { %v5370_v7 = vpack.c.bf16 %v5366_v43, %v5366_v43 }
 0x923   : >> { %5444 = vmatmul.bf16.vlgmr.msra.gmra.mxu1 %v5370_v7 }
 0x925   : >> { %v5461_v1 = vpop.f32.mrf.mxu3  ;;  %v5354_v47 = vpop.f32.mrf.mxu2 }
 0x928   : >> { %v5368_v38 = vpop.f32.mrf.mxu0 }
 0x99d   : >> { %v5538_v5 = vpop.f32.mrf.mxu0 }
 0x9a0   : >> { %v5445_v45 = vpop.f32.mrf.mxu1 }
 0x9a1   : >> { %v5449_v22 = vadd.f32 %v5445_v45, %v5356_v46 }
 0x9a3   : >> { %v5542_v9 = vadd.f32 %v5538_v5, %v5449_v22 }
 0x9a5   : >> { %v5540_v62 = vpop.f32.mrf.mxu0  ;;  %v5546_v58 = vadd.f32 %v5544_v21, %v5542_v9 }
 0x9a6   : > { %4669 = sbr.rel (!%p4667_p2) target bundleno = 1898 (0x76a), region = 211 }
 0x9a7   : >> { %vm5547_vm6 = vcmp.gt.f32.partialorder %v5546_v58, 0.0  ;;  %v5548_v6 = vmul.f32 0.2, %v5546_v58 }
 0x9a8   : >> { %v5447_v28 = vpop.f32.mrf.mxu1 }
 0x9a9   : >> { %v5549_v51 = vsel %vm5547_vm6, %v5546_v58, %v5548_v6 }
 0x9aa   : >> { %8073 = vst [vmem:[%s7020_s6 + $0x9] sm:$0xf] %v5549_v51 }
 0x9ab LB: >> { %v8151_v48 = vld [vmem:[%s15206_s7 + $0xf0] sm:$0xf]  ;;  %v8976_v29 = vld [vmem:[%s15206_s7 + $0xf4] sm:$0xf0]  ;;  %v8975_v40 = vld [vmem:[%s15206_s7 + $0xf4] sm:$0xf]  ;;  %s9868_s11 = sphi %s14224_s11, %s5560_s11  }
 0x9ac   : >> { %v8152_v42 = vor.u32 %v8976_v29, %v8151_v48  ;;  %v8153_v17 = vld [vmem:[%s15206_s7 + $0xf8] sm:$0xf0]  ;;  %v8143_v20 = vld [vmem:[%s15206_s7 + $0xe0] sm:$0xf]  ;;  %s8074_s2 = smul.u32 24, %s9868_s11  ;;  %vm5566_vm7 = vcmask 48128  }
 0x9ad   : >> { %v8156_v13 = vor.u32 %v8975_v40, %v8153_v17  ;;  %v8974_v19 = vld [vmem:[%s15206_s7 + $0xe4] sm:$0xf0]  ;;  %v8973_v24 = vld [vmem:[%s15206_s7 + $0xe4] sm:$0xf]  ;;  %v8145_v32 = vld [vmem:[%s15206_s7 + $0xe8] sm:$0xf0] }
 0x9ae   : >> { %5718 = vmatpush.bf16.msra.mxu2 %v8152_v42  ;;  %v8144_v15 = vor.u32 %v8974_v19, %v8143_v20  ;;  %v8215_v23 = vld [vmem:[%s15206_s7 + $0x70] sm:$0xf]  ;;  %v8148_v61 = vor.u32 %v8973_v24, %v8145_v32  ;;  %v8960_v54 = vld [vmem:[%s15206_s7 + $0x74] sm:$0xf0]  ;;  %v8959_v39 = vld [vmem:[%s15206_s7 + $0x74] sm:$0xf] }
 0x9af   : >> { %5731 = vmatpush.bf16.msra.mxu3 %v8156_v13  ;;  %s14263_s29 = scalar_lea.vmem [#allocation5], %s8074_s2  ;;  %v8217_v52 = vld [vmem:[%s15206_s7 + $0x78] sm:$0xf0]  ;;  %v8135_v16 = vld [vmem:[%s15206_s7 + $0xd0] sm:$0xf]  ;;  %v8216_v44 = vor.u32 %v8960_v54, %v8215_v23  ;;  %s9089_s24 = sshll.u32 %s9868_s11, 2 }
 0x9b0   : >> { %v8220_v12 = vor.u32 %v8959_v39, %v8217_v52  ;;  %v8972_v56 = vld [vmem:[%s15206_s7 + $0xd4] sm:$0xf0]  ;;  %v8971_v41 = vld [vmem:[%s15206_s7 + $0xd4] sm:$0xf]  ;;  %v8137_v27 = vld [vmem:[%s15206_s7 + $0xd8] sm:$0xf0] }
 0x9b1   : >> { %v5564_v8 = vld [vmem:[%s14263_s29] sm:$0x3f]  ;;  %v8136_v18 = vor.u32 %v8972_v56, %v8135_v16  ;;  %v8958_v3 = vld [vmem:[%s15206_s7 + $0x64] sm:$0xf0]  ;;  %v8209_v4 = vld [vmem:[%s15206_s7 + $0x68] sm:$0xf0]  ;;  %v8140_v37 = vor.u32 %v8971_v41, %v8137_v27 }
 0x9b2   : >> { %v5565_v59 = vpack.c.bf16 %v5564_v8, %v5564_v8  ;;  %5719 = vmatpush.bf16.msra.mxu2 %v8144_v15  ;;  %v8207_v34 = vld [vmem:[%s15206_s7 + $0x60] sm:$0xf]  ;;  %v8957_v50 = vld [vmem:[%s15206_s7 + $0x64] sm:$0xf]  ;;  %v8970_v10 = vld [vmem:[%s15206_s7 + $0xc4] sm:$0xf0] }
 0x9b3   : >> { %5732 = vmatpush.bf16.msra.mxu3 %v8148_v61  ;;  %v8127_v35 = vld [vmem:[%s15206_s7 + $0xc0] sm:$0xf]  ;;  %v8208_v60 = vor.u32 %v8958_v3, %v8207_v34  ;;  %v8212_v63 = vor.u32 %v8957_v50, %v8209_v4  ;;  %v8969_v14 = vld [vmem:[%s15206_s7 + $0xc4] sm:$0xf]  ;;  %v8129_v36 = vld [vmem:[%s15206_s7 + $0xc8] sm:$0xf0] }
 0x9b4   : >> { %v14291_v53 = vsel %vm3199_vm8, %v5565_v59, 0  ;;  %v8199_v0 = vld [vmem:[%s15206_s7 + $0x50] sm:$0xf]  ;;  %v8128_v57 = vor.u32 %v8970_v10, %v8127_v35  ;;  %v8956_v2 = vld [vmem:[%s15206_s7 + $0x54] sm:$0xf0]  ;;  %v8132_v43 = vor.u32 %v8969_v14, %v8129_v36  ;;  %s6863_s23 = scalar_lea.vmem [#allocation6], %s9089_s24 }
 0x9b5   : >> { %5614 = vmatpush.bf16.msra.mxu1 %v14291_v53  ;;  %5581 = vmatpush.bf16.msra.mxu0 %v14291_v53  ;;  %v8955_v55 = vld [vmem:[%s15206_s7 + $0x54] sm:$0xf]  ;;  %v8201_v26 = vld [vmem:[%s15206_s7 + $0x58] sm:$0xf0]  ;;  %v8119_v46 = vld [vmem:[%s15206_s7 + $0xb0] sm:$0xf]  ;;  %v8200_v7 = vor.u32 %v8956_v2, %v8199_v0 }
 0x9b6   : >> { %5720 = vmatpush.bf16.msra.mxu2 %v8136_v18  ;;  %v8968_v31 = vld [vmem:[%s15206_s7 + $0xb4] sm:$0xf0]  ;;  %v8204_v1 = vor.u32 %v8955_v55, %v8201_v26  ;;  %v8967_v47 = vld [vmem:[%s15206_s7 + $0xb4] sm:$0xf]  ;;  %v8121_v38 = vld [vmem:[%s15206_s7 + $0xb8] sm:$0xf0] }
 0x9b7   : >> { %5733 = vmatpush.bf16.msra.mxu3 %v8140_v37  ;;  %v8191_v5 = vld [vmem:[%s15206_s7 + $0x40] sm:$0xf]  ;;  %v8120_v45 = vor.u32 %v8968_v31, %v8119_v46  ;;  %v8954_v22 = vld [vmem:[%s15206_s7 + $0x44] sm:$0xf0]  ;;  %v8953_v21 = vld [vmem:[%s15206_s7 + $0x44] sm:$0xf]  ;;  %v8124_v6 = vor.u32 %v8967_v47, %v8121_v38 }
 0x9b8   : >> { %8076 = vmatmul.msk.bf16.vlgmr.msra.gmra.mxu1 %vm5566_vm7, %v13957_v33  ;;  %8075 = vmatmul.msk.bf16.vlgmr.msra.gmra.mxu0 %vm5566_vm7, %v13951_v49  ;;  %v8193_v9 = vld [vmem:[%s15206_s7 + $0x48] sm:$0xf0]  ;;  %v8111_v62 = vld [vmem:[%s15206_s7 + $0xa0] sm:$0xf]  ;;  %v8966_v58 = vld [vmem:[%s15206_s7 + $0xa4] sm:$0xf0]  ;;  %v8192_v28 = vor.u32 %v8954_v22, %v8191_v5 }
 0x9b9   : >> { %5824 = vmatpush.bf16.msrb.mxu0 %v8216_v44  ;;  %5837 = vmatpush.bf16.msrb.mxu1 %v8220_v12  ;;  %v8196_v51 = vor.u32 %v8953_v21, %v8193_v9  ;;  %v8965_v48 = vld [vmem:[%s15206_s7 + $0xa4] sm:$0xf]  ;;  %v8113_v29 = vld [vmem:[%s15206_s7 + $0xa8] sm:$0xf0]  ;;  %v8183_v42 = vld [vmem:[%s15206_s7 + $0x30] sm:$0xf]  ;;  %v8112_v40 = vor.u32 %v8966_v58, %v8111_v62 }
 0x9ba   : >> { %5721 = vmatpush.bf16.msra.mxu2 %v8128_v57  ;;  %v8952_v17 = vld [vmem:[%s15206_s7 + $0x34] sm:$0xf0]  ;;  %v8951_v20 = vld [vmem:[%s15206_s7 + $0x34] sm:$0xf]  ;;  %v8185_v13 = vld [vmem:[%s15206_s7 + $0x38] sm:$0xf0]  ;;  %v8116_v15 = vor.u32 %v8965_v48, %v8113_v29 }
 0x9bb   : >> { %5734 = vmatpush.bf16.msra.mxu3 %v8132_v43  ;;  %v8103_v19 = vld [vmem:[%s15206_s7 + $0x90] sm:$0xf]  ;;  %v8964_v24 = vld [vmem:[%s15206_s7 + $0x94] sm:$0xf0]  ;;  %v8184_v32 = vor.u32 %v8952_v17, %v8183_v42  ;;  %v8188_v23 = vor.u32 %v8951_v20, %v8185_v13  ;;  %v8963_v61 = vld [vmem:[%s15206_s7 + $0x94] sm:$0xf] }
 0x9bc   : >> { %v8105_v54 = vld [vmem:[%s15206_s7 + $0x98] sm:$0xf0]  ;;  %v8175_v39 = vld [vmem:[%s15206_s7 + $0x20] sm:$0xf]  ;;  %v8104_v8 = vor.u32 %v8964_v24, %v8103_v19  ;;  %v8950_v52 = vld [vmem:[%s15206_s7 + $0x24] sm:$0xf0] }
 0x9bd   : >> { %5825 = vmatpush.bf16.msrb.mxu0 %v8208_v60  ;;  %5838 = vmatpush.bf16.msrb.mxu1 %v8212_v63  ;;  %v8949_v16 = vld [vmem:[%s15206_s7 + $0x24] sm:$0xf]  ;;  %v8177_v59 = vld [vmem:[%s15206_s7 + $0x28] sm:$0xf0]  ;;  %v8108_v44 = vor.u32 %v8963_v61, %v8105_v54  ;;  %v8176_v12 = vor.u32 %v8950_v52, %v8175_v39  ;;  %v8095_v41 = vld [vmem:[%s15206_s7 + $0x80] sm:$0xf] }
 0x9be   : >> { %5722 = vmatpush.bf16.msra.mxu2 %v8120_v45  ;;  %v8180_v56 = vor.u32 %v8949_v16, %v8177_v59  ;;  %v8962_v27 = vld [vmem:[%s15206_s7 + $0x84] sm:$0xf0]  ;;  %v8961_v18 = vld [vmem:[%s15206_s7 + $0x84] sm:$0xf]  ;;  %v8097_v3 = vld [vmem:[%s15206_s7 + $0x88] sm:$0xf0] }
 0x9bf   : >> { %5735 = vmatpush.bf16.msra.mxu3 %v8124_v6  ;;  %v8096_v34 = vor.u32 %v8962_v27, %v8095_v41  ;;  %v8100_v50 = vor.u32 %v8961_v18, %v8097_v3  ;;  %v8167_v4 = vld [vmem:[%s15206_s7 + $0x10] sm:$0xf]  ;;  %v8948_v35 = vld [vmem:[%s15206_s7 + $0x14] sm:$0xf0]  ;;  %v8947_v37 = vld [vmem:[%s15206_s7 + $0x14] sm:$0xf] }
 0x9c0   : >> { %v8168_v10 = vor.u32 %v8948_v35, %v8167_v4  ;;  %v8169_v60 = vld [vmem:[%s15206_s7 + $0x18] sm:$0xf0]  ;;  %v8159_v14 = vld [vmem:[%s15206_s7] sm:$0xf]  ;;  %v8946_v36 = vld [vmem:[%s15206_s7 + $0x4] sm:$0xf0] }
 0x9c1   : >> { %5826 = vmatpush.bf16.msrb.mxu0 %v8200_v7  ;;  %5839 = vmatpush.bf16.msrb.mxu1 %v8204_v1  ;;  %v8172_v63 = vor.u32 %v8947_v37, %v8169_v60  ;;  %v8945_v0 = vld [vmem:[%s15206_s7 + $0x4] sm:$0xf]  ;;  %v8160_v57 = vor.u32 %v8946_v36, %v8159_v14  ;;  %v8161_v2 = vld [vmem:[%s15206_s7 + $0x8] sm:$0xf0]  ;;  %v8991_v46 = vld [vmem:[%s15206_s7 + $0x174] sm:$0xf] }
 0x9c2   : >> { %5723 = vmatpush.bf16.msra.mxu2 %v8112_v40  ;;  %v8164_v55 = vor.u32 %v8945_v0, %v8161_v2  ;;  %v8298_v31 = vld [vmem:[%s15206_s7 + $0x178] sm:$0xf0]  ;;  %v8379_v43 = vld [vmem:[%s15206_s7 + $0x1f0] sm:$0xf]  ;;  %v9008_v7 = vld [vmem:[%s15206_s7 + $0x1f4] sm:$0xf0] }
 0x9c3   : >> { %5736 = vmatpush.bf16.msra.mxu3 %v8116_v15  ;;  %v8301_v47 = vor.u32 %v8991_v46, %v8298_v31  ;;  %v8380_v38 = vor.u32 %v9008_v7, %v8379_v43  ;;  %v8989_v5 = vld [vmem:[%s15206_s7 + $0x164] sm:$0xf]  ;;  %v8290_v45 = vld [vmem:[%s15206_s7 + $0x168] sm:$0xf0]  ;;  %v8371_v22 = vld [vmem:[%s15206_s7 + $0x1e0] sm:$0xf] }
 0x9c4   : >> { %v9006_v21 = vld [vmem:[%s15206_s7 + $0x1e4] sm:$0xf0]  ;;  %v8293_v9 = vor.u32 %v8989_v5, %v8290_v45  ;;  %v8987_v58 = vld [vmem:[%s15206_s7 + $0x154] sm:$0xf]  ;;  %v8282_v6 = vld [vmem:[%s15206_s7 + $0x158] sm:$0xf0] }
 0x9c5   : >> { %5827 = vmatpush.bf16.msrb.mxu0 %v8192_v28  ;;  %5840 = vmatpush.bf16.msrb.mxu1 %v8196_v51  ;;  %v8372_v62 = vor.u32 %v9006_v21, %v8371_v22  ;;  %v8363_v28 = vld [vmem:[%s15206_s7 + $0x1d0] sm:$0xf]  ;;  %v9004_v51 = vld [vmem:[%s15206_s7 + $0x1d4] sm:$0xf0]  ;;  %v8285_v48 = vor.u32 %v8987_v58, %v8282_v6  ;;  %v9007_v17 = vld [vmem:[%s15206_s7 + $0x1f4] sm:$0xf] }
 0x9c6   : >> { %5724 = vmatpush.bf16.msra.mxu2 %v8104_v8  ;;  %v8364_v29 = vor.u32 %v9004_v51, %v8363_v28  ;;  %v8296_v42 = vld [vmem:[%s15206_s7 + $0x170] sm:$0xf]  ;;  %v8992_v40 = vld [vmem:[%s15206_s7 + $0x174] sm:$0xf0]  ;;  %v8381_v20 = vld [vmem:[%s15206_s7 + $0x1f8] sm:$0xf0] }
 0x9c7   : >> { %5737 = vmatpush.bf16.msra.mxu3 %v8108_v44  ;;  %v8288_v61 = vld [vmem:[%s15206_s7 + $0x160] sm:$0xf]  ;;  %v8990_v54 = vld [vmem:[%s15206_s7 + $0x164] sm:$0xf0]  ;;  %v9005_v39 = vld [vmem:[%s15206_s7 + $0x1e4] sm:$0xf] }
 0x9c8   : >> { %v8373_v8 = vld [vmem:[%s15206_s7 + $0x1e8] sm:$0xf0]  ;;  %v8289_v52 = vor.u32 %v8990_v54, %v8288_v61  ;;  %v8280_v59 = vld [vmem:[%s15206_s7 + $0x150] sm:$0xf]  ;;  %v8988_v44 = vld [vmem:[%s15206_s7 + $0x154] sm:$0xf0] }
 0x9c9   : >> { %5828 = vmatpush.bf16.msrb.mxu0 %v8184_v32  ;;  %5841 = vmatpush.bf16.msrb.mxu1 %v8188_v23  ;;  %v8297_v32 = vor.u32 %v8992_v40, %v8296_v42  ;;  %v8384_v23 = vor.u32 %v9007_v17, %v8381_v20  ;;  %v8376_v16 = vor.u32 %v9005_v39, %v8373_v8  ;;  %v8272_v3 = vld [vmem:[%s15206_s7 + $0x140] sm:$0xf]  ;;  %v8985_v4 = vld [vmem:[%s15206_s7 + $0x144] sm:$0xf]  ;;  %v8274_v37 = vld [vmem:[%s15206_s7 + $0x148] sm:$0xf0] }
 0x9ca   : >> { %5725 = vmatpush.bf16.msra.mxu2 %v8096_v34  ;;  %v8281_v18 = vor.u32 %v8988_v44, %v8280_v59  ;;  %v8355_v60 = vld [vmem:[%s15206_s7 + $0x1c0] sm:$0xf]  ;;  %v9001_v14 = vld [vmem:[%s15206_s7 + $0x1c4] sm:$0xf]  ;;  %v8357_v0 = vld [vmem:[%s15206_s7 + $0x1c8] sm:$0xf0] }
 0x9cb   : >> { %5738 = vmatpush.bf16.msra.mxu3 %v8100_v50  ;;  %v8986_v50 = vld [vmem:[%s15206_s7 + $0x144] sm:$0xf0]  ;;  %v8264_v2 = vld [vmem:[%s15206_s7 + $0x130] sm:$0xf]  ;;  %v8266_v46 = vld [vmem:[%s15206_s7 + $0x138] sm:$0xf0] }
 0x9cc   : >> { %v8273_v35 = vor.u32 %v8986_v50, %v8272_v3  ;;  %v8347_v31 = vld [vmem:[%s15206_s7 + $0x1b0] sm:$0xf]  ;;  %v9000_v43 = vld [vmem:[%s15206_s7 + $0x1b4] sm:$0xf0]  ;;  %v8349_v5 = vld [vmem:[%s15206_s7 + $0x1b8] sm:$0xf0] }
 0x9cd   : >> { %5829 = vmatpush.bf16.msrb.mxu0 %v8176_v12  ;;  %5842 = vmatpush.bf16.msrb.mxu1 %v8180_v56  ;;  %v9003_v12 = vld [vmem:[%s15206_s7 + $0x1d4] sm:$0xf]  ;;  %v8365_v56 = vld [vmem:[%s15206_s7 + $0x1d8] sm:$0xf0]  ;;  %v8256_v22 = vld [vmem:[%s15206_s7 + $0x120] sm:$0xf] }
 0x9ce   : >> { %6111 = vmatpush.bf16.msrb.mxu2 %v8380_v38  ;;  %v8368_v34 = vor.u32 %v9003_v12, %v8365_v56  ;;  %v8999_v38 = vld [vmem:[%s15206_s7 + $0x1b4] sm:$0xf]  ;;  %v8982_v21 = vld [vmem:[%s15206_s7 + $0x124] sm:$0xf0]  ;;  %v8258_v58 = vld [vmem:[%s15206_s7 + $0x128] sm:$0xf0] }
 0x9cf   : >> { %5860 = vmatpush.bf16.msrb.mxu3 %v14291_v53  ;;  %v8303_v53 = vld [vmem:[%s14263_s29 + $0x8] sm:$0x3f]  ;;  %v8352_v45 = vor.u32 %v8999_v38, %v8349_v5  ;;  %v8339_v28 = vld [vmem:[%s15206_s7 + $0x1a0] sm:$0xf]  ;;  %v8248_v40 = vld [vmem:[%s15206_s7 + $0x110] sm:$0xf] }
 0x9d0   : >> { %v5996_v26 = vpack.c.bf16 %v8303_v53, %v8303_v53  ;;  %v8983_v53 = vld [vmem:[%s15206_s7 + $0x134] sm:$0xf]  ;;  %v8998_v51 = vld [vmem:[%s15206_s7 + $0x1a4] sm:$0xf0]  ;;  %v8341_v42 = vld [vmem:[%s15206_s7 + $0x1a8] sm:$0xf0] }
 0x9d1   : >> { %5830 = vmatpush.bf16.msrb.mxu0 %v8168_v10  ;;  %5843 = vmatpush.bf16.msrb.mxu1 %v8172_v63  ;;  %v8277_v10 = vor.u32 %v8985_v4, %v8274_v37  ;;  %v9002_v63 = vld [vmem:[%s15206_s7 + $0x1c4] sm:$0xf0]  ;;  %v8269_v7 = vor.u32 %v8983_v53, %v8266_v46  ;;  %v8980_v17 = vld [vmem:[%s15206_s7 + $0x114] sm:$0xf0]  ;;  %v8995_v61 = vld [vmem:[%s15206_s7 + $0x194] sm:$0xf] }
 0x9d2   : >> { %v14449_v1 = vsel %vm3199_vm8, %v5996_v26, 0  ;;  %6112 = vmatpush.bf16.msrb.mxu2 %v8372_v62  ;;  %v8356_v36 = vor.u32 %v9002_v63, %v8355_v60  ;;  %v8257_v62 = vor.u32 %v8982_v21, %v8256_v22  ;;  %v8333_v54 = vld [vmem:[%s15206_s7 + $0x198] sm:$0xf0]  ;;  %v8977_v59 = vld [vmem:[%s15206_s7 + $0x104] sm:$0xf]  ;;  %s5560_s11 = sadd.s32 1, %s9868_s11  }
 0x9d3   : >> { %v8336_v8 = vor.u32 %v8995_v61, %v8333_v54  ;;  %v8242_v12 = vld [vmem:[%s15206_s7 + $0x108] sm:$0xf0]  ;;  %v8462_v38 = vld [vmem:[%s15206_s7 + $0x278] sm:$0xf0]  ;;  %v8452_v5 = vld [vmem:[%s15206_s7 + $0x260] sm:$0xf] }
 0x9d4   : >> { %v8245_v56 = vor.u32 %v8977_v59, %v8242_v12  ;;  %v8325_v3 = vld [vmem:[%s15206_s7 + $0x188] sm:$0xf0]  ;;  %v9021_v21 = vld [vmem:[%s15206_s7 + $0x264] sm:$0xf]  ;;  %v8430_v54 = vld [vmem:[%s15206_s7 + $0x238] sm:$0xf0] }
 0x9d5   : >> { %5831 = vmatpush.bf16.msrb.mxu0 %v8160_v57  ;;  %5844 = vmatpush.bf16.msrb.mxu1 %v8164_v55  ;;  %v8360_v57 = vor.u32 %v9001_v14, %v8357_v0  ;;  %v8984_v55 = vld [vmem:[%s15206_s7 + $0x134] sm:$0xf0]  ;;  %v9039_v59 = vld [vmem:[%s15206_s7 + $0x2f4] sm:$0xf]  ;;  %p5557_p3 = scmp.ge.s32.totalorder %s5560_s11, 2  }
 0x9d6   : >> { %6113 = vmatpush.bf16.msrb.mxu2 %v8364_v29  ;;  %v8265_v26 = vor.u32 %v8984_v55, %v8264_v2  ;;  %v8340_v29 = vor.u32 %v8998_v51, %v8339_v28  ;;  %v9020_v28 = vld [vmem:[%s15206_s7 + $0x254] sm:$0xf0]  ;;  %v9019_v51 = vld [vmem:[%s15206_s7 + $0x254] sm:$0xf]  ;;  %vm6885_vm12 = vcmask (%p5557_p3), 1040384   ;;  %s8797_s11 = sshll.u32 (%p5557_p3), %s9952_s13, 1 }
 0x9d7   : > { %s6943_s18 = scalar_lea.hbm (%p5557_p3), %s15208_s9, %s8797_s11  ;;  %vm6922_vm1 = vcmask (%p5557_p3), 1042434   ;;  %s6945_s1 = sshll.u32 (%p5557_p3), %s400_s22, 4  ;;  %vm6929_vm15 = vcmp.lt.s32.totalorder (%p5557_p3), %v3135_v11, 256  ;;  %s6946_s1 = int_to_ptr.vmem [resolvable:$true] %s6945_s1 }
 0x9d8   : > { %s6947_s27 = sshll.u32 (%p5557_p3), %s6943_s18, 4  ;;  %s6933_s13 = scalar_lea.sflag (%p5557_p3), [#allocation9], %s398_s21  ;;  %s6948_s27 = int_to_ptr.hbm [resolvable:$true] %s6947_s27 }
 0x9d9   : >> { %6007 = vmatpush.bf16.msra.mxu1 %v14449_v1  ;;  %5977 = vmatpush.bf16.msra.mxu0 %v8301_v47  ;;  %v8348_v47 = vor.u32 %v9000_v43, %v8347_v31  ;;  %v8460_v31 = vld [vmem:[%s15206_s7 + $0x270] sm:$0xf]  ;;  %v9024_v43 = vld [vmem:[%s15206_s7 + $0x274] sm:$0xf0]  ;;  %s9776_s28 = sshra.s32 (%p5557_p3), %s6948_s27, 4  ;;  %s9777_s28 = int_to_ptr.hbm [resolvable:$true] %s9776_s28 }
 0x9da   : >> { %6114 = vmatpush.bf16.msrb.mxu2 %v8356_v36  ;;  %s9778_s26 = scalar_lea.hbm (%p5557_p3), %s9777_s28, 2  ;;  %p9783_p9 = scmp.lt.s32.totalorder (%p5557_p3), %s9777_s28, %s15208_s9 }
 0x9db   : > { %p9779_p4 = scmp.ne.s32.totalorder (%p5557_p3), %s9777_s28, %s9778_s26 }
 0x9dd   : >> { %5978 = vmatpush.bf16.msra.mxu0 %v8293_v9  ;;  %v8981_v9 = vld [vmem:[%s15206_s7 + $0x124] sm:$0xf]  ;;  %p9780_p7 = pnand (%p5557_p3), %p9779_p4, %p9969_p5 }
 0x9de   : >> { %6115 = vmatpush.bf16.msrb.mxu2 %v8348_v47  ;;  %v8261_v6 = vor.u32 %v8981_v9, %v8258_v58  ;;  %v8461_v47 = vor.u32 %v9024_v43, %v8460_v31  ;;  %v9035_v43 = vld [vmem:[%s15206_s7 + $0x2d4] sm:$0xf] }
 0x9df   : > { %p9781_p8 = pneg (%p5557_p3), %p9780_p7 }
 0x9e1   : >> { %5979 = vmatpush.bf16.msra.mxu0 %v8285_v48  ;;  %v8997_v48 = vld [vmem:[%s15206_s7 + $0x1a4] sm:$0xf] }
 0x9e2   : >> { %v8344_v20 = vor.u32 %v8997_v48, %v8341_v42  ;;  %6116 = vmatpush.bf16.msrb.mxu2 %v8340_v29  ;;  %v8446_v29 = vld [vmem:[%s15206_s7 + $0x258] sm:$0xf0] }
 0x9e3   : >> { %v8449_v42 = vor.u32 %v9019_v51, %v8446_v29  ;;  %v9032_v29 = vld [vmem:[%s15206_s7 + $0x2b4] sm:$0xf0] }
 0x9e5   : >> { %5980 = vmatpush.bf16.msra.mxu0 %v8277_v10 }
 0x9e9   : >> { %5981 = vmatpush.bf16.msra.mxu0 %v8269_v7  ;;  %v9023_v7 = vld [vmem:[%s15206_s7 + $0x274] sm:$0xf] }
 0x9ea   : >> { %v8465_v22 = vor.u32 %v9023_v7, %v8462_v38  ;;  %v8527_v7 = vld [vmem:[%s15206_s7 + $0x2d8] sm:$0xf0]  ;;  %v8404_v38 = vld [vmem:[%s15206_s7 + $0x200] sm:$0xf] }
 0x9ed   : >> { %5982 = vmatpush.bf16.msra.mxu0 %v8261_v6  ;;  %v8444_v6 = vld [vmem:[%s15206_s7 + $0x250] sm:$0xf] }
 0x9ee   : >> { %v8445_v48 = vor.u32 %v9020_v28, %v8444_v6  ;;  %v9033_v6 = vld [vmem:[%s15206_s7 + $0x2c4] sm:$0xf]  ;;  %v8519_v28 = vld [vmem:[%s15206_s7 + $0x2c8] sm:$0xf0] }
 0x9ef   : >> { %v8522_v51 = vor.u32 %v9033_v6, %v8519_v28  ;;  %v9051_v6 = vld [vmem:[%s15206_s7 + $0x354] sm:$0xf]  ;;  %v8610_v28 = vld [vmem:[%s15206_s7 + $0x358] sm:$0xf0] }
 0xa35   : >> { %v5616_v13 = vpop.f32.mrf.mxu1  ;;  %v5583_v19 = vpop.f32.mrf.mxu0 }
 0xa36   : >> { %v5620_v24 = vpack.c.bf16 %v5616_v13, %v5616_v13  ;;  %v5587_v15 = vpack.c.bf16 %v5583_v19, %v5583_v19  ;;  %v8249_v13 = vor.u32 %v8980_v17, %v8248_v40  ;;  %v8979_v19 = vld [vmem:[%s15206_s7 + $0x114] sm:$0xf]  ;;  %v8436_v40 = vld [vmem:[%s15206_s7 + $0x240] sm:$0xf]  ;;  %v9018_v17 = vld [vmem:[%s15206_s7 + $0x244] sm:$0xf0] }
 0xa38   : >> { %5726 = vmatmul.bf16.vlgmr.msra.gmra.mxu2 %v5620_v24  ;;  %5739 = vmatmul.bf16.vlgmr.msra.gmra.mxu3 %v5620_v24  ;;  %v8250_v24 = vld [vmem:[%s15206_s7 + $0x118] sm:$0xf0] }
 0xa39   : >> { %5832 = vmatmul.bf16.vlgmr.msrb.gmra.mxu0 %v5587_v15  ;;  %5845 = vmatmul.bf16.vlgmr.msrb.gmra.mxu1 %v5587_v15  ;;  %v8331_v15 = vld [vmem:[%s15206_s7 + $0x190] sm:$0xf] }
 0xa3a   : >> { %5964 = vmatpush.bf16.msra.mxu3 %v8297_v32  ;;  %6124 = vmatpush.bf16.msrb.mxu1 %v8384_v23  ;;  %v8253_v32 = vor.u32 %v8979_v19, %v8250_v24  ;;  %v8996_v23 = vld [vmem:[%s15206_s7 + $0x194] sm:$0xf0]  ;;  %v8438_v19 = vld [vmem:[%s15206_s7 + $0x248] sm:$0xf0] }
 0xa3b   : >> { %v8332_v39 = vor.u32 %v8996_v23, %v8331_v15  ;;  %v8428_v15 = vld [vmem:[%s15206_s7 + $0x230] sm:$0xf]  ;;  %v9015_v23 = vld [vmem:[%s15206_s7 + $0x234] sm:$0xf] }
 0xa3c   : >> { %5983 = vmatpush.bf16.msra.mxu0 %v8253_v32  ;;  %v9016_v32 = vld [vmem:[%s15206_s7 + $0x234] sm:$0xf0] }
 0xa3d   : >> { %v5618_v41 = vpop.f32.mrf.mxu1  ;;  %v5585_v27 = vpop.f32.mrf.mxu0  ;;  %6117 = vmatpush.bf16.msrb.mxu2 %v8332_v39  ;;  %v8429_v61 = vor.u32 %v9016_v32, %v8428_v15  ;;  %v8541_v39 = vld [vmem:[%s15206_s7 + $0x2f0] sm:$0xf]  ;;  %v8501_v15 = vld [vmem:[%s15206_s7 + $0x2a0] sm:$0xf]  ;;  %v9030_v32 = vld [vmem:[%s15206_s7 + $0x2a4] sm:$0xf0] }
 0xa3e   : >> { %5965 = vmatpush.bf16.msra.mxu3 %v8289_v52  ;;  %6125 = vmatpush.bf16.msrb.mxu1 %v8376_v16  ;;  %v8240_v52 = vld [vmem:[%s15206_s7 + $0x100] sm:$0xf]  ;;  %v8978_v16 = vld [vmem:[%s15206_s7 + $0x104] sm:$0xf0] }
 0xa3f   : >> { %v8241_v44 = vor.u32 %v8978_v16, %v8240_v52  ;;  %v8323_v41 = vld [vmem:[%s15206_s7 + $0x180] sm:$0xf]  ;;  %v8994_v27 = vld [vmem:[%s15206_s7 + $0x184] sm:$0xf0]  ;;  %v8433_v52 = vor.u32 %v9015_v23, %v8430_v54  ;;  %v9029_v23 = vld [vmem:[%s15206_s7 + $0x2a4] sm:$0xf]  ;;  %v8502_v54 = vor.u32 %v9030_v32, %v8501_v15 }
 0xa40   : >> { %5984 = vmatpush.bf16.msra.mxu0 %v8245_v56  ;;  %v8420_v56 = vld [vmem:[%s15206_s7 + $0x220] sm:$0xf]  ;;  %v8592_v32 = vld [vmem:[%s15206_s7 + $0x330] sm:$0xf] }
 0xa42   : >> { %5966 = vmatpush.bf16.msra.mxu3 %v8281_v18  ;;  %6126 = vmatpush.bf16.msrb.mxu1 %v8368_v34  ;;  %v8993_v18 = vld [vmem:[%s15206_s7 + $0x184] sm:$0xf]  ;;  %v8324_v34 = vor.u32 %v8994_v27, %v8323_v41  ;;  %v9014_v41 = vld [vmem:[%s15206_s7 + $0x224] sm:$0xf0] }
 0xa43   : >> { %v8328_v50 = vor.u32 %v8993_v18, %v8325_v3  ;;  %v9013_v27 = vld [vmem:[%s15206_s7 + $0x224] sm:$0xf]  ;;  %v8421_v18 = vor.u32 %v9014_v41, %v8420_v56  ;;  %v8533_v3 = vld [vmem:[%s15206_s7 + $0x2e0] sm:$0xf] }
 0xa44   : >> { %6118 = vmatpush.bf16.msrb.mxu2 %v8324_v34  ;;  %6250 = vmatpush.bf16.msrb.mxu0 %v8461_v47  ;;  %v8422_v34 = vld [vmem:[%s15206_s7 + $0x228] sm:$0xf0]  ;;  %v8530_v47 = vor.u32 %v9035_v43, %v8527_v7  ;;  %v8626_v7 = vld [vmem:[%s15206_s7 + $0x378] sm:$0xf0] }
 0xa46   : >> { %5967 = vmatpush.bf16.msra.mxu3 %v8273_v35  ;;  %6127 = vmatpush.bf16.msrb.mxu1 %v8360_v57 }
 0xa48   : >> { %8221 = vmatmul.msk.bf16.vlgmr.msrb.gmra.mxu3 %vm5566_vm7, %v13959_v30  ;;  %6263 = vmatpush.bf16.msra.mxu2 %v8465_v22 }
 0xa49   : >> { %8304 = vmatmul.msk.bf16.vlgmr.msra.gmra.mxu1 %vm5566_vm7, %v13951_v49 }
 0xa4a   : >> { %5968 = vmatpush.bf16.msra.mxu3 %v8265_v26  ;;  %6128 = vmatpush.bf16.msrb.mxu1 %v8352_v45  ;;  %v9022_v45 = vld [vmem:[%s15206_s7 + $0x264] sm:$0xf0] }
 0xa4b   : >> { %v8453_v9 = vor.u32 %v9022_v45, %v8452_v5  ;;  %v9010_v5 = vld [vmem:[%s15206_s7 + $0x204] sm:$0xf0]  ;;  %v9009_v45 = vld [vmem:[%s15206_s7 + $0x204] sm:$0xf] }
 0xa4c   : >> { %v8405_v22 = vor.u32 %v9010_v5, %v8404_v38  ;;  %v9054_v38 = vld [vmem:[%s15206_s7 + $0x364] sm:$0xf0] }
 0xa4d   : >> { %6251 = vmatpush.bf16.msrb.mxu0 %v8453_v9  ;;  %v9034_v9 = vld [vmem:[%s15206_s7 + $0x2c4] sm:$0xf0] }
 0xa4e   : >> { %5969 = vmatpush.bf16.msra.mxu3 %v8257_v62  ;;  %6129 = vmatpush.bf16.msrb.mxu1 %v8344_v20  ;;  %v9017_v20 = vld [vmem:[%s15206_s7 + $0x244] sm:$0xf] }
 0xa4f   : >> { %v8441_v24 = vor.u32 %v9017_v20, %v8438_v19  ;;  %v8548_v20 = vld [vmem:[%s14263_s29 + $0x10] sm:$0x3f]  ;;  %s9782_s29 = scalar_lea.hbm (%p5557_p3), %s15208_s9, 4 }
 0xa50   : >> { %v6421_v19 = vpack.c.bf16 %v8548_v20, %v8548_v20  ;;  %v9050_v20 = vld [vmem:[%s15206_s7 + $0x344] sm:$0xf0]  ;;  %p9784_p10 = scmp.lt.s32.totalorder (%p5557_p3), %s9782_s29, %s9778_s26 }
 0xa51   : >> { %6252 = vmatpush.bf16.msrb.mxu0 %v8445_v48  ;;  %v8509_v48 = vld [vmem:[%s15206_s7 + $0x2b0] sm:$0xf] }
 0xa52   : >> { %5970 = vmatpush.bf16.msra.mxu3 %v8249_v13  ;;  %6130 = vmatpush.bf16.msrb.mxu1 %v8336_v8  ;;  %v8437_v13 = vor.u32 %v9018_v17, %v8436_v40  ;;  %v9040_v8 = vld [vmem:[%s15206_s7 + $0x2f4] sm:$0xf0]  ;;  %v8510_v40 = vor.u32 %v9032_v29, %v8509_v48  ;;  %v8511_v17 = vld [vmem:[%s15206_s7 + $0x2b8] sm:$0xf0]  ;;  %v8613_v48 = vor.u32 %v9051_v6, %v8610_v28  ;;  %p9785_p11 = por (%p5557_p3), %p9784_p10, %p9783_p9 }
 0xa53   : >> { %v8542_v16 = vor.u32 %v9040_v8, %v8541_v39  ;;  %v8503_v39 = vld [vmem:[%s15206_s7 + $0x2a8] sm:$0xf0] }
 0xa54   : >> { %v8506_v8 = vor.u32 %v9029_v23, %v8503_v39  ;;  %v9048_v23 = vld [vmem:[%s15206_s7 + $0x334] sm:$0xf0]  ;;  %p9786_p12 = pnand (%p5557_p3), %p9785_p11, %p9781_p8 }
 0xa55   : >> { %6253 = vmatpush.bf16.msrb.mxu0 %v8437_v13  ;;  %v8593_v39 = vor.u32 %v9048_v23, %v8592_v32  ;;  %v9061_v32 = vld [vmem:[%s15206_s7 + $0x3a4] sm:$0xf]  ;;  %v8667_v23 = vld [vmem:[%s15206_s7 + $0x3a8] sm:$0xf0] }
 0xa56   : >> { %5971 = vmatpush.bf16.msra.mxu3 %v8241_v44  ;;  %6131 = vmatpush.bf16.msrb.mxu1 %v8328_v50  ;;  %v8543_v44 = vld [vmem:[%s15206_s7 + $0x2f8] sm:$0xf0]  ;;  %v9038_v50 = vld [vmem:[%s15206_s7 + $0x2e4] sm:$0xf0] }
 0xa57   : >> { %v8546_v12 = vor.u32 %v9039_v59, %v8543_v44  ;;  %v9027_v59 = vld [vmem:[%s15206_s7 + $0x294] sm:$0xf] }
 0xa59   : >> { %6254 = vmatpush.bf16.msrb.mxu0 %v8429_v61  ;;  %v14813_v61 = vsel %vm3199_vm8, %v6421_v19, 0 }
 0xa5a   : >> { %6146 = vmatpush.bf16.msrb.mxu3 %v14449_v1  ;;  %6389 = vmatpush.bf16.msra.mxu1 %v8542_v16  ;;  %v9028_v16 = vld [vmem:[%s15206_s7 + $0x294] sm:$0xf0] }
 0xa5d   : >> { %6255 = vmatpush.bf16.msrb.mxu0 %v8421_v18 }
 0xab6   : >> { %v5833_v4 = vpop.f32.mrf.mxu0  ;;  %v5846_v35 = vpop.f32.mrf.mxu1 }
 0xabb   : >> { %v5727_v37 = vpop.f32.mrf.mxu2  ;;  %v5740_v10 = vpop.f32.mrf.mxu3 }
 0xabc   : >> { %v14637_v60 = vadd.f32 %v5833_v4, %v5727_v37  ;;  %v14639_v63 = vadd.f32 %v5846_v35, %v5740_v10  ;;  %v8425_v4 = vor.u32 %v9013_v27, %v8422_v34  ;;  %v8534_v35 = vor.u32 %v9038_v50, %v8533_v3  ;;  %v9037_v37 = vld [vmem:[%s15206_s7 + $0x2e4] sm:$0xf]  ;;  %v8535_v10 = vld [vmem:[%s15206_s7 + $0x2e8] sm:$0xf0]  ;;  %v8485_v3 = vld [vmem:[%s15206_s7 + $0x280] sm:$0xf] }
 0xabd   : >> { %v9026_v50 = vld [vmem:[%s15206_s7 + $0x284] sm:$0xf0] }
 0xabe   : >> { %v5848_v14 = vpop.f32.mrf.mxu1  ;;  %v5835_v36 = vpop.f32.mrf.mxu0  ;;  %6390 = vmatpush.bf16.msra.mxu1 %v8534_v35 }
 0xabf   : >> { %v8538_v14 = vor.u32 %v9037_v37, %v8535_v10  ;;  %v8412_v36 = vld [vmem:[%s15206_s7 + $0x210] sm:$0xf]  ;;  %v8486_v37 = vor.u32 %v9026_v50, %v8485_v3  ;;  %v9045_v3 = vld [vmem:[%s15206_s7 + $0x324] sm:$0xf] }
 0xac3   : >> { %v5729_v0 = vpop.f32.mrf.mxu2  ;;  %v5742_v57 = vpop.f32.mrf.mxu3 }
 0xac4   : >> { %v9012_v0 = vld [vmem:[%s15206_s7 + $0x214] sm:$0xf0]  ;;  %v9011_v57 = vld [vmem:[%s15206_s7 + $0x214] sm:$0xf] }
 0xac6   : >> { %v6009_v2 = vpop.f32.mrf.mxu1 }
 0xac7   : >> { %v6013_v55 = vpack.c.bf16 %v6009_v2, %v6009_v2  ;;  %v8413_v2 = vor.u32 %v9012_v0, %v8412_v36 }
 0xac9   : >> { %6119 = vmatmul.bf16.vlgmr.msrb.gmra.mxu2 %v6013_v55  ;;  %6132 = vmatmul.bf16.vlgmr.msrb.gmra.mxu1 %v6013_v55  ;;  %v8414_v55 = vld [vmem:[%s15206_s7 + $0x218] sm:$0xf0] }
 0xaca   : >> { %6256 = vmatpush.bf16.msrb.mxu0 %v8413_v2 }
 0xacb   : >> { %v5862_v53 = vpop.f32.mrf.mxu3 }
 0xacc   : >> { %v5866_v26 = vpack.c.bf16 %v5862_v53, %v5862_v53  ;;  %v8525_v53 = vld [vmem:[%s15206_s7 + $0x2d0] sm:$0xf] }
 0xace   : >> { %5972 = vmatmul.bf16.vlgmr.msra.gmra.mxu3 %v5866_v26  ;;  %5985 = vmatmul.bf16.vlgmr.msra.gmra.mxu0 %v5866_v26  ;;  %v6011_v46 = vpop.f32.mrf.mxu1  ;;  %v9036_v26 = vld [vmem:[%s15206_s7 + $0x2d4] sm:$0xf0] }
 0xacf   : >> { %6285 = vmatpush.bf16.msra.mxu3 %v14449_v1  ;;  %v8454_v1 = vld [vmem:[%s15206_s7 + $0x268] sm:$0xf0]  ;;  %v8417_v46 = vor.u32 %v9011_v57, %v8414_v55  ;;  %v8526_v31 = vor.u32 %v9036_v26, %v8525_v53  ;;  %6257 = vmatpush.bf16.msrb.mxu0 %v8405_v22 }
 0xad0   : >> { %v8457_v62 = vor.u32 %v9021_v21, %v8454_v1  ;;  %v8406_v21 = vld [vmem:[%s15206_s7 + $0x208] sm:$0xf0]  ;;  %v8517_v1 = vld [vmem:[%s15206_s7 + $0x2c0] sm:$0xf] }
 0xad1   : >> { %6391 = vmatpush.bf16.msra.mxu1 %v8526_v31  ;;  %v9055_v31 = vld [vmem:[%s15206_s7 + $0x374] sm:$0xf]  ;;  %v8618_v22 = vld [vmem:[%s15206_s7 + $0x368] sm:$0xf0] }
 0xad2   : >> { %6264 = vmatpush.bf16.msra.mxu2 %v8457_v62  ;;  %v8409_v62 = vor.u32 %v9009_v45, %v8406_v21  ;;  %v8629_v5 = vor.u32 %v9055_v31, %v8626_v7  ;;  %v9053_v45 = vld [vmem:[%s15206_s7 + $0x364] sm:$0xf]  ;;  %v8689_v31 = vld [vmem:[%s15206_s7 + $0x3d0] sm:$0xf]  ;;  %v9067_v7 = vld [vmem:[%s15206_s7 + $0x3d4] sm:$0xf] }
 0xad3   : >> { %v5864_v58 = vpop.f32.mrf.mxu3  ;;  %6432 = vmatpush.bf16.msra.mxu0 %v14813_v61 }
 0xad4   : >> { %v8518_v58 = vor.u32 %v9034_v9, %v8517_v1  ;;  %v8621_v1 = vor.u32 %v9053_v45, %v8618_v22  ;;  %v8608_v9 = vld [vmem:[%s15206_s7 + $0x350] sm:$0xf]  ;;  %v8568_v45 = vld [vmem:[%s15206_s7 + $0x300] sm:$0xf]  ;;  %v9042_v22 = vld [vmem:[%s15206_s7 + $0x304] sm:$0xf0] }
 0xad6   : >> { %6265 = vmatpush.bf16.msra.mxu2 %v8449_v42  ;;  %6392 = vmatpush.bf16.msra.mxu1 %v8518_v58  ;;  %v9031_v42 = vld [vmem:[%s15206_s7 + $0x2b4] sm:$0xf] }
 0xad7   : >> { %v8514_v13 = vor.u32 %v9031_v42, %v8511_v17  ;;  %v8600_v17 = vld [vmem:[%s15206_s7 + $0x340] sm:$0xf] }
 0xad8   : >> { %v8601_v19 = vor.u32 %v9050_v20, %v8600_v17  ;;  %v9063_v17 = vld [vmem:[%s15206_s7 + $0x3b4] sm:$0xf] }
 0xada   : >> { %6266 = vmatpush.bf16.msra.mxu2 %v8441_v24  ;;  %6393 = vmatpush.bf16.msra.mxu1 %v8510_v40 }
 0xade   : >> { %8385 = vmatmul.msk.bf16.vlgmr.msrb.gmra.mxu3 %vm5566_vm7, %v13957_v33  ;;  %6267 = vmatpush.bf16.msra.mxu2 %v8433_v52  ;;  %v8493_v52 = vld [vmem:[%s15206_s7 + $0x290] sm:$0xf] }
 0xadf   : >> { %6402 = vmatpush.bf16.msrb.mxu3 %v8546_v12  ;;  %6394 = vmatpush.bf16.msra.mxu1 %v8502_v54  ;;  %v8494_v44 = vor.u32 %v9028_v16, %v8493_v52  ;;  %v8495_v12 = vld [vmem:[%s15206_s7 + $0x298] sm:$0xf0]  ;;  %v9047_v54 = vld [vmem:[%s15206_s7 + $0x334] sm:$0xf]  ;;  %v8705_v52 = vld [vmem:[%s15206_s7 + $0x3f0] sm:$0xf] }
 0xae0   : >> { %v8498_v41 = vor.u32 %v9027_v59, %v8495_v12  ;;  %v9072_v16 = vld [vmem:[%s15206_s7 + $0x3f4] sm:$0xf0]  ;;  %v9071_v12 = vld [vmem:[%s15206_s7 + $0x3f4] sm:$0xf] }
 0xae2   : >> { %6268 = vmatpush.bf16.msra.mxu2 %v8425_v4  ;;  %v9025_v4 = vld [vmem:[%s15206_s7 + $0x284] sm:$0xf] }
 0xae3   : >> { %6403 = vmatpush.bf16.msrb.mxu3 %v8538_v14  ;;  %6395 = vmatpush.bf16.msra.mxu1 %v8494_v44  ;;  %v8706_v44 = vor.u32 %v9072_v16, %v8705_v52  ;;  %v9059_v52 = vld [vmem:[%s15206_s7 + $0x394] sm:$0xf] }
 0xae6   : >> { %6269 = vmatpush.bf16.msra.mxu2 %v8417_v46  ;;  %v8624_v46 = vld [vmem:[%s15206_s7 + $0x370] sm:$0xf] }
 0xae7   : >> { %6404 = vmatpush.bf16.msrb.mxu3 %v8530_v47  ;;  %6396 = vmatpush.bf16.msra.mxu1 %v8486_v37  ;;  %v8616_v47 = vld [vmem:[%s15206_s7 + $0x360] sm:$0xf]  ;;  %v9070_v37 = vld [vmem:[%s15206_s7 + $0x3e4] sm:$0xf0] }
 0xae8   : >> { %v8617_v21 = vor.u32 %v9054_v38, %v8616_v47  ;;  %v8691_v38 = vld [vmem:[%s15206_s7 + $0x3d8] sm:$0xf0] }
 0xaea   : >> { %6270 = vmatpush.bf16.msra.mxu2 %v8409_v62  ;;  %v9052_v62 = vld [vmem:[%s15206_s7 + $0x354] sm:$0xf0] }
 0xaeb   : >> { %6405 = vmatpush.bf16.msrb.mxu3 %v8522_v51  ;;  %6571 = vmatpush.bf16.msrb.mxu1 %v14813_v61  ;;  %v8609_v51 = vor.u32 %v9052_v62, %v8608_v9  ;;  %v8570_v9 = vld [vmem:[%s15206_s7 + $0x308] sm:$0xf0]  ;;  %v8681_v62 = vld [vmem:[%s15206_s7 + $0x3c0] sm:$0xf] }
 0xaee   : >> { %8466 = vmatmul.msk.bf16.vlgmr.msra.gmra.mxu3 %vm5566_vm7, %v13959_v30 }
 0xaef   : >> { %6406 = vmatpush.bf16.msrb.mxu3 %v8514_v13  ;;  %v9049_v13 = vld [vmem:[%s15206_s7 + $0x344] sm:$0xf] }
 0xaf3   : >> { %6407 = vmatpush.bf16.msrb.mxu3 %v8506_v8  ;;  %v8594_v8 = vld [vmem:[%s15206_s7 + $0x338] sm:$0xf0] }
 0xaf4   : >> { %v8597_v59 = vor.u32 %v9047_v54, %v8594_v8  ;;  %v8670_v54 = vor.u32 %v9061_v32, %v8667_v23  ;;  %v9060_v8 = vld [vmem:[%s15206_s7 + $0x394] sm:$0xf0] }
 0xaf5   : >> { %v9080_v32 = vld [vmem:[%s15206_s7 + $0x434] sm:$0xf0] }
 0xaf7   : >> { %6408 = vmatpush.bf16.msrb.mxu3 %v8498_v41 }
 0xb46   : >> { %v6133_v24 = vpop.f32.mrf.mxu1 }
 0xb4b   : >> { %v5986_v56 = vpop.f32.mrf.mxu0 }
 0xb4c   : >> { %v5991_v27 = vadd.f32 %v5986_v56, %v14639_v63  ;;  %v6120_v18 = vpop.f32.mrf.mxu2  ;;  %v8487_v63 = vld [vmem:[%s15206_s7 + $0x288] sm:$0xf0]  ;;  %v8707_v56 = vld [vmem:[%s15206_s7 + $0x3f8] sm:$0xf0] }
 0xb4d   : >> { %v8490_v10 = vor.u32 %v9025_v4, %v8487_v63  ;;  %v8710_v41 = vor.u32 %v9071_v12, %v8707_v56  ;;  %v8586_v4 = vld [vmem:[%s15206_s7 + $0x328] sm:$0xf0]  ;;  %v8649_v12 = vld [vmem:[%s15206_s7 + $0x380] sm:$0xf]  ;;  %v9058_v56 = vld [vmem:[%s15206_s7 + $0x384] sm:$0xf0] }
 0xb4e   : >> { %v14832_v34 = vadd.f32 %v6133_v24, %v5991_v27  ;;  %v6135_v35 = vpop.f32.mrf.mxu1  ;;  %v8602_v24 = vld [vmem:[%s15206_s7 + $0x348] sm:$0xf0]  ;;  %v8584_v27 = vld [vmem:[%s15206_s7 + $0x320] sm:$0xf]  ;;  %v8589_v63 = vor.u32 %v9045_v3, %v8586_v4 }
 0xb4f   : >> { %6409 = vmatpush.bf16.msrb.mxu3 %v8490_v10  ;;  %v8605_v15 = vor.u32 %v9049_v13, %v8602_v24  ;;  %v8697_v35 = vld [vmem:[%s15206_s7 + $0x3e0] sm:$0xf]  ;;  %v8675_v13 = vld [vmem:[%s15206_s7 + $0x3b8] sm:$0xf0] }
 0xb50   : >> { %v8698_v10 = vor.u32 %v9070_v37, %v8697_v35  ;;  %v8665_v24 = vld [vmem:[%s15206_s7 + $0x3a0] sm:$0xf]  ;;  %v8786_v35 = vld [vmem:[%s15206_s7 + $0x470] sm:$0xf]  ;;  %v9088_v37 = vld [vmem:[%s15206_s7 + $0x474] sm:$0xf0] }
 0xb51   : >> { %v5973_v14 = vpop.f32.mrf.mxu3 }
 0xb52   : >> { %v5990_v36 = vadd.f32 %v5973_v14, %v14637_v60  ;;  %v9056_v60 = vld [vmem:[%s15206_s7 + $0x374] sm:$0xf0]  ;;  %v9069_v14 = vld [vmem:[%s15206_s7 + $0x3e4] sm:$0xf] }
 0xb53   : >> { %v5988_v0 = vpop.f32.mrf.mxu0  ;;  %v8625_v43 = vor.u32 %v9056_v60, %v8624_v46  ;;  %6675 = vmatpush.bf16.msra.mxu3 %v8706_v44 }
 0xb54   : >> { %v14848_v57 = vadd.f32 %v6120_v18, %v5990_v36  ;;  %v6122_v2 = vpop.f32.mrf.mxu2  ;;  %v9046_v18 = vld [vmem:[%s15206_s7 + $0x324] sm:$0xf0]  ;;  %v8699_v36 = vld [vmem:[%s15206_s7 + $0x3e8] sm:$0xf0]  ;;  %v8576_v0 = vld [vmem:[%s15206_s7 + $0x310] sm:$0xf] }
 0xb55   : >> { %6536 = vmatpush.bf16.msrb.mxu2 %v8625_v43  ;;  %v8585_v50 = vor.u32 %v9046_v18, %v8584_v27  ;;  %v8702_v2 = vor.u32 %v9069_v14, %v8699_v36  ;;  %v9068_v43 = vld [vmem:[%s15206_s7 + $0x3d4] sm:$0xf0]  ;;  %v8650_v27 = vor.u32 %v9058_v56, %v8649_v12  ;;  %v8651_v18 = vld [vmem:[%s15206_s7 + $0x388] sm:$0xf0]  ;;  %v9086_v14 = vld [vmem:[%s15206_s7 + $0x464] sm:$0xf0] }
 0xb56   : >> { %v8690_v47 = vor.u32 %v9068_v43, %v8689_v31  ;;  %v8738_v56 = vld [vmem:[%s15206_s7 + $0x410] sm:$0xf] }
 0xb57   : >> { %6676 = vmatpush.bf16.msra.mxu3 %v8698_v10  ;;  %v8778_v10 = vld [vmem:[%s15206_s7 + $0x460] sm:$0xf] }
 0xb59   : >> { %v5975_v55 = vpop.f32.mrf.mxu3  ;;  %6537 = vmatpush.bf16.msrb.mxu2 %v8617_v21  ;;  %v9041_v21 = vld [vmem:[%s15206_s7 + $0x304] sm:$0xf] }
 0xb5a   : >> { %v9044_v55 = vld [vmem:[%s15206_s7 + $0x314] sm:$0xf0]  ;;  %v8573_v6 = vor.u32 %v9041_v21, %v8570_v9 }
 0xb5b   : >> { %v8577_v46 = vor.u32 %v9044_v55, %v8576_v0  ;;  %6677 = vmatpush.bf16.msra.mxu3 %v8690_v47  ;;  %v8779_v0 = vor.u32 %v9086_v14, %v8778_v10  ;;  %v8780_v47 = vld [vmem:[%s15206_s7 + $0x468] sm:$0xf0] }
 0xb5c   : >> { %v8732_v10 = vld [vmem:[%s15206_s7 + $0x408] sm:$0xf0] }
 0xb5d   : >> { %6538 = vmatpush.bf16.msrb.mxu2 %v8609_v51  ;;  %v9065_v51 = vld [vmem:[%s15206_s7 + $0x3c4] sm:$0xf] }
 0xb61   : >> { %v6148_v53 = vpop.f32.mrf.mxu3  ;;  %6539 = vmatpush.bf16.msrb.mxu2 %v8601_v19  ;;  %v8678_v19 = vor.u32 %v9063_v17, %v8675_v13  ;;  %v9082_v17 = vld [vmem:[%s15206_s7 + $0x444] sm:$0xf0] }
 0xb62   : >> { %v6152_v26 = vpack.c.bf16 %v6148_v53, %v6148_v53  ;;  %v9043_v53 = vld [vmem:[%s15206_s7 + $0x314] sm:$0xf] }
 0xb64   : >> { %6258 = vmatmul.bf16.vlgmr.msrb.gmra.mxu0 %v6152_v26  ;;  %6271 = vmatmul.bf16.vlgmr.msra.gmra.mxu2 %v6152_v26  ;;  %v8578_v26 = vld [vmem:[%s15206_s7 + $0x318] sm:$0xf0] }
 0xb65   : >> { %6549 = vmatpush.bf16.msrb.mxu0 %v8629_v5  ;;  %6540 = vmatpush.bf16.msrb.mxu2 %v8593_v39  ;;  %v8581_v60 = vor.u32 %v9043_v53, %v8578_v26  ;;  %v8694_v5 = vor.u32 %v9067_v7, %v8691_v38  ;;  %v8657_v39 = vld [vmem:[%s15206_s7 + $0x390] sm:$0xf]  ;;  %v9087_v53 = vld [vmem:[%s15206_s7 + $0x474] sm:$0xf]  ;;  %v8788_v26 = vld [vmem:[%s15206_s7 + $0x478] sm:$0xf0] }
 0xb66   : >> { %v8658_v16 = vor.u32 %v9060_v8, %v8657_v39  ;;  %v8791_v43 = vor.u32 %v9087_v53, %v8788_v26  ;;  %v8746_v8 = vld [vmem:[%s15206_s7 + $0x420] sm:$0xf] }
 0xb69   : >> { %v6150_v58 = vpop.f32.mrf.mxu3  ;;  %6550 = vmatpush.bf16.msrb.mxu0 %v8621_v1  ;;  %6541 = vmatpush.bf16.msrb.mxu2 %v8585_v50  ;;  %v8569_v1 = vor.u32 %v9042_v22, %v8568_v45 }
 0xb6a   : >> { %v9066_v58 = vld [vmem:[%s15206_s7 + $0x3c4] sm:$0xf0] }
 0xb6b   : >> { %v8682_v28 = vor.u32 %v9066_v58, %v8681_v62 }
 0xb6d   : >> { %6551 = vmatpush.bf16.msrb.mxu0 %v8613_v48  ;;  %6542 = vmatpush.bf16.msrb.mxu2 %v8577_v46  ;;  %v8683_v48 = vld [vmem:[%s15206_s7 + $0x3c8] sm:$0xf0] }
 0xb6e   : >> { %6678 = vmatpush.bf16.msra.mxu3 %v8682_v28  ;;  %v9084_v28 = vld [vmem:[%s15206_s7 + $0x454] sm:$0xf0] }
 0xb71   : >> { %v6287_v29 = vpop.f32.mrf.mxu3  ;;  %6552 = vmatpush.bf16.msrb.mxu0 %v8605_v15  ;;  %6543 = vmatpush.bf16.msrb.mxu2 %v8569_v1  ;;  %v9062_v15 = vld [vmem:[%s15206_s7 + $0x3a4] sm:$0xf0] }
 0xb72   : >> { %v6291_v42 = vpack.c.bf16 %v6287_v29, %v6287_v29  ;;  %v8686_v29 = vor.u32 %v9065_v51, %v8683_v48  ;;  %v9083_v51 = vld [vmem:[%s15206_s7 + $0x454] sm:$0xf] }
 0xb74   : >> { %6397 = vmatmul.bf16.vlgmr.msra.gmra.mxu1 %v6291_v42  ;;  %6410 = vmatmul.bf16.vlgmr.msrb.gmra.mxu3 %v6291_v42  ;;  %v8673_v42 = vld [vmem:[%s15206_s7 + $0x3b0] sm:$0xf] }
 0xb75   : >> { %8549 = vmatmul.msk.bf16.vlgmr.msra.gmra.mxu0 %vm5566_vm7, %v13951_v49  ;;  %6688 = vmatpush.bf16.msra.mxu1 %v8710_v41  ;;  %v9057_v41 = vld [vmem:[%s15206_s7 + $0x384] sm:$0xf] }
 0xb76   : >> { %6553 = vmatpush.bf16.msrb.mxu0 %v8597_v59  ;;  %6710 = vmatpush.bf16.msra.mxu2 %v14813_v61  ;;  %v8666_v61 = vor.u32 %v9062_v15, %v8665_v24  ;;  %v8659_v59 = vld [vmem:[%s15206_s7 + $0x398] sm:$0xf0]  ;;  %v8654_v50 = vor.u32 %v9057_v41, %v8651_v18  ;;  %v8754_v15 = vld [vmem:[%s15206_s7 + $0x430] sm:$0xf]  ;;  %v9076_v41 = vld [vmem:[%s15206_s7 + $0x414] sm:$0xf0] }
 0xb77   : >> { %v8662_v44 = vor.u32 %v9059_v52, %v8659_v59  ;;  %v8755_v23 = vor.u32 %v9080_v32, %v8754_v15  ;;  %v9078_v52 = vld [vmem:[%s15206_s7 + $0x424] sm:$0xf0]  ;;  %v8739_v18 = vor.u32 %v9076_v41, %v8738_v56 }
 0xb78   : >> { %v8747_v59 = vor.u32 %v9078_v52, %v8746_v8 }
 0xb79   : >> { %v6289_v40 = vpop.f32.mrf.mxu3  ;;  %6689 = vmatpush.bf16.msra.mxu1 %v8702_v2 }
 0xb7a   : >> { %6554 = vmatpush.bf16.msrb.mxu0 %v8589_v63  ;;  %v9064_v40 = vld [vmem:[%s15206_s7 + $0x3b4] sm:$0xf0]  ;;  %v8787_v63 = vor.u32 %v9088_v37, %v8786_v35  ;;  %v9074_v35 = vld [vmem:[%s15206_s7 + $0x404] sm:$0xf0]  ;;  %v9073_v37 = vld [vmem:[%s15206_s7 + $0x404] sm:$0xf] }
 0xb7b   : >> { %v8674_v20 = vor.u32 %v9064_v40, %v8673_v42  ;;  %v8762_v40 = vld [vmem:[%s15206_s7 + $0x440] sm:$0xf]  ;;  %v8735_v14 = vor.u32 %v9073_v37, %v8732_v10 }
 0xb7c   : >> { %v8763_v13 = vor.u32 %v9082_v17, %v8762_v40 }
 0xb7d   : >> { %6690 = vmatpush.bf16.msra.mxu1 %v8694_v5  ;;  %6679 = vmatpush.bf16.msra.mxu3 %v8674_v20  ;;  %v9081_v20 = vld [vmem:[%s15206_s7 + $0x444] sm:$0xf] }
 0xb7e   : >> { %6555 = vmatpush.bf16.msrb.mxu0 %v8581_v60 }
 0xb81   : >> { %6691 = vmatpush.bf16.msra.mxu1 %v8686_v29  ;;  %6680 = vmatpush.bf16.msra.mxu3 %v8666_v61  ;;  %v8772_v29 = vld [vmem:[%s15206_s7 + $0x458] sm:$0xf0]  ;;  %v9079_v61 = vld [vmem:[%s15206_s7 + $0x434] sm:$0xf] }
 0xb82   : >> { %6556 = vmatpush.bf16.msrb.mxu0 %v8573_v6  ;;  %v8770_v6 = vld [vmem:[%s15206_s7 + $0x450] sm:$0xf]  ;;  %v8775_v42 = vor.u32 %v9083_v51, %v8772_v29 }
 0xb83   : >> { %v8771_v48 = vor.u32 %v9084_v28, %v8770_v6 }
 0xb84   : >> { %8630 = vmatmul.msk.bf16.vlgmr.msrb.gmra.mxu1 %vm5566_vm7, %v13957_v33 }
 0xb85   : >> { %6692 = vmatpush.bf16.msra.mxu1 %v8678_v19  ;;  %6681 = vmatpush.bf16.msra.mxu3 %v8658_v16  ;;  %v8764_v19 = vld [vmem:[%s15206_s7 + $0x448] sm:$0xf0]  ;;  %v9077_v16 = vld [vmem:[%s15206_s7 + $0x424] sm:$0xf] }
 0xb86   : >> { %6814 = vmatpush.bf16.msra.mxu0 %v8787_v63  ;;  %v8767_v24 = vor.u32 %v9081_v20, %v8764_v19 }
 0xb89   : >> { %6693 = vmatpush.bf16.msra.mxu1 %v8670_v54  ;;  %6682 = vmatpush.bf16.msra.mxu3 %v8650_v27  ;;  %v8756_v54 = vld [vmem:[%s15206_s7 + $0x438] sm:$0xf0]  ;;  %v9075_v27 = vld [vmem:[%s15206_s7 + $0x414] sm:$0xf] }
 0xb8a   : >> { %6815 = vmatpush.bf16.msra.mxu0 %v8779_v0  ;;  %v8759_v39 = vor.u32 %v9079_v61, %v8756_v54 }
 0xb8d   : >> { %6694 = vmatpush.bf16.msra.mxu1 %v8662_v44  ;;  %v8748_v44 = vld [vmem:[%s15206_s7 + $0x428] sm:$0xf0] }
 0xb8e   : >> { %6816 = vmatpush.bf16.msra.mxu0 %v8771_v48  ;;  %v8751_v12 = vor.u32 %v9077_v16, %v8748_v44  ;;  %v9879_v44 = vmov (%p5557_p3), 256.0  }
 0xb8f   : > { %9608 = vrcp.f32 (%p5557_p3), %v9879_v44 }
 0xb91   : >> { %6695 = vmatpush.bf16.msra.mxu1 %v8654_v50 }
 0xb92   : >> { %6817 = vmatpush.bf16.msra.mxu0 %v8763_v13 }
 0xb95   : > { %v9609_v49 = vpop.eup (%p5557_p3), %9608 }
 0xb96   : >> { %6818 = vmatpush.bf16.msra.mxu0 %v8755_v23  ;;  %v6892_v33 = vmul.f32 (%p5557_p3), 256.0, %v9609_v49  ;;  %vm6896_vm8 = vweird.f32 (%p5557_p3), %v9609_v49 }
 0xb9a   : >> { %6819 = vmatpush.bf16.msra.mxu0 %v8747_v59 }
 0xb9e   : >> { %6820 = vmatpush.bf16.msra.mxu0 %v8739_v18 }
 0xbe1   : >> { %v6259_v3 = vpop.f32.mrf.mxu0 }
 0xbe2   : >> { %v6276_v4 = vadd.f32 %v6259_v3, %v14848_v57  ;;  %v8740_v3 = vld [vmem:[%s15206_s7 + $0x418] sm:$0xf0] }
 0xbe3   : >> { %v8743_v50 = vor.u32 %v9075_v27, %v8740_v3 }
 0xbe7   : >> { %v6272_v57 = vpop.f32.mrf.mxu2 }
 0xbe8   : >> { %v6277_v36 = vadd.f32 %v6272_v57, %v14832_v34  ;;  %v9085_v34 = vld [vmem:[%s15206_s7 + $0x464] sm:$0xf] }
 0xbe9   : >> { %v6261_v2 = vpop.f32.mrf.mxu0  ;;  %v8783_v38 = vor.u32 %v9085_v34, %v8780_v47 }
 0xbef   : >> { %v6274_v55 = vpop.f32.mrf.mxu2 }
 0xbf1   : >> { %v6398_v46 = vpop.f32.mrf.mxu1 }
 0xbf2   : >> { %v15067_v60 = vadd.f32 %v6398_v46, %v6276_v4  ;;  %v6434_v31 = vpop.f32.mrf.mxu0  ;;  %v8730_v4 = vld [vmem:[%s15206_s7 + $0x400] sm:$0xf] }
 0xbf3   : >> { %v6438_v7 = vpack.c.bf16 %v6434_v31, %v6434_v31  ;;  %v8731_v63 = vor.u32 %v9074_v35, %v8730_v4  ;;  %v9880_v35 = vmov (%p5557_p3), 269488144  }
 0xbf4   : > { %v6912_v37 = vunpack.c.l.s4 (%p5557_p3), %v9880_v35 }
 0xbf5   : >> { %6544 = vmatmul.bf16.vlgmr.msrb.gmra.mxu2 %v6438_v7  ;;  %6557 = vmatmul.bf16.vlgmr.msrb.gmra.mxu0 %v6438_v7 }
 0xbf6   : >> { %6827 = vmatpush.bf16.msrb.mxu2 %v8791_v43  ;;  %6821 = vmatpush.bf16.msra.mxu0 %v8731_v63 }
 0xbf7   : >> { %v6411_v5 = vpop.f32.mrf.mxu3 }
 0xbf8   : >> { %v6416_v45 = vadd.f32 %v6411_v5, %v6277_v36 }
 0xbf9   : >> { %v6400_v22 = vpop.f32.mrf.mxu1 }
 0xbfa   : >> { %v6436_v21 = vpop.f32.mrf.mxu0  ;;  %6828 = vmatpush.bf16.msrb.mxu2 %v8783_v38 }
 0xbfe   : >> { %6829 = vmatpush.bf16.msrb.mxu2 %v8775_v42 }
 0xbff   : >> { %v6413_v1 = vpop.f32.mrf.mxu3 }
 0xc01   : >> { %v6573_v9 = vpop.f32.mrf.mxu1 }
 0xc02   : >> { %v6577_v62 = vpack.c.bf16 %v6573_v9, %v6573_v9  ;;  %6830 = vmatpush.bf16.msrb.mxu2 %v8767_v24 }
 0xc04   : >> { %6683 = vmatmul.bf16.vlgmr.msra.gmra.mxu3 %v6577_v62  ;;  %6696 = vmatmul.bf16.vlgmr.msra.gmra.mxu1 %v6577_v62 }
 0xc05   : >> { %8711 = vmatmul.msk.bf16.vlgmr.msra.gmra.mxu2 %vm5566_vm7, %v13959_v30  ;;  %v6893_v30 = vsub.f32 (%p5557_p3), 1.0, %v6892_v33 }
 0xc06   : >> { %6831 = vmatpush.bf16.msrb.mxu2 %v8759_v39 }
 0xc09   : >> { %v6575_v58 = vpop.f32.mrf.mxu1 }
 0xc0a   : >> { %6832 = vmatpush.bf16.msrb.mxu2 %v8751_v12 }
 0xc0e   : >> { %6833 = vmatpush.bf16.msrb.mxu2 %v8743_v50 }
 0xc12   : >> { %6834 = vmatpush.bf16.msrb.mxu2 %v8735_v14  ;;  %v6913_v14 = vunpack.c.0.s8 (%p5557_p3), %v6912_v37 }
 0xc72   : >> { %v6558_v57 = vpop.f32.mrf.mxu0 }
 0xc73   : >> { %v6563_v36 = vadd.f32 %v6558_v57, %v6416_v45  ;;  %v6843_v45 = vperm.slane %v14222_v25, 0 }
 0xc78   : >> { %v6545_v0 = vpop.f32.mrf.mxu2 }
 0xc79   : >> { %v6562_v2 = vadd.f32 %v6545_v0, %v15067_v60  ;;  %v6844_v60 = vperm.slane %v14222_v25, 1  ;;  %v6894_v25 = vmul.f32 (%p5557_p3), %v9609_v49, %v6893_v30 }
 0xc7a   : >> { %v6560_v55 = vpop.f32.mrf.mxu0 }
 0xc7b   : > { %v6895_v12 = vadd.f32 (%p5557_p3), %v9609_v49, %v6894_v25 }
 0xc7d   : > { %v6897_v56 = vsel (%p5557_p3), %vm6896_vm8, %v9609_v49, %v6895_v12 }
 0xc80   : >> { %v6547_v53 = vpop.f32.mrf.mxu2 }
 0xc81   : >> { %v6697_v26 = vpop.f32.mrf.mxu1 }
 0xc82   : >> { %v6702_v46 = vadd.f32 %v6697_v26, %v6563_v36 }
 0xc87   : >> { %v6684_v31 = vpop.f32.mrf.mxu3 }
 0xc88   : >> { %v6701_v43 = vadd.f32 %v6684_v31, %v6562_v2  ;;  %v6712_v7 = vpop.f32.mrf.mxu2 }
 0xc89   : >> { %v6716_v34 = vpack.c.bf16 %v6712_v7, %v6712_v7  ;;  %v6699_v47 = vpop.f32.mrf.mxu1 }
 0xc8b   : >> { %6822 = vmatmul.bf16.vlgmr.msra.gmra.mxu0 %v6716_v34  ;;  %6835 = vmatmul.bf16.vlgmr.msrb.gmra.mxu2 %v6716_v34 }
 0xc8f   : >> { %v6686_v38 = vpop.f32.mrf.mxu3 }
 0xc90   : >> { %v6714_v5 = vpop.f32.mrf.mxu2 }
 0xd08   : >> { %v6823_v22 = vpop.f32.mrf.mxu0 }
 0xd09   : >> { %v6840_v21 = vadd.f32 %v6823_v22, %v6701_v43 }
 0xd0b   : >> { %v6847_v9 = vadd.f32 %v6843_v45, %v6840_v21 }
 0xd0d   : >> { %v6851_v28 = vmul.f32 0.2, %v6847_v9  ;;  %vm6849_vm11 = vcmp.gt.f32.partialorder %v6847_v9, 0.0 }
 0xd0e   : >> { %v6836_v1 = vpop.f32.mrf.mxu2 }
 0xd0f   : >> { %v6841_v62 = vadd.f32 %v6836_v1, %v6702_v46  ;;  %v6853_v40 = vsel %vm6849_vm11, %v6847_v9, %v6851_v28 }
 0xd10   : >> { %v6825_v58 = vpop.f32.mrf.mxu0 }
 0xd11   : >> { %v6848_v6 = vadd.f32 %v6844_v60, %v6841_v62 }
 0xd13   : >> { %vm6850_vm9 = vcmp.gt.f32.partialorder %v6848_v6, 0.0  ;;  %v6852_v51 = vmul.f32 0.2, %v6848_v6 }
 0xd15   : >> { %v6854_v48 = vsel %vm6850_vm9, %v6848_v6, %v6852_v51  ;;  %5559 = sbr.rel (!%p5557_p3) target bundleno = 2475 (0x9ab), region = 222 }
 0xd16   : >> { %v6857_v29 = vrot.slane %v6854_v48, 6  ;;  %v6838_v42 = vpop.f32.mrf.mxu2 }
 0xd18   : >> { %v6859_v17 = vsel %vm3258_vm10, %v6853_v40, %v6857_v29 }
 0xd19   : >> { %6864 = vst [vmem:[%s6863_s23] sm:$0xf] %v6859_v17 }
 0xd20   : > { %v6865_v20 = vld [vmem:[#allocation6] sm:$0xf]  ;;  %v6866_v13 = vld [vmem:[#allocation6 + $0x4] sm:$0xf] }
 0xd21   : > { %v8794_v19 = vrot.slane %v6865_v20, 9  ;;  %v8795_v15 = vrot.slane %v6866_v13, 9 }
 0xd23   : > { %v6871_v24 = vadd.f32 %v8794_v19, %v6865_v20 }
 0xd25   : > { %v6872_v32 = vadd.f32 %v6871_v24, %v6866_v13 }
 0xd27   : > { %v6877_v61 = vadd.f32 %v8795_v15, %v6872_v32 }
 0xd29   : > { %v6878_v23 = vmul.f32 0.25, %v6877_v61 }
 0xd2b   : > { %v6879_v54 = vmul.f32 %v6878_v23, %v6878_v23 }
 0xd2d   : > { %v6881_v39 = vperm.slane %v6879_v54, 0  ;;  %v6882_v8 = vperm.slane %v6879_v54, 2 }
 0xd2f   : > { %v6886_v52 = vsel %vm6885_vm12, %v6881_v39, 0.0  ;;  %v6887_v16 = vsel %vm6885_vm12, %v6882_v8, 0.0 }
 0xd30   : > { %v6888_v59 = vadd.f32 %v6887_v16, %v6886_v52 }
 0xd32   : > { %6889 = vadd.xlane.f32.xlu0 %v6888_v59 }
 0xda5   : > { %v6890_v41 = vpop.xlane.xlu0 %6889 }
 0xda6   : > { %v6898_v27 = vmul.f32 %v6897_v56, %v6890_v41 }
 0xda8   : > { %v6899_v18 = vadd.f32 1e-08, %v6898_v27 }
 0xdaa   : > { %9610 = vrsqrt.f32 %v6899_v18  ;;  %vm6906_vm0 = vweird.f32 %v6899_v18 }
 0xdb0   : > { %v9611_v3 = vpop.eup %9610 }
 0xdb1   : > { %v6901_v50 = vmul.f32 %v9611_v3, %v6899_v18  ;;  %vm6907_vm13 = vweird.f32 %v9611_v3 }
 0xdb2   : > { %vm6908_vm14 = vmor %vm6906_vm0, %vm6907_vm13 }
 0xdb3   : > { %v6902_v4 = vmul.f32 %v9611_v3, %v6901_v50 }
 0xdb5   : > { %v6903_v63 = vmul.f32 0.5, %v6902_v4 }
 0xdb7   : > { %v6904_v10 = vsub.f32 1.5, %v6903_v63 }
 0xdb9   : > { %v6905_v57 = vmul.f32 %v9611_v3, %v6904_v10 }
 0xdbb   : > { %v6909_v36 = vsel %vm6908_vm14, %v9611_v3, %v6905_v57 }
 0xdbc   : > { %v6914_v0 = vperm.slane %v6909_v36, %v6913_v14 }
 0xdbe   : > { %v6916_v2 = vmul.f32 %v6914_v0, %v6878_v23 }
 0xdc0   : > { %v6918_v55 = vrot.slane %v6916_v2, 1  ;;  %v6919_v53 = vrot.slane %v6916_v2, 2  ;;  %v6920_v26 = vrot.slane %v6916_v2, 3 }
 0xdc2   : > { %v6921_v46 = vsel %vm6885_vm12, %v6916_v2, %v6918_v55  ;;  %v6923_v31 = vsel %vm6922_vm1, %v6919_v53, %v6920_v26 }
 0xdc3   : > { %v6925_v43 = vsel %vm3258_vm10, %v6921_v46, %v6923_v31 }
 0xdc4   : > { %6931 = vst.msk [vmem:[%s400_s22] sm:$0x3] %vm6929_vm15, %v6925_v43 }
 0xdc5   : > { %9789 = shalt.err (!%p9786_p12)
}
 0xdc6   : > { %9112 = dma.vmem_to_hbm [thread:$0]  (%p9969_p5), %s6946_s1, 32, %s6948_s27, %s6933_s13  }
 0xdc7 PF: > { %p9144_p13 = scmp.ge.s32.totalorder %s9852_s12, 2  ;;  %s6959_s21 = sand.u32 1, %s9840_s30  }
 0xdc8   : > { %s6960_s14 = scalar_lea.sflag [#allocation9], %s6959_s21 }
 0xdc9   : > { %p9131_p0 = pnand %p9144_p13, %p9973_p6 }
 0xdcb   : > { %p9132_p1 = pneg %p9131_p0 }
 0xdcd   : > { %9835 = dma.done.wait (%p9132_p1), %s6960_s14, 32  }
 0xdce   : > { %9837 = vsyncadd (%p9132_p1), %s6960_s14, 4294967264  ;;  %s15254_s22 = sld [smem:[#allocation21_spill]]  ;;  %p22_p2 = scmp.ge.s32.totalorder %s9956_s15, 4  }
 0xdcf   : > { %s15255_s11 = sld [smem:[#allocation22_spill]]  ;;  %s15256_s30 = smov %s9844_s10 }
 0xdd0   : > { %s15258_s12 = smov %s9956_s15  ;;  %24 = sbr.rel (!%p22_p2) target bundleno = 10 (0xa), region = 233 }
 0xdd4   : > { %s15257_s10 = smov %s15254_s22 }
 0xdd5   :  { %6966 = vsyncpa [#allocation8], 1 }
 0xdd6   :  { %6968 = vsyncpa [#allocation8 + $0x1], 1 }
 0xdd7   :  { %6969 = vsyncpa [#allocation11], 1 }
 0xdd8   :  { %6970 = vsyncpa [#allocation14], 1 }
 0xdd9   :  { %6971 = vsyncpa [#allocation9], 1 }
 0xdda   :  { %6973 = vsyncpa [#allocation9 + $0x1], 1 }

</bundles_post_ra>
